<compile_context>
chip_gen: v7x
topology: tpu7x:2x2x1
jax: 0.10.0
libtpu: 0.0.40
codegen_flags: <defaults>
</compile_context>

<pallas_src>
import functools

import jax
import jax.numpy as jnp
from jax import lax
from jax.experimental import pallas as pl
from jax.experimental.pallas import tpu as pltpu


def _round_up(v, m):
    return ((v + m - 1) // m) * m


_COMPILER_PARAMS = pltpu.CompilerParams(
    dimension_semantics=("parallel",),
    vmem_limit_bytes=48 * 1024 * 1024,   # safe on v7x's 64 MiB physical VMEM
)


# ----------------------------------------------------------------------------
# Pallas kernels
# ----------------------------------------------------------------------------
def _apply_act(y, act, neg):
    if act == "relu":
        return jnp.maximum(y, 0.0)
    if act == "leaky_relu":
        return jnp.where(y >= 0.0, y, neg * y)
    if act == "tanh":
        return jnp.tanh(y)
    return y


def _gemm_bias_act_kernel(x_ref, w_ref, b_ref, o_ref, *, act, neg):
    # bf16 operands, f32 accumulate on the MXU; bias + activation epilogue in
    # f32; output cast to o_ref.dtype (bf16 when the consumer is another GEMM).
    acc = jnp.dot(x_ref[...], w_ref[...], preferred_element_type=jnp.float32)
    acc = acc + b_ref[...]          # (1,N) column bias or (TM,1) row bias
    o_ref[...] = _apply_act(acc, act, neg).astype(o_ref.dtype)


def _gemm_bn_leaky_kernel(x_ref, w_ref, b_ref, g_ref, bt_ref, o_ref,
                          *, m_real, mask_pad, eps, neg):
    # conv GEMM + training-mode BatchNorm (biased batch variance) + leaky_relu,
    # all fused: the full M block is in-kernel (single tile), so batch stats
    # are computed in the epilogue.
    acc = jnp.dot(x_ref[...], w_ref[...], preferred_element_type=jnp.float32)
    acc = acc + b_ref[...]
    if mask_pad:
        row = lax.broadcasted_iota(jnp.int32, acc.shape, 0)
        stats_in = jnp.where(row < m_real, acc, 0.0)
    else:
        stats_in = acc
    inv_m = 1.0 / float(m_real)
    mean = jnp.sum(stats_in, axis=0, keepdims=True) * inv_m
    var = jnp.maximum(
        jnp.sum(stats_in * stats_in, axis=0, keepdims=True) * inv_m - mean * mean,
        0.0)
    a = g_ref[...] * lax.rsqrt(var + eps)
    c = bt_ref[...] - mean * a
    y = acc * a + c
    o_ref[...] = jnp.where(y >= 0.0, y, neg * y).astype(o_ref.dtype)


# ----------------------------------------------------------------------------
# Fused GEMM wrapper
# ----------------------------------------------------------------------------
def pallas_gemm(x, w, b, *, act="none", neg=0.2, out_dtype=jnp.float32,
                gamma=None, beta=None, eps=1e-5):
    """act(x @ w + b), optionally with fused BatchNorm before the activation.

    x:  (M, K) activation (cast to bf16; zero K-padded only if the pre-padded
        weight expects Kp > K -- zero weight rows make those columns inert).
    w:  (Kp, N) weight already in GEMM layout / bf16 (precomputed at init).
    b:  (1, N) column bias OR (Mp, 1) per-row bias, f32.
    gamma/beta: optional (1, N) -> fused BatchNorm(batch stats) + leaky_relu.
    """
    M, K = x.shape
    Kp, N = w.shape
    x = x.astype(jnp.bfloat16)
    w = w.astype(jnp.bfloat16)
    if Kp > K:
        x = jnp.pad(x, ((0, 0), (0, Kp - K)))     # zeros match zero weight rows

    fuse_bn = gamma is not None
    if fuse_bn or M <= 128:
        TM = _round_up(M, 8)                      # single tile (BN needs all rows)
    else:
        n_tiles = max(2, -(-M // 512))            # >=2 steps: v7x 2nd TensorCore
        TM = _round_up(-(-M // n_tiles), 16)      # 16: bf16 sublane tile safety
    Mp = _round_up(M, TM)
    if Mp > M:
        x = jnp.pad(x, ((0, Mp - M), (0, 0)))

    row_bias = (b.shape[0] != 1)
    b = b.astype(jnp.float32)
    if row_bias and b.shape[0] < Mp:
        b = jnp.pad(b, ((0, Mp - b.shape[0]), (0, 0)))
    b_spec = (pl.BlockSpec((TM, 1), lambda i: (i, 0)) if row_bias
              else pl.BlockSpec((1, N), lambda i: (0, 0)))

    in_specs = [
        pl.BlockSpec((TM, Kp), lambda i: (i, 0)),
        pl.BlockSpec((Kp, N), lambda i: (0, 0)),   # weight resident across M grid
        b_spec,
    ]
    args = [x, w, b]
    if fuse_bn:
        kernel = functools.partial(_gemm_bn_leaky_kernel, m_real=M,
                                   mask_pad=(Mp > M), eps=eps, neg=neg)
        in_specs += [pl.BlockSpec((1, N), lambda i: (0, 0)),
                     pl.BlockSpec((1, N), lambda i: (0, 0))]
        args += [gamma.astype(jnp.float32), beta.astype(jnp.float32)]
    else:
        kernel = functools.partial(_gemm_bias_act_kernel, act=act, neg=neg)

    out = pl.pallas_call(
        kernel,
        out_shape=jax.ShapeDtypeStruct((Mp, N), out_dtype),
        grid=(Mp // TM,),
        in_specs=in_specs,
        out_specs=pl.BlockSpec((TM, N), lambda i: (i, 0)),
        compiler_params=_COMPILER_PARAMS,
    )(*args)
    return out[:M] if Mp > M else out


# ----------------------------------------------------------------------------
# Conv / ConvTranspose layers, channels-last, lowered to im2col + Pallas GEMM
# ----------------------------------------------------------------------------
def conv2d_gemm(x, wmat, b, *, k, stride, pad, act="none",
                out_dtype=jnp.float32, gamma=None, beta=None, neg=0.2):
    """PyTorch Conv2d via im2col + fused Pallas GEMM (+ optional BN+leaky)."""
    N, H, W, C = x.shape
    OH = (H + 2 * pad - k) // stride + 1
    OW = (W + 2 * pad - k) // stride + 1
    xp = jnp.pad(x, ((0, 0), (pad, pad), (pad, pad), (0, 0)))
    cols = [xp[:, ky:ky + stride * OH:stride, kx:kx + stride * OW:stride, :]
            for ky in range(k) for kx in range(k)]
    col = jnp.stack(cols, axis=3).reshape(N * OH * OW, k * k * C)   # (ky,kx,ci)
    out = pallas_gemm(col, wmat, b, act=act, neg=neg, out_dtype=out_dtype,
                      gamma=gamma, beta=beta)
    return out.reshape(N, OH, OW, wmat.shape[1])


def deconv_1x1_gemm(h, wmat, bias, *, k, act, out_dtype):
    """ConvTranspose2d(k, stride=1, pad=0) on a 1x1 spatial input == one GEMM."""
    cout = wmat.shape[1] // (k * k)
    out = pallas_gemm(h, wmat, bias, act=act, out_dtype=out_dtype)
    return out.reshape(-1, k, k, cout)                               # NHWC


def conv_transpose2d_s2(x, w_all, bias_all, *, act, out_dtype):
    """ConvTranspose2d(4, stride=2, pad=1) in sub-pixel form: one GEMM with
    K = 4*Cin and all 4 output phases fused (4*Cout output columns)."""
    N, H, W, Cin = x.shape
    Cout = w_all.shape[1] // 4
    xp = jnp.pad(x, ((0, 0), (1, 1), (1, 1), (0, 0)))
    cols = [xp[:, ty:ty + H + 1, tx:tx + W + 1, :]
            for ty in range(2) for tx in range(2)]
    P = jnp.stack(cols, axis=3).reshape(N * (H + 1) * (W + 1), 4 * Cin)
    slab = pallas_gemm(P, w_all, bias_all, act=act, out_dtype=out_dtype)
    slab = slab.reshape(N, H + 1, W + 1, 4, Cout)
    blocks = [[slab[:, py:py + H, px:px + W, py * 2 + px, :] for px in range(2)]
              for py in range(2)]
    rows = [jnp.stack([blocks[py][0], blocks[py][1]], axis=3) for py in range(2)]
    full = jnp.stack(rows, axis=2)                                   # (N,H,2,W,2,C)
    return full.reshape(N, 2 * H, 2 * W, Cout)


def conv_transpose2d_s2_final(x, w_allT, row_bias, *, cout, act, out_dtype):
    """Final ConvTranspose2d(4, stride=2, pad=1) as a TRANSPOSED sub-pixel GEMM:
    (4*Cout x 4*Cin) @ (4*Cin x pixels).  The long pixel axis becomes the lane
    (N) axis -> lane-dense output instead of padding Cout*4 -> 128 lanes.
    Returns NCHW directly (what the model boundary wants)."""
    N, H, W, Cin = x.shape
    xc = jnp.transpose(x, (3, 0, 1, 2))                              # NHWC -> CNHW
    xc = jnp.pad(xc, ((0, 0), (0, 0), (1, 1), (1, 1)))
    taps = [xc[:, :, ty:ty + H + 1, tx:tx + W + 1]
            for ty in range(2) for tx in range(2)]
    p_t = jnp.stack(taps, axis=0).reshape(4 * Cin, N * (H + 1) * (W + 1))
    slab = pallas_gemm(w_allT, p_t, row_bias, act=act, out_dtype=out_dtype)
    slab = slab[:4 * cout].reshape(2, 2, cout, N, H + 1, W + 1)      # (py,px,c,n,Y,X)
    blocks = [[slab[py, px, :, :, py:py + H, px:px + W] for px in range(2)]
              for py in range(2)]
    rows = [jnp.stack([blocks[py][0], blocks[py][1]], axis=-1) for py in range(2)]
    full = jnp.stack(rows, axis=3)                                   # (c,n,y,py,x,px)
    return jnp.transpose(full, (1, 0, 2, 3, 4, 5)).reshape(N, cout, 2 * H, 2 * W)


# ----------------------------------------------------------------------------
# DVAE parameters: normal(0, 0.02) init, GEMM-layout weights precomputed here
# ----------------------------------------------------------------------------
def init_params(key, latent_dim, n_clayers, n_channels, kernel1_size, d=128):
    keys = iter(jax.random.split(key, 64))

    def normal(shape):
        return 0.02 * jax.random.normal(next(keys), shape, jnp.float32)

    def conv_gemm_w(w):
        """(Cout,Cin,k,k) -> bf16 (round_up(k*k*Cin,128), Cout), K zero-padded."""
        Cout, Cin, k, _ = w.shape
        kk = k * k * Cin
        m = w.transpose(2, 3, 1, 0).reshape(kk, Cout)                # (ky,kx,ci) x co
        return jnp.pad(m, ((0, _round_up(kk, 128) - kk), (0, 0))).astype(jnp.bfloat16)

    def deconv1x1_gemm_w(w):
        """(Cin,Cout,k,k) -> bf16 (round_up(Cin,128), k*k*Cout)."""
        Cin, Cout, k, _ = w.shape
        m = w.transpose(0, 2, 3, 1).reshape(Cin, k * k * Cout)       # ci x (ky,kx,co)
        return jnp.pad(m, ((0, _round_up(Cin, 128) - Cin), (0, 0))).astype(jnp.bfloat16)

    def deconv_s2_wall(w):
        """(Cin,Cout,4,4) -> (4*Cin, 4*Cout) sub-pixel GEMM weight (f32)."""
        Cin, Cout, _, _ = w.shape
        ktaps = ((3, 1), (2, 0))
        blocks = []
        for py in range(2):
            for px in range(2):
                wp = jnp.stack(
                    [jnp.stack([w[:, :, ktaps[py][ty], ktaps[px][tx]]
                                for tx in range(2)], axis=0)
                     for ty in range(2)], axis=0)                    # (ty,tx,Cin,Cout)
                blocks.append(wp.reshape(4 * Cin, Cout))
        return jnp.concatenate(blocks, axis=1)

    p = {}
    # --- Encoder (dynamic: conv_first takes 2*n_channels) ---
    p["enc_first_w"] = conv_gemm_w(normal((d, 2 * n_channels, 4, 4)))
    p["enc_first_b"] = jnp.zeros((1, d), jnp.float32)
    chan_in = d
    enc_convs = []
    for _ in range(n_clayers - 2):
        chan_out = chan_in * 2
        enc_convs.append(dict(
            w=conv_gemm_w(normal((chan_out, chan_in, 4, 4))),
            b=jnp.zeros((1, chan_out), jnp.float32),
            gamma=jnp.ones((1, chan_out), jnp.float32),
            beta=jnp.zeros((1, chan_out), jnp.float32)))
        chan_in = chan_out
    p["enc_convs"] = enc_convs
    # conv_last kept in f32 / plain jnp.dot (M=1 matvec, mu/log_var precision).
    w_last = normal((4 * latent_dim, chan_in, kernel1_size, kernel1_size))
    p["enc_last_w"] = w_last.transpose(2, 3, 1, 0).reshape(
        kernel1_size * kernel1_size * chan_in, 4 * latent_dim)
    p["enc_last_b"] = jnp.zeros((4 * latent_dim,), jnp.float32)

    # --- Decoder ---
    p["dec_dense_wT"] = normal((100, latent_dim)).T                  # (L, 100)
    p["dec_dense_b"] = jnp.zeros((100,), jnp.float32)
    chan_in = int(d * 2 ** (n_clayers - 2))
    p["dec_first_w"] = deconv1x1_gemm_w(
        normal((100, chan_in, kernel1_size, kernel1_size)))
    p["dec_first_b"] = jnp.zeros((1, kernel1_size * kernel1_size * chan_in),
                                 jnp.float32)
    dec_deconvs = []
    for i in range(n_clayers - 1):
        chan_out = chan_in // 2 if i < n_clayers - 2 else n_channels
        w = normal((chan_in, chan_out, 4, 4))
        b = jnp.zeros((chan_out,), jnp.float32)
        w_all = deconv_s2_wall(w)
        if i == n_clayers - 2:
            # Final layer -> transposed (lane-dense) layout; pad rows to 8.
            mp = _round_up(4 * chan_out, 8)
            wT = jnp.pad(w_all.T, ((0, mp - 4 * chan_out), (0, 0)))
            rb = jnp.pad(jnp.tile(b, 4).reshape(4 * chan_out, 1),
                         ((0, mp - 4 * chan_out), (0, 0)))
            dec_deconvs.append(dict(wT=wT.astype(jnp.bfloat16), row_b=rb))
        else:
            dec_deconvs.append(dict(
                w_all=w_all.astype(jnp.bfloat16),
                b_all=jnp.tile(b, 4).reshape(1, 4 * chan_out)))
        chan_in = chan_out
    p["dec_deconvs"] = dec_deconvs

    # --- Transition matrices ---
    p["A"] = jnp.eye(latent_dim, dtype=jnp.float32) * 0.70711
    p["B"] = jnp.eye(latent_dim, dtype=jnp.float32) * 0.70711
    return p


# ----------------------------------------------------------------------------
# DVAE forward (ds=1 path, incomplete=False)
# ----------------------------------------------------------------------------
def encoder_forward(p, x_nchw):
    x = jnp.transpose(x_nchw, (0, 2, 3, 1))                          # NCHW -> NHWC once
    # ds == 1 -> no bilinear downscale.
    x = conv2d_gemm(x, p["enc_first_w"], p["enc_first_b"], k=4, stride=2, pad=1,
                    act="leaky_relu", out_dtype=jnp.bfloat16)
    n_enc = len(p["enc_convs"])
    for i, layer in enumerate(p["enc_convs"]):
        od = jnp.float32 if i == n_enc - 1 else jnp.bfloat16
        # conv + BatchNorm(batch stats) + leaky_relu fused into ONE kernel.
        x = conv2d_gemm(x, layer["w"], layer["b"], k=4, stride=2, pad=1,
                        gamma=layer["gamma"], beta=layer["beta"], out_dtype=od)
    # conv_last: full 4x4 window at stride 1 == flatten + matvec; XLA dot.
    xf = x.reshape(x.shape[0], -1).astype(jnp.float32)
    return xf @ p["enc_last_w"] + p["enc_last_b"]                    # (B, 4L)


def decoder_forward(p, z, kernel1_size, n_channels):
    # Tiny latent-space GEMM kept in XLA; NO activation before deconv_first.
    h = z @ p["dec_dense_wT"] + p["dec_dense_b"]                     # (B, 100)
    # relu is applied to the INPUT of every deconv in the list -> fused into the
    # producing layer's epilogue; final tanh fused into the last deconv.
    x = deconv_1x1_gemm(h, p["dec_first_w"], p["dec_first_b"],
                        k=kernel1_size, act="relu", out_dtype=jnp.bfloat16)
    n_dec = len(p["dec_deconvs"])
    for i, layer in enumerate(p["dec_deconvs"]):
        if i < n_dec - 1:
            x = conv_transpose2d_s2(x, layer["w_all"], layer["b_all"],
                                    act="relu", out_dtype=jnp.bfloat16)
        else:
            x = conv_transpose2d_s2_final(x, layer["wT"], layer["row_b"],
                                          cout=n_channels, act="tanh",
                                          out_dtype=jnp.float32)
    # ds == 1 -> no bilinear upsample.
    return x                                                         # NCHW


def dvae_forward(p, x, key, *, latent_dim, kernel1_size, n_channels, N=8):
    mu_logvar = encoder_forward(p, x)                                # (B, 4L)
    mu, log_var = jnp.split(mu_logvar, 2, axis=1)                    # each (B, 2L)
    # Reparametrization trick (tiny elementwise, plain JAX).
    eps = jax.random.normal(key, (N, mu.shape[1]), jnp.float32)
    h = mu + eps * jnp.exp(log_var / 2.0)                            # (N, 2L)
    h_prev, h_next = jnp.split(h, 2, axis=1)                         # each (N, L)
    h_next = h_prev @ p["A"].T + h_next @ p["B"].T                   # tiny, XLA dot
    # Batch both decoder passes into one call (shared weights/graph).
    z_all = jnp.concatenate([h_prev, h_next], axis=0)                # (2N, L)
    dec = decoder_forward(p, z_all, kernel1_size, n_channels)        # (2N, C, H, W)
    out = jnp.concatenate([dec[:N], dec[N:]], axis=1)                # (N, 2C, H, W)
    return out, mu, log_var


# ----------------------------------------------------------------------------
# Main
# ----------------------------------------------------------------------------
if __name__ == "__main__":
    latent_dim = 4
    n_clayers = 3
    n_channels = 1      # image channels; encoder sees 2*n_channels stacked frames
    kernel1_size = 4
    N_mc = 8

    root = jax.random.PRNGKey(0)
    k_param, k_x, k_eps = jax.random.split(root, 3)

    params = init_params(k_param, latent_dim=latent_dim, n_clayers=n_clayers,
                         n_channels=n_channels, kernel1_size=kernel1_size, d=128)

    # x must have dimensions (1, 2, height, width); 16x16 -> 8 -> 4 -> 1x1.
    x = jax.random.normal(k_x, (1, 2 * n_channels, 16, 16), jnp.float32)

    fwd = jax.jit(functools.partial(dvae_forward, latent_dim=latent_dim,
                                    kernel1_size=kernel1_size,
                                    n_channels=n_channels, N=N_mc))
    out, mu, log_var = fwd(params, x, k_eps)
    out, mu, log_var = jax.block_until_ready((out, mu, log_var))

    assert out.shape == (N_mc, 2 * n_channels, 16, 16), out.shape
    assert mu.shape == (1, 2 * latent_dim), mu.shape
    assert log_var.shape == (1, 2 * latent_dim), log_var.shape
    assert bool(jnp.all(jnp.isfinite(out)))
    print("KERNEL_OK")
</pallas_src>

<mosaic_0001>
module attributes {stable_mosaic.version = 11 : i64} {
  func.func @_gemm_bias_act_kernel(%arg0: i32, %arg1: memref<64x128xbf16, #tpu.memory_space<vmem>>, %arg2: memref<128x128xbf16, #tpu.memory_space<vmem>>, %arg3: memref<1x128xf32, #tpu.memory_space<vmem>>, %arg4: memref<64x128xbf16, #tpu.memory_space<vmem>>) attributes {dimension_semantics = [#tpu.dimension_semantics<parallel>], iteration_bounds = array<i64: 1>, scalar_prefetch = 0 : i64, scratch_operands = 0 : i64, tpu.core_type = #tpu.core_type<tc>, window_params = [{transform_indices = @transform_0, window_bounds = array<i64: 64, 128>}, {pipeline_mode = #tpu.pipeline_mode<synchronous>, transform_indices = @transform_1, window_bounds = array<i64: 128, 128>}, {pipeline_mode = #tpu.pipeline_mode<synchronous>, transform_indices = @transform_2, window_bounds = array<i64: 1, 128>}, {transform_indices = @transform_3, window_bounds = array<i64: 64, 128>}]} {
    %c0 = arith.constant 0 : index
    %c0_0 = arith.constant 0 : index
    %0 = vector.load %arg1[%c0, %c0_0] : memref<64x128xbf16, #tpu.memory_space<vmem>>, vector<64x128xbf16>
    %c0_1 = arith.constant 0 : index
    %c0_2 = arith.constant 0 : index
    %1 = vector.load %arg2[%c0_1, %c0_2] : memref<128x128xbf16, #tpu.memory_space<vmem>>, vector<128x128xbf16>
    %cst = arith.constant dense<0.000000e+00> : vector<64x128xf32>
    %2 = tpu.matmul %0, %1, %cst {dimension_numbers = #tpu.dot_dimension_numbers<[1], [0], [0], [1], [0, 0, 1, 1], [], []>} : vector<64x128xbf16>, vector<128x128xbf16>, vector<64x128xf32> -> vector<64x128xf32>
    %c0_3 = arith.constant 0 : index
    %c0_4 = arith.constant 0 : index
    %3 = vector.load %arg3[%c0_3, %c0_4] : memref<1x128xf32, #tpu.memory_space<vmem>>, vector<1x128xf32>
    %4 = vector.broadcast %3 : vector<1x128xf32> to vector<64x128xf32>
    %5 = arith.addf %2, %4 : vector<64x128xf32>
    %cst_5 = arith.constant 0.000000e+00 : f32
    %6 = vector.broadcast %cst_5 : f32 to vector<64x128xf32>
    %7 = arith.cmpf oge, %5, %6 : vector<64x128xf32>
    %cst_6 = arith.constant 2.000000e-01 : f32
    %8 = vector.broadcast %cst_6 : f32 to vector<64x128xf32>
    %9 = arith.mulf %8, %5 : vector<64x128xf32>
    %10 = arith.select %7, %5, %9 : vector<64x128xi1>, vector<64x128xf32>
    %11 = arith.truncf %10 : vector<64x128xf32> to vector<64x128xbf16>
    %c0_7 = arith.constant 0 : index
    %c0_8 = arith.constant 0 : index
    %12 = vector.load %arg4[%c0_7, %c0_8] : memref<64x128xbf16, #tpu.memory_space<vmem>>, vector<64x128xbf16>
    tpu.vector_store %arg4[%c0_7, %c0_8], %11 {strides = array<i32>} : memref<64x128xbf16, #tpu.memory_space<vmem>>, vector<64x128xbf16>,
    return
  }
  func.func @transform_0(%arg0: i32) -> (i32, i32) {
    %c0_i32 = arith.constant 0 : i32
    %c0_i32_0 = arith.constant 0 : i32
    return %arg0, %c0_i32 : i32, i32
  }
  func.func @transform_1(%arg0: i32) -> (i32, i32) {
    %c0_i32 = arith.constant 0 : i32
    %c0_i32_0 = arith.constant 0 : i32
    %c0_i32_1 = arith.constant 0 : i32
    return %c0_i32, %c0_i32_0 : i32, i32
  }
  func.func @transform_2(%arg0: i32) -> (i32, i32) {
    %c0_i32 = arith.constant 0 : i32
    %c0_i32_0 = arith.constant 0 : i32
    %c0_i32_1 = arith.constant 0 : i32
    return %c0_i32, %c0_i32_0 : i32, i32
  }
  func.func @transform_3(%arg0: i32) -> (i32, i32) {
    %c0_i32 = arith.constant 0 : i32
    %c0_i32_0 = arith.constant 0 : i32
    return %arg0, %c0_i32 : i32, i32
  }
}

module attributes {stable_mosaic.version = 11 : i64} {
  func.func @_gemm_bias_act_kernel(%arg0: i32, %arg1: memref<16x128xbf16, #tpu.memory_space<vmem>>, %arg2: memref<128x4096xbf16, #tpu.memory_space<vmem>>, %arg3: memref<1x4096xf32, #tpu.memory_space<vmem>>, %arg4: memref<16x4096xbf16, #tpu.memory_space<vmem>>) attributes {dimension_semantics = [#tpu.dimension_semantics<parallel>], iteration_bounds = array<i64: 1>, scalar_prefetch = 0 : i64, scratch_operands = 0 : i64, tpu.core_type = #tpu.core_type<tc>, window_params = [{transform_indices = @transform_0, window_bounds = array<i64: 16, 128>}, {pipeline_mode = #tpu.pipeline_mode<synchronous>, transform_indices = @transform_1, window_bounds = array<i64: 128, 4096>}, {pipeline_mode = #tpu.pipeline_mode<synchronous>, transform_indices = @transform_2, window_bounds = array<i64: 1, 4096>}, {transform_indices = @transform_3, window_bounds = array<i64: 16, 4096>}]} {
    %c0 = arith.constant 0 : index
    %c0_0 = arith.constant 0 : index
    %0 = vector.load %arg1[%c0, %c0_0] : memref<16x128xbf16, #tpu.memory_space<vmem>>, vector<16x128xbf16>
    %c0_1 = arith.constant 0 : index
    %c0_2 = arith.constant 0 : index
    %1 = vector.load %arg2[%c0_1, %c0_2] : memref<128x4096xbf16, #tpu.memory_space<vmem>>, vector<128x4096xbf16>
    %cst = arith.constant dense<0.000000e+00> : vector<16x4096xf32>
    %2 = tpu.matmul %0, %1, %cst {dimension_numbers = #tpu.dot_dimension_numbers<[1], [0], [0], [1], [0, 0, 1, 1], [], []>} : vector<16x128xbf16>, vector<128x4096xbf16>, vector<16x4096xf32> -> vector<16x4096xf32>
    %c0_3 = arith.constant 0 : index
    %c0_4 = arith.constant 0 : index
    %3 = vector.load %arg3[%c0_3, %c0_4] : memref<1x4096xf32, #tpu.memory_space<vmem>>, vector<1x4096xf32>
    %4 = vector.broadcast %3 : vector<1x4096xf32> to vector<16x4096xf32>
    %5 = arith.addf %2, %4 : vector<16x4096xf32>
    %cst_5 = arith.constant 0.000000e+00 : f32
    %6 = vector.broadcast %cst_5 : f32 to vector<16x4096xf32>
    %7 = arith.maximumf %5, %6 : vector<16x4096xf32>
    %8 = arith.truncf %7 : vector<16x4096xf32> to vector<16x4096xbf16>
    %c0_6 = arith.constant 0 : index
    %c0_7 = arith.constant 0 : index
    %9 = vector.load %arg4[%c0_6, %c0_7] : memref<16x4096xbf16, #tpu.memory_space<vmem>>, vector<16x4096xbf16>
    tpu.vector_store %arg4[%c0_6, %c0_7], %8 {strides = array<i32>} : memref<16x4096xbf16, #tpu.memory_space<vmem>>, vector<16x4096xbf16>,
    return
  }
  func.func @transform_0(%arg0: i32) -> (i32, i32) {
    %c0_i32 = arith.constant 0 : i32
    %c0_i32_0 = arith.constant 0 : i32
    return %arg0, %c0_i32 : i32, i32
  }
  func.func @transform_1(%arg0: i32) -> (i32, i32) {
    %c0_i32 = arith.constant 0 : i32
    %c0_i32_0 = arith.constant 0 : i32
    %c0_i32_1 = arith.constant 0 : i32
    return %c0_i32, %c0_i32_0 : i32, i32
  }
  func.func @transform_2(%arg0: i32) -> (i32, i32) {
    %c0_i32 = arith.constant 0 : i32
    %c0_i32_0 = arith.constant 0 : i32
    %c0_i32_1 = arith.constant 0 : i32
    return %c0_i32, %c0_i32_0 : i32, i32
  }
  func.func @transform_3(%arg0: i32) -> (i32, i32) {
    %c0_i32 = arith.constant 0 : i32
    %c0_i32_0 = arith.constant 0 : i32
    return %arg0, %c0_i32 : i32, i32
  }
}

module attributes {stable_mosaic.version = 11 : i64} {
  func.func @_gemm_bn_leaky_kernel(%arg0: i32, %arg1: memref<16x2048xbf16, #tpu.memory_space<vmem>>, %arg2: memref<2048x256xbf16, #tpu.memory_space<vmem>>, %arg3: memref<1x256xf32, #tpu.memory_space<vmem>>, %arg4: memref<1x256xf32, #tpu.memory_space<vmem>>, %arg5: memref<1x256xf32, #tpu.memory_space<vmem>>, %arg6: memref<16x256xf32, #tpu.memory_space<vmem>>) attributes {dimension_semantics = [#tpu.dimension_semantics<parallel>], iteration_bounds = array<i64: 1>, scalar_prefetch = 0 : i64, scratch_operands = 0 : i64, tpu.core_type = #tpu.core_type<tc>, window_params = [{transform_indices = @transform_0, window_bounds = array<i64: 16, 2048>}, {pipeline_mode = #tpu.pipeline_mode<synchronous>, transform_indices = @transform_1, window_bounds = array<i64: 2048, 256>}, {pipeline_mode = #tpu.pipeline_mode<synchronous>, transform_indices = @transform_2, window_bounds = array<i64: 1, 256>}, {pipeline_mode = #tpu.pipeline_mode<synchronous>, transform_indices = @transform_3, window_bounds = array<i64: 1, 256>}, {pipeline_mode = #tpu.pipeline_mode<synchronous>, transform_indices = @transform_4, window_bounds = array<i64: 1, 256>}, {transform_indices = @transform_5, window_bounds = array<i64: 16, 256>}]} {
    %c0 = arith.constant 0 : index
    %c0_0 = arith.constant 0 : index
    %0 = vector.load %arg1[%c0, %c0_0] : memref<16x2048xbf16, #tpu.memory_space<vmem>>, vector<16x2048xbf16>
    %c0_1 = arith.constant 0 : index
    %c0_2 = arith.constant 0 : index
    %1 = vector.load %arg2[%c0_1, %c0_2] : memref<2048x256xbf16, #tpu.memory_space<vmem>>, vector<2048x256xbf16>
    %cst = arith.constant dense<0.000000e+00> : vector<16x256xf32>
    %2 = tpu.matmul %0, %1, %cst {dimension_numbers = #tpu.dot_dimension_numbers<[1], [0], [0], [1], [0, 0, 1, 1], [], []>} : vector<16x2048xbf16>, vector<2048x256xbf16>, vector<16x256xf32> -> vector<16x256xf32>
    %c0_3 = arith.constant 0 : index
    %c0_4 = arith.constant 0 : index
    %3 = vector.load %arg3[%c0_3, %c0_4] : memref<1x256xf32, #tpu.memory_space<vmem>>, vector<1x256xf32>
    %4 = vector.broadcast %3 : vector<1x256xf32> to vector<16x256xf32>
    %5 = arith.addf %2, %4 : vector<16x256xf32>
    %cst_5 = arith.constant dense<0.000000e+00> : vector<256xf32>
    %6 = vector.multi_reduction <add>, %5, %cst_5 [0] : vector<16x256xf32> to vector<256xf32>
    %7 = vector.shape_cast %6 : vector<256xf32> to vector<1x256xf32>
    %cst_6 = arith.constant 6.250000e-02 : f32
    %8 = vector.broadcast %cst_6 : f32 to vector<1x256xf32>
    %9 = arith.mulf %7, %8 : vector<1x256xf32>
    %10 = arith.mulf %5, %5 : vector<16x256xf32>
    %cst_7 = arith.constant dense<0.000000e+00> : vector<256xf32>
    %11 = vector.multi_reduction <add>, %10, %cst_7 [0] : vector<16x256xf32> to vector<256xf32>
    %12 = vector.shape_cast %11 : vector<256xf32> to vector<1x256xf32>
    %cst_8 = arith.constant 6.250000e-02 : f32
    %13 = vector.broadcast %cst_8 : f32 to vector<1x256xf32>
    %14 = arith.mulf %12, %13 : vector<1x256xf32>
    %15 = arith.mulf %9, %9 : vector<1x256xf32>
    %16 = arith.subf %14, %15 : vector<1x256xf32>
    %cst_9 = arith.constant 0.000000e+00 : f32
    %17 = vector.broadcast %cst_9 : f32 to vector<1x256xf32>
    %18 = arith.maximumf %16, %17 : vector<1x256xf32>
    %c0_10 = arith.constant 0 : index
    %c0_11 = arith.constant 0 : index
    %19 = vector.load %arg4[%c0_10, %c0_11] : memref<1x256xf32, #tpu.memory_space<vmem>>, vector<1x256xf32>
    %cst_12 = arith.constant 9.99999974E-6 : f32
    %20 = vector.broadcast %cst_12 : f32 to vector<1x256xf32>
    %21 = arith.addf %18, %20 : vector<1x256xf32>
    %22 = math.rsqrt %21 : vector<1x256xf32>
    %23 = arith.mulf %19, %22 : vector<1x256xf32>
    %c0_13 = arith.constant 0 : index
    %c0_14 = arith.constant 0 : index
    %24 = vector.load %arg5[%c0_13, %c0_14] : memref<1x256xf32, #tpu.memory_space<vmem>>, vector<1x256xf32>
    %25 = arith.mulf %9, %23 : vector<1x256xf32>
    %26 = arith.subf %24, %25 : vector<1x256xf32>
    %27 = vector.broadcast %23 : vector<1x256xf32> to vector<16x256xf32>
    %28 = arith.mulf %5, %27 : vector<16x256xf32>
    %29 = vector.broadcast %26 : vector<1x256xf32> to vector<16x256xf32>
    %30 = arith.addf %28, %29 : vector<16x256xf32>
    %cst_15 = arith.constant 0.000000e+00 : f32
    %31 = vector.broadcast %cst_15 : f32 to vector<16x256xf32>
    %32 = arith.cmpf oge, %30, %31 : vector<16x256xf32>
    %cst_16 = arith.constant 2.000000e-01 : f32
    %33 = vector.broadcast %cst_16 : f32 to vector<16x256xf32>
    %34 = arith.mulf %33, %30 : vector<16x256xf32>
    %35 = arith.select %32, %30, %34 : vector<16x256xi1>, vector<16x256xf32>
    %c0_17 = arith.constant 0 : index
    %c0_18 = arith.constant 0 : index
    %36 = vector.load %arg6[%c0_17, %c0_18] : memref<16x256xf32, #tpu.memory_space<vmem>>, vector<16x256xf32>
    tpu.vector_store %arg6[%c0_17, %c0_18], %35 {strides = array<i32>} : memref<16x256xf32, #tpu.memory_space<vmem>>, vector<16x256xf32>,
    return
  }
  func.func @transform_0(%arg0: i32) -> (i32, i32) {
    %c0_i32 = arith.constant 0 : i32
    %c0_i32_0 = arith.constant 0 : i32
    return %arg0, %c0_i32 : i32, i32
  }
  func.func @transform_1(%arg0: i32) -> (i32, i32) {
    %c0_i32 = arith.constant 0 : i32
    %c0_i32_0 = arith.constant 0 : i32
    %c0_i32_1 = arith.constant 0 : i32
    return %c0_i32, %c0_i32_0 : i32, i32
  }
  func.func @transform_2(%arg0: i32) -> (i32, i32) {
    %c0_i32 = arith.constant 0 : i32
    %c0_i32_0 = arith.constant 0 : i32
    %c0_i32_1 = arith.constant 0 : i32
    return %c0_i32, %c0_i32_0 : i32, i32
  }
  func.func @transform_3(%arg0: i32) -> (i32, i32) {
    %c0_i32 = arith.constant 0 : i32
    %c0_i32_0 = arith.constant 0 : i32
    %c0_i32_1 = arith.constant 0 : i32
    return %c0_i32, %c0_i32_0 : i32, i32
  }
  func.func @transform_4(%arg0: i32) -> (i32, i32) {
    %c0_i32 = arith.constant 0 : i32
    %c0_i32_0 = arith.constant 0 : i32
    %c0_i32_1 = arith.constant 0 : i32
    return %c0_i32, %c0_i32_0 : i32, i32
  }
  func.func @transform_5(%arg0: i32) -> (i32, i32) {
    %c0_i32 = arith.constant 0 : i32
    %c0_i32_0 = arith.constant 0 : i32
    return %arg0, %c0_i32 : i32, i32
  }
}

module attributes {stable_mosaic.version = 11 : i64} {
  func.func @_gemm_bias_act_kernel(%arg0: i32, %arg1: memref<208x1024xbf16, #tpu.memory_space<vmem>>, %arg2: memref<1024x512xbf16, #tpu.memory_space<vmem>>, %arg3: memref<1x512xf32, #tpu.memory_space<vmem>>, %arg4: memref<208x512xbf16, #tpu.memory_space<vmem>>) attributes {dimension_semantics = [#tpu.dimension_semantics<parallel>], iteration_bounds = array<i64: 2>, scalar_prefetch = 0 : i64, scratch_operands = 0 : i64, tpu.core_type = #tpu.core_type<tc>, window_params = [{transform_indices = @transform_0, window_bounds = array<i64: 208, 1024>}, {pipeline_mode = #tpu.pipeline_mode<synchronous>, transform_indices = @transform_1, window_bounds = array<i64: 1024, 512>}, {pipeline_mode = #tpu.pipeline_mode<synchronous>, transform_indices = @transform_2, window_bounds = array<i64: 1, 512>}, {transform_indices = @transform_3, window_bounds = array<i64: 208, 512>}]} {
    %c0 = arith.constant 0 : index
    %c0_0 = arith.constant 0 : index
    %0 = vector.load %arg1[%c0, %c0_0] : memref<208x1024xbf16, #tpu.memory_space<vmem>>, vector<208x1024xbf16>
    %c0_1 = arith.constant 0 : index
    %c0_2 = arith.constant 0 : index
    %1 = vector.load %arg2[%c0_1, %c0_2] : memref<1024x512xbf16, #tpu.memory_space<vmem>>, vector<1024x512xbf16>
    %cst = arith.constant dense<0.000000e+00> : vector<208x512xf32>
    %2 = tpu.matmul %0, %1, %cst {dimension_numbers = #tpu.dot_dimension_numbers<[1], [0], [0], [1], [0, 0, 1, 1], [], []>} : vector<208x1024xbf16>, vector<1024x512xbf16>, vector<208x512xf32> -> vector<208x512xf32>
    %c0_3 = arith.constant 0 : index
    %c0_4 = arith.constant 0 : index
    %3 = vector.load %arg3[%c0_3, %c0_4] : memref<1x512xf32, #tpu.memory_space<vmem>>, vector<1x512xf32>
    %4 = vector.broadcast %3 : vector<1x512xf32> to vector<208x512xf32>
    %5 = arith.addf %2, %4 : vector<208x512xf32>
    %cst_5 = arith.constant 0.000000e+00 : f32
    %6 = vector.broadcast %cst_5 : f32 to vector<208x512xf32>
    %7 = arith.maximumf %5, %6 : vector<208x512xf32>
    %8 = arith.truncf %7 : vector<208x512xf32> to vector<208x512xbf16>
    %c0_6 = arith.constant 0 : index
    %c0_7 = arith.constant 0 : index
    %9 = vector.load %arg4[%c0_6, %c0_7] : memref<208x512xbf16, #tpu.memory_space<vmem>>, vector<208x512xbf16>
    tpu.vector_store %arg4[%c0_6, %c0_7], %8 {strides = array<i32>} : memref<208x512xbf16, #tpu.memory_space<vmem>>, vector<208x512xbf16>,
    return
  }
  func.func @transform_0(%arg0: i32) -> (i32, i32) {
    %c0_i32 = arith.constant 0 : i32
    %c0_i32_0 = arith.constant 0 : i32
    return %arg0, %c0_i32 : i32, i32
  }
  func.func @transform_1(%arg0: i32) -> (i32, i32) {
    %c0_i32 = arith.constant 0 : i32
    %c0_i32_0 = arith.constant 0 : i32
    %c0_i32_1 = arith.constant 0 : i32
    return %c0_i32, %c0_i32_0 : i32, i32
  }
  func.func @transform_2(%arg0: i32) -> (i32, i32) {
    %c0_i32 = arith.constant 0 : i32
    %c0_i32_0 = arith.constant 0 : i32
    %c0_i32_1 = arith.constant 0 : i32
    return %c0_i32, %c0_i32_0 : i32, i32
  }
  func.func @transform_3(%arg0: i32) -> (i32, i32) {
    %c0_i32 = arith.constant 0 : i32
    %c0_i32_0 = arith.constant 0 : i32
    return %arg0, %c0_i32 : i32, i32
  }
}

module attributes {stable_mosaic.version = 11 : i64} {
  func.func @_gemm_bias_act_kernel(%arg0: i32, %arg1: memref<8x512xbf16, #tpu.memory_space<vmem>>, %arg2: memref<512x1296xbf16, #tpu.memory_space<vmem>>, %arg3: memref<8x1xf32, #tpu.memory_space<vmem>>, %arg4: memref<8x1296xf32, #tpu.memory_space<vmem>>) attributes {dimension_semantics = [#tpu.dimension_semantics<parallel>], iteration_bounds = array<i64: 1>, scalar_prefetch = 0 : i64, scratch_operands = 0 : i64, tpu.core_type = #tpu.core_type<tc>, window_params = [{transform_indices = @transform_0, window_bounds = array<i64: 8, 512>}, {pipeline_mode = #tpu.pipeline_mode<synchronous>, transform_indices = @transform_1, window_bounds = array<i64: 512, 1296>}, {transform_indices = @transform_2, window_bounds = array<i64: 8, 1>}, {transform_indices = @transform_3, window_bounds = array<i64: 8, 1296>}]} {
    %c0 = arith.constant 0 : index
    %c0_0 = arith.constant 0 : index
    %0 = vector.load %arg1[%c0, %c0_0] : memref<8x512xbf16, #tpu.memory_space<vmem>>, vector<8x512xbf16>
    %c0_1 = arith.constant 0 : index
    %c0_2 = arith.constant 0 : index
    %1 = vector.load %arg2[%c0_1, %c0_2] : memref<512x1296xbf16, #tpu.memory_space<vmem>>, vector<512x1296xbf16>
    %cst = arith.constant dense<0.000000e+00> : vector<8x1296xf32>
    %2 = tpu.matmul %0, %1, %cst {dimension_numbers = #tpu.dot_dimension_numbers<[1], [0], [0], [1], [0, 0, 1, 1], [], []>} : vector<8x512xbf16>, vector<512x1296xbf16>, vector<8x1296xf32> -> vector<8x1296xf32>
    %c0_3 = arith.constant 0 : index
    %c0_4 = arith.constant 0 : index
    %3 = vector.load %arg3[%c0_3, %c0_4] : memref<8x1xf32, #tpu.memory_space<vmem>>, vector<8x1xf32>
    %4 = vector.broadcast %3 : vector<8x1xf32> to vector<8x1296xf32>
    %5 = arith.addf %2, %4 : vector<8x1296xf32>
    %6 = math.tanh %5 : vector<8x1296xf32>
    %c0_5 = arith.constant 0 : index
    %c0_6 = arith.constant 0 : index
    %7 = vector.load %arg4[%c0_5, %c0_6] : memref<8x1296xf32, #tpu.memory_space<vmem>>, vector<8x1296xf32>
    tpu.vector_store %arg4[%c0_5, %c0_6], %6 {strides = array<i32>} : memref<8x1296xf32, #tpu.memory_space<vmem>>, vector<8x1296xf32>,
    return
  }
  func.func @transform_0(%arg0: i32) -> (i32, i32) {
    %c0_i32 = arith.constant 0 : i32
    %c0_i32_0 = arith.constant 0 : i32
    return %arg0, %c0_i32 : i32, i32
  }
  func.func @transform_1(%arg0: i32) -> (i32, i32) {
    %c0_i32 = arith.constant 0 : i32
    %c0_i32_0 = arith.constant 0 : i32
    %c0_i32_1 = arith.constant 0 : i32
    return %c0_i32, %c0_i32_0 : i32, i32
  }
  func.func @transform_2(%arg0: i32) -> (i32, i32) {
    %c0_i32 = arith.constant 0 : i32
    %c0_i32_0 = arith.constant 0 : i32
    return %arg0, %c0_i32 : i32, i32
  }
  func.func @transform_3(%arg0: i32) -> (i32, i32) {
    %c0_i32 = arith.constant 0 : i32
    %c0_i32_0 = arith.constant 0 : i32
    return %arg0, %c0_i32 : i32, i32
  }
}

</mosaic_0001>

<bundles_post_ra>
// kernel: split.6
= control target key start
LH: loop header
LB: loop body
LE: loop exit
PB: predicated region body
PF: predicated region fallthrough
CT: control target
= control target key end

     0   :  { %s24_s0 = inlined_call_operand.vmem [shape: bf16[8,8], index: 0, kind: input, shape index: {}]   ;;  %s25_s1 = inlined_call_operand.vmem [shape: bf16[8,4], index: 1, kind: output, shape index: {}]  }
   0x1   :  { %v7_v0 = vld [vmem:[%s24_s0] sm:$0xf] }
   0x2   :  { %6 = vst [vmem:[%s25_s1] sm:$0x3] %v7_v0 }

// kernel: dvae_forward.5
= control target key start
LH: loop header
LB: loop body
LE: loop exit
PB: predicated region body
PF: predicated region fallthrough
CT: control target
= control target key end

     0   :  { %8 = vsyncpa [#allocation3], 0  ;;  %s521_s0 = inlined_call_operand.vmem [shape: bf16[64,128], index: 0, kind: input, shape index: {}]   ;;  %s522_s1 = inlined_call_operand.hbm [shape: bf16[128,128], index: 1, kind: input, shape index: {}]   ;;  %s523_s2 = inlined_call_operand.hbm [shape: f32[1,128], index: 2, kind: input, shape index: {}]   ;;  %s524_s3 = inlined_call_operand.vmem [shape: bf16[64,128], index: 3, kind: output, shape index: {}]  }
   0x1   :  { %9 = vsyncpa [#allocation5], 0  ;;  %s447_s12 = smov [#allocation2]   ;;  %s399_s16 = scalar_lea.hbm %s522_s1, 1024 }
   0x2   :  { %s17_s13 = sshll.u32 %s447_s12, 4  ;;  %p400_p0 = scmp.ne.s32.totalorder %s522_s1, %s399_s16  ;;  %s18_s13 = int_to_ptr.vmem [resolvable:$true] %s17_s13 }
   0x3   :  { %p403_p1 = scmp.lt.u32.totalorder %s399_s16, %s522_s1 }
   0x5   :  { %p405_p2 = pnand %p403_p1, %p400_p0 }
   0x7   :  { %408 = shalt.err (!%p405_p2)
}
   0x8   :  { %s409_s21 = scalar_lea.vmem %s18_s13, 1024  ;;  %p414_p4 = scmp.lt.s32.totalorder %s18_s13, %s18_s13 }
   0x9   :  { %p410_p3 = scmp.ne.s32.totalorder %s18_s13, %s409_s21  ;;  %p415_p5 = scmp.lt.s32.totalorder %s409_s21, %s409_s21 }
   0xb   :  { %p416_p6 = por %p415_p5, %p414_p4 }
   0xd   :  { %p417_p7 = pnand %p416_p6, %p410_p3 }
   0xf   :  { %420 = shalt.err (!%p417_p7)
}
  0x10   :  { %s448_s22 = smov 64   ;;  %s449_s23 = smov 4  }
  0x11   :  { %23 = dma.hbm_to_vmem [thread:$0]  %s522_s1, 1024, %s18_s13, [#allocation3], %s448_s22, %s448_s22, %s449_s23  }
  0x12   :  { %s450_s26 = smov [#allocation4]   ;;  %s421_s30 = scalar_lea.hbm %s523_s2, 16 }
  0x13   :  { %s30_s27 = sshll.u32 %s450_s26, 4  ;;  %p422_p8 = scmp.ne.s32.totalorder %s523_s2, %s421_s30  ;;  %s31_s27 = int_to_ptr.vmem [resolvable:$true] %s30_s27 }
  0x14   :  { %p425_p9 = scmp.lt.u32.totalorder %s421_s30, %s523_s2 }
  0x16   :  { %p427_p10 = pnand %p425_p9, %p422_p8 }
  0x18   :  { %430 = shalt.err (!%p427_p10)
}
  0x19   :  { %s431_s8 = scalar_lea.vmem %s31_s27, 16  ;;  %s435_s1 = scalar_lea.vmem %s31_s27, 32 }
  0x1a   :  { %p432_p11 = scmp.ne.s32.totalorder %s31_s27, %s431_s8  ;;  %p436_p12 = scmp.lt.s32.totalorder %s31_s27, %s31_s27 }
  0x1b   :  { %p437_p13 = scmp.lt.s32.totalorder %s435_s1, %s431_s8 }
  0x1d   :  { %p438_p0 = por %p437_p13, %p436_p12 }
  0x1f   :  { %p439_p1 = pnand %p438_p0, %p432_p11 }
  0x21   :  { %442 = shalt.err (!%p439_p1)
}
  0x22   :  { %33 = dma.hbm_to_vmem [thread:$0]  %s523_s2, 16, %s31_s27, [#allocation5]  }
  0x23   :  { %443 = dma.done.wait [#allocation3], 1024  }
  0x24   :  { %444 = vsyncadd [#allocation3], 4294966272 }
  0x25   :  { %445 = dma.done.wait [#allocation5], 16  }
  0x26   :  { %446 = vsyncadd [#allocation5], 4294967280  ;;  %v387_v0 = vld [vmem:[#allocation2] sm:$0xff]   ;;  %v388_v1 = vld [vmem:[#allocation2 + $0x8] sm:$0xff]  }
  0x27   :  { %343 = vmatprep.subr.bf16.mxu0 %v387_v0  ;;  %367 = vmatprep.subr.bf16.mxu1 %v387_v0  ;;  %v389_v2 = vld [vmem:[#allocation2 + $0x10] sm:$0xff]   ;;  %v390_v3 = vld [vmem:[#allocation2 + $0x18] sm:$0xff]   ;;  %v395_v4 = vld [vmem:[%s521_s0] sm:$0xff]  }
  0x28   :  { %344 = vmatpush3.bf16.msra.mxu0 %v387_v0  ;;  %375 = vmatpush3.bf16.msra.mxu1 %v387_v0  ;;  %v396_v5 = vld [vmem:[%s521_s0 + $0x10] sm:$0xff]   ;;  %v391_v6 = vld [vmem:[#allocation2 + $0x20] sm:$0xff]   ;;  %v392_v7 = vld [vmem:[#allocation2 + $0x28] sm:$0xff]  }
  0x29   :  { %345 = vmatprep.subr.bf16.mxu0 %v388_v1  ;;  %368 = vmatprep.subr.bf16.mxu1 %v388_v1  ;;  %v393_v8 = vld [vmem:[#allocation2 + $0x30] sm:$0xff]   ;;  %v394_v9 = vld [vmem:[#allocation2 + $0x38] sm:$0xff]   ;;  %v397_v10 = vld [vmem:[%s521_s0 + $0x8] sm:$0xff]  }
  0x2a   :  { %359 = vmatprep.mubr.bf16.mxu0 %v395_v4  ;;  %363 = vmatprep.mubr.bf16.mxu1 %v396_v5  ;;  %v398_v11 = vld [vmem:[%s521_s0 + $0x18] sm:$0xff]   ;;  %v279_v12 = vld [vmem:[#allocation4] ss:$0 sm:$0xff] }
  0x2c   :  { %346 = vmatpush3.bf16.msra.mxu0 %v388_v1  ;;  %376 = vmatpush3.bf16.msra.mxu1 %v388_v1 }
  0x2d   :  { %347 = vmatprep.subr.bf16.mxu0 %v389_v2  ;;  %369 = vmatprep.subr.bf16.mxu1 %v389_v2 }
  0x30   :  { %348 = vmatpush3.bf16.msra.mxu0 %v389_v2  ;;  %377 = vmatpush3.bf16.msra.mxu1 %v389_v2 }
  0x31   :  { %349 = vmatprep.subr.bf16.mxu0 %v390_v3  ;;  %370 = vmatprep.subr.bf16.mxu1 %v390_v3 }
  0x34   :  { %350 = vmatpush3.bf16.msra.mxu0 %v390_v3  ;;  %378 = vmatpush3.bf16.msra.mxu1 %v390_v3 }
  0x35   :  { %351 = vmatprep.subr.bf16.mxu0 %v391_v6  ;;  %371 = vmatprep.subr.bf16.mxu1 %v391_v6 }
  0x38   :  { %352 = vmatpush3.bf16.msra.mxu0 %v391_v6  ;;  %379 = vmatpush3.bf16.msra.mxu1 %v391_v6 }
  0x39   :  { %353 = vmatprep.subr.bf16.mxu0 %v392_v7  ;;  %372 = vmatprep.subr.bf16.mxu1 %v392_v7 }
  0x3c   :  { %354 = vmatpush3.bf16.msra.mxu0 %v392_v7  ;;  %380 = vmatpush3.bf16.msra.mxu1 %v392_v7 }
  0x3d   :  { %355 = vmatprep.subr.bf16.mxu0 %v393_v8  ;;  %373 = vmatprep.subr.bf16.mxu1 %v393_v8 }
  0x40   :  { %356 = vmatpush3.bf16.msra.mxu0 %v393_v8  ;;  %381 = vmatpush3.bf16.msra.mxu1 %v393_v8 }
  0x41   :  { %357 = vmatprep.subr.bf16.mxu0 %v394_v9  ;;  %374 = vmatprep.subr.bf16.mxu1 %v394_v9 }
  0x44   :  { %358 = vmatpush3.bf16.msra.mxu0 %v394_v9  ;;  %382 = vmatpush3.bf16.msra.mxu1 %v394_v9 }
  0x47   :  { %360 = vmatmul.mubr.bf16.vlgmr.msra.gmra.mrb[0].mxu0 %v397_v10  ;;  %364 = vmatmul.mubr.bf16.vlgmr.msra.gmra.mrb[0].mxu1 %v398_v11 }
 0x11a   :  { %v361_v13 = vpop.f32.mrb[0].mxu0  ;;  %v365_v14 = vpop.f32.mrb[0].mxu1 }
 0x11b   :  { %v187_v15 = vadd.f32 %v361_v13, %v279_v12  ;;  %v203_v16 = vadd.f32 %v365_v14, %v279_v12  ;;  %v178_v17 = vpop.f32.mrb[1].mxu0  ;;  %v194_v18 = vpop.f32.mrb[1].mxu1 }
 0x11c   :  { %v179_v19 = vadd.f32 %v279_v12, %v178_v17  ;;  %v195_v20 = vadd.f32 %v279_v12, %v194_v18  ;;  %v362_v21 = vpop.f32.mrb[2].mxu0  ;;  %v366_v22 = vpop.f32.mrb[2].mxu1 }
 0x11d   :  { %vm211_vm0 = vcmp.ge.f32.partialorder %v187_v15, 0.0  ;;  %v219_v23 = vmul.f32 0.2, %v187_v15  ;;  %vm215_vm1 = vcmp.ge.f32.partialorder %v203_v16, 0.0  ;;  %v223_v24 = vmul.f32 0.2, %v203_v16 }
 0x11e   :  { %vm209_vm2 = vcmp.ge.f32.partialorder %v179_v19, 0.0  ;;  %v217_v25 = vmul.f32 0.2, %v179_v19  ;;  %vm213_vm3 = vcmp.ge.f32.partialorder %v195_v20, 0.0  ;;  %v221_v26 = vmul.f32 0.2, %v195_v20 }
 0x11f   :  { %v190_v27 = vadd.f32 %v362_v21, %v279_v12  ;;  %v206_v28 = vadd.f32 %v366_v22, %v279_v12  ;;  %v181_v29 = vpop.f32.mrb[3].mxu0  ;;  %v197_v30 = vpop.f32.mrb[3].mxu1  ;;  %v227_v31 = vsel %vm211_vm0, %v187_v15, %v219_v23  ;;  %v231_v32 = vsel %vm215_vm1, %v203_v16, %v223_v24 }
 0x120   :  { %v182_v33 = vadd.f32 %v279_v12, %v181_v29  ;;  %v198_v34 = vadd.f32 %v279_v12, %v197_v30  ;;  %v225_v39 = vsel %vm209_vm2, %v179_v19, %v217_v25  ;;  %v229_v40 = vsel %vm213_vm3, %v195_v20, %v221_v26 }
 0x121   :  { %vm212_vm4 = vcmp.ge.f32.partialorder %v190_v27, 0.0  ;;  %v220_v35 = vmul.f32 0.2, %v190_v27  ;;  %vm216_vm5 = vcmp.ge.f32.partialorder %v206_v28, 0.0  ;;  %v224_v36 = vmul.f32 0.2, %v206_v28 }
 0x122   :  { %vm210_vm6 = vcmp.ge.f32.partialorder %v182_v33, 0.0  ;;  %v218_v37 = vmul.f32 0.2, %v182_v33  ;;  %vm214_vm7 = vcmp.ge.f32.partialorder %v198_v34, 0.0  ;;  %v222_v38 = vmul.f32 0.2, %v198_v34 }
 0x123   :  { %v228_v41 = vsel %vm212_vm4, %v190_v27, %v220_v35  ;;  %v232_v42 = vsel %vm216_vm5, %v206_v28, %v224_v36 }
 0x124   :  { %v316_v43 = vpack.c.bf16 %v228_v41, %v227_v31  ;;  %v326_v44 = vpack.c.bf16 %v232_v42, %v231_v32  ;;  %v226_v45 = vsel %vm210_vm6, %v182_v33, %v218_v37  ;;  %v230_v46 = vsel %vm214_vm7, %v198_v34, %v222_v38 }
 0x125   :  { %v311_v47 = vpack.c.bf16 %v226_v45, %v225_v39  ;;  %v321_v48 = vpack.c.bf16 %v230_v46, %v229_v40 }
 0x126   :  { %328 = vst [vmem:[%s524_s3 + $0x8] sm:$0xff] %v316_v43   ;;  %330 = vst [vmem:[%s524_s3 + $0x18] sm:$0xff] %v326_v44  }
 0x127   :  { %312 = vst [vmem:[%s524_s3] sm:$0xff] %v311_v47   ;;  %329 = vst [vmem:[%s524_s3 + $0x10] sm:$0xff] %v321_v48  }
 0x128   :  { %277 = vsyncpa [#allocation3], 1 }
 0x129   :  { %278 = vsyncpa [#allocation5], 1 }

// kernel: dvae_forward.7
= control target key start
LH: loop header
LB: loop body
LE: loop exit
PB: predicated region body
PF: predicated region fallthrough
CT: control target
= control target key end

     0   :  { %v3031_v3 = vmov 0   ;;  %s4038_s1 = inlined_call_operand.vmem [shape: bf16[128,4096], index: 1, kind: input, shape index: {}]   ;;  %s4039_s0 = inlined_call_operand.vmem [shape: bf16[16,128], index: 0, kind: input, shape index: {}]   ;;  %s4040_s2 = inlined_call_operand.vmem [shape: f32[1,4096], index: 2, kind: input, shape index: {}]   ;;  %s4041_s3 = inlined_call_operand.vmem [shape: bf16[16,4096], index: 3, kind: output, shape index: {}]  }
   0x1   :  { %v17_v0 = vld [vmem:[%s4038_s1] sm:$0xff]  ;;  %v18_v2 = vld [vmem:[%s4038_s1 + $0x8] sm:$0xff]  ;;  %1759 = vmatprep.mubr.bf16.mxu0 %v3031_v3  ;;  %1802 = vmatprep.mubr.bf16.mxu1 %v3031_v3  ;;  %v19_v63 = vld [vmem:[%s4038_s1 + $0x10] sm:$0xff] }
   0x2   :  { %v33_v1 = vld [vmem:[%s4038_s1 + $0x80] sm:$0xff]  ;;  %v34_v5 = vld [vmem:[%s4038_s1 + $0x88] sm:$0xff] }
   0x3   :  { %v2709_v4 = vcombine.high %v17_v0, %v33_v1  ;;  %v2708_v6 = vcombine.low %v17_v0, %v33_v1  ;;  %v49_v7 = vld [vmem:[%s4038_s1 + $0x100] sm:$0xff]  ;;  %v2711_v9 = vcombine.high %v18_v2, %v34_v5  ;;  %v2710_v10 = vcombine.low %v18_v2, %v34_v5  ;;  %v50_v12 = vld [vmem:[%s4038_s1 + $0x108] sm:$0xff]  ;;  %v35_v0 = vld [vmem:[%s4038_s1 + $0x90] sm:$0xff] }
   0x4   :  { %v65_v8 = vld [vmem:[%s4038_s1 + $0x180] sm:$0xff]  ;;  %v66_v13 = vld [vmem:[%s4038_s1 + $0x188] sm:$0xff]  ;;  %v20_v1 = vld [vmem:[%s4038_s1 + $0x18] sm:$0xff] }
   0x5   :  { %v2741_v11 = vcombine.high %v49_v7, %v65_v8  ;;  %v81_v14 = vld [vmem:[%s4038_s1 + $0x200] sm:$0xff]  ;;  %1727 = vmatprep.subr.bf16.mxu0 %v2709_v4  ;;  %v2743_v15 = vcombine.high %v50_v12, %v66_v13  ;;  %v82_v17 = vld [vmem:[%s4038_s1 + $0x208] sm:$0xff]  ;;  %1770 = vmatprep.subr.bf16.mxu1 %v2711_v9  ;;  %v2740_v19 = vcombine.low %v49_v7, %v65_v8  ;;  %v36_v2 = vld [vmem:[%s4038_s1 + $0x98] sm:$0xff] }
   0x6   :  { %v97_v16 = vld [vmem:[%s4038_s1 + $0x280] sm:$0xff]  ;;  %v98_v18 = vld [vmem:[%s4038_s1 + $0x288] sm:$0xff]  ;;  %1728 = vmatpush1.bf16.msra.mxu0 %v2708_v6  ;;  %1771 = vmatpush1.bf16.msra.mxu1 %v2710_v10  ;;  %v2742_v20 = vcombine.low %v50_v12, %v66_v13  ;;  %v2713_v6 = vcombine.high %v19_v63, %v35_v0  ;;  %v2715_v7 = vcombine.high %v20_v1, %v36_v2  ;;  %v51_v8 = vld [vmem:[%s4038_s1 + $0x110] sm:$0xff] }
   0x7   :  { %1729 = vmatprep.subr.bf16.mxu0 %v2741_v11  ;;  %v2773_v21 = vcombine.high %v81_v14, %v97_v16  ;;  %1772 = vmatprep.subr.bf16.mxu1 %v2743_v15  ;;  %v2775_v22 = vcombine.high %v82_v17, %v98_v18  ;;  %v113_v23 = vld [vmem:[%s4038_s1 + $0x300] sm:$0xff]  ;;  %v114_v25 = vld [vmem:[%s4038_s1 + $0x308] sm:$0xff]  ;;  %v2772_v27 = vcombine.low %v81_v14, %v97_v16  ;;  %v67_v9 = vld [vmem:[%s4038_s1 + $0x190] sm:$0xff] }
   0x8   :  { %v129_v24 = vld [vmem:[%s4038_s1 + $0x380] sm:$0xff]  ;;  %v130_v26 = vld [vmem:[%s4038_s1 + $0x388] sm:$0xff]  ;;  %v2774_v28 = vcombine.low %v82_v17, %v98_v18  ;;  %v52_v11 = vld [vmem:[%s4038_s1 + $0x118] sm:$0xff]  ;;  %v2712_v13 = vcombine.low %v19_v63, %v35_v0  ;;  %v2714_v14 = vcombine.low %v20_v1, %v36_v2  ;;  %v2745_v15 = vcombine.high %v51_v8, %v67_v9 }
   0x9   :  { %v2805_v29 = vcombine.high %v113_v23, %v129_v24  ;;  %v2807_v30 = vcombine.high %v114_v25, %v130_v26  ;;  %v145_v31 = vld [vmem:[%s4038_s1 + $0x400] sm:$0xff]  ;;  %v146_v33 = vld [vmem:[%s4038_s1 + $0x408] sm:$0xff]  ;;  %v2804_v35 = vcombine.low %v113_v23, %v129_v24  ;;  %v2806_v36 = vcombine.low %v114_v25, %v130_v26  ;;  %v68_v12 = vld [vmem:[%s4038_s1 + $0x198] sm:$0xff] }
   0xa   :  { %1730 = vmatpush1.bf16.msra.mxu0 %v2740_v19  ;;  %1773 = vmatpush1.bf16.msra.mxu1 %v2742_v20  ;;  %v161_v32 = vld [vmem:[%s4038_s1 + $0x480] sm:$0xff]  ;;  %v162_v34 = vld [vmem:[%s4038_s1 + $0x488] sm:$0xff]  ;;  %v2747_v16 = vcombine.high %v52_v11, %v68_v12  ;;  %v83_v17 = vld [vmem:[%s4038_s1 + $0x210] sm:$0xff] }
   0xb   :  { %1731 = vmatprep.subr.bf16.mxu0 %v2773_v21  ;;  %1774 = vmatprep.subr.bf16.mxu1 %v2775_v22  ;;  %v2837_v37 = vcombine.high %v145_v31, %v161_v32  ;;  %v2839_v38 = vcombine.high %v146_v33, %v162_v34  ;;  %v177_v39 = vld [vmem:[%s4038_s1 + $0x500] sm:$0xff]  ;;  %v178_v41 = vld [vmem:[%s4038_s1 + $0x508] sm:$0xff]  ;;  %v2836_v43 = vcombine.low %v145_v31, %v161_v32  ;;  %v99_v18 = vld [vmem:[%s4038_s1 + $0x290] sm:$0xff] }
   0xc   :  { %v193_v40 = vld [vmem:[%s4038_s1 + $0x580] sm:$0xff]  ;;  %v194_v42 = vld [vmem:[%s4038_s1 + $0x588] sm:$0xff]  ;;  %v2838_v44 = vcombine.low %v146_v33, %v162_v34  ;;  %v84_v19 = vld [vmem:[%s4038_s1 + $0x218] sm:$0xff]  ;;  %v2744_v21 = vcombine.low %v51_v8, %v67_v9  ;;  %v2746_v22 = vcombine.low %v52_v11, %v68_v12  ;;  %v2777_v23 = vcombine.high %v83_v17, %v99_v18 }
   0xd   :  { %v2869_v45 = vcombine.high %v177_v39, %v193_v40  ;;  %v2871_v46 = vcombine.high %v178_v41, %v194_v42  ;;  %v209_v47 = vld [vmem:[%s4038_s1 + $0x600] sm:$0xff]  ;;  %v210_v49 = vld [vmem:[%s4038_s1 + $0x608] sm:$0xff]  ;;  %v2868_v51 = vcombine.low %v177_v39, %v193_v40  ;;  %v2870_v52 = vcombine.low %v178_v41, %v194_v42  ;;  %v100_v20 = vld [vmem:[%s4038_s1 + $0x298] sm:$0xff] }
   0xe   :  { %1732 = vmatpush1.bf16.msra.mxu0 %v2772_v27  ;;  %1775 = vmatpush1.bf16.msra.mxu1 %v2774_v28  ;;  %v225_v48 = vld [vmem:[%s4038_s1 + $0x680] sm:$0xff]  ;;  %v226_v50 = vld [vmem:[%s4038_s1 + $0x688] sm:$0xff]  ;;  %v2779_v24 = vcombine.high %v84_v19, %v100_v20  ;;  %v115_v25 = vld [vmem:[%s4038_s1 + $0x310] sm:$0xff] }
   0xf   :  { %1733 = vmatprep.subr.bf16.mxu0 %v2805_v29  ;;  %1776 = vmatprep.subr.bf16.mxu1 %v2807_v30  ;;  %v2901_v53 = vcombine.high %v209_v47, %v225_v48  ;;  %v2903_v54 = vcombine.high %v210_v49, %v226_v50  ;;  %v241_v55 = vld [vmem:[%s4038_s1 + $0x700] sm:$0xff]  ;;  %v242_v57 = vld [vmem:[%s4038_s1 + $0x708] sm:$0xff]  ;;  %v2900_v59 = vcombine.low %v209_v47, %v225_v48  ;;  %v131_v26 = vld [vmem:[%s4038_s1 + $0x390] sm:$0xff] }
  0x10   :  { %v257_v56 = vld [vmem:[%s4038_s1 + $0x780] sm:$0xff]  ;;  %v258_v58 = vld [vmem:[%s4038_s1 + $0x788] sm:$0xff]  ;;  %v2902_v60 = vcombine.low %v210_v49, %v226_v50  ;;  %v116_v27 = vld [vmem:[%s4038_s1 + $0x318] sm:$0xff]  ;;  %v2776_v29 = vcombine.low %v83_v17, %v99_v18  ;;  %v2778_v30 = vcombine.low %v84_v19, %v100_v20  ;;  %v2809_v31 = vcombine.high %v115_v25, %v131_v26 }
  0x11   :  { %v2933_v61 = vcombine.high %v241_v55, %v257_v56  ;;  %v2935_v62 = vcombine.high %v242_v57, %v258_v58  ;;  %v2932_v4 = vcombine.low %v241_v55, %v257_v56  ;;  %v2934_v5 = vcombine.low %v242_v57, %v258_v58  ;;  %v3171_v10 = vld [vmem:[%s4039_s0] sm:$0xff]   ;;  %v132_v28 = vld [vmem:[%s4038_s1 + $0x398] sm:$0xff]  ;;  %v147_v33 = vld [vmem:[%s4038_s1 + $0x410] sm:$0xff] }
  0x12   :  { %1734 = vmatpush1.bf16.msra.mxu0 %v2804_v35  ;;  %1777 = vmatpush1.bf16.msra.mxu1 %v2806_v36  ;;  %v2811_v32 = vcombine.high %v116_v27, %v132_v28  ;;  %v163_v34 = vld [vmem:[%s4038_s1 + $0x490] sm:$0xff]  ;;  %v148_v35 = vld [vmem:[%s4038_s1 + $0x418] sm:$0xff]  ;;  %v21_v1 = vld [vmem:[%s4038_s1 + $0x20] sm:$0xff] }
  0x13   :  { %1735 = vmatprep.subr.bf16.mxu0 %v2837_v37  ;;  %1778 = vmatprep.subr.bf16.mxu1 %v2839_v38  ;;  %v164_v36 = vld [vmem:[%s4038_s1 + $0x498] sm:$0xff]  ;;  %v2808_v37 = vcombine.low %v115_v25, %v131_v26  ;;  %v2810_v38 = vcombine.low %v116_v27, %v132_v28  ;;  %v2841_v39 = vcombine.high %v147_v33, %v163_v34  ;;  %v179_v41 = vld [vmem:[%s4038_s1 + $0x510] sm:$0xff]  ;;  %v37_v2 = vld [vmem:[%s4038_s1 + $0xa0] sm:$0xff] }
  0x14   :  { %v2843_v40 = vcombine.high %v148_v35, %v164_v36  ;;  %v195_v42 = vld [vmem:[%s4038_s1 + $0x590] sm:$0xff]  ;;  %v2717_v8 = vcombine.high %v21_v1, %v37_v2  ;;  %v53_v11 = vld [vmem:[%s4038_s1 + $0x120] sm:$0xff] }
  0x15   :  { %v2873_v47 = vcombine.high %v179_v41, %v195_v42  ;;  %v211_v49 = vld [vmem:[%s4038_s1 + $0x610] sm:$0xff]  ;;  %v69_v12 = vld [vmem:[%s4038_s1 + $0x1a0] sm:$0xff] }
  0x16   :  { %1736 = vmatpush1.bf16.msra.mxu0 %v2836_v43  ;;  %1779 = vmatpush1.bf16.msra.mxu1 %v2838_v44  ;;  %v180_v43 = vld [vmem:[%s4038_s1 + $0x518] sm:$0xff]  ;;  %v227_v50 = vld [vmem:[%s4038_s1 + $0x690] sm:$0xff]  ;;  %v2749_v17 = vcombine.high %v53_v11, %v69_v12  ;;  %v85_v19 = vld [vmem:[%s4038_s1 + $0x220] sm:$0xff] }
  0x17   :  { %1737 = vmatprep.subr.bf16.mxu0 %v2869_v45  ;;  %1780 = vmatprep.subr.bf16.mxu1 %v2871_v46  ;;  %v196_v44 = vld [vmem:[%s4038_s1 + $0x598] sm:$0xff]  ;;  %v2840_v45 = vcombine.low %v147_v33, %v163_v34  ;;  %v2842_v46 = vcombine.low %v148_v35, %v164_v36  ;;  %v2905_v55 = vcombine.high %v211_v49, %v227_v50  ;;  %v243_v57 = vld [vmem:[%s4038_s1 + $0x710] sm:$0xff]  ;;  %v101_v20 = vld [vmem:[%s4038_s1 + $0x2a0] sm:$0xff] }
  0x18   :  { %v2875_v48 = vcombine.high %v180_v43, %v196_v44  ;;  %v259_v58 = vld [vmem:[%s4038_s1 + $0x790] sm:$0xff]  ;;  %v2781_v25 = vcombine.high %v85_v19, %v101_v20  ;;  %v117_v27 = vld [vmem:[%s4038_s1 + $0x320] sm:$0xff] }
  0x19   :  { %v2937_v63 = vcombine.high %v243_v57, %v259_v58  ;;  %v133_v28 = vld [vmem:[%s4038_s1 + $0x3a0] sm:$0xff] }
  0x1a   :  { %1738 = vmatpush1.bf16.msra.mxu0 %v2868_v51  ;;  %1781 = vmatpush1.bf16.msra.mxu1 %v2870_v52  ;;  %v212_v51 = vld [vmem:[%s4038_s1 + $0x618] sm:$0xff]  ;;  %v2813_v33 = vcombine.high %v117_v27, %v133_v28  ;;  %v149_v35 = vld [vmem:[%s4038_s1 + $0x420] sm:$0xff] }
  0x1b   :  { %1739 = vmatprep.subr.bf16.mxu0 %v2901_v53  ;;  %1782 = vmatprep.subr.bf16.mxu1 %v2903_v54  ;;  %v228_v52 = vld [vmem:[%s4038_s1 + $0x698] sm:$0xff]  ;;  %v2872_v53 = vcombine.low %v179_v41, %v195_v42  ;;  %v2874_v54 = vcombine.low %v180_v43, %v196_v44  ;;  %v165_v36 = vld [vmem:[%s4038_s1 + $0x4a0] sm:$0xff] }
  0x1c   :  { %v2907_v56 = vcombine.high %v212_v51, %v228_v52  ;;  %v2845_v41 = vcombine.high %v149_v35, %v165_v36  ;;  %v181_v43 = vld [vmem:[%s4038_s1 + $0x520] sm:$0xff] }
  0x1d   :  { %v197_v44 = vld [vmem:[%s4038_s1 + $0x5a0] sm:$0xff] }
  0x1e   :  { %1740 = vmatpush1.bf16.msra.mxu0 %v2900_v59  ;;  %1783 = vmatpush1.bf16.msra.mxu1 %v2902_v60  ;;  %v244_v59 = vld [vmem:[%s4038_s1 + $0x718] sm:$0xff] }
  0x1f   :  { %1741 = vmatprep.subr.bf16.mxu0 %v2933_v61  ;;  %1784 = vmatprep.subr.bf16.mxu1 %v2935_v62  ;;  %v260_v60 = vld [vmem:[%s4038_s1 + $0x798] sm:$0xff]  ;;  %v2904_v61 = vcombine.low %v211_v49, %v227_v50  ;;  %v2906_v62 = vcombine.low %v212_v51, %v228_v52  ;;  %v2877_v49 = vcombine.high %v181_v43, %v197_v44  ;;  %v213_v51 = vld [vmem:[%s4038_s1 + $0x620] sm:$0xff] }
  0x20   :  { %v2939_v0 = vcombine.high %v244_v59, %v260_v60  ;;  %v229_v52 = vld [vmem:[%s4038_s1 + $0x6a0] sm:$0xff] }
  0x22   :  { %1742 = vmatpush1.bf16.msra.mxu0 %v2932_v4  ;;  %1785 = vmatpush1.bf16.msra.mxu1 %v2934_v5  ;;  %v22_v4 = vld [vmem:[%s4038_s1 + $0x28] sm:$0xff] }
  0x23   :  { %1813 = vmatprep.subr.bf16.mxu0 %v2713_v6  ;;  %1856 = vmatprep.subr.bf16.mxu1 %v2715_v7  ;;  %v38_v5 = vld [vmem:[%s4038_s1 + $0xa8] sm:$0xff]  ;;  %v2936_v6 = vcombine.low %v243_v57, %v259_v58  ;;  %v2938_v7 = vcombine.low %v244_v59, %v260_v60  ;;  %v2909_v57 = vcombine.high %v213_v51, %v229_v52  ;;  %v245_v59 = vld [vmem:[%s4038_s1 + $0x720] sm:$0xff] }
  0x24   :  { %v2719_v9 = vcombine.high %v22_v4, %v38_v5  ;;  %v261_v60 = vld [vmem:[%s4038_s1 + $0x7a0] sm:$0xff] }
  0x25   :  { %1760 = vmatmul.mubr.bf16.vlgmr.msra.gmra.mrb[0].mxu0 %v3171_v10  ;;  %1803 = vmatmul.mubr.bf16.vlgmr.msra.gmra.mrb[0].mxu1 %v3171_v10 }
  0x26   :  { %1814 = vmatpush1.bf16.msra.mxu0 %v2712_v13  ;;  %1857 = vmatpush1.bf16.msra.mxu1 %v2714_v14  ;;  %v54_v13 = vld [vmem:[%s4038_s1 + $0x128] sm:$0xff] }
  0x27   :  { %1815 = vmatprep.subr.bf16.mxu0 %v2745_v15  ;;  %1858 = vmatprep.subr.bf16.mxu1 %v2747_v16  ;;  %v70_v14 = vld [vmem:[%s4038_s1 + $0x1a8] sm:$0xff]  ;;  %v2716_v15 = vcombine.low %v21_v1, %v37_v2  ;;  %v2718_v16 = vcombine.low %v22_v4, %v38_v5  ;;  %v2941_v1 = vcombine.high %v245_v59, %v261_v60  ;;  %v23_v4 = vld [vmem:[%s4038_s1 + $0x30] sm:$0xff] }
  0x28   :  { %1845 = vmatprep.mubr.bf16.mxu0 %v3031_v3  ;;  %1888 = vmatprep.mubr.bf16.mxu1 %v3031_v3  ;;  %v2751_v18 = vcombine.high %v54_v13, %v70_v14  ;;  %v39_v5 = vld [vmem:[%s4038_s1 + $0xb0] sm:$0xff] }
  0x2a   :  { %1816 = vmatpush1.bf16.msra.mxu0 %v2744_v21  ;;  %1859 = vmatpush1.bf16.msra.mxu1 %v2746_v22  ;;  %v86_v21 = vld [vmem:[%s4038_s1 + $0x228] sm:$0xff] }
  0x2b   :  { %1817 = vmatprep.subr.bf16.mxu0 %v2777_v23  ;;  %1860 = vmatprep.subr.bf16.mxu1 %v2779_v24  ;;  %v102_v22 = vld [vmem:[%s4038_s1 + $0x2a8] sm:$0xff]  ;;  %v2748_v23 = vcombine.low %v53_v11, %v69_v12  ;;  %v2750_v24 = vcombine.low %v54_v13, %v70_v14  ;;  %v2721_v11 = vcombine.high %v23_v4, %v39_v5  ;;  %v55_v13 = vld [vmem:[%s4038_s1 + $0x130] sm:$0xff] }
  0x2c   :  { %v2783_v26 = vcombine.high %v86_v21, %v102_v22  ;;  %v71_v14 = vld [vmem:[%s4038_s1 + $0x1b0] sm:$0xff] }
  0x2e   :  { %1818 = vmatpush1.bf16.msra.mxu0 %v2776_v29  ;;  %1861 = vmatpush1.bf16.msra.mxu1 %v2778_v30  ;;  %v118_v29 = vld [vmem:[%s4038_s1 + $0x328] sm:$0xff] }
  0x2f   :  { %1819 = vmatprep.subr.bf16.mxu0 %v2809_v31  ;;  %1862 = vmatprep.subr.bf16.mxu1 %v2811_v32  ;;  %v134_v30 = vld [vmem:[%s4038_s1 + $0x3a8] sm:$0xff]  ;;  %v2780_v31 = vcombine.low %v85_v19, %v101_v20  ;;  %v2782_v32 = vcombine.low %v86_v21, %v102_v22  ;;  %v2753_v19 = vcombine.high %v55_v13, %v71_v14  ;;  %v87_v21 = vld [vmem:[%s4038_s1 + $0x230] sm:$0xff] }
  0x30   :  { %v2815_v34 = vcombine.high %v118_v29, %v134_v30  ;;  %v103_v22 = vld [vmem:[%s4038_s1 + $0x2b0] sm:$0xff] }
  0x32   :  { %1820 = vmatpush1.bf16.msra.mxu0 %v2808_v37  ;;  %1863 = vmatpush1.bf16.msra.mxu1 %v2810_v38  ;;  %v150_v37 = vld [vmem:[%s4038_s1 + $0x428] sm:$0xff] }
  0x33   :  { %1821 = vmatprep.subr.bf16.mxu0 %v2841_v39  ;;  %1864 = vmatprep.subr.bf16.mxu1 %v2843_v40  ;;  %v166_v38 = vld [vmem:[%s4038_s1 + $0x4a8] sm:$0xff]  ;;  %v2812_v39 = vcombine.low %v117_v27, %v133_v28  ;;  %v2814_v40 = vcombine.low %v118_v29, %v134_v30  ;;  %v2785_v27 = vcombine.high %v87_v21, %v103_v22  ;;  %v119_v29 = vld [vmem:[%s4038_s1 + $0x330] sm:$0xff] }
  0x34   :  { %v2847_v42 = vcombine.high %v150_v37, %v166_v38  ;;  %v135_v30 = vld [vmem:[%s4038_s1 + $0x3b0] sm:$0xff] }
  0x36   :  { %1822 = vmatpush1.bf16.msra.mxu0 %v2840_v45  ;;  %1865 = vmatpush1.bf16.msra.mxu1 %v2842_v46  ;;  %v182_v45 = vld [vmem:[%s4038_s1 + $0x528] sm:$0xff] }
  0x37   :  { %1823 = vmatprep.subr.bf16.mxu0 %v2873_v47  ;;  %1866 = vmatprep.subr.bf16.mxu1 %v2875_v48  ;;  %v198_v46 = vld [vmem:[%s4038_s1 + $0x5a8] sm:$0xff]  ;;  %v2844_v47 = vcombine.low %v149_v35, %v165_v36  ;;  %v2846_v48 = vcombine.low %v150_v37, %v166_v38  ;;  %v2817_v35 = vcombine.high %v119_v29, %v135_v30  ;;  %v151_v37 = vld [vmem:[%s4038_s1 + $0x430] sm:$0xff] }
  0x38   :  { %v2879_v50 = vcombine.high %v182_v45, %v198_v46  ;;  %v167_v38 = vld [vmem:[%s4038_s1 + $0x4b0] sm:$0xff] }
  0x3a   :  { %1824 = vmatpush1.bf16.msra.mxu0 %v2872_v53  ;;  %1867 = vmatpush1.bf16.msra.mxu1 %v2874_v54  ;;  %v214_v53 = vld [vmem:[%s4038_s1 + $0x628] sm:$0xff] }
  0x3b   :  { %1825 = vmatprep.subr.bf16.mxu0 %v2905_v55  ;;  %1868 = vmatprep.subr.bf16.mxu1 %v2907_v56  ;;  %v230_v54 = vld [vmem:[%s4038_s1 + $0x6a8] sm:$0xff]  ;;  %v2876_v55 = vcombine.low %v181_v43, %v197_v44  ;;  %v2878_v56 = vcombine.low %v182_v45, %v198_v46  ;;  %v2849_v43 = vcombine.high %v151_v37, %v167_v38  ;;  %v183_v45 = vld [vmem:[%s4038_s1 + $0x530] sm:$0xff] }
  0x3c   :  { %v2911_v58 = vcombine.high %v214_v53, %v230_v54  ;;  %v199_v46 = vld [vmem:[%s4038_s1 + $0x5b0] sm:$0xff] }
  0x3e   :  { %1826 = vmatpush1.bf16.msra.mxu0 %v2904_v61  ;;  %1869 = vmatpush1.bf16.msra.mxu1 %v2906_v62  ;;  %v246_v61 = vld [vmem:[%s4038_s1 + $0x728] sm:$0xff] }
  0x3f   :  { %1827 = vmatprep.subr.bf16.mxu0 %v2937_v63  ;;  %1870 = vmatprep.subr.bf16.mxu1 %v2939_v0  ;;  %v262_v62 = vld [vmem:[%s4038_s1 + $0x7a8] sm:$0xff]  ;;  %v2908_v63 = vcombine.low %v213_v51, %v229_v52  ;;  %v2910_v0 = vcombine.low %v214_v53, %v230_v54  ;;  %v2881_v51 = vcombine.high %v183_v45, %v199_v46  ;;  %v215_v53 = vld [vmem:[%s4038_s1 + $0x630] sm:$0xff] }
  0x40   :  { %v2943_v2 = vcombine.high %v246_v61, %v262_v62  ;;  %v231_v54 = vld [vmem:[%s4038_s1 + $0x6b0] sm:$0xff] }
  0x42   :  { %1828 = vmatpush1.bf16.msra.mxu0 %v2936_v6  ;;  %1871 = vmatpush1.bf16.msra.mxu1 %v2938_v7  ;;  %v24_v6 = vld [vmem:[%s4038_s1 + $0x38] sm:$0xff] }
  0x43   :  { %1899 = vmatprep.subr.bf16.mxu0 %v2717_v8  ;;  %1942 = vmatprep.subr.bf16.mxu1 %v2719_v9  ;;  %v40_v7 = vld [vmem:[%s4038_s1 + $0xb8] sm:$0xff]  ;;  %v2940_v8 = vcombine.low %v245_v59, %v261_v60  ;;  %v2942_v9 = vcombine.low %v246_v61, %v262_v62  ;;  %v2913_v59 = vcombine.high %v215_v53, %v231_v54  ;;  %v247_v61 = vld [vmem:[%s4038_s1 + $0x730] sm:$0xff] }
  0x44   :  { %v2723_v12 = vcombine.high %v24_v6, %v40_v7  ;;  %v263_v62 = vld [vmem:[%s4038_s1 + $0x7b0] sm:$0xff] }
  0x45   :  { %1846 = vmatmul.mubr.bf16.vlgmr.msra.gmra.mrb[4].mxu0 %v3171_v10  ;;  %1889 = vmatmul.mubr.bf16.vlgmr.msra.gmra.mrb[4].mxu1 %v3171_v10 }
  0x46   :  { %1900 = vmatpush1.bf16.msra.mxu0 %v2716_v15  ;;  %1943 = vmatpush1.bf16.msra.mxu1 %v2718_v16  ;;  %v56_v15 = vld [vmem:[%s4038_s1 + $0x138] sm:$0xff] }
  0x47   :  { %1901 = vmatprep.subr.bf16.mxu0 %v2749_v17  ;;  %1944 = vmatprep.subr.bf16.mxu1 %v2751_v18  ;;  %v72_v16 = vld [vmem:[%s4038_s1 + $0x1b8] sm:$0xff]  ;;  %v2720_v17 = vcombine.low %v23_v4, %v39_v5  ;;  %v2722_v18 = vcombine.low %v24_v6, %v40_v7  ;;  %v2945_v4 = vcombine.high %v247_v61, %v263_v62  ;;  %v25_v6 = vld [vmem:[%s4038_s1 + $0x40] sm:$0xff] }
  0x48   :  { %1931 = vmatprep.mubr.bf16.mxu0 %v3031_v3  ;;  %1974 = vmatprep.mubr.bf16.mxu1 %v3031_v3  ;;  %v2755_v20 = vcombine.high %v56_v15, %v72_v16  ;;  %v41_v7 = vld [vmem:[%s4038_s1 + $0xc0] sm:$0xff] }
  0x4a   :  { %1902 = vmatpush1.bf16.msra.mxu0 %v2748_v23  ;;  %1945 = vmatpush1.bf16.msra.mxu1 %v2750_v24  ;;  %v88_v23 = vld [vmem:[%s4038_s1 + $0x238] sm:$0xff] }
  0x4b   :  { %1903 = vmatprep.subr.bf16.mxu0 %v2781_v25  ;;  %1946 = vmatprep.subr.bf16.mxu1 %v2783_v26  ;;  %v104_v24 = vld [vmem:[%s4038_s1 + $0x2b8] sm:$0xff]  ;;  %v2752_v25 = vcombine.low %v55_v13, %v71_v14  ;;  %v2754_v26 = vcombine.low %v56_v15, %v72_v16  ;;  %v2725_v13 = vcombine.high %v25_v6, %v41_v7  ;;  %v57_v15 = vld [vmem:[%s4038_s1 + $0x140] sm:$0xff] }
  0x4c   :  { %v2787_v28 = vcombine.high %v88_v23, %v104_v24  ;;  %v73_v16 = vld [vmem:[%s4038_s1 + $0x1c0] sm:$0xff] }
  0x4e   :  { %1904 = vmatpush1.bf16.msra.mxu0 %v2780_v31  ;;  %1947 = vmatpush1.bf16.msra.mxu1 %v2782_v32  ;;  %v120_v31 = vld [vmem:[%s4038_s1 + $0x338] sm:$0xff] }
  0x4f   :  { %1905 = vmatprep.subr.bf16.mxu0 %v2813_v33  ;;  %1948 = vmatprep.subr.bf16.mxu1 %v2815_v34  ;;  %v136_v32 = vld [vmem:[%s4038_s1 + $0x3b8] sm:$0xff]  ;;  %v2784_v33 = vcombine.low %v87_v21, %v103_v22  ;;  %v2786_v34 = vcombine.low %v88_v23, %v104_v24  ;;  %v2757_v21 = vcombine.high %v57_v15, %v73_v16  ;;  %v89_v23 = vld [vmem:[%s4038_s1 + $0x240] sm:$0xff] }
  0x50   :  { %v2819_v36 = vcombine.high %v120_v31, %v136_v32  ;;  %v105_v24 = vld [vmem:[%s4038_s1 + $0x2c0] sm:$0xff] }
  0x52   :  { %1906 = vmatpush1.bf16.msra.mxu0 %v2812_v39  ;;  %1949 = vmatpush1.bf16.msra.mxu1 %v2814_v40  ;;  %v152_v39 = vld [vmem:[%s4038_s1 + $0x438] sm:$0xff] }
  0x53   :  { %1907 = vmatprep.subr.bf16.mxu0 %v2845_v41  ;;  %1950 = vmatprep.subr.bf16.mxu1 %v2847_v42  ;;  %v168_v40 = vld [vmem:[%s4038_s1 + $0x4b8] sm:$0xff]  ;;  %v2816_v41 = vcombine.low %v119_v29, %v135_v30  ;;  %v2818_v42 = vcombine.low %v120_v31, %v136_v32  ;;  %v2789_v29 = vcombine.high %v89_v23, %v105_v24  ;;  %v121_v31 = vld [vmem:[%s4038_s1 + $0x340] sm:$0xff] }
  0x54   :  { %v2851_v44 = vcombine.high %v152_v39, %v168_v40  ;;  %v137_v32 = vld [vmem:[%s4038_s1 + $0x3c0] sm:$0xff] }
  0x56   :  { %1908 = vmatpush1.bf16.msra.mxu0 %v2844_v47  ;;  %1951 = vmatpush1.bf16.msra.mxu1 %v2846_v48  ;;  %v184_v47 = vld [vmem:[%s4038_s1 + $0x538] sm:$0xff] }
  0x57   :  { %1909 = vmatprep.subr.bf16.mxu0 %v2877_v49  ;;  %1952 = vmatprep.subr.bf16.mxu1 %v2879_v50  ;;  %v200_v48 = vld [vmem:[%s4038_s1 + $0x5b8] sm:$0xff]  ;;  %v2848_v49 = vcombine.low %v151_v37, %v167_v38  ;;  %v2850_v50 = vcombine.low %v152_v39, %v168_v40  ;;  %v2821_v37 = vcombine.high %v121_v31, %v137_v32  ;;  %v153_v39 = vld [vmem:[%s4038_s1 + $0x440] sm:$0xff] }
  0x58   :  { %v2883_v52 = vcombine.high %v184_v47, %v200_v48  ;;  %v169_v40 = vld [vmem:[%s4038_s1 + $0x4c0] sm:$0xff] }
  0x5a   :  { %1910 = vmatpush1.bf16.msra.mxu0 %v2876_v55  ;;  %1953 = vmatpush1.bf16.msra.mxu1 %v2878_v56  ;;  %v216_v55 = vld [vmem:[%s4038_s1 + $0x638] sm:$0xff] }
  0x5b   :  { %1911 = vmatprep.subr.bf16.mxu0 %v2909_v57  ;;  %1954 = vmatprep.subr.bf16.mxu1 %v2911_v58  ;;  %v232_v56 = vld [vmem:[%s4038_s1 + $0x6b8] sm:$0xff]  ;;  %v2880_v57 = vcombine.low %v183_v45, %v199_v46  ;;  %v2882_v58 = vcombine.low %v184_v47, %v200_v48  ;;  %v2853_v45 = vcombine.high %v153_v39, %v169_v40  ;;  %v185_v47 = vld [vmem:[%s4038_s1 + $0x540] sm:$0xff] }
  0x5c   :  { %v2915_v60 = vcombine.high %v216_v55, %v232_v56  ;;  %v201_v48 = vld [vmem:[%s4038_s1 + $0x5c0] sm:$0xff] }
  0x5e   :  { %1912 = vmatpush1.bf16.msra.mxu0 %v2908_v63  ;;  %1955 = vmatpush1.bf16.msra.mxu1 %v2910_v0  ;;  %v248_v63 = vld [vmem:[%s4038_s1 + $0x738] sm:$0xff] }
  0x5f   :  { %1913 = vmatprep.subr.bf16.mxu0 %v2941_v1  ;;  %1956 = vmatprep.subr.bf16.mxu1 %v2943_v2  ;;  %v264_v0 = vld [vmem:[%s4038_s1 + $0x7b8] sm:$0xff]  ;;  %v2912_v1 = vcombine.low %v215_v53, %v231_v54  ;;  %v2914_v2 = vcombine.low %v216_v55, %v232_v56  ;;  %v2885_v53 = vcombine.high %v185_v47, %v201_v48  ;;  %v217_v55 = vld [vmem:[%s4038_s1 + $0x640] sm:$0xff] }
  0x60   :  { %v2947_v5 = vcombine.high %v248_v63, %v264_v0  ;;  %v233_v56 = vld [vmem:[%s4038_s1 + $0x6c0] sm:$0xff] }
  0x62   :  { %1914 = vmatpush1.bf16.msra.mxu0 %v2940_v8  ;;  %1957 = vmatpush1.bf16.msra.mxu1 %v2942_v9  ;;  %v26_v8 = vld [vmem:[%s4038_s1 + $0x48] sm:$0xff] }
  0x63   :  { %1985 = vmatprep.subr.bf16.mxu0 %v2721_v11  ;;  %2028 = vmatprep.subr.bf16.mxu1 %v2723_v12  ;;  %v42_v9 = vld [vmem:[%s4038_s1 + $0xc8] sm:$0xff]  ;;  %v2944_v11 = vcombine.low %v247_v61, %v263_v62  ;;  %v2946_v12 = vcombine.low %v248_v63, %v264_v0  ;;  %v2917_v61 = vcombine.high %v217_v55, %v233_v56  ;;  %v249_v63 = vld [vmem:[%s4038_s1 + $0x740] sm:$0xff] }
  0x64   :  { %v2727_v14 = vcombine.high %v26_v8, %v42_v9  ;;  %v265_v0 = vld [vmem:[%s4038_s1 + $0x7c0] sm:$0xff] }
  0x65   :  { %1932 = vmatmul.mubr.bf16.vlgmr.msra.gmra.mrb[8].mxu0 %v3171_v10  ;;  %1975 = vmatmul.mubr.bf16.vlgmr.msra.gmra.mrb[8].mxu1 %v3171_v10 }
  0x66   :  { %1986 = vmatpush1.bf16.msra.mxu0 %v2720_v17  ;;  %2029 = vmatpush1.bf16.msra.mxu1 %v2722_v18  ;;  %v58_v17 = vld [vmem:[%s4038_s1 + $0x148] sm:$0xff] }
  0x67   :  { %1987 = vmatprep.subr.bf16.mxu0 %v2753_v19  ;;  %2030 = vmatprep.subr.bf16.mxu1 %v2755_v20  ;;  %v74_v18 = vld [vmem:[%s4038_s1 + $0x1c8] sm:$0xff]  ;;  %v2724_v19 = vcombine.low %v25_v6, %v41_v7  ;;  %v2726_v20 = vcombine.low %v26_v8, %v42_v9  ;;  %v2949_v6 = vcombine.high %v249_v63, %v265_v0  ;;  %v27_v8 = vld [vmem:[%s4038_s1 + $0x50] sm:$0xff] }
  0x68   :  { %2017 = vmatprep.mubr.bf16.mxu0 %v3031_v3  ;;  %2060 = vmatprep.mubr.bf16.mxu1 %v3031_v3  ;;  %v2759_v22 = vcombine.high %v58_v17, %v74_v18  ;;  %v43_v9 = vld [vmem:[%s4038_s1 + $0xd0] sm:$0xff] }
  0x6a   :  { %1988 = vmatpush1.bf16.msra.mxu0 %v2752_v25  ;;  %2031 = vmatpush1.bf16.msra.mxu1 %v2754_v26  ;;  %v90_v25 = vld [vmem:[%s4038_s1 + $0x248] sm:$0xff] }
  0x6b   :  { %1989 = vmatprep.subr.bf16.mxu0 %v2785_v27  ;;  %2032 = vmatprep.subr.bf16.mxu1 %v2787_v28  ;;  %v106_v26 = vld [vmem:[%s4038_s1 + $0x2c8] sm:$0xff]  ;;  %v2756_v27 = vcombine.low %v57_v15, %v73_v16  ;;  %v2758_v28 = vcombine.low %v58_v17, %v74_v18  ;;  %v2729_v15 = vcombine.high %v27_v8, %v43_v9  ;;  %v59_v17 = vld [vmem:[%s4038_s1 + $0x150] sm:$0xff] }
  0x6c   :  { %v2791_v30 = vcombine.high %v90_v25, %v106_v26  ;;  %v75_v18 = vld [vmem:[%s4038_s1 + $0x1d0] sm:$0xff] }
  0x6e   :  { %1990 = vmatpush1.bf16.msra.mxu0 %v2784_v33  ;;  %2033 = vmatpush1.bf16.msra.mxu1 %v2786_v34  ;;  %v122_v33 = vld [vmem:[%s4038_s1 + $0x348] sm:$0xff] }
  0x6f   :  { %1991 = vmatprep.subr.bf16.mxu0 %v2817_v35  ;;  %2034 = vmatprep.subr.bf16.mxu1 %v2819_v36  ;;  %v138_v34 = vld [vmem:[%s4038_s1 + $0x3c8] sm:$0xff]  ;;  %v2788_v35 = vcombine.low %v89_v23, %v105_v24  ;;  %v2790_v36 = vcombine.low %v90_v25, %v106_v26  ;;  %v2761_v23 = vcombine.high %v59_v17, %v75_v18  ;;  %v91_v25 = vld [vmem:[%s4038_s1 + $0x250] sm:$0xff] }
  0x70   :  { %v2823_v38 = vcombine.high %v122_v33, %v138_v34  ;;  %v107_v26 = vld [vmem:[%s4038_s1 + $0x2d0] sm:$0xff] }
  0x72   :  { %1992 = vmatpush1.bf16.msra.mxu0 %v2816_v41  ;;  %2035 = vmatpush1.bf16.msra.mxu1 %v2818_v42  ;;  %v154_v41 = vld [vmem:[%s4038_s1 + $0x448] sm:$0xff] }
  0x73   :  { %1993 = vmatprep.subr.bf16.mxu0 %v2849_v43  ;;  %2036 = vmatprep.subr.bf16.mxu1 %v2851_v44  ;;  %v170_v42 = vld [vmem:[%s4038_s1 + $0x4c8] sm:$0xff]  ;;  %v2820_v43 = vcombine.low %v121_v31, %v137_v32  ;;  %v2822_v44 = vcombine.low %v122_v33, %v138_v34  ;;  %v2793_v31 = vcombine.high %v91_v25, %v107_v26  ;;  %v123_v33 = vld [vmem:[%s4038_s1 + $0x350] sm:$0xff] }
  0x74   :  { %v2855_v46 = vcombine.high %v154_v41, %v170_v42  ;;  %v139_v34 = vld [vmem:[%s4038_s1 + $0x3d0] sm:$0xff] }
  0x76   :  { %1994 = vmatpush1.bf16.msra.mxu0 %v2848_v49  ;;  %2037 = vmatpush1.bf16.msra.mxu1 %v2850_v50  ;;  %v186_v49 = vld [vmem:[%s4038_s1 + $0x548] sm:$0xff] }
  0x77   :  { %1995 = vmatprep.subr.bf16.mxu0 %v2881_v51  ;;  %2038 = vmatprep.subr.bf16.mxu1 %v2883_v52  ;;  %v202_v50 = vld [vmem:[%s4038_s1 + $0x5c8] sm:$0xff]  ;;  %v2852_v51 = vcombine.low %v153_v39, %v169_v40  ;;  %v2854_v52 = vcombine.low %v154_v41, %v170_v42  ;;  %v155_v40 = vld [vmem:[%s4038_s1 + $0x450] sm:$0xff]  ;;  %v156_v42 = vld [vmem:[%s4038_s1 + $0x458] sm:$0xff] }
  0x78   :  { %v2887_v54 = vcombine.high %v186_v49, %v202_v50  ;;  %v171_v41 = vld [vmem:[%s4038_s1 + $0x4d0] sm:$0xff] }
  0x7a   :  { %1996 = vmatpush1.bf16.msra.mxu0 %v2880_v57  ;;  %2039 = vmatpush1.bf16.msra.mxu1 %v2882_v58  ;;  %v218_v57 = vld [vmem:[%s4038_s1 + $0x648] sm:$0xff] }
  0x7b   :  { %1997 = vmatprep.subr.bf16.mxu0 %v2913_v59  ;;  %2040 = vmatprep.subr.bf16.mxu1 %v2915_v60  ;;  %v234_v58 = vld [vmem:[%s4038_s1 + $0x6c8] sm:$0xff]  ;;  %v2884_v59 = vcombine.low %v185_v47, %v201_v48  ;;  %v2886_v60 = vcombine.low %v186_v49, %v202_v50  ;;  %v187_v48 = vld [vmem:[%s4038_s1 + $0x550] sm:$0xff]  ;;  %v188_v50 = vld [vmem:[%s4038_s1 + $0x558] sm:$0xff] }
  0x7c   :  { %v2919_v62 = vcombine.high %v218_v57, %v234_v58  ;;  %v203_v49 = vld [vmem:[%s4038_s1 + $0x5d0] sm:$0xff] }
  0x7e   :  { %1998 = vmatpush1.bf16.msra.mxu0 %v2912_v1  ;;  %2041 = vmatpush1.bf16.msra.mxu1 %v2914_v2  ;;  %v250_v1 = vld [vmem:[%s4038_s1 + $0x748] sm:$0xff] }
  0x7f   :  { %1999 = vmatprep.subr.bf16.mxu0 %v2945_v4  ;;  %2042 = vmatprep.subr.bf16.mxu1 %v2947_v5  ;;  %v266_v2 = vld [vmem:[%s4038_s1 + $0x7c8] sm:$0xff]  ;;  %v2916_v4 = vcombine.low %v217_v55, %v233_v56  ;;  %v2918_v5 = vcombine.low %v218_v57, %v234_v58  ;;  %v219_v56 = vld [vmem:[%s4038_s1 + $0x650] sm:$0xff]  ;;  %v220_v58 = vld [vmem:[%s4038_s1 + $0x658] sm:$0xff] }
  0x80   :  { %v2951_v7 = vcombine.high %v250_v1, %v266_v2  ;;  %v235_v57 = vld [vmem:[%s4038_s1 + $0x6d0] sm:$0xff] }
  0x82   :  { %2000 = vmatpush1.bf16.msra.mxu0 %v2944_v11  ;;  %2043 = vmatpush1.bf16.msra.mxu1 %v2946_v12  ;;  %v28_v11 = vld [vmem:[%s4038_s1 + $0x58] sm:$0xff] }
  0x83   :  { %2071 = vmatprep.subr.bf16.mxu0 %v2725_v13  ;;  %2114 = vmatprep.subr.bf16.mxu1 %v2727_v14  ;;  %v44_v12 = vld [vmem:[%s4038_s1 + $0xd8] sm:$0xff]  ;;  %v2948_v13 = vcombine.low %v249_v63, %v265_v0  ;;  %v2950_v14 = vcombine.low %v250_v1, %v266_v2  ;;  %v251_v0 = vld [vmem:[%s4038_s1 + $0x750] sm:$0xff] }
  0x84   :  { %v2731_v16 = vcombine.high %v28_v11, %v44_v12  ;;  %v267_v1 = vld [vmem:[%s4038_s1 + $0x7d0] sm:$0xff]  ;;  %v252_v2 = vld [vmem:[%s4038_s1 + $0x758] sm:$0xff] }
  0x85   :  { %2018 = vmatmul.mubr.bf16.vlgmr.msra.gmra.mrb[12].mxu0 %v3171_v10  ;;  %2061 = vmatmul.mubr.bf16.vlgmr.msra.gmra.mrb[12].mxu1 %v3171_v10 }
  0x86   :  { %2072 = vmatpush1.bf16.msra.mxu0 %v2724_v19  ;;  %2115 = vmatpush1.bf16.msra.mxu1 %v2726_v20  ;;  %v60_v19 = vld [vmem:[%s4038_s1 + $0x158] sm:$0xff] }
  0x87   :  { %2073 = vmatprep.subr.bf16.mxu0 %v2757_v21  ;;  %2116 = vmatprep.subr.bf16.mxu1 %v2759_v22  ;;  %v76_v20 = vld [vmem:[%s4038_s1 + $0x1d8] sm:$0xff]  ;;  %v2728_v21 = vcombine.low %v27_v8, %v43_v9  ;;  %v2730_v22 = vcombine.low %v28_v11, %v44_v12  ;;  %v29_v9 = vld [vmem:[%s4038_s1 + $0x60] sm:$0xff]  ;;  %v30_v12 = vld [vmem:[%s4038_s1 + $0x68] sm:$0xff] }
  0x88   :  { %2103 = vmatprep.mubr.bf16.mxu0 %v3031_v3  ;;  %2146 = vmatprep.mubr.bf16.mxu1 %v3031_v3  ;;  %v2763_v24 = vcombine.high %v60_v19, %v76_v20  ;;  %v45_v11 = vld [vmem:[%s4038_s1 + $0xe0] sm:$0xff] }
  0x8a   :  { %2074 = vmatpush1.bf16.msra.mxu0 %v2756_v27  ;;  %2117 = vmatpush1.bf16.msra.mxu1 %v2758_v28  ;;  %v92_v27 = vld [vmem:[%s4038_s1 + $0x258] sm:$0xff] }
  0x8b   :  { %2075 = vmatprep.subr.bf16.mxu0 %v2789_v29  ;;  %2118 = vmatprep.subr.bf16.mxu1 %v2791_v30  ;;  %v108_v28 = vld [vmem:[%s4038_s1 + $0x2d8] sm:$0xff]  ;;  %v2760_v29 = vcombine.low %v59_v17, %v75_v18  ;;  %v2762_v30 = vcombine.low %v60_v19, %v76_v20  ;;  %v61_v18 = vld [vmem:[%s4038_s1 + $0x160] sm:$0xff]  ;;  %v62_v20 = vld [vmem:[%s4038_s1 + $0x168] sm:$0xff] }
  0x8c   :  { %v2795_v32 = vcombine.high %v92_v27, %v108_v28  ;;  %v77_v19 = vld [vmem:[%s4038_s1 + $0x1e0] sm:$0xff] }
  0x8e   :  { %2076 = vmatpush1.bf16.msra.mxu0 %v2788_v35  ;;  %2119 = vmatpush1.bf16.msra.mxu1 %v2790_v36  ;;  %v140_v35 = vld [vmem:[%s4038_s1 + $0x3d8] sm:$0xff]  ;;  %v2792_v36 = vcombine.low %v91_v25, %v107_v26  ;;  %v93_v26 = vld [vmem:[%s4038_s1 + $0x260] sm:$0xff] }
  0x8f   :  { %2077 = vmatprep.subr.bf16.mxu0 %v2821_v37  ;;  %2120 = vmatprep.subr.bf16.mxu1 %v2823_v38  ;;  %v2794_v37 = vcombine.low %v92_v27, %v108_v28  ;;  %v2825_v38 = vcombine.high %v123_v33, %v139_v34  ;;  %v109_v27 = vld [vmem:[%s4038_s1 + $0x2e0] sm:$0xff] }
  0x90   :  { %v3688_v28 = vld [vmem:[%s4039_s0] sm:$0xff]  }
  0x92   :  { %2078 = vmatpush1.bf16.msra.mxu0 %v2820_v43  ;;  %2121 = vmatpush1.bf16.msra.mxu1 %v2822_v44  ;;  %v172_v43 = vld [vmem:[%s4038_s1 + $0x4d8] sm:$0xff]  ;;  %v2824_v44 = vcombine.low %v123_v33, %v139_v34  ;;  %v2797_v33 = vcombine.high %v93_v26, %v109_v27 }
  0x93   :  { %2079 = vmatprep.subr.bf16.mxu0 %v2853_v45  ;;  %2122 = vmatprep.subr.bf16.mxu1 %v2855_v46  ;;  %v2857_v46 = vcombine.high %v155_v40, %v171_v41  ;;  %v2859_v47 = vcombine.high %v156_v42, %v172_v43 }
  0x96   :  { %2080 = vmatpush1.bf16.msra.mxu0 %v2852_v51  ;;  %2123 = vmatpush1.bf16.msra.mxu1 %v2854_v52  ;;  %v204_v51 = vld [vmem:[%s4038_s1 + $0x5d8] sm:$0xff]  ;;  %v2856_v52 = vcombine.low %v155_v40, %v171_v41 }
  0x97   :  { %2081 = vmatprep.subr.bf16.mxu0 %v2885_v53  ;;  %2124 = vmatprep.subr.bf16.mxu1 %v2887_v54  ;;  %v2858_v53 = vcombine.low %v156_v42, %v172_v43  ;;  %v2889_v54 = vcombine.high %v187_v48, %v203_v49  ;;  %v2891_v55 = vcombine.high %v188_v50, %v204_v51  ;;  %v157_v42 = vld [vmem:[%s4038_s1 + $0x460] sm:$0xff] }
  0x98   :  { %v173_v43 = vld [vmem:[%s4038_s1 + $0x4e0] sm:$0xff] }
  0x9a   :  { %2082 = vmatpush1.bf16.msra.mxu0 %v2884_v59  ;;  %2125 = vmatpush1.bf16.msra.mxu1 %v2886_v60  ;;  %v236_v59 = vld [vmem:[%s4038_s1 + $0x6d8] sm:$0xff]  ;;  %v2888_v60 = vcombine.low %v187_v48, %v203_v49  ;;  %v2861_v48 = vcombine.high %v157_v42, %v173_v43 }
  0x9b   :  { %2083 = vmatprep.subr.bf16.mxu0 %v2917_v61  ;;  %2126 = vmatprep.subr.bf16.mxu1 %v2919_v62  ;;  %v2890_v61 = vcombine.low %v188_v50, %v204_v51  ;;  %v2921_v62 = vcombine.high %v219_v56, %v235_v57  ;;  %v2923_v63 = vcombine.high %v220_v58, %v236_v59  ;;  %v189_v50 = vld [vmem:[%s4038_s1 + $0x560] sm:$0xff] }
  0x9c   :  { %v205_v51 = vld [vmem:[%s4038_s1 + $0x5e0] sm:$0xff] }
  0x9e   :  { %2084 = vmatpush1.bf16.msra.mxu0 %v2916_v4  ;;  %2127 = vmatpush1.bf16.msra.mxu1 %v2918_v5  ;;  %v268_v4 = vld [vmem:[%s4038_s1 + $0x7d8] sm:$0xff]  ;;  %v2920_v5 = vcombine.low %v219_v56, %v235_v57  ;;  %v2893_v56 = vcombine.high %v189_v50, %v205_v51 }
  0x9f   :  { %2085 = vmatprep.subr.bf16.mxu0 %v2949_v6  ;;  %2128 = vmatprep.subr.bf16.mxu1 %v2951_v7  ;;  %v2922_v6 = vcombine.low %v220_v58, %v236_v59  ;;  %v2953_v7 = vcombine.high %v251_v0, %v267_v1  ;;  %v2955_v8 = vcombine.high %v252_v2, %v268_v4  ;;  %v221_v58 = vld [vmem:[%s4038_s1 + $0x660] sm:$0xff] }
  0xa0   :  { %v237_v59 = vld [vmem:[%s4038_s1 + $0x6e0] sm:$0xff] }
  0xa2   :  { %2086 = vmatpush1.bf16.msra.mxu0 %v2948_v13  ;;  %2129 = vmatpush1.bf16.msra.mxu1 %v2950_v14  ;;  %v46_v13 = vld [vmem:[%s4038_s1 + $0xe8] sm:$0xff]  ;;  %v2952_v14 = vcombine.low %v251_v0, %v267_v1  ;;  %v2925_v0 = vcombine.high %v221_v58, %v237_v59 }
  0xa3   :  { %2157 = vmatprep.subr.bf16.mxu0 %v2729_v15  ;;  %2200 = vmatprep.subr.bf16.mxu1 %v2731_v16  ;;  %v2954_v15 = vcombine.low %v252_v2, %v268_v4  ;;  %v2733_v16 = vcombine.high %v29_v9, %v45_v11  ;;  %v2735_v17 = vcombine.high %v30_v12, %v46_v13  ;;  %v253_v2 = vld [vmem:[%s4038_s1 + $0x760] sm:$0xff] }
  0xa4   :  { %v269_v4 = vld [vmem:[%s4038_s1 + $0x7e0] sm:$0xff] }
  0xa5   :  { %2104 = vmatmul.mubr.bf16.vlgmr.msra.gmra.mrb[16].mxu0 %v3171_v10  ;;  %2147 = vmatmul.mubr.bf16.vlgmr.msra.gmra.mrb[16].mxu1 %v3171_v10  ;;  %v124_v10 = vld [vmem:[%s4038_s1 + $0x358] sm:$0xff] }
  0xa6   :  { %2158 = vmatpush1.bf16.msra.mxu0 %v2728_v21  ;;  %2201 = vmatpush1.bf16.msra.mxu1 %v2730_v22  ;;  %v2827_v39 = vcombine.high %v124_v10, %v140_v35  ;;  %v2826_v45 = vcombine.low %v124_v10, %v140_v35  ;;  %v78_v21 = vld [vmem:[%s4038_s1 + $0x1e8] sm:$0xff]  ;;  %v2732_v22 = vcombine.low %v29_v9, %v45_v11  ;;  %v125_v10 = vld [vmem:[%s4038_s1 + $0x360] sm:$0xff] }
  0xa7   :  { %2159 = vmatprep.subr.bf16.mxu0 %v2761_v23  ;;  %2202 = vmatprep.subr.bf16.mxu1 %v2763_v24  ;;  %v2734_v23 = vcombine.low %v30_v12, %v46_v13  ;;  %v2765_v24 = vcombine.high %v61_v18, %v77_v19  ;;  %v2767_v25 = vcombine.high %v62_v20, %v78_v21  ;;  %v141_v35 = vld [vmem:[%s4038_s1 + $0x3e0] sm:$0xff]  ;;  %v31_v12 = vld [vmem:[%s4038_s1 + $0x70] sm:$0xff] }
  0xa8   :  { %2189 = vmatprep.mubr.bf16.mxu0 %v3031_v3  ;;  %2232 = vmatprep.mubr.bf16.mxu1 %v3031_v3  ;;  %v2829_v40 = vcombine.high %v125_v10, %v141_v35  ;;  %v2957_v9 = vcombine.high %v253_v2, %v269_v4  ;;  %v47_v13 = vld [vmem:[%s4038_s1 + $0xf0] sm:$0xff] }
  0xaa   :  { %2160 = vmatpush1.bf16.msra.mxu0 %v2760_v29  ;;  %2203 = vmatpush1.bf16.msra.mxu1 %v2762_v30  ;;  %v94_v29 = vld [vmem:[%s4038_s1 + $0x268] sm:$0xff] }
  0xab   :  { %2161 = vmatprep.subr.bf16.mxu0 %v2793_v31  ;;  %2204 = vmatprep.subr.bf16.mxu1 %v2795_v32  ;;  %v110_v30 = vld [vmem:[%s4038_s1 + $0x2e8] sm:$0xff]  ;;  %v2764_v31 = vcombine.low %v61_v18, %v77_v19  ;;  %v2766_v32 = vcombine.low %v62_v20, %v78_v21  ;;  %v2737_v18 = vcombine.high %v31_v12, %v47_v13  ;;  %v63_v20 = vld [vmem:[%s4038_s1 + $0x170] sm:$0xff] }
  0xac   :  { %v2799_v34 = vcombine.high %v94_v29, %v110_v30  ;;  %v79_v21 = vld [vmem:[%s4038_s1 + $0x1f0] sm:$0xff] }
  0xae   :  { %2162 = vmatpush1.bf16.msra.mxu0 %v2792_v36  ;;  %2205 = vmatpush1.bf16.msra.mxu1 %v2794_v37  ;;  %v126_v36 = vld [vmem:[%s4038_s1 + $0x368] sm:$0xff] }
  0xaf   :  { %2163 = vmatprep.subr.bf16.mxu0 %v2825_v38  ;;  %2206 = vmatprep.subr.bf16.mxu1 %v2827_v39  ;;  %v142_v37 = vld [vmem:[%s4038_s1 + $0x3e8] sm:$0xff]  ;;  %v2796_v38 = vcombine.low %v93_v26, %v109_v27  ;;  %v2798_v39 = vcombine.low %v94_v29, %v110_v30  ;;  %v2769_v26 = vcombine.high %v63_v20, %v79_v21  ;;  %v95_v29 = vld [vmem:[%s4038_s1 + $0x270] sm:$0xff] }
  0xb0   :  { %v2831_v41 = vcombine.high %v126_v36, %v142_v37  ;;  %v111_v30 = vld [vmem:[%s4038_s1 + $0x2f0] sm:$0xff] }
  0xb2   :  { %2164 = vmatpush1.bf16.msra.mxu0 %v2824_v44  ;;  %2207 = vmatpush1.bf16.msra.mxu1 %v2826_v45  ;;  %v158_v44 = vld [vmem:[%s4038_s1 + $0x468] sm:$0xff] }
  0xb3   :  { %2165 = vmatprep.subr.bf16.mxu0 %v2857_v46  ;;  %2208 = vmatprep.subr.bf16.mxu1 %v2859_v47  ;;  %v174_v45 = vld [vmem:[%s4038_s1 + $0x4e8] sm:$0xff]  ;;  %v2828_v46 = vcombine.low %v125_v10, %v141_v35  ;;  %v2830_v47 = vcombine.low %v126_v36, %v142_v37  ;;  %v2801_v10 = vcombine.high %v95_v29, %v111_v30  ;;  %v127_v36 = vld [vmem:[%s4038_s1 + $0x370] sm:$0xff] }
  0xb4   :  { %v2863_v49 = vcombine.high %v158_v44, %v174_v45  ;;  %v143_v37 = vld [vmem:[%s4038_s1 + $0x3f0] sm:$0xff] }
  0xb6   :  { %2166 = vmatpush1.bf16.msra.mxu0 %v2856_v52  ;;  %2209 = vmatpush1.bf16.msra.mxu1 %v2858_v53  ;;  %v190_v52 = vld [vmem:[%s4038_s1 + $0x568] sm:$0xff] }
  0xb7   :  { %2167 = vmatprep.subr.bf16.mxu0 %v2889_v54  ;;  %2210 = vmatprep.subr.bf16.mxu1 %v2891_v55  ;;  %v206_v53 = vld [vmem:[%s4038_s1 + $0x5e8] sm:$0xff]  ;;  %v2860_v54 = vcombine.low %v157_v42, %v173_v43  ;;  %v2862_v55 = vcombine.low %v158_v44, %v174_v45  ;;  %v2833_v43 = vcombine.high %v127_v36, %v143_v37  ;;  %v159_v45 = vld [vmem:[%s4038_s1 + $0x470] sm:$0xff] }
  0xb8   :  { %v2895_v57 = vcombine.high %v190_v52, %v206_v53 }
  0xba   :  { %2168 = vmatpush1.bf16.msra.mxu0 %v2888_v60  ;;  %2211 = vmatpush1.bf16.msra.mxu1 %v2890_v61  ;;  %v222_v60 = vld [vmem:[%s4038_s1 + $0x668] sm:$0xff] }
  0xbb   :  { %2169 = vmatprep.subr.bf16.mxu0 %v2921_v62  ;;  %2212 = vmatprep.subr.bf16.mxu1 %v2923_v63  ;;  %v238_v61 = vld [vmem:[%s4038_s1 + $0x6e8] sm:$0xff]  ;;  %v2892_v62 = vcombine.low %v189_v50, %v205_v51  ;;  %v2894_v63 = vcombine.low %v190_v52, %v206_v53  ;;  %v191_v53 = vld [vmem:[%s4038_s1 + $0x570] sm:$0xff] }
  0xbc   :  { %v2927_v1 = vcombine.high %v222_v60, %v238_v61 }
  0xbe   :  { %2170 = vmatpush1.bf16.msra.mxu0 %v2920_v5  ;;  %2213 = vmatpush1.bf16.msra.mxu1 %v2922_v6  ;;  %v254_v5 = vld [vmem:[%s4038_s1 + $0x768] sm:$0xff] }
  0xbf   :  { %2171 = vmatprep.subr.bf16.mxu0 %v2953_v7  ;;  %2214 = vmatprep.subr.bf16.mxu1 %v2955_v8  ;;  %v270_v6 = vld [vmem:[%s4038_s1 + $0x7e8] sm:$0xff]  ;;  %v2924_v7 = vcombine.low %v221_v58, %v237_v59  ;;  %v2926_v8 = vcombine.low %v222_v60, %v238_v61  ;;  %v3844_v59 = vld [vmem:[%s4040_s2] sm:$0xff] }
  0xc0   :  { %v2959_v11 = vcombine.high %v254_v5, %v270_v6 }
  0xc2   :  { %2172 = vmatpush1.bf16.msra.mxu0 %v2952_v14  ;;  %2215 = vmatpush1.bf16.msra.mxu1 %v2954_v15  ;;  %v32_v14 = vld [vmem:[%s4038_s1 + $0x78] sm:$0xff] }
  0xc3   :  { %2243 = vmatprep.subr.bf16.mxu0 %v2733_v16  ;;  %2286 = vmatprep.subr.bf16.mxu1 %v2735_v17  ;;  %v48_v15 = vld [vmem:[%s4038_s1 + $0xf8] sm:$0xff]  ;;  %v2956_v16 = vcombine.low %v253_v2, %v269_v4  ;;  %v2958_v17 = vcombine.low %v254_v5, %v270_v6  ;;  %v223_v2 = vld [vmem:[%s4038_s1 + $0x670] sm:$0xff] }
  0xc4   :  { %v2739_v19 = vcombine.high %v32_v14, %v48_v15  ;;  %v239_v4 = vld [vmem:[%s4038_s1 + $0x6f0] sm:$0xff]  ;;  %v224_v6 = vld [vmem:[%s4038_s1 + $0x678] sm:$0xff] }
  0xc5   :  { %2190 = vmatmul.mubr.bf16.vlgmr.msra.gmra.mrb[20].mxu0 %v3688_v28  ;;  %2233 = vmatmul.mubr.bf16.vlgmr.msra.gmra.mrb[20].mxu1 %v3688_v28 }
  0xc6   :  { %2244 = vmatpush1.bf16.msra.mxu0 %v2732_v22  ;;  %2287 = vmatpush1.bf16.msra.mxu1 %v2734_v23  ;;  %v64_v22 = vld [vmem:[%s4038_s1 + $0x178] sm:$0xff] }
  0xc7   :  { %2245 = vmatprep.subr.bf16.mxu0 %v2765_v24  ;;  %2288 = vmatprep.subr.bf16.mxu1 %v2767_v25  ;;  %v80_v23 = vld [vmem:[%s4038_s1 + $0x1f8] sm:$0xff]  ;;  %v2736_v24 = vcombine.low %v31_v12, %v47_v13  ;;  %v2738_v25 = vcombine.low %v32_v14, %v48_v15  ;;  %v2929_v14 = vcombine.high %v223_v2, %v239_v4  ;;  %v255_v15 = vld [vmem:[%s4038_s1 + $0x770] sm:$0xff] }
  0xc8   :  { %2275 = vmatprep.mubr.bf16.mxu0 %v3031_v3  ;;  %2318 = vmatprep.mubr.bf16.mxu1 %v3031_v3  ;;  %v2771_v27 = vcombine.high %v64_v22, %v80_v23 }
  0xca   :  { %2246 = vmatpush1.bf16.msra.mxu0 %v2764_v31  ;;  %2289 = vmatpush1.bf16.msra.mxu1 %v2766_v32  ;;  %v96_v31 = vld [vmem:[%s4038_s1 + $0x278] sm:$0xff] }
  0xcb   :  { %2247 = vmatprep.subr.bf16.mxu0 %v2797_v33  ;;  %2290 = vmatprep.subr.bf16.mxu1 %v2799_v34  ;;  %v112_v32 = vld [vmem:[%s4038_s1 + $0x2f8] sm:$0xff]  ;;  %v2768_v33 = vcombine.low %v63_v20, %v79_v21  ;;  %v2770_v34 = vcombine.low %v64_v22, %v80_v23 }
  0xcc   :  { %v2803_v35 = vcombine.high %v96_v31, %v112_v32  ;;  %v2802_v42 = vcombine.low %v96_v31, %v112_v32  ;;  %v272_v20 = vld [vmem:[%s4038_s1 + $0x7f8] sm:$0xff] }
  0xce   :  { %2248 = vmatpush1.bf16.msra.mxu0 %v2796_v38  ;;  %2291 = vmatpush1.bf16.msra.mxu1 %v2798_v39  ;;  %v128_v38 = vld [vmem:[%s4038_s1 + $0x378] sm:$0xff] }
  0xcf   :  { %2249 = vmatprep.subr.bf16.mxu0 %v2829_v40  ;;  %2292 = vmatprep.subr.bf16.mxu1 %v2831_v41  ;;  %v144_v39 = vld [vmem:[%s4038_s1 + $0x3f8] sm:$0xff]  ;;  %v281_v40 = vlaneseq  ;;  %v2800_v41 = vcombine.low %v95_v29, %v111_v30 }
  0xd0   :  { %v2835_v44 = vcombine.high %v128_v38, %v144_v39  ;;  %v2834_v50 = vcombine.low %v128_v38, %v144_v39 }
  0xd2   :  { %2250 = vmatpush1.bf16.msra.mxu0 %v2828_v46  ;;  %2293 = vmatpush1.bf16.msra.mxu1 %v2830_v47  ;;  %v175_v46 = vld [vmem:[%s4038_s1 + $0x4f0] sm:$0xff]  ;;  %v176_v47 = vld [vmem:[%s4038_s1 + $0x4f8] sm:$0xff] }
  0xd3   :  { %2251 = vmatprep.subr.bf16.mxu0 %v2861_v48  ;;  %2294 = vmatprep.subr.bf16.mxu1 %v2863_v49  ;;  %v3824_v48 = vshrl.u32 %v281_v40, 7  ;;  %v2832_v49 = vcombine.low %v127_v36, %v143_v37  ;;  %v2865_v51 = vcombine.high %v159_v45, %v175_v46  ;;  %v2864_v58 = vcombine.low %v159_v45, %v175_v46 }
  0xd5   :  { %v3847_v60 = vsub.s32 2, %v3824_v48  ;;  %v3850_v61 = vsub.s32 1, %v3824_v48 }
  0xd6   :  { %2252 = vmatpush1.bf16.msra.mxu0 %v2860_v54  ;;  %2295 = vmatpush1.bf16.msra.mxu1 %v2862_v55  ;;  %v207_v54 = vld [vmem:[%s4038_s1 + $0x5f0] sm:$0xff]  ;;  %v3833_v55 = vsub.s32 0, %v3824_v48 }
  0xd7   :  { %2253 = vmatprep.subr.bf16.mxu0 %v2893_v56  ;;  %2296 = vmatprep.subr.bf16.mxu1 %v2895_v57  ;;  %v192_v56 = vld [vmem:[%s4038_s1 + $0x578] sm:$0xff] }
  0xd8   :  { %v208_v57 = vld [vmem:[%s4038_s1 + $0x5f8] sm:$0xff]  ;;  %v284_v5 = vrot.slane %v3844_v59, %v3833_v55 }
  0xd9   :  { %v2898_v13 = vcombine.low %v192_v56, %v208_v57 }
  0xda   :  { %2254 = vmatpush1.bf16.msra.mxu0 %v2892_v62  ;;  %2297 = vmatpush1.bf16.msra.mxu1 %v2894_v63  ;;  %v3853_v63 = vsub.s32 3, %v3824_v48 }
  0xdb   :  { %2255 = vmatprep.subr.bf16.mxu0 %v2925_v0  ;;  %2298 = vmatprep.subr.bf16.mxu1 %v2927_v1  ;;  %v2897_v0 = vcombine.high %v191_v53, %v207_v54  ;;  %v2899_v1 = vcombine.high %v192_v56, %v208_v57  ;;  %v3905_v56 = vsub.s32 6, %v3824_v48  ;;  %v3908_v57 = vsub.s32 5, %v3824_v48 }
  0xdc   :  { %v296_v12 = vrot.slane %v3844_v59, %v3853_v63 }
  0xde   :  { %2256 = vmatpush1.bf16.msra.mxu0 %v2924_v7  ;;  %2299 = vmatpush1.bf16.msra.mxu1 %v2926_v8  ;;  %v240_v7 = vld [vmem:[%s4038_s1 + $0x6f8] sm:$0xff]  ;;  %v292_v8 = vrot.slane %v3844_v59, %v3847_v60 }
  0xdf   :  { %2257 = vmatprep.subr.bf16.mxu0 %v2957_v9  ;;  %2300 = vmatprep.subr.bf16.mxu1 %v2959_v11  ;;  %v288_v9 = vrot.slane %v3844_v59, %v3850_v61  ;;  %v2896_v11 = vcombine.low %v191_v53, %v207_v54  ;;  %v2930_v30 = vcombine.low %v224_v6, %v240_v7  ;;  %v3902_v54 = vsub.s32 4, %v3824_v48 }
  0xe2   :  { %2258 = vmatpush1.bf16.msra.mxu0 %v2956_v16  ;;  %2301 = vmatpush1.bf16.msra.mxu1 %v2958_v17  ;;  %v271_v16 = vld [vmem:[%s4038_s1 + $0x7f0] sm:$0xff] }
  0xe3   :  { %2329 = vmatprep.subr.bf16.mxu0 %v2737_v18  ;;  %2372 = vmatprep.subr.bf16.mxu1 %v2739_v19  ;;  %v2931_v18 = vcombine.high %v224_v6, %v240_v7  ;;  %v256_v19 = vld [vmem:[%s4038_s1 + $0x778] sm:$0xff]  ;;  %v2961_v31 = vcombine.high %v255_v15, %v271_v16 }
  0xe4   :  { %v2963_v36 = vcombine.high %v256_v19, %v272_v20 }
  0xe5   :  { %2276 = vmatmul.mubr.bf16.vlgmr.msra.gmra.mrb[24].mxu0 %v3688_v28  ;;  %2319 = vmatmul.mubr.bf16.vlgmr.msra.gmra.mrb[24].mxu1 %v3688_v28 }
  0xe6   :  { %2330 = vmatpush1.bf16.msra.mxu0 %v2736_v24  ;;  %2373 = vmatpush1.bf16.msra.mxu1 %v2738_v25  ;;  %v2928_v24 = vcombine.low %v223_v2, %v239_v4 }
  0xe7   :  { %2331 = vmatprep.subr.bf16.mxu0 %v2769_v26  ;;  %2374 = vmatprep.subr.bf16.mxu1 %v2771_v27 }
  0xe8   :  { %2361 = vmatprep.mubr.bf16.mxu0 %v3031_v3  ;;  %2404 = vmatprep.mubr.bf16.mxu1 %v3031_v3  ;;  %v160_v3 = vld [vmem:[%s4038_s1 + $0x478] sm:$0xff] }
  0xe9   :  { %v2867_v52 = vcombine.high %v160_v3, %v176_v47  ;;  %v2866_v62 = vcombine.low %v160_v3, %v176_v47  ;;  %v2960_v47 = vcombine.low %v255_v15, %v271_v16 }
  0xea   :  { %2332 = vmatpush1.bf16.msra.mxu0 %v2768_v33  ;;  %2375 = vmatpush1.bf16.msra.mxu1 %v2770_v34 }
  0xeb   :  { %2333 = vmatprep.subr.bf16.mxu0 %v2801_v10  ;;  %2376 = vmatprep.subr.bf16.mxu1 %v2803_v35 }
  0xee   :  { %2334 = vmatpush1.bf16.msra.mxu0 %v2800_v41  ;;  %2377 = vmatpush1.bf16.msra.mxu1 %v2802_v42 }
  0xef   :  { %2335 = vmatprep.subr.bf16.mxu0 %v2833_v43  ;;  %2378 = vmatprep.subr.bf16.mxu1 %v2835_v44 }
  0xf2   :  { %2336 = vmatpush1.bf16.msra.mxu0 %v2832_v49  ;;  %2379 = vmatpush1.bf16.msra.mxu1 %v2834_v50 }
  0xf3   :  { %2337 = vmatprep.subr.bf16.mxu0 %v2865_v51  ;;  %2380 = vmatprep.subr.bf16.mxu1 %v2867_v52  ;;  %v2962_v51 = vcombine.low %v256_v19, %v272_v20 }
  0xf6   :  { %2338 = vmatpush1.bf16.msra.mxu0 %v2864_v58  ;;  %2381 = vmatpush1.bf16.msra.mxu1 %v2866_v62  ;;  %v3911_v58 = vsub.s32 7, %v3824_v48  ;;  %v300_v62 = vrot.slane %v3844_v59, %v3902_v54 }
  0xf7   :  { %2339 = vmatprep.subr.bf16.mxu0 %v2897_v0  ;;  %2382 = vmatprep.subr.bf16.mxu1 %v2899_v1  ;;  %v308_v0 = vrot.slane %v3844_v59, %v3905_v56 }
  0xf8   :  { %v1761_v17 = vpop.f32.mrb[0].mxu0  ;;  %v1804_v22 = vpop.f32.mrb[0].mxu1  ;;  %v312_v1 = vrot.slane %v3844_v59, %v3911_v58 }
  0xf9   :  { %v1762_v21 = vadd.f32 %v1761_v17, %v284_v5  ;;  %v1763_v23 = vpop.f32.mrb[1].mxu0  ;;  %v1805_v25 = vadd.f32 %v1804_v22, %v292_v8  ;;  %v1806_v27 = vpop.f32.mrb[1].mxu1 }
  0xfa   :  { %v1764_v26 = vadd.f32 %v1763_v23, %v288_v9  ;;  %v1765_v29 = vpop.f32.mrb[2].mxu0  ;;  %2340 = vmatpush1.bf16.msra.mxu0 %v2896_v11  ;;  %v1807_v33 = vadd.f32 %v1806_v27, %v296_v12  ;;  %v1808_v10 = vpop.f32.mrb[2].mxu1  ;;  %2383 = vmatpush1.bf16.msra.mxu1 %v2898_v13 }
  0xfb   :  { %v2415_v32 = vmax.f32 %v1762_v21, 0.0  ;;  %v1766_v34 = vadd.f32 %v1765_v29, %v284_v5  ;;  %v1767_v35 = vpop.f32.mrb[3].mxu0  ;;  %2341 = vmatprep.subr.bf16.mxu0 %v2929_v14  ;;  %v2417_v37 = vmax.f32 %v1805_v25, 0.0  ;;  %v1809_v39 = vadd.f32 %v1808_v10, %v292_v8  ;;  %v1810_v41 = vpop.f32.mrb[3].mxu1  ;;  %2384 = vmatprep.subr.bf16.mxu1 %v2931_v18 }
  0xfc   :  { %v2416_v38 = vmax.f32 %v1764_v26, 0.0  ;;  %v1768_v40 = vadd.f32 %v1767_v35, %v288_v9  ;;  %v2418_v42 = vmax.f32 %v1807_v33, 0.0  ;;  %v1811_v44 = vadd.f32 %v1810_v41, %v296_v12 }
  0xfd   :  { %v2447_v43 = vmax.f32 %v1766_v34, 0.0  ;;  %v2449_v46 = vmax.f32 %v1809_v39, 0.0 }
  0xfe   :  { %v2996_v45 = vpack.c.bf16 %v2416_v38, %v2415_v32  ;;  %v2448_v3 = vmax.f32 %v1768_v40, 0.0  ;;  %2342 = vmatpush1.bf16.msra.mxu0 %v2928_v24  ;;  %v2997_v49 = vpack.c.bf16 %v2418_v42, %v2417_v37  ;;  %v2450_v50 = vmax.f32 %v1811_v44, 0.0  ;;  %2385 = vmatpush1.bf16.msra.mxu1 %v2930_v30 }
  0xff   :  { %2343 = vmatprep.subr.bf16.mxu0 %v2961_v31  ;;  %2386 = vmatprep.subr.bf16.mxu1 %v2963_v36  ;;  %v274_v31 = vld [vmem:[%s4040_s2 + $0x8] sm:$0xff] }
 0x100   :  { %2671 = vst [vmem:[%s4041_s3] sm:$0xff] %v2996_v45  ;;  %v3012_v52 = vpack.c.bf16 %v2448_v3, %v2447_v43  ;;  %2672 = vst [vmem:[%s4041_s3 + $0x8] sm:$0xff] %v2997_v49  ;;  %v3013_v53 = vpack.c.bf16 %v2450_v50, %v2449_v46  ;;  %v316_v32 = vrot.slane %v274_v31, %v3833_v55 }
 0x101   :  { %v324_v33 = vrot.slane %v274_v31, %v3847_v60  ;;  %v320_v34 = vrot.slane %v274_v31, %v3850_v61  ;;  %v328_v10 = vrot.slane %v274_v31, %v3853_v63 }
 0x102   :  { %2687 = vst [vmem:[%s4041_s3 + $0x80] sm:$0xff] %v3012_v52  ;;  %2344 = vmatpush1.bf16.msra.mxu0 %v2960_v47  ;;  %2688 = vst [vmem:[%s4041_s3 + $0x88] sm:$0xff] %v3013_v53  ;;  %2387 = vmatpush1.bf16.msra.mxu1 %v2962_v51 }
 0x105   :  { %2362 = vmatmul.mubr.bf16.vlgmr.msra.gmra.mrb[28].mxu0 %v3688_v28  ;;  %2405 = vmatmul.mubr.bf16.vlgmr.msra.gmra.mrb[28].mxu1 %v3688_v28  ;;  %v304_v28 = vrot.slane %v3844_v59, %v3908_v57 }
 0x118   :  { %v1847_v2 = vpop.f32.mrb[4].mxu0  ;;  %v1890_v5 = vpop.f32.mrb[4].mxu1 }
 0x119   :  { %v1848_v4 = vadd.f32 %v1847_v2, %v300_v62  ;;  %v1849_v6 = vpop.f32.mrb[5].mxu0  ;;  %v1891_v7 = vadd.f32 %v1890_v5, %v308_v0  ;;  %v1892_v48 = vpop.f32.mrb[5].mxu1 }
 0x11a   :  { %v1850_v8 = vadd.f32 %v1849_v6, %v304_v28  ;;  %v1851_v9 = vpop.f32.mrb[6].mxu0  ;;  %v1893_v12 = vadd.f32 %v1892_v48, %v312_v1  ;;  %v1894_v14 = vpop.f32.mrb[6].mxu1  ;;  %v340_v48 = vrot.slane %v274_v31, %v3905_v56 }
 0x11b   :  { %v2419_v11 = vmax.f32 %v1848_v4, 0.0  ;;  %v1852_v13 = vadd.f32 %v1851_v9, %v300_v62  ;;  %v1853_v15 = vpop.f32.mrb[7].mxu0  ;;  %v2421_v16 = vmax.f32 %v1891_v7, 0.0  ;;  %v1895_v18 = vadd.f32 %v1894_v14, %v308_v0  ;;  %v1896_v20 = vpop.f32.mrb[7].mxu1 }
 0x11c   :  { %v2420_v17 = vmax.f32 %v1850_v8, 0.0  ;;  %v1854_v19 = vadd.f32 %v1853_v15, %v304_v28  ;;  %v2422_v21 = vmax.f32 %v1893_v12, 0.0  ;;  %v1897_v22 = vadd.f32 %v1896_v20, %v312_v1 }
 0x11d   :  { %v2451_v59 = vmax.f32 %v1852_v13, 0.0  ;;  %v2453_v24 = vmax.f32 %v1895_v18, 0.0  ;;  %v332_v8 = vrot.slane %v274_v31, %v3902_v54  ;;  %v336_v9 = vrot.slane %v274_v31, %v3908_v57 }
 0x11e   :  { %v2998_v23 = vpack.c.bf16 %v2420_v17, %v2419_v11  ;;  %v2452_v25 = vmax.f32 %v1854_v19, 0.0  ;;  %v2999_v26 = vpack.c.bf16 %v2422_v21, %v2421_v16  ;;  %v2454_v27 = vmax.f32 %v1897_v22, 0.0 }
 0x11f   :  { %v344_v11 = vrot.slane %v274_v31, %v3911_v58 }
 0x120   :  { %2673 = vst [vmem:[%s4041_s3 + $0x10] sm:$0xff] %v2998_v23  ;;  %v3014_v29 = vpack.c.bf16 %v2452_v25, %v2451_v59  ;;  %2674 = vst [vmem:[%s4041_s3 + $0x18] sm:$0xff] %v2999_v26  ;;  %v3015_v30 = vpack.c.bf16 %v2454_v27, %v2453_v24 }
 0x122   :  { %2689 = vst [vmem:[%s4041_s3 + $0x90] sm:$0xff] %v3014_v29  ;;  %2690 = vst [vmem:[%s4041_s3 + $0x98] sm:$0xff] %v3015_v30 }
 0x138   :  { %v1933_v35 = vpop.f32.mrb[8].mxu0  ;;  %v1976_v37 = vpop.f32.mrb[8].mxu1 }
 0x139   :  { %v1934_v36 = vadd.f32 %v1933_v35, %v316_v32  ;;  %v1935_v38 = vpop.f32.mrb[9].mxu0  ;;  %v1977_v39 = vadd.f32 %v1976_v37, %v324_v33  ;;  %v1978_v41 = vpop.f32.mrb[9].mxu1 }
 0x13a   :  { %v1936_v40 = vadd.f32 %v1935_v38, %v320_v34  ;;  %v1937_v42 = vpop.f32.mrb[10].mxu0  ;;  %v1979_v44 = vadd.f32 %v1978_v41, %v328_v10  ;;  %v1980_v46 = vpop.f32.mrb[10].mxu1 }
 0x13b   :  { %v2423_v43 = vmax.f32 %v1934_v36, 0.0  ;;  %v1938_v45 = vadd.f32 %v1937_v42, %v316_v32  ;;  %v1939_v3 = vpop.f32.mrb[11].mxu0  ;;  %v2425_v47 = vmax.f32 %v1977_v39, 0.0  ;;  %v1981_v50 = vadd.f32 %v1980_v46, %v324_v33  ;;  %v1982_v52 = vpop.f32.mrb[11].mxu1  ;;  %v275_v39 = vld [vmem:[%s4040_s2 + $0x10] sm:$0xff] }
 0x13c   :  { %v2424_v49 = vmax.f32 %v1936_v40, 0.0  ;;  %v1940_v51 = vadd.f32 %v1939_v3, %v320_v34  ;;  %v2426_v53 = vmax.f32 %v1979_v44, 0.0  ;;  %v1983_v0 = vadd.f32 %v1982_v52, %v328_v10 }
 0x13d   :  { %v2455_v62 = vmax.f32 %v1938_v45, 0.0  ;;  %v2457_v1 = vmax.f32 %v1981_v50, 0.0  ;;  %v348_v40 = vrot.slane %v275_v39, %v3833_v55  ;;  %v356_v41 = vrot.slane %v275_v39, %v3847_v60 }
 0x13e   :  { %v3000_v28 = vpack.c.bf16 %v2424_v49, %v2423_v43  ;;  %v2456_v2 = vmax.f32 %v1940_v51, 0.0  ;;  %v3001_v4 = vpack.c.bf16 %v2426_v53, %v2425_v47  ;;  %v2458_v5 = vmax.f32 %v1983_v0, 0.0 }
 0x13f   :  { %v352_v42 = vrot.slane %v275_v39, %v3850_v61  ;;  %v360_v43 = vrot.slane %v275_v39, %v3853_v63 }
 0x140   :  { %2675 = vst [vmem:[%s4041_s3 + $0x20] sm:$0xff] %v3000_v28  ;;  %v3016_v6 = vpack.c.bf16 %v2456_v2, %v2455_v62  ;;  %2676 = vst [vmem:[%s4041_s3 + $0x28] sm:$0xff] %v3001_v4  ;;  %v3017_v7 = vpack.c.bf16 %v2458_v5, %v2457_v1 }
 0x142   :  { %2691 = vst [vmem:[%s4041_s3 + $0xa0] sm:$0xff] %v3016_v6  ;;  %2692 = vst [vmem:[%s4041_s3 + $0xa8] sm:$0xff] %v3017_v7 }
 0x158   :  { %v2019_v12 = vpop.f32.mrb[12].mxu0  ;;  %v2062_v14 = vpop.f32.mrb[12].mxu1 }
 0x159   :  { %v2020_v13 = vadd.f32 %v2019_v12, %v332_v8  ;;  %v2021_v15 = vpop.f32.mrb[13].mxu0  ;;  %v2063_v16 = vadd.f32 %v2062_v14, %v340_v48  ;;  %v2064_v18 = vpop.f32.mrb[13].mxu1 }
 0x15a   :  { %v2022_v17 = vadd.f32 %v2021_v15, %v336_v9  ;;  %v2023_v19 = vpop.f32.mrb[14].mxu0  ;;  %v2065_v21 = vadd.f32 %v2064_v18, %v344_v11  ;;  %v2066_v22 = vpop.f32.mrb[14].mxu1  ;;  %v372_v18 = vrot.slane %v275_v39, %v3905_v56 }
 0x15b   :  { %v2427_v20 = vmax.f32 %v2020_v13, 0.0  ;;  %v2024_v59 = vadd.f32 %v2023_v19, %v332_v8  ;;  %v2025_v23 = vpop.f32.mrb[15].mxu0  ;;  %v2429_v24 = vmax.f32 %v2063_v16, 0.0  ;;  %v2067_v26 = vadd.f32 %v2066_v22, %v340_v48  ;;  %v2068_v29 = vpop.f32.mrb[15].mxu1 }
 0x15c   :  { %v2428_v25 = vmax.f32 %v2022_v17, 0.0  ;;  %v2026_v27 = vadd.f32 %v2025_v23, %v336_v9  ;;  %v2430_v30 = vmax.f32 %v2065_v21, 0.0  ;;  %v2069_v32 = vadd.f32 %v2068_v29, %v344_v11 }
 0x15d   :  { %v2459_v31 = vmax.f32 %v2024_v59, 0.0  ;;  %v2461_v34 = vmax.f32 %v2067_v26, 0.0  ;;  %v364_v17 = vrot.slane %v275_v39, %v3902_v54  ;;  %v368_v19 = vrot.slane %v275_v39, %v3908_v57 }
 0x15e   :  { %v3002_v33 = vpack.c.bf16 %v2428_v25, %v2427_v20  ;;  %v2460_v10 = vmax.f32 %v2026_v27, 0.0  ;;  %v3003_v35 = vpack.c.bf16 %v2430_v30, %v2429_v24  ;;  %v2462_v36 = vmax.f32 %v2069_v32, 0.0 }
 0x15f   :  { %v376_v20 = vrot.slane %v275_v39, %v3911_v58 }
 0x160   :  { %2677 = vst [vmem:[%s4041_s3 + $0x30] sm:$0xff] %v3002_v33  ;;  %v3018_v37 = vpack.c.bf16 %v2460_v10, %v2459_v31  ;;  %2678 = vst [vmem:[%s4041_s3 + $0x38] sm:$0xff] %v3003_v35  ;;  %v3019_v38 = vpack.c.bf16 %v2462_v36, %v2461_v34 }
 0x162   :  { %2693 = vst [vmem:[%s4041_s3 + $0xb0] sm:$0xff] %v3018_v37  ;;  %2694 = vst [vmem:[%s4041_s3 + $0xb8] sm:$0xff] %v3019_v38 }
 0x178   :  { %v2105_v44 = vpop.f32.mrb[16].mxu0  ;;  %v2148_v46 = vpop.f32.mrb[16].mxu1 }
 0x179   :  { %v2106_v45 = vadd.f32 %v2105_v44, %v348_v40  ;;  %v2107_v3 = vpop.f32.mrb[17].mxu0  ;;  %v2149_v47 = vadd.f32 %v2148_v46, %v356_v41  ;;  %v2150_v50 = vpop.f32.mrb[17].mxu1 }
 0x17a   :  { %v2108_v49 = vadd.f32 %v2107_v3, %v352_v42  ;;  %v2109_v51 = vpop.f32.mrb[18].mxu0  ;;  %v2151_v53 = vadd.f32 %v2150_v50, %v360_v43  ;;  %v2152_v0 = vpop.f32.mrb[18].mxu1 }
 0x17b   :  { %v2431_v52 = vmax.f32 %v2106_v45, 0.0  ;;  %v2110_v62 = vadd.f32 %v2109_v51, %v348_v40  ;;  %v2111_v28 = vpop.f32.mrb[19].mxu0  ;;  %v2433_v1 = vmax.f32 %v2149_v47, 0.0  ;;  %v2153_v4 = vadd.f32 %v2152_v0, %v356_v41  ;;  %v2154_v6 = vpop.f32.mrb[19].mxu1  ;;  %v276_v47 = vld [vmem:[%s4040_s2 + $0x18] sm:$0xff] }
 0x17c   :  { %v2432_v2 = vmax.f32 %v2108_v49, 0.0  ;;  %v2112_v5 = vadd.f32 %v2111_v28, %v352_v42  ;;  %v2434_v7 = vmax.f32 %v2151_v53, 0.0  ;;  %v2155_v48 = vadd.f32 %v2154_v6, %v360_v43 }
 0x17d   :  { %v2463_v8 = vmax.f32 %v2110_v62, 0.0  ;;  %v2465_v11 = vmax.f32 %v2153_v4, 0.0  ;;  %v380_v49 = vrot.slane %v276_v47, %v3833_v55  ;;  %v388_v50 = vrot.slane %v276_v47, %v3847_v60 }
 0x17e   :  { %v3004_v9 = vpack.c.bf16 %v2432_v2, %v2431_v52  ;;  %v2464_v12 = vmax.f32 %v2112_v5, 0.0  ;;  %v3005_v13 = vpack.c.bf16 %v2434_v7, %v2433_v1  ;;  %v2466_v14 = vmax.f32 %v2155_v48, 0.0 }
 0x17f   :  { %v384_v51 = vrot.slane %v276_v47, %v3850_v61  ;;  %v392_v52 = vrot.slane %v276_v47, %v3853_v63 }
 0x180   :  { %2679 = vst [vmem:[%s4041_s3 + $0x40] sm:$0xff] %v3004_v9  ;;  %v3020_v15 = vpack.c.bf16 %v2464_v12, %v2463_v8  ;;  %2680 = vst [vmem:[%s4041_s3 + $0x48] sm:$0xff] %v3005_v13  ;;  %v3021_v16 = vpack.c.bf16 %v2466_v14, %v2465_v11 }
 0x182   :  { %2695 = vst [vmem:[%s4041_s3 + $0xc0] sm:$0xff] %v3020_v15  ;;  %2696 = vst [vmem:[%s4041_s3 + $0xc8] sm:$0xff] %v3021_v16 }
 0x198   :  { %v2191_v21 = vpop.f32.mrb[20].mxu0  ;;  %v2234_v22 = vpop.f32.mrb[20].mxu1 }
 0x199   :  { %v2192_v59 = vadd.f32 %v2191_v21, %v364_v17  ;;  %v2193_v23 = vpop.f32.mrb[21].mxu0  ;;  %v2235_v24 = vadd.f32 %v2234_v22, %v372_v18  ;;  %v2236_v26 = vpop.f32.mrb[21].mxu1  ;;  %v404_v22 = vrot.slane %v276_v47, %v3905_v56 }
 0x19a   :  { %v2194_v25 = vadd.f32 %v2193_v23, %v368_v19  ;;  %v2195_v27 = vpop.f32.mrb[22].mxu0  ;;  %v2237_v30 = vadd.f32 %v2236_v26, %v376_v20  ;;  %v2238_v32 = vpop.f32.mrb[22].mxu1  ;;  %v400_v23 = vrot.slane %v276_v47, %v3908_v57 }
 0x19b   :  { %v2435_v29 = vmax.f32 %v2192_v59, 0.0  ;;  %v2196_v31 = vadd.f32 %v2195_v27, %v364_v17  ;;  %v2197_v33 = vpop.f32.mrb[23].mxu0  ;;  %v2437_v34 = vmax.f32 %v2235_v24, 0.0  ;;  %v2239_v35 = vadd.f32 %v2238_v32, %v372_v18  ;;  %v2240_v37 = vpop.f32.mrb[23].mxu1 }
 0x19c   :  { %v2436_v10 = vmax.f32 %v2194_v25, 0.0  ;;  %v2198_v36 = vadd.f32 %v2197_v33, %v368_v19  ;;  %v2438_v38 = vmax.f32 %v2237_v30, 0.0  ;;  %v2241_v40 = vadd.f32 %v2240_v37, %v376_v20 }
 0x19d   :  { %v2467_v39 = vmax.f32 %v2196_v31, 0.0  ;;  %v2469_v42 = vmax.f32 %v2239_v35, 0.0  ;;  %v396_v59 = vrot.slane %v276_v47, %v3902_v54  ;;  %v408_v24 = vrot.slane %v276_v47, %v3911_v58 }
 0x19e   :  { %v3006_v41 = vpack.c.bf16 %v2436_v10, %v2435_v29  ;;  %v2468_v43 = vmax.f32 %v2198_v36, 0.0  ;;  %v3007_v44 = vpack.c.bf16 %v2438_v38, %v2437_v34  ;;  %v2470_v45 = vmax.f32 %v2241_v40, 0.0 }
 0x1a0   :  { %2681 = vst [vmem:[%s4041_s3 + $0x50] sm:$0xff] %v3006_v41  ;;  %v3022_v46 = vpack.c.bf16 %v2468_v43, %v2467_v39  ;;  %2682 = vst [vmem:[%s4041_s3 + $0x58] sm:$0xff] %v3007_v44  ;;  %v3023_v3 = vpack.c.bf16 %v2470_v45, %v2469_v42 }
 0x1a2   :  { %2697 = vst [vmem:[%s4041_s3 + $0xd0] sm:$0xff] %v3022_v46  ;;  %2698 = vst [vmem:[%s4041_s3 + $0xd8] sm:$0xff] %v3023_v3 }
 0x1b8   :  { %v2277_v53 = vpop.f32.mrb[24].mxu0  ;;  %v2320_v0 = vpop.f32.mrb[24].mxu1 }
 0x1b9   :  { %v2278_v62 = vadd.f32 %v2277_v53, %v380_v49  ;;  %v2279_v28 = vpop.f32.mrb[25].mxu0  ;;  %v2321_v1 = vadd.f32 %v2320_v0, %v388_v50  ;;  %v2322_v4 = vpop.f32.mrb[25].mxu1 }
 0x1ba   :  { %v2280_v2 = vadd.f32 %v2279_v28, %v384_v51  ;;  %v2281_v5 = vpop.f32.mrb[26].mxu0  ;;  %v2323_v7 = vadd.f32 %v2322_v4, %v392_v52  ;;  %v2324_v48 = vpop.f32.mrb[26].mxu1 }
 0x1bb   :  { %v2439_v6 = vmax.f32 %v2278_v62, 0.0  ;;  %v2282_v8 = vadd.f32 %v2281_v5, %v380_v49  ;;  %v2283_v9 = vpop.f32.mrb[27].mxu0  ;;  %v2441_v55 = vmax.f32 %v2321_v1, 0.0  ;;  %v2325_v60 = vadd.f32 %v2324_v48, %v388_v50  ;;  %v2326_v61 = vpop.f32.mrb[27].mxu1 }
 0x1bc   :  { %v2440_v11 = vmax.f32 %v2280_v2, 0.0  ;;  %v2284_v12 = vadd.f32 %v2283_v9, %v384_v51  ;;  %v2442_v13 = vmax.f32 %v2323_v7, 0.0  ;;  %v2327_v14 = vadd.f32 %v2326_v61, %v392_v52 }
 0x1bd   :  { %v2471_v63 = vmax.f32 %v2282_v8, 0.0  ;;  %v2473_v16 = vmax.f32 %v2325_v60, 0.0 }
 0x1be   :  { %v3008_v15 = vpack.c.bf16 %v2440_v11, %v2439_v6  ;;  %v2472_v17 = vmax.f32 %v2284_v12, 0.0  ;;  %v3009_v18 = vpack.c.bf16 %v2442_v13, %v2441_v55  ;;  %v2474_v19 = vmax.f32 %v2327_v14, 0.0 }
 0x1c0   :  { %2683 = vst [vmem:[%s4041_s3 + $0x60] sm:$0xff] %v3008_v15  ;;  %v3024_v20 = vpack.c.bf16 %v2472_v17, %v2471_v63  ;;  %2684 = vst [vmem:[%s4041_s3 + $0x68] sm:$0xff] %v3009_v18  ;;  %v3025_v21 = vpack.c.bf16 %v2474_v19, %v2473_v16 }
 0x1c2   :  { %2699 = vst [vmem:[%s4041_s3 + $0xe0] sm:$0xff] %v3024_v20  ;;  %2700 = vst [vmem:[%s4041_s3 + $0xe8] sm:$0xff] %v3025_v21 }
 0x1d8   :  { %v2363_v25 = vpop.f32.mrb[28].mxu0  ;;  %v2406_v27 = vpop.f32.mrb[28].mxu1 }
 0x1d9   :  { %v2364_v26 = vadd.f32 %v2363_v25, %v396_v59  ;;  %v2365_v29 = vpop.f32.mrb[29].mxu0  ;;  %v2407_v30 = vadd.f32 %v2406_v27, %v404_v22  ;;  %v2408_v32 = vpop.f32.mrb[29].mxu1 }
 0x1da   :  { %v2366_v31 = vadd.f32 %v2365_v29, %v400_v23  ;;  %v2367_v33 = vpop.f32.mrb[30].mxu0  ;;  %v2409_v10 = vadd.f32 %v2408_v32, %v408_v24  ;;  %v2410_v36 = vpop.f32.mrb[30].mxu1 }
 0x1db   :  { %v2443_v34 = vmax.f32 %v2364_v26, 0.0  ;;  %v2368_v35 = vadd.f32 %v2367_v33, %v396_v59  ;;  %v2369_v37 = vpop.f32.mrb[31].mxu0  ;;  %v2445_v54 = vmax.f32 %v2407_v30, 0.0  ;;  %v2411_v56 = vadd.f32 %v2410_v36, %v404_v22  ;;  %v2412_v57 = vpop.f32.mrb[31].mxu1 }
 0x1dc   :  { %v2444_v38 = vmax.f32 %v2366_v31, 0.0  ;;  %v2370_v39 = vadd.f32 %v2369_v37, %v400_v23  ;;  %v2446_v40 = vmax.f32 %v2409_v10, 0.0  ;;  %v2413_v41 = vadd.f32 %v2412_v57, %v408_v24 }
 0x1dd   :  { %v2475_v58 = vmax.f32 %v2368_v35, 0.0  ;;  %v2477_v43 = vmax.f32 %v2411_v56, 0.0 }
 0x1de   :  { %v3010_v42 = vpack.c.bf16 %v2444_v38, %v2443_v34  ;;  %v2476_v44 = vmax.f32 %v2370_v39, 0.0  ;;  %v3011_v45 = vpack.c.bf16 %v2446_v40, %v2445_v54  ;;  %v2478_v46 = vmax.f32 %v2413_v41, 0.0 }
 0x1e0   :  { %2685 = vst [vmem:[%s4041_s3 + $0x70] sm:$0xff] %v3010_v42  ;;  %v3026_v3 = vpack.c.bf16 %v2476_v44, %v2475_v58  ;;  %2686 = vst [vmem:[%s4041_s3 + $0x78] sm:$0xff] %v3011_v45  ;;  %v3027_v47 = vpack.c.bf16 %v2478_v46, %v2477_v43 }
 0x1e2   :  { %2701 = vst [vmem:[%s4041_s3 + $0xf0] sm:$0xff] %v3026_v3  ;;  %2702 = vst [vmem:[%s4041_s3 + $0xf8] sm:$0xff] %v3027_v47 }

// kernel: dvae_forward.6
= control target key start
LH: loop header
LB: loop body
LE: loop exit
PB: predicated region body
PF: predicated region fallthrough
CT: control target
= control target key end

     0   :  { %10 = vsyncpa [#allocation3], 0  ;;  %s3934_s0 = inlined_call_operand.vmem [shape: bf16[16,2048], index: 0, kind: input, shape index: {}]   ;;  %s3935_s1 = inlined_call_operand.vmem [shape: bf16[2048,256], index: 1, kind: input, shape index: {}]   ;;  %s3936_s2 = inlined_call_operand.hbm [shape: f32[1,256], index: 2, kind: input, shape index: {}]   ;;  %s3937_s3 = inlined_call_operand.hbm [shape: f32[1,256], index: 3, kind: input, shape index: {}]   ;;  %s3938_s4 = inlined_call_operand.hbm [shape: f32[1,256], index: 4, kind: input, shape index: {}]   ;;  %s3939_s5 = inlined_call_operand.vmem [shape: f32[16,256], index: 5, kind: output, shape index: {}]  }
   0x1   :  { %11 = vsyncpa [#allocation5], 0  ;;  %s2949_s18 = smov [#allocation4]   ;;  %s2950_s20 = smov [#allocation2]  }
   0x2   :  { %s32_s19 = sshll.u32 %s2949_s18, 4  ;;  %s22_s21 = sshll.u32 %s2950_s20, 4  ;;  %s33_s19 = int_to_ptr.vmem [resolvable:$true] %s32_s19  ;;  %s23_s21 = int_to_ptr.vmem [resolvable:$true] %s22_s21 }
   0x3   :  { %s2879_s24 = scalar_lea.hbm %s3937_s3, 32 }
   0x4   :  { %p2880_p0 = scmp.ne.s32.totalorder %s3937_s3, %s2879_s24  ;;  %p2883_p1 = scmp.lt.u32.totalorder %s2879_s24, %s3937_s3 }
   0x6   :  { %p2885_p2 = pnand %p2883_p1, %p2880_p0 }
   0x8   :  { %2888 = shalt.err (!%p2885_p2)
}
   0x9   :  { %s2889_s29 = scalar_lea.vmem %s33_s19, 32  ;;  %p2894_p4 = scmp.lt.s32.totalorder %s33_s19, %s33_s19 }
   0xa   :  { %p2890_p3 = scmp.ne.s32.totalorder %s33_s19, %s2889_s29  ;;  %p2895_p5 = scmp.lt.s32.totalorder %s2889_s29, %s2889_s29 }
   0xc   :  { %p2896_p6 = por %p2895_p5, %p2894_p4 }
   0xe   :  { %p2897_p7 = pnand %p2896_p6, %p2890_p3 }
  0x10   :  { %2900 = shalt.err (!%p2897_p7)
}
  0x11   :  { %35 = dma.hbm_to_vmem [thread:$0]  %s3937_s3, 32, %s33_s19, [#allocation5]  }
  0x12   :  { %s2901_s9 = scalar_lea.hbm %s3936_s2, 32 }
  0x13   :  { %p2902_p8 = scmp.ne.s32.totalorder %s3936_s2, %s2901_s9  ;;  %p2905_p9 = scmp.lt.u32.totalorder %s2901_s9, %s3936_s2 }
  0x15   :  { %p2907_p10 = pnand %p2905_p9, %p2902_p8 }
  0x17   :  { %2910 = shalt.err (!%p2907_p10)
}
  0x18   :  { %s2911_s14 = scalar_lea.vmem %s23_s21, 32  ;;  %p2916_p12 = scmp.lt.s32.totalorder %s23_s21, %s23_s21 }
  0x19   :  { %p2912_p11 = scmp.ne.s32.totalorder %s23_s21, %s2911_s14  ;;  %p2917_p13 = scmp.lt.s32.totalorder %s2911_s14, %s2911_s14 }
  0x1b   :  { %p2918_p0 = por %p2917_p13, %p2916_p12 }
  0x1d   :  { %p2919_p1 = pnand %p2918_p0, %p2912_p11 }
  0x1f   :  { %2922 = shalt.err (!%p2919_p1)
}
  0x20   :  { %25 = dma.hbm_to_vmem [thread:$0]  %s3936_s2, 32, %s23_s21, [#allocation3]  }
  0x21   :  { %s2951_s16 = smov [#allocation6]   ;;  %s2923_s20 = scalar_lea.hbm %s3938_s4, 32 }
  0x22   :  { %s42_s17 = sshll.u32 %s2951_s16, 4  ;;  %p2924_p2 = scmp.ne.s32.totalorder %s3938_s4, %s2923_s20  ;;  %s43_s17 = int_to_ptr.vmem [resolvable:$true] %s42_s17 }
  0x23   :  { %p2927_p3 = scmp.lt.u32.totalorder %s2923_s20, %s3938_s4 }
  0x25   :  { %p2929_p4 = pnand %p2927_p3, %p2924_p2 }
  0x27   :  { %2932 = shalt.err (!%p2929_p4)
}
  0x28   :  { %s2933_s26 = scalar_lea.vmem %s43_s17, 32  ;;  %p2938_p6 = scmp.lt.s32.totalorder %s43_s17, %s43_s17 }
  0x29   :  { %p2934_p5 = scmp.ne.s32.totalorder %s43_s17, %s2933_s26  ;;  %p2939_p7 = scmp.lt.s32.totalorder %s2933_s26, %s2933_s26 }
  0x2b   :  { %p2940_p8 = por %p2939_p7, %p2938_p6 }
  0x2d   :  { %p2941_p9 = pnand %p2940_p8, %p2934_p5 }
  0x2f   :  { %2944 = shalt.err (!%p2941_p9)
}
  0x30   :  { %45 = dma.hbm_to_vmem [thread:$0]  %s3938_s4, 32, %s43_s17, [#allocation5]  }
  0x31   :  { %2945 = dma.done.wait [#allocation3], 32  }
  0x32   :  { %2946 = vsyncadd [#allocation3], 4294967264 }
  0x33   :  { %2947 = dma.done.wait [#allocation5], 64  }
  0x34   :  { %2948 = vsyncadd [#allocation5], 4294967232  ;;  %v2491_v0 = vld [vmem:[%s3935_s1 + $0x4] ss:$8 sps:$4 sm:$0xff]   ;;  %v2495_v2 = vld [vmem:[%s3935_s1] ss:$8 sps:$4 sm:$0xff]  }
  0x35   :  { %v2493_v1 = vld [vmem:[%s3935_s1 + $0x404] ss:$8 sps:$4 sm:$0xff]   ;;  %1699 = vmatprep.subr.bf16.mxu1 %v2491_v0  ;;  %v2496_v3 = vld [vmem:[%s3935_s1 + $0x400] ss:$8 sps:$4 sm:$0xff]   ;;  %v2497_v4 = vld [vmem:[%s3935_s1 + $0x14] ss:$8 sps:$4 sm:$0xff]  }
  0x36   :  { %1871 = vmatprep.subr.bf16.mxu0 %v2493_v1  ;;  %1700 = vmatpush1.bf16.msra.mxu1 %v2495_v2  ;;  %v2499_v5 = vld [vmem:[%s3935_s1 + $0x414] ss:$8 sps:$4 sm:$0xff]   ;;  %v2501_v6 = vld [vmem:[%s3935_s1 + $0x10] ss:$8 sps:$4 sm:$0xff]   ;;  %v2503_v8 = vld [vmem:[%s3935_s1 + $0x24] ss:$8 sps:$4 sm:$0xff]  }
  0x37   :  { %1872 = vmatpush1.bf16.msra.mxu0 %v2496_v3  ;;  %1701 = vmatprep.subr.bf16.mxu1 %v2497_v4  ;;  %v2502_v7 = vld [vmem:[%s3935_s1 + $0x410] ss:$8 sps:$4 sm:$0xff]   ;;  %v2505_v9 = vld [vmem:[%s3935_s1 + $0x424] ss:$8 sps:$4 sm:$0xff]   ;;  %v2507_v10 = vld [vmem:[%s3935_s1 + $0x20] ss:$8 sps:$4 sm:$0xff]  }
  0x38   :  { %1873 = vmatprep.subr.bf16.mxu0 %v2499_v5  ;;  %v2508_v11 = vld [vmem:[%s3935_s1 + $0x420] ss:$8 sps:$4 sm:$0xff]   ;;  %v2509_v12 = vld [vmem:[%s3935_s1 + $0x34] ss:$8 sps:$4 sm:$0xff]   ;;  %v2513_v14 = vld [vmem:[%s3935_s1 + $0x30] ss:$8 sps:$4 sm:$0xff]  }
  0x39   :  { %v2511_v13 = vld [vmem:[%s3935_s1 + $0x434] ss:$8 sps:$4 sm:$0xff]   ;;  %v2514_v15 = vld [vmem:[%s3935_s1 + $0x430] ss:$8 sps:$4 sm:$0xff]   ;;  %v2515_v16 = vld [vmem:[%s3935_s1 + $0x44] ss:$8 sps:$4 sm:$0xff]  }
  0x3a   :  { %1702 = vmatpush1.bf16.msra.mxu1 %v2501_v6  ;;  %v2517_v17 = vld [vmem:[%s3935_s1 + $0x444] ss:$8 sps:$4 sm:$0xff]   ;;  %v2519_v18 = vld [vmem:[%s3935_s1 + $0x40] ss:$8 sps:$4 sm:$0xff]   ;;  %v2521_v20 = vld [vmem:[%s3935_s1 + $0x54] ss:$8 sps:$4 sm:$0xff]  }
  0x3b   :  { %1874 = vmatpush1.bf16.msra.mxu0 %v2502_v7  ;;  %1703 = vmatprep.subr.bf16.mxu1 %v2503_v8  ;;  %v2520_v19 = vld [vmem:[%s3935_s1 + $0x440] ss:$8 sps:$4 sm:$0xff]   ;;  %v2523_v21 = vld [vmem:[%s3935_s1 + $0x454] ss:$8 sps:$4 sm:$0xff]   ;;  %v2525_v22 = vld [vmem:[%s3935_s1 + $0x50] ss:$8 sps:$4 sm:$0xff]  }
  0x3c   :  { %1875 = vmatprep.subr.bf16.mxu0 %v2505_v9  ;;  %v2526_v23 = vld [vmem:[%s3935_s1 + $0x450] ss:$8 sps:$4 sm:$0xff]   ;;  %v2527_v24 = vld [vmem:[%s3935_s1 + $0x64] ss:$8 sps:$4 sm:$0xff]   ;;  %v2531_v26 = vld [vmem:[%s3935_s1 + $0x60] ss:$8 sps:$4 sm:$0xff]  }
  0x3d   :  { %v2529_v25 = vld [vmem:[%s3935_s1 + $0x464] ss:$8 sps:$4 sm:$0xff]   ;;  %v2532_v27 = vld [vmem:[%s3935_s1 + $0x460] ss:$8 sps:$4 sm:$0xff]   ;;  %v2533_v28 = vld [vmem:[%s3935_s1 + $0x74] ss:$8 sps:$4 sm:$0xff]  }
  0x3e   :  { %1704 = vmatpush1.bf16.msra.mxu1 %v2507_v10  ;;  %v2535_v29 = vld [vmem:[%s3935_s1 + $0x474] ss:$8 sps:$4 sm:$0xff]   ;;  %v2537_v30 = vld [vmem:[%s3935_s1 + $0x70] ss:$8 sps:$4 sm:$0xff]   ;;  %v2539_v32 = vld [vmem:[%s3935_s1 + $0x84] ss:$8 sps:$4 sm:$0xff]  }
  0x3f   :  { %1876 = vmatpush1.bf16.msra.mxu0 %v2508_v11  ;;  %1705 = vmatprep.subr.bf16.mxu1 %v2509_v12  ;;  %v2538_v31 = vld [vmem:[%s3935_s1 + $0x470] ss:$8 sps:$4 sm:$0xff]   ;;  %v2541_v33 = vld [vmem:[%s3935_s1 + $0x484] ss:$8 sps:$4 sm:$0xff]   ;;  %v2543_v34 = vld [vmem:[%s3935_s1 + $0x80] ss:$8 sps:$4 sm:$0xff]  }
  0x40   :  { %1877 = vmatprep.subr.bf16.mxu0 %v2511_v13  ;;  %v2544_v35 = vld [vmem:[%s3935_s1 + $0x480] ss:$8 sps:$4 sm:$0xff]   ;;  %v2545_v36 = vld [vmem:[%s3935_s1 + $0x94] ss:$8 sps:$4 sm:$0xff]   ;;  %v2549_v38 = vld [vmem:[%s3935_s1 + $0x90] ss:$8 sps:$4 sm:$0xff]  }
  0x41   :  { %v2547_v37 = vld [vmem:[%s3935_s1 + $0x494] ss:$8 sps:$4 sm:$0xff]   ;;  %v2550_v39 = vld [vmem:[%s3935_s1 + $0x490] ss:$8 sps:$4 sm:$0xff]   ;;  %v2551_v40 = vld [vmem:[%s3935_s1 + $0xa4] ss:$8 sps:$4 sm:$0xff]  }
  0x42   :  { %1706 = vmatpush1.bf16.msra.mxu1 %v2513_v14  ;;  %v2553_v41 = vld [vmem:[%s3935_s1 + $0x4a4] ss:$8 sps:$4 sm:$0xff]   ;;  %v2555_v42 = vld [vmem:[%s3935_s1 + $0xa0] ss:$8 sps:$4 sm:$0xff]   ;;  %v2557_v44 = vld [vmem:[%s3935_s1 + $0xb4] ss:$8 sps:$4 sm:$0xff]  }
  0x43   :  { %1878 = vmatpush1.bf16.msra.mxu0 %v2514_v15  ;;  %1707 = vmatprep.subr.bf16.mxu1 %v2515_v16  ;;  %v2556_v43 = vld [vmem:[%s3935_s1 + $0x4a0] ss:$8 sps:$4 sm:$0xff]   ;;  %v2559_v45 = vld [vmem:[%s3935_s1 + $0x4b4] ss:$8 sps:$4 sm:$0xff]   ;;  %v2561_v46 = vld [vmem:[%s3935_s1 + $0xb0] ss:$8 sps:$4 sm:$0xff]  }
  0x44   :  { %1879 = vmatprep.subr.bf16.mxu0 %v2517_v17  ;;  %v2562_v47 = vld [vmem:[%s3935_s1 + $0x4b0] ss:$8 sps:$4 sm:$0xff]   ;;  %v55_v48 = vld [vmem:[%s3934_s0] sm:$0xff]  ;;  %v2569_v58 = vld [vmem:[%s3935_s1 + $0xd4] ss:$8 sps:$4 sm:$0xff]  }
  0x45   :  { %v63_v49 = vld [vmem:[%s3934_s0 + $0x40] sm:$0xff]  ;;  %v2571_v59 = vld [vmem:[%s3935_s1 + $0x4d4] ss:$8 sps:$4 sm:$0xff]   ;;  %v2573_v60 = vld [vmem:[%s3935_s1 + $0xd0] ss:$8 sps:$4 sm:$0xff]  }
  0x46   :  { %1708 = vmatpush1.bf16.msra.mxu1 %v2519_v18  ;;  %v2563_v50 = vld [vmem:[%s3935_s1 + $0xc4] ss:$8 sps:$4 sm:$0xff]   ;;  %v2184_v52 = vcombine.high %v55_v48, %v63_v49  ;;  %v2567_v56 = vld [vmem:[%s3935_s1 + $0xc0] ss:$8 sps:$4 sm:$0xff]   ;;  %v2574_v61 = vld [vmem:[%s3935_s1 + $0x4d0] ss:$8 sps:$4 sm:$0xff]   ;;  %v2183_v8 = vcombine.low %v55_v48, %v63_v49 }
  0x47   :  { %1880 = vmatpush1.bf16.msra.mxu0 %v2520_v19  ;;  %1709 = vmatprep.subr.bf16.mxu1 %v2521_v20  ;;  %v2565_v51 = vld [vmem:[%s3935_s1 + $0x4c4] ss:$8 sps:$4 sm:$0xff]   ;;  %v2568_v57 = vld [vmem:[%s3935_s1 + $0x4c0] ss:$8 sps:$4 sm:$0xff]   ;;  %v2581_v2 = vld [vmem:[%s3935_s1 + $0xf4] ss:$8 sps:$4 sm:$0xff]  }
  0x48   :  { %1881 = vmatprep.subr.bf16.mxu0 %v2523_v21  ;;  %v59_v53 = vld [vmem:[%s3934_s0 + $0x20] sm:$0xff]  ;;  %1731 = vmatprep.mubr.bf16.mxu1 %v2184_v52  ;;  %v2583_v3 = vld [vmem:[%s3935_s1 + $0x4f4] ss:$8 sps:$4 sm:$0xff]   ;;  %v2585_v4 = vld [vmem:[%s3935_s1 + $0xf0] ss:$8 sps:$4 sm:$0xff]  }
  0x49   :  { %v67_v54 = vld [vmem:[%s3934_s0 + $0x60] sm:$0xff]  ;;  %v2586_v5 = vld [vmem:[%s3935_s1 + $0x4f0] ss:$8 sps:$4 sm:$0xff]   ;;  %v2595_v12 = vld [vmem:[%s3935_s1 + $0x114] ss:$8 sps:$4 sm:$0xff]  }
  0x4a   :  { %1710 = vmatpush1.bf16.msra.mxu1 %v2525_v22  ;;  %v2192_v55 = vcombine.high %v59_v53, %v67_v54  ;;  %v2575_v62 = vld [vmem:[%s3935_s1 + $0xe4] ss:$8 sps:$4 sm:$0xff]   ;;  %v2579_v0 = vld [vmem:[%s3935_s1 + $0xe0] ss:$8 sps:$4 sm:$0xff]   ;;  %v2191_v10 = vcombine.low %v59_v53, %v67_v54  ;;  %v2598_v13 = vld [vmem:[%s3935_s1 + $0x514] ss:$8 sps:$4 sm:$0xff]  }
  0x4b   :  { %1882 = vmatpush1.bf16.msra.mxu0 %v2526_v23  ;;  %1711 = vmatprep.subr.bf16.mxu1 %v2527_v24  ;;  %v2577_v63 = vld [vmem:[%s3935_s1 + $0x4e4] ss:$8 sps:$4 sm:$0xff]   ;;  %v2580_v1 = vld [vmem:[%s3935_s1 + $0x4e0] ss:$8 sps:$4 sm:$0xff]   ;;  %v2593_v14 = vld [vmem:[%s3935_s1 + $0x110] ss:$8 sps:$4 sm:$0xff]  }
  0x4c   :  { %1883 = vmatprep.subr.bf16.mxu0 %v2529_v25  ;;  %1903 = vmatprep.mubr.bf16.mxu0 %v2192_v55  ;;  %v2589_v6 = vld [vmem:[%s3935_s1 + $0x104] ss:$8 sps:$4 sm:$0xff]   ;;  %v2587_v9 = vld [vmem:[%s3935_s1 + $0x100] ss:$8 sps:$4 sm:$0xff]   ;;  %v2596_v15 = vld [vmem:[%s3935_s1 + $0x510] ss:$8 sps:$4 sm:$0xff]  }
  0x4d   :  { %v2592_v7 = vld [vmem:[%s3935_s1 + $0x504] ss:$8 sps:$4 sm:$0xff]   ;;  %v2590_v11 = vld [vmem:[%s3935_s1 + $0x500] ss:$8 sps:$4 sm:$0xff]   ;;  %v2607_v20 = vld [vmem:[%s3935_s1 + $0x134] ss:$8 sps:$4 sm:$0xff]  }
  0x4e   :  { %1712 = vmatpush1.bf16.msra.mxu1 %v2531_v26  ;;  %v2601_v16 = vld [vmem:[%s3935_s1 + $0x124] ss:$8 sps:$4 sm:$0xff]   ;;  %v2599_v18 = vld [vmem:[%s3935_s1 + $0x120] ss:$8 sps:$4 sm:$0xff]   ;;  %v2610_v21 = vld [vmem:[%s3935_s1 + $0x534] ss:$8 sps:$4 sm:$0xff]  }
  0x4f   :  { %1884 = vmatpush1.bf16.msra.mxu0 %v2532_v27  ;;  %1713 = vmatprep.subr.bf16.mxu1 %v2533_v28  ;;  %v2604_v17 = vld [vmem:[%s3935_s1 + $0x524] ss:$8 sps:$4 sm:$0xff]   ;;  %v2602_v19 = vld [vmem:[%s3935_s1 + $0x520] ss:$8 sps:$4 sm:$0xff]   ;;  %v2605_v22 = vld [vmem:[%s3935_s1 + $0x130] ss:$8 sps:$4 sm:$0xff]  }
  0x50   :  { %1885 = vmatprep.subr.bf16.mxu0 %v2535_v29  ;;  %v2608_v23 = vld [vmem:[%s3935_s1 + $0x530] ss:$8 sps:$4 sm:$0xff]   ;;  %v2613_v24 = vld [vmem:[%s3935_s1 + $0x144] ss:$8 sps:$4 sm:$0xff]   ;;  %v2611_v26 = vld [vmem:[%s3935_s1 + $0x140] ss:$8 sps:$4 sm:$0xff]  }
  0x51   :  { %v2616_v25 = vld [vmem:[%s3935_s1 + $0x544] ss:$8 sps:$4 sm:$0xff]   ;;  %v2614_v27 = vld [vmem:[%s3935_s1 + $0x540] ss:$8 sps:$4 sm:$0xff]   ;;  %v2619_v28 = vld [vmem:[%s3935_s1 + $0x154] ss:$8 sps:$4 sm:$0xff]  }
  0x52   :  { %1714 = vmatpush1.bf16.msra.mxu1 %v2537_v30  ;;  %v2622_v29 = vld [vmem:[%s3935_s1 + $0x554] ss:$8 sps:$4 sm:$0xff]   ;;  %v2617_v30 = vld [vmem:[%s3935_s1 + $0x150] ss:$8 sps:$4 sm:$0xff]   ;;  %v2635_v48 = vld [vmem:[%s3935_s1 + $0x180] ss:$8 sps:$4 sm:$0xff]  }
  0x53   :  { %1886 = vmatpush1.bf16.msra.mxu0 %v2538_v31  ;;  %1715 = vmatprep.subr.bf16.mxu1 %v2539_v32  ;;  %v2620_v31 = vld [vmem:[%s3935_s1 + $0x550] ss:$8 sps:$4 sm:$0xff]   ;;  %v2625_v32 = vld [vmem:[%s3935_s1 + $0x164] ss:$8 sps:$4 sm:$0xff]   ;;  %v2638_v49 = vld [vmem:[%s3935_s1 + $0x580] ss:$8 sps:$4 sm:$0xff]  }
  0x54   :  { %1887 = vmatprep.subr.bf16.mxu0 %v2541_v33  ;;  %v2628_v33 = vld [vmem:[%s3935_s1 + $0x564] ss:$8 sps:$4 sm:$0xff]   ;;  %v2641_v52 = vld [vmem:[%s3935_s1 + $0x190] ss:$8 sps:$4 sm:$0xff]  }
  0x55   :  { %v2644_v53 = vld [vmem:[%s3935_s1 + $0x590] ss:$8 sps:$4 sm:$0xff]   ;;  %v2649_v54 = vld [vmem:[%s3935_s1 + $0x1a4] ss:$8 sps:$4 sm:$0xff]  }
  0x56   :  { %1716 = vmatpush1.bf16.msra.mxu1 %v2543_v34  ;;  %v2623_v34 = vld [vmem:[%s3935_s1 + $0x160] ss:$8 sps:$4 sm:$0xff]   ;;  %v2652_v55 = vld [vmem:[%s3935_s1 + $0x5a4] ss:$8 sps:$4 sm:$0xff]  }
  0x57   :  { %1888 = vmatpush1.bf16.msra.mxu0 %v2544_v35  ;;  %1717 = vmatprep.subr.bf16.mxu1 %v2545_v36  ;;  %v2626_v35 = vld [vmem:[%s3935_s1 + $0x560] ss:$8 sps:$4 sm:$0xff]  }
  0x58   :  { %1889 = vmatprep.subr.bf16.mxu0 %v2547_v37  ;;  %v3310_v36 = vld [vmem:[%s3934_s0 + $0x8] sm:$0xff] }
  0x59   :  { %v3315_v37 = vld [vmem:[%s3934_s0 + $0x48] sm:$0xff] }
  0x5a   :  { %1718 = vmatpush1.bf16.msra.mxu1 %v2549_v38  ;;  %v2631_v38 = vld [vmem:[%s3935_s1 + $0x174] ss:$8 sps:$4 sm:$0xff]  }
  0x5b   :  { %1890 = vmatpush1.bf16.msra.mxu0 %v2550_v39  ;;  %1719 = vmatprep.subr.bf16.mxu1 %v2551_v40  ;;  %v2634_v39 = vld [vmem:[%s3935_s1 + $0x574] ss:$8 sps:$4 sm:$0xff]   ;;  %v2186_v40 = vcombine.high %v3310_v36, %v3315_v37 }
  0x5c   :  { %1891 = vmatprep.subr.bf16.mxu0 %v2553_v41  ;;  %v3328_v41 = vld [vmem:[%s3934_s0 + $0x28] sm:$0xff] }
  0x5e   :  { %1720 = vmatpush1.bf16.msra.mxu1 %v2555_v42  ;;  %v3333_v42 = vld [vmem:[%s3934_s0 + $0x68] sm:$0xff] }
  0x5f   :  { %1892 = vmatpush1.bf16.msra.mxu0 %v2556_v43  ;;  %1721 = vmatprep.subr.bf16.mxu1 %v2557_v44  ;;  %v2194_v43 = vcombine.high %v3328_v41, %v3333_v42  ;;  %v2629_v44 = vld [vmem:[%s3935_s1 + $0x170] ss:$8 sps:$4 sm:$0xff]  }
  0x60   :  { %1893 = vmatprep.subr.bf16.mxu0 %v2559_v45  ;;  %v2632_v45 = vld [vmem:[%s3935_s1 + $0x570] ss:$8 sps:$4 sm:$0xff]  }
  0x62   :  { %1722 = vmatpush1.bf16.msra.mxu1 %v2561_v46  ;;  %v2637_v46 = vld [vmem:[%s3935_s1 + $0x184] ss:$8 sps:$4 sm:$0xff]  }
  0x63   :  { %1894 = vmatpush1.bf16.msra.mxu0 %v2562_v47  ;;  %1723 = vmatprep.subr.bf16.mxu1 %v2563_v50  ;;  %v2640_v47 = vld [vmem:[%s3935_s1 + $0x584] ss:$8 sps:$4 sm:$0xff]   ;;  %v2643_v50 = vld [vmem:[%s3935_s1 + $0x194] ss:$8 sps:$4 sm:$0xff]  }
  0x64   :  { %1895 = vmatprep.subr.bf16.mxu0 %v2565_v51  ;;  %v2646_v51 = vld [vmem:[%s3935_s1 + $0x594] ss:$8 sps:$4 sm:$0xff]  }
  0x66   :  { %1724 = vmatpush1.bf16.msra.mxu1 %v2567_v56  ;;  %v2647_v56 = vld [vmem:[%s3935_s1 + $0x1a0] ss:$8 sps:$4 sm:$0xff]  }
  0x67   :  { %1896 = vmatpush1.bf16.msra.mxu0 %v2568_v57  ;;  %1725 = vmatprep.subr.bf16.mxu1 %v2569_v58  ;;  %v2650_v57 = vld [vmem:[%s3935_s1 + $0x5a0] ss:$8 sps:$4 sm:$0xff]   ;;  %v2655_v58 = vld [vmem:[%s3935_s1 + $0x1b4] ss:$8 sps:$4 sm:$0xff]  }
  0x68   :  { %1897 = vmatprep.subr.bf16.mxu0 %v2571_v59  ;;  %v2658_v59 = vld [vmem:[%s3935_s1 + $0x5b4] ss:$8 sps:$4 sm:$0xff]  }
  0x6a   :  { %1726 = vmatpush1.bf16.msra.mxu1 %v2573_v60  ;;  %v2653_v60 = vld [vmem:[%s3935_s1 + $0x1b0] ss:$8 sps:$4 sm:$0xff]  }
  0x6b   :  { %1898 = vmatpush1.bf16.msra.mxu0 %v2574_v61  ;;  %1727 = vmatprep.subr.bf16.mxu1 %v2575_v62  ;;  %v2656_v61 = vld [vmem:[%s3935_s1 + $0x5b0] ss:$8 sps:$4 sm:$0xff]   ;;  %v2661_v62 = vld [vmem:[%s3935_s1 + $0x1c4] ss:$8 sps:$4 sm:$0xff]  }
  0x6c   :  { %1899 = vmatprep.subr.bf16.mxu0 %v2577_v63  ;;  %v2664_v63 = vld [vmem:[%s3935_s1 + $0x5c4] ss:$8 sps:$4 sm:$0xff]  }
  0x6e   :  { %1728 = vmatpush1.bf16.msra.mxu1 %v2579_v0  ;;  %v2659_v0 = vld [vmem:[%s3935_s1 + $0x1c0] ss:$8 sps:$4 sm:$0xff]  }
  0x6f   :  { %1900 = vmatpush1.bf16.msra.mxu0 %v2580_v1  ;;  %1729 = vmatprep.subr.bf16.mxu1 %v2581_v2  ;;  %v2662_v1 = vld [vmem:[%s3935_s1 + $0x5c0] ss:$8 sps:$4 sm:$0xff]   ;;  %v2667_v2 = vld [vmem:[%s3935_s1 + $0x1d4] ss:$8 sps:$4 sm:$0xff]  }
  0x70   :  { %1901 = vmatprep.subr.bf16.mxu0 %v2583_v3  ;;  %v2670_v3 = vld [vmem:[%s3935_s1 + $0x5d4] ss:$8 sps:$4 sm:$0xff]  }
  0x72   :  { %1730 = vmatpush1.bf16.msra.mxu1 %v2585_v4  ;;  %v2665_v4 = vld [vmem:[%s3935_s1 + $0x1d0] ss:$8 sps:$4 sm:$0xff]  }
  0x73   :  { %1902 = vmatpush1.bf16.msra.mxu0 %v2586_v5  ;;  %1742 = vmatprep.subr.bf16.mxu1 %v2589_v6  ;;  %v2668_v5 = vld [vmem:[%s3935_s1 + $0x5d0] ss:$8 sps:$4 sm:$0xff]   ;;  %v2673_v6 = vld [vmem:[%s3935_s1 + $0x1e4] ss:$8 sps:$4 sm:$0xff]  }
  0x74   :  { %1914 = vmatprep.subr.bf16.mxu0 %v2592_v7  ;;  %v2676_v7 = vld [vmem:[%s3935_s1 + $0x5e4] ss:$8 sps:$4 sm:$0xff]  }
  0x75   :  { %1732 = vmatmul.mubr.bf16.vlgmr.msra.gmra.mrb[0].mxu1 %v2183_v8  ;;  %v2671_v8 = vld [vmem:[%s3935_s1 + $0x1e0] ss:$8 sps:$4 sm:$0xff]  }
  0x76   :  { %1904 = vmatmul.mubr.bf16.vlgmr.msra.gmra.mrb[0].mxu0 %v2191_v10  ;;  %1743 = vmatpush1.bf16.msra.mxu1 %v2587_v9  ;;  %v2674_v9 = vld [vmem:[%s3935_s1 + $0x5e0] ss:$8 sps:$4 sm:$0xff]   ;;  %v2679_v10 = vld [vmem:[%s3935_s1 + $0x1f4] ss:$8 sps:$4 sm:$0xff]  }
  0x77   :  { %1915 = vmatpush1.bf16.msra.mxu0 %v2590_v11  ;;  %1744 = vmatprep.subr.bf16.mxu1 %v2595_v12  ;;  %v2682_v11 = vld [vmem:[%s3935_s1 + $0x5f4] ss:$8 sps:$4 sm:$0xff]   ;;  %v2677_v12 = vld [vmem:[%s3935_s1 + $0x1f0] ss:$8 sps:$4 sm:$0xff]  }
  0x78   :  { %1916 = vmatprep.subr.bf16.mxu0 %v2598_v13  ;;  %1774 = vmatprep.mubr.bf16.mxu1 %v2186_v40  ;;  %v2680_v13 = vld [vmem:[%s3935_s1 + $0x5f0] ss:$8 sps:$4 sm:$0xff]   ;;  %v2707_v40 = vld [vmem:[%s3935_s1 + $0x240] ss:$8 sps:$4 sm:$0xff]  }
  0x79   :  { %1946 = vmatprep.mubr.bf16.mxu0 %v2194_v43  ;;  %v2718_v43 = vld [vmem:[%s3935_s1 + $0x654] ss:$8 sps:$4 sm:$0xff]  }
  0x7a   :  { %1745 = vmatpush1.bf16.msra.mxu1 %v2593_v14  ;;  %v2685_v14 = vld [vmem:[%s3935_s1 + $0x204] ss:$8 sps:$4 sm:$0xff]  }
  0x7b   :  { %1917 = vmatpush1.bf16.msra.mxu0 %v2596_v15  ;;  %1746 = vmatprep.subr.bf16.mxu1 %v2601_v16  ;;  %v2688_v15 = vld [vmem:[%s3935_s1 + $0x604] ss:$8 sps:$4 sm:$0xff]   ;;  %v2185_v16 = vcombine.low %v3310_v36, %v3315_v37  ;;  %v2701_v36 = vld [vmem:[%s3935_s1 + $0x230] ss:$8 sps:$4 sm:$0xff]  }
  0x7c   :  { %1918 = vmatprep.subr.bf16.mxu0 %v2604_v17  ;;  %v2683_v17 = vld [vmem:[%s3935_s1 + $0x200] ss:$8 sps:$4 sm:$0xff]   ;;  %v2704_v37 = vld [vmem:[%s3935_s1 + $0x630] ss:$8 sps:$4 sm:$0xff]  }
  0x7e   :  { %1747 = vmatpush1.bf16.msra.mxu1 %v2599_v18  ;;  %v2193_v18 = vcombine.low %v3328_v41, %v3333_v42  ;;  %v2710_v41 = vld [vmem:[%s3935_s1 + $0x640] ss:$8 sps:$4 sm:$0xff]   ;;  %v2715_v42 = vld [vmem:[%s3935_s1 + $0x254] ss:$8 sps:$4 sm:$0xff]  }
  0x7f   :  { %1919 = vmatpush1.bf16.msra.mxu0 %v2602_v19  ;;  %1748 = vmatprep.subr.bf16.mxu1 %v2607_v20  ;;  %v2686_v19 = vld [vmem:[%s3935_s1 + $0x600] ss:$8 sps:$4 sm:$0xff]   ;;  %v2691_v20 = vld [vmem:[%s3935_s1 + $0x214] ss:$8 sps:$4 sm:$0xff]  }
  0x80   :  { %1920 = vmatprep.subr.bf16.mxu0 %v2610_v21  ;;  %v2694_v21 = vld [vmem:[%s3935_s1 + $0x614] ss:$8 sps:$4 sm:$0xff]  }
  0x82   :  { %1749 = vmatpush1.bf16.msra.mxu1 %v2605_v22  ;;  %v2689_v22 = vld [vmem:[%s3935_s1 + $0x210] ss:$8 sps:$4 sm:$0xff]  }
  0x83   :  { %1921 = vmatpush1.bf16.msra.mxu0 %v2608_v23  ;;  %1750 = vmatprep.subr.bf16.mxu1 %v2613_v24  ;;  %v2692_v23 = vld [vmem:[%s3935_s1 + $0x610] ss:$8 sps:$4 sm:$0xff]  }
  0x84   :  { %1922 = vmatprep.subr.bf16.mxu0 %v2616_v25  ;;  %v3470_v24 = vld [vmem:[%s3934_s0 + $0x10] sm:$0xff] }
  0x85   :  { %v3475_v25 = vld [vmem:[%s3934_s0 + $0x50] sm:$0xff] }
  0x86   :  { %1751 = vmatpush1.bf16.msra.mxu1 %v2611_v26  ;;  %v2697_v26 = vld [vmem:[%s3935_s1 + $0x224] ss:$8 sps:$4 sm:$0xff]  }
  0x87   :  { %1923 = vmatpush1.bf16.msra.mxu0 %v2614_v27  ;;  %1752 = vmatprep.subr.bf16.mxu1 %v2619_v28  ;;  %v2700_v27 = vld [vmem:[%s3935_s1 + $0x624] ss:$8 sps:$4 sm:$0xff]   ;;  %v2188_v28 = vcombine.high %v3470_v24, %v3475_v25 }
  0x88   :  { %1924 = vmatprep.subr.bf16.mxu0 %v2622_v29  ;;  %v3488_v29 = vld [vmem:[%s3934_s0 + $0x30] sm:$0xff] }
  0x8a   :  { %1753 = vmatpush1.bf16.msra.mxu1 %v2617_v30  ;;  %v3493_v30 = vld [vmem:[%s3934_s0 + $0x70] sm:$0xff] }
  0x8b   :  { %1925 = vmatpush1.bf16.msra.mxu0 %v2620_v31  ;;  %1754 = vmatprep.subr.bf16.mxu1 %v2625_v32  ;;  %v2196_v31 = vcombine.high %v3488_v29, %v3493_v30  ;;  %v2695_v32 = vld [vmem:[%s3935_s1 + $0x220] ss:$8 sps:$4 sm:$0xff]  }
  0x8c   :  { %1926 = vmatprep.subr.bf16.mxu0 %v2628_v33  ;;  %v2698_v33 = vld [vmem:[%s3935_s1 + $0x620] ss:$8 sps:$4 sm:$0xff]  }
  0x8e   :  { %1755 = vmatpush1.bf16.msra.mxu1 %v2623_v34  ;;  %v2703_v34 = vld [vmem:[%s3935_s1 + $0x234] ss:$8 sps:$4 sm:$0xff]  }
  0x8f   :  { %1927 = vmatpush1.bf16.msra.mxu0 %v2626_v35  ;;  %1756 = vmatprep.subr.bf16.mxu1 %v2631_v38  ;;  %v2706_v35 = vld [vmem:[%s3935_s1 + $0x634] ss:$8 sps:$4 sm:$0xff]   ;;  %v2709_v38 = vld [vmem:[%s3935_s1 + $0x244] ss:$8 sps:$4 sm:$0xff]  }
  0x90   :  { %1928 = vmatprep.subr.bf16.mxu0 %v2634_v39  ;;  %v2712_v39 = vld [vmem:[%s3935_s1 + $0x644] ss:$8 sps:$4 sm:$0xff]  }
  0x92   :  { %1757 = vmatpush1.bf16.msra.mxu1 %v2629_v44  ;;  %v2713_v44 = vld [vmem:[%s3935_s1 + $0x250] ss:$8 sps:$4 sm:$0xff]  }
  0x93   :  { %1929 = vmatpush1.bf16.msra.mxu0 %v2632_v45  ;;  %1758 = vmatprep.subr.bf16.mxu1 %v2637_v46  ;;  %v2716_v45 = vld [vmem:[%s3935_s1 + $0x650] ss:$8 sps:$4 sm:$0xff]   ;;  %v2721_v46 = vld [vmem:[%s3935_s1 + $0x264] ss:$8 sps:$4 sm:$0xff]  }
  0x94   :  { %1930 = vmatprep.subr.bf16.mxu0 %v2640_v47  ;;  %v2724_v47 = vld [vmem:[%s3935_s1 + $0x664] ss:$8 sps:$4 sm:$0xff]  }
  0x96   :  { %1759 = vmatpush1.bf16.msra.mxu1 %v2635_v48  ;;  %v2719_v48 = vld [vmem:[%s3935_s1 + $0x260] ss:$8 sps:$4 sm:$0xff]  }
  0x97   :  { %1931 = vmatpush1.bf16.msra.mxu0 %v2638_v49  ;;  %1760 = vmatprep.subr.bf16.mxu1 %v2643_v50  ;;  %v2722_v49 = vld [vmem:[%s3935_s1 + $0x660] ss:$8 sps:$4 sm:$0xff]   ;;  %v2727_v50 = vld [vmem:[%s3935_s1 + $0x274] ss:$8 sps:$4 sm:$0xff]  }
  0x98   :  { %1932 = vmatprep.subr.bf16.mxu0 %v2646_v51  ;;  %v2730_v51 = vld [vmem:[%s3935_s1 + $0x674] ss:$8 sps:$4 sm:$0xff]  }
  0x9a   :  { %1761 = vmatpush1.bf16.msra.mxu1 %v2641_v52  ;;  %v2725_v52 = vld [vmem:[%s3935_s1 + $0x270] ss:$8 sps:$4 sm:$0xff]  }
  0x9b   :  { %1933 = vmatpush1.bf16.msra.mxu0 %v2644_v53  ;;  %1762 = vmatprep.subr.bf16.mxu1 %v2649_v54  ;;  %v2728_v53 = vld [vmem:[%s3935_s1 + $0x670] ss:$8 sps:$4 sm:$0xff]   ;;  %v2733_v54 = vld [vmem:[%s3935_s1 + $0x284] ss:$8 sps:$4 sm:$0xff]  }
  0x9c   :  { %1934 = vmatprep.subr.bf16.mxu0 %v2652_v55  ;;  %v2736_v55 = vld [vmem:[%s3935_s1 + $0x684] ss:$8 sps:$4 sm:$0xff]  }
  0x9e   :  { %1763 = vmatpush1.bf16.msra.mxu1 %v2647_v56  ;;  %v2731_v56 = vld [vmem:[%s3935_s1 + $0x280] ss:$8 sps:$4 sm:$0xff]  }
  0x9f   :  { %1935 = vmatpush1.bf16.msra.mxu0 %v2650_v57  ;;  %1764 = vmatprep.subr.bf16.mxu1 %v2655_v58  ;;  %v2734_v57 = vld [vmem:[%s3935_s1 + $0x680] ss:$8 sps:$4 sm:$0xff]   ;;  %v2739_v58 = vld [vmem:[%s3935_s1 + $0x294] ss:$8 sps:$4 sm:$0xff]  }
  0xa0   :  { %1936 = vmatprep.subr.bf16.mxu0 %v2658_v59  ;;  %v2742_v59 = vld [vmem:[%s3935_s1 + $0x694] ss:$8 sps:$4 sm:$0xff]  }
  0xa2   :  { %1765 = vmatpush1.bf16.msra.mxu1 %v2653_v60  ;;  %v2737_v60 = vld [vmem:[%s3935_s1 + $0x290] ss:$8 sps:$4 sm:$0xff]  }
  0xa3   :  { %1937 = vmatpush1.bf16.msra.mxu0 %v2656_v61  ;;  %1766 = vmatprep.subr.bf16.mxu1 %v2661_v62  ;;  %v2740_v61 = vld [vmem:[%s3935_s1 + $0x690] ss:$8 sps:$4 sm:$0xff]   ;;  %v2745_v62 = vld [vmem:[%s3935_s1 + $0x2a4] ss:$8 sps:$4 sm:$0xff]  }
  0xa4   :  { %1938 = vmatprep.subr.bf16.mxu0 %v2664_v63  ;;  %v2748_v63 = vld [vmem:[%s3935_s1 + $0x6a4] ss:$8 sps:$4 sm:$0xff]  }
  0xa6   :  { %1767 = vmatpush1.bf16.msra.mxu1 %v2659_v0  ;;  %v2743_v0 = vld [vmem:[%s3935_s1 + $0x2a0] ss:$8 sps:$4 sm:$0xff]  }
  0xa7   :  { %1939 = vmatpush1.bf16.msra.mxu0 %v2662_v1  ;;  %1768 = vmatprep.subr.bf16.mxu1 %v2667_v2  ;;  %v2746_v1 = vld [vmem:[%s3935_s1 + $0x6a0] ss:$8 sps:$4 sm:$0xff]   ;;  %v2751_v2 = vld [vmem:[%s3935_s1 + $0x2b4] ss:$8 sps:$4 sm:$0xff]  }
  0xa8   :  { %1940 = vmatprep.subr.bf16.mxu0 %v2670_v3  ;;  %v2754_v3 = vld [vmem:[%s3935_s1 + $0x6b4] ss:$8 sps:$4 sm:$0xff]  }
  0xaa   :  { %1769 = vmatpush1.bf16.msra.mxu1 %v2665_v4  ;;  %v2749_v4 = vld [vmem:[%s3935_s1 + $0x2b0] ss:$8 sps:$4 sm:$0xff]  }
  0xab   :  { %1941 = vmatpush1.bf16.msra.mxu0 %v2668_v5  ;;  %1770 = vmatprep.subr.bf16.mxu1 %v2673_v6  ;;  %v2752_v5 = vld [vmem:[%s3935_s1 + $0x6b0] ss:$8 sps:$4 sm:$0xff]   ;;  %v2757_v6 = vld [vmem:[%s3935_s1 + $0x2c4] ss:$8 sps:$4 sm:$0xff]  }
  0xac   :  { %1942 = vmatprep.subr.bf16.mxu0 %v2676_v7  ;;  %v2760_v7 = vld [vmem:[%s3935_s1 + $0x6c4] ss:$8 sps:$4 sm:$0xff]  }
  0xae   :  { %1771 = vmatpush1.bf16.msra.mxu1 %v2671_v8  ;;  %v2755_v8 = vld [vmem:[%s3935_s1 + $0x2c0] ss:$8 sps:$4 sm:$0xff]  }
  0xaf   :  { %1943 = vmatpush1.bf16.msra.mxu0 %v2674_v9  ;;  %1772 = vmatprep.subr.bf16.mxu1 %v2679_v10  ;;  %v2758_v9 = vld [vmem:[%s3935_s1 + $0x6c0] ss:$8 sps:$4 sm:$0xff]   ;;  %v2763_v10 = vld [vmem:[%s3935_s1 + $0x2d4] ss:$8 sps:$4 sm:$0xff]  }
  0xb0   :  { %1944 = vmatprep.subr.bf16.mxu0 %v2682_v11  ;;  %v2766_v11 = vld [vmem:[%s3935_s1 + $0x6d4] ss:$8 sps:$4 sm:$0xff]  }
  0xb2   :  { %1773 = vmatpush1.bf16.msra.mxu1 %v2677_v12  ;;  %v2761_v12 = vld [vmem:[%s3935_s1 + $0x2d0] ss:$8 sps:$4 sm:$0xff]  }
  0xb3   :  { %1945 = vmatpush1.bf16.msra.mxu0 %v2680_v13  ;;  %1785 = vmatprep.subr.bf16.mxu1 %v2685_v14  ;;  %v2764_v13 = vld [vmem:[%s3935_s1 + $0x6d0] ss:$8 sps:$4 sm:$0xff]   ;;  %v2769_v14 = vld [vmem:[%s3935_s1 + $0x2e4] ss:$8 sps:$4 sm:$0xff]  }
  0xb4   :  { %1957 = vmatprep.subr.bf16.mxu0 %v2688_v15  ;;  %v2772_v15 = vld [vmem:[%s3935_s1 + $0x6e4] ss:$8 sps:$4 sm:$0xff]  }
  0xb5   :  { %1775 = vmatmul.mubr.bf16.vlgmr.msra.gmra.mrb[0].mxu1 %v2185_v16  ;;  %v2767_v16 = vld [vmem:[%s3935_s1 + $0x2e0] ss:$8 sps:$4 sm:$0xff]  }
  0xb6   :  { %1947 = vmatmul.mubr.bf16.vlgmr.msra.gmra.mrb[0].mxu0 %v2193_v18  ;;  %1786 = vmatpush1.bf16.msra.mxu1 %v2683_v17  ;;  %v2770_v17 = vld [vmem:[%s3935_s1 + $0x6e0] ss:$8 sps:$4 sm:$0xff]   ;;  %v2775_v18 = vld [vmem:[%s3935_s1 + $0x2f4] ss:$8 sps:$4 sm:$0xff]  }
  0xb7   :  { %1958 = vmatpush1.bf16.msra.mxu0 %v2686_v19  ;;  %1787 = vmatprep.subr.bf16.mxu1 %v2691_v20  ;;  %v2778_v19 = vld [vmem:[%s3935_s1 + $0x6f4] ss:$8 sps:$4 sm:$0xff]   ;;  %v2773_v20 = vld [vmem:[%s3935_s1 + $0x2f0] ss:$8 sps:$4 sm:$0xff]  }
  0xb8   :  { %1959 = vmatprep.subr.bf16.mxu0 %v2694_v21  ;;  %1817 = vmatprep.mubr.bf16.mxu1 %v2188_v28  ;;  %v2776_v21 = vld [vmem:[%s3935_s1 + $0x6f0] ss:$8 sps:$4 sm:$0xff]   ;;  %v2195_v28 = vcombine.low %v3488_v29, %v3493_v30  ;;  %v2787_v29 = vld [vmem:[%s3935_s1 + $0x314] ss:$8 sps:$4 sm:$0xff]  }
  0xb9   :  { %1989 = vmatprep.mubr.bf16.mxu0 %v2196_v31  ;;  %v3677_v31 = vld [vmem:[%s3934_s0 + $0x58] sm:$0xff] }
  0xba   :  { %1788 = vmatpush1.bf16.msra.mxu1 %v2689_v22  ;;  %v2781_v22 = vld [vmem:[%s3935_s1 + $0x304] ss:$8 sps:$4 sm:$0xff]   ;;  %v2790_v30 = vld [vmem:[%s3935_s1 + $0x714] ss:$8 sps:$4 sm:$0xff]  }
  0xbb   :  { %1960 = vmatpush1.bf16.msra.mxu0 %v2692_v23  ;;  %1789 = vmatprep.subr.bf16.mxu1 %v2697_v26  ;;  %v2784_v23 = vld [vmem:[%s3935_s1 + $0x704] ss:$8 sps:$4 sm:$0xff]   ;;  %v3668_v26 = vld [vmem:[%s3934_s0 + $0x18] sm:$0xff] }
  0xbc   :  { %1961 = vmatprep.subr.bf16.mxu0 %v2700_v27  ;;  %v2187_v27 = vcombine.low %v3470_v24, %v3475_v25  ;;  %v2779_v24 = vld [vmem:[%s3935_s1 + $0x300] ss:$8 sps:$4 sm:$0xff]  }
  0xbd   :  { %v2782_v25 = vld [vmem:[%s3935_s1 + $0x700] ss:$8 sps:$4 sm:$0xff]  }
  0xbe   :  { %1790 = vmatpush1.bf16.msra.mxu1 %v2695_v32  ;;  %v3682_v32 = vld [vmem:[%s3934_s0 + $0x38] sm:$0xff] }
  0xbf   :  { %1962 = vmatpush1.bf16.msra.mxu0 %v2698_v33  ;;  %1791 = vmatprep.subr.bf16.mxu1 %v2703_v34  ;;  %v3687_v33 = vld [vmem:[%s3934_s0 + $0x78] sm:$0xff]  ;;  %v2190_v34 = vcombine.high %v3668_v26, %v3677_v31 }
  0xc0   :  { %1963 = vmatprep.subr.bf16.mxu0 %v2706_v35  ;;  %v2198_v35 = vcombine.high %v3682_v32, %v3687_v33 }
  0xc2   :  { %1792 = vmatpush1.bf16.msra.mxu1 %v2701_v36  ;;  %v2785_v36 = vld [vmem:[%s3935_s1 + $0x310] ss:$8 sps:$4 sm:$0xff]  }
  0xc3   :  { %1964 = vmatpush1.bf16.msra.mxu0 %v2704_v37  ;;  %1793 = vmatprep.subr.bf16.mxu1 %v2709_v38  ;;  %v2788_v37 = vld [vmem:[%s3935_s1 + $0x710] ss:$8 sps:$4 sm:$0xff]   ;;  %v2793_v38 = vld [vmem:[%s3935_s1 + $0x324] ss:$8 sps:$4 sm:$0xff]  }
  0xc4   :  { %1965 = vmatprep.subr.bf16.mxu0 %v2712_v39  ;;  %v2796_v39 = vld [vmem:[%s3935_s1 + $0x724] ss:$8 sps:$4 sm:$0xff]  }
  0xc6   :  { %1794 = vmatpush1.bf16.msra.mxu1 %v2707_v40  ;;  %v2791_v40 = vld [vmem:[%s3935_s1 + $0x320] ss:$8 sps:$4 sm:$0xff]  }
  0xc7   :  { %1966 = vmatpush1.bf16.msra.mxu0 %v2710_v41  ;;  %1795 = vmatprep.subr.bf16.mxu1 %v2715_v42  ;;  %v2794_v41 = vld [vmem:[%s3935_s1 + $0x720] ss:$8 sps:$4 sm:$0xff]   ;;  %v2799_v42 = vld [vmem:[%s3935_s1 + $0x334] ss:$8 sps:$4 sm:$0xff]  }
  0xc8   :  { %1967 = vmatprep.subr.bf16.mxu0 %v2718_v43  ;;  %v2802_v43 = vld [vmem:[%s3935_s1 + $0x734] ss:$8 sps:$4 sm:$0xff]  }
  0xca   :  { %1796 = vmatpush1.bf16.msra.mxu1 %v2713_v44  ;;  %v2797_v44 = vld [vmem:[%s3935_s1 + $0x330] ss:$8 sps:$4 sm:$0xff]  }
  0xcb   :  { %1968 = vmatpush1.bf16.msra.mxu0 %v2716_v45  ;;  %1797 = vmatprep.subr.bf16.mxu1 %v2721_v46  ;;  %v2800_v45 = vld [vmem:[%s3935_s1 + $0x730] ss:$8 sps:$4 sm:$0xff]   ;;  %v2805_v46 = vld [vmem:[%s3935_s1 + $0x344] ss:$8 sps:$4 sm:$0xff]  }
  0xcc   :  { %1969 = vmatprep.subr.bf16.mxu0 %v2724_v47  ;;  %v2808_v47 = vld [vmem:[%s3935_s1 + $0x744] ss:$8 sps:$4 sm:$0xff]  }
  0xce   :  { %1798 = vmatpush1.bf16.msra.mxu1 %v2719_v48  ;;  %v2803_v48 = vld [vmem:[%s3935_s1 + $0x340] ss:$8 sps:$4 sm:$0xff]  }
  0xcf   :  { %1970 = vmatpush1.bf16.msra.mxu0 %v2722_v49  ;;  %1799 = vmatprep.subr.bf16.mxu1 %v2727_v50  ;;  %v2806_v49 = vld [vmem:[%s3935_s1 + $0x740] ss:$8 sps:$4 sm:$0xff]   ;;  %v2811_v50 = vld [vmem:[%s3935_s1 + $0x354] ss:$8 sps:$4 sm:$0xff]  }
  0xd0   :  { %1971 = vmatprep.subr.bf16.mxu0 %v2730_v51  ;;  %v2814_v51 = vld [vmem:[%s3935_s1 + $0x754] ss:$8 sps:$4 sm:$0xff]  }
  0xd2   :  { %1800 = vmatpush1.bf16.msra.mxu1 %v2725_v52  ;;  %v2809_v52 = vld [vmem:[%s3935_s1 + $0x350] ss:$8 sps:$4 sm:$0xff]  }
  0xd3   :  { %1972 = vmatpush1.bf16.msra.mxu0 %v2728_v53  ;;  %1801 = vmatprep.subr.bf16.mxu1 %v2733_v54  ;;  %v2812_v53 = vld [vmem:[%s3935_s1 + $0x750] ss:$8 sps:$4 sm:$0xff]   ;;  %v2817_v54 = vld [vmem:[%s3935_s1 + $0x364] ss:$8 sps:$4 sm:$0xff]  }
  0xd4   :  { %1973 = vmatprep.subr.bf16.mxu0 %v2736_v55  ;;  %v2820_v55 = vld [vmem:[%s3935_s1 + $0x764] ss:$8 sps:$4 sm:$0xff]  }
  0xd6   :  { %1802 = vmatpush1.bf16.msra.mxu1 %v2731_v56  ;;  %v2815_v56 = vld [vmem:[%s3935_s1 + $0x360] ss:$8 sps:$4 sm:$0xff]  }
  0xd7   :  { %1974 = vmatpush1.bf16.msra.mxu0 %v2734_v57  ;;  %1803 = vmatprep.subr.bf16.mxu1 %v2739_v58  ;;  %v2818_v57 = vld [vmem:[%s3935_s1 + $0x760] ss:$8 sps:$4 sm:$0xff]   ;;  %v2823_v58 = vld [vmem:[%s3935_s1 + $0x374] ss:$8 sps:$4 sm:$0xff]  }
  0xd8   :  { %1975 = vmatprep.subr.bf16.mxu0 %v2742_v59  ;;  %v2826_v59 = vld [vmem:[%s3935_s1 + $0x774] ss:$8 sps:$4 sm:$0xff]  }
  0xda   :  { %1804 = vmatpush1.bf16.msra.mxu1 %v2737_v60  ;;  %v2821_v60 = vld [vmem:[%s3935_s1 + $0x370] ss:$8 sps:$4 sm:$0xff]  }
  0xdb   :  { %1976 = vmatpush1.bf16.msra.mxu0 %v2740_v61  ;;  %1805 = vmatprep.subr.bf16.mxu1 %v2745_v62  ;;  %v2824_v61 = vld [vmem:[%s3935_s1 + $0x770] ss:$8 sps:$4 sm:$0xff]   ;;  %v2829_v62 = vld [vmem:[%s3935_s1 + $0x384] ss:$8 sps:$4 sm:$0xff]  }
  0xdc   :  { %1977 = vmatprep.subr.bf16.mxu0 %v2748_v63  ;;  %v2832_v63 = vld [vmem:[%s3935_s1 + $0x784] ss:$8 sps:$4 sm:$0xff]  }
  0xde   :  { %1806 = vmatpush1.bf16.msra.mxu1 %v2743_v0  ;;  %v2827_v0 = vld [vmem:[%s3935_s1 + $0x380] ss:$8 sps:$4 sm:$0xff]  }
  0xdf   :  { %1978 = vmatpush1.bf16.msra.mxu0 %v2746_v1  ;;  %1807 = vmatprep.subr.bf16.mxu1 %v2751_v2  ;;  %v2830_v1 = vld [vmem:[%s3935_s1 + $0x780] ss:$8 sps:$4 sm:$0xff]   ;;  %v2835_v2 = vld [vmem:[%s3935_s1 + $0x394] ss:$8 sps:$4 sm:$0xff]  }
  0xe0   :  { %1979 = vmatprep.subr.bf16.mxu0 %v2754_v3  ;;  %v2838_v3 = vld [vmem:[%s3935_s1 + $0x794] ss:$8 sps:$4 sm:$0xff]  }
  0xe2   :  { %1808 = vmatpush1.bf16.msra.mxu1 %v2749_v4  ;;  %v2833_v4 = vld [vmem:[%s3935_s1 + $0x390] ss:$8 sps:$4 sm:$0xff]  }
  0xe3   :  { %1980 = vmatpush1.bf16.msra.mxu0 %v2752_v5  ;;  %1809 = vmatprep.subr.bf16.mxu1 %v2757_v6  ;;  %v2836_v5 = vld [vmem:[%s3935_s1 + $0x790] ss:$8 sps:$4 sm:$0xff]   ;;  %v2841_v6 = vld [vmem:[%s3935_s1 + $0x3a4] ss:$8 sps:$4 sm:$0xff]  }
  0xe4   :  { %1981 = vmatprep.subr.bf16.mxu0 %v2760_v7  ;;  %v2844_v7 = vld [vmem:[%s3935_s1 + $0x7a4] ss:$8 sps:$4 sm:$0xff]  }
  0xe6   :  { %1810 = vmatpush1.bf16.msra.mxu1 %v2755_v8  ;;  %v2839_v8 = vld [vmem:[%s3935_s1 + $0x3a0] ss:$8 sps:$4 sm:$0xff]  }
  0xe7   :  { %1982 = vmatpush1.bf16.msra.mxu0 %v2758_v9  ;;  %1811 = vmatprep.subr.bf16.mxu1 %v2763_v10  ;;  %v2842_v9 = vld [vmem:[%s3935_s1 + $0x7a0] ss:$8 sps:$4 sm:$0xff]   ;;  %v2847_v10 = vld [vmem:[%s3935_s1 + $0x3b4] ss:$8 sps:$4 sm:$0xff]  }
  0xe8   :  { %1983 = vmatprep.subr.bf16.mxu0 %v2766_v11  ;;  %v2850_v11 = vld [vmem:[%s3935_s1 + $0x7b4] ss:$8 sps:$4 sm:$0xff]  }
  0xea   :  { %1812 = vmatpush1.bf16.msra.mxu1 %v2761_v12  ;;  %v2845_v12 = vld [vmem:[%s3935_s1 + $0x3b0] ss:$8 sps:$4 sm:$0xff]  }
  0xeb   :  { %1984 = vmatpush1.bf16.msra.mxu0 %v2764_v13  ;;  %1813 = vmatprep.subr.bf16.mxu1 %v2769_v14  ;;  %v2848_v13 = vld [vmem:[%s3935_s1 + $0x7b0] ss:$8 sps:$4 sm:$0xff]   ;;  %v2853_v14 = vld [vmem:[%s3935_s1 + $0x3c4] ss:$8 sps:$4 sm:$0xff]  }
  0xec   :  { %1985 = vmatprep.subr.bf16.mxu0 %v2772_v15  ;;  %v2856_v15 = vld [vmem:[%s3935_s1 + $0x7c4] ss:$8 sps:$4 sm:$0xff]  }
  0xee   :  { %1814 = vmatpush1.bf16.msra.mxu1 %v2767_v16  ;;  %v2851_v16 = vld [vmem:[%s3935_s1 + $0x3c0] ss:$8 sps:$4 sm:$0xff]  }
  0xef   :  { %1986 = vmatpush1.bf16.msra.mxu0 %v2770_v17  ;;  %1815 = vmatprep.subr.bf16.mxu1 %v2775_v18  ;;  %v2854_v17 = vld [vmem:[%s3935_s1 + $0x7c0] ss:$8 sps:$4 sm:$0xff]   ;;  %v2859_v18 = vld [vmem:[%s3935_s1 + $0x3d4] ss:$8 sps:$4 sm:$0xff]  }
  0xf0   :  { %1987 = vmatprep.subr.bf16.mxu0 %v2778_v19  ;;  %v2862_v19 = vld [vmem:[%s3935_s1 + $0x7d4] ss:$8 sps:$4 sm:$0xff]  }
  0xf2   :  { %1816 = vmatpush1.bf16.msra.mxu1 %v2773_v20  ;;  %v2857_v20 = vld [vmem:[%s3935_s1 + $0x3d0] ss:$8 sps:$4 sm:$0xff]  }
  0xf3   :  { %1988 = vmatpush1.bf16.msra.mxu0 %v2776_v21  ;;  %1828 = vmatprep.subr.bf16.mxu1 %v2781_v22  ;;  %v2860_v21 = vld [vmem:[%s3935_s1 + $0x7d0] ss:$8 sps:$4 sm:$0xff]   ;;  %v2865_v22 = vld [vmem:[%s3935_s1 + $0x3e4] ss:$8 sps:$4 sm:$0xff]  }
  0xf4   :  { %2000 = vmatprep.subr.bf16.mxu0 %v2784_v23  ;;  %v2868_v23 = vld [vmem:[%s3935_s1 + $0x7e4] ss:$8 sps:$4 sm:$0xff]  }
  0xf5   :  { %1818 = vmatmul.mubr.bf16.vlgmr.msra.gmra.mrb[0].mxu1 %v2187_v27  ;;  %v2863_v27 = vld [vmem:[%s3935_s1 + $0x3e0] ss:$8 sps:$4 sm:$0xff]  }
  0xf6   :  { %1990 = vmatmul.mubr.bf16.vlgmr.msra.gmra.mrb[0].mxu0 %v2195_v28  ;;  %1829 = vmatpush1.bf16.msra.mxu1 %v2779_v24  ;;  %v2866_v28 = vld [vmem:[%s3935_s1 + $0x7e0] ss:$8 sps:$4 sm:$0xff]   ;;  %v2871_v24 = vld [vmem:[%s3935_s1 + $0x3f4] ss:$8 sps:$4 sm:$0xff]  }
  0xf7   :  { %2001 = vmatpush1.bf16.msra.mxu0 %v2782_v25  ;;  %1830 = vmatprep.subr.bf16.mxu1 %v2787_v29  ;;  %v2874_v25 = vld [vmem:[%s3935_s1 + $0x7f4] ss:$8 sps:$4 sm:$0xff]   ;;  %v2869_v29 = vld [vmem:[%s3935_s1 + $0x3f0] ss:$8 sps:$4 sm:$0xff]  }
  0xf8   :  { %2002 = vmatprep.subr.bf16.mxu0 %v2790_v30  ;;  %1860 = vmatprep.mubr.bf16.mxu1 %v2190_v34  ;;  %v2872_v30 = vld [vmem:[%s3935_s1 + $0x7f0] ss:$8 sps:$4 sm:$0xff]   ;;  %v2189_v34 = vcombine.low %v3668_v26, %v3677_v31 }
  0xf9   :  { %2032 = vmatprep.mubr.bf16.mxu0 %v2198_v35  ;;  %v2197_v35 = vcombine.low %v3682_v32, %v3687_v33 }
  0xfa   :  { %1831 = vmatpush1.bf16.msra.mxu1 %v2785_v36  ;;  %v329_v36 = vlaneseq }
  0xfb   :  { %2003 = vmatpush1.bf16.msra.mxu0 %v2788_v37  ;;  %1832 = vmatprep.subr.bf16.mxu1 %v2793_v38 }
  0xfc   :  { %2004 = vmatprep.subr.bf16.mxu0 %v2796_v39  ;;  %v3883_v37 = vshrl.u32 %v329_v36, 7  ;;  %v327_v39 = vld [vmem:[#allocation2] sm:$0x3] }
  0xfe   :  { %1833 = vmatpush1.bf16.msra.mxu1 %v2791_v40  ;;  %v3886_v38 = vsub.s32 0, %v3883_v37  ;;  %v3889_v40 = vsub.s32 1, %v3883_v37 }
  0xff   :  { %2005 = vmatpush1.bf16.msra.mxu0 %v2794_v41  ;;  %1834 = vmatprep.subr.bf16.mxu1 %v2799_v42 }
 0x100   :  { %2006 = vmatprep.subr.bf16.mxu0 %v2802_v43  ;;  %v332_v41 = vrot.slane %v327_v39, %v3886_v38  ;;  %v336_v26 = vrot.slane %v327_v39, %v3889_v40 }
 0x102   :  { %1835 = vmatpush1.bf16.msra.mxu1 %v2797_v44 }
 0x103   :  { %2007 = vmatpush1.bf16.msra.mxu0 %v2800_v45  ;;  %1836 = vmatprep.subr.bf16.mxu1 %v2805_v46 }
 0x104   :  { %2008 = vmatprep.subr.bf16.mxu0 %v2808_v47 }
 0x106   :  { %1837 = vmatpush1.bf16.msra.mxu1 %v2803_v48 }
 0x107   :  { %2009 = vmatpush1.bf16.msra.mxu0 %v2806_v49  ;;  %1838 = vmatprep.subr.bf16.mxu1 %v2811_v50 }
 0x108   :  { %2010 = vmatprep.subr.bf16.mxu0 %v2814_v51 }
 0x10a   :  { %1839 = vmatpush1.bf16.msra.mxu1 %v2809_v52 }
 0x10b   :  { %2011 = vmatpush1.bf16.msra.mxu0 %v2812_v53  ;;  %1840 = vmatprep.subr.bf16.mxu1 %v2817_v54 }
 0x10c   :  { %2012 = vmatprep.subr.bf16.mxu0 %v2820_v55 }
 0x10e   :  { %1841 = vmatpush1.bf16.msra.mxu1 %v2815_v56 }
 0x10f   :  { %2013 = vmatpush1.bf16.msra.mxu0 %v2818_v57  ;;  %1842 = vmatprep.subr.bf16.mxu1 %v2823_v58 }
 0x110   :  { %2014 = vmatprep.subr.bf16.mxu0 %v2826_v59 }
 0x112   :  { %1843 = vmatpush1.bf16.msra.mxu1 %v2821_v60 }
 0x113   :  { %2015 = vmatpush1.bf16.msra.mxu0 %v2824_v61  ;;  %1844 = vmatprep.subr.bf16.mxu1 %v2829_v62 }
 0x114   :  { %2016 = vmatprep.subr.bf16.mxu0 %v2832_v63 }
 0x116   :  { %1845 = vmatpush1.bf16.msra.mxu1 %v2827_v0 }
 0x117   :  { %2017 = vmatpush1.bf16.msra.mxu0 %v2830_v1  ;;  %1846 = vmatprep.subr.bf16.mxu1 %v2835_v2 }
 0x118   :  { %2018 = vmatprep.subr.bf16.mxu0 %v2838_v3 }
 0x11a   :  { %1847 = vmatpush1.bf16.msra.mxu1 %v2833_v4 }
 0x11b   :  { %2019 = vmatpush1.bf16.msra.mxu0 %v2836_v5  ;;  %1848 = vmatprep.subr.bf16.mxu1 %v2841_v6 }
 0x11c   :  { %2020 = vmatprep.subr.bf16.mxu0 %v2844_v7 }
 0x11e   :  { %1849 = vmatpush1.bf16.msra.mxu1 %v2839_v8 }
 0x11f   :  { %2021 = vmatpush1.bf16.msra.mxu0 %v2842_v9  ;;  %1850 = vmatprep.subr.bf16.mxu1 %v2847_v10 }
 0x120   :  { %2022 = vmatprep.subr.bf16.mxu0 %v2850_v11 }
 0x122   :  { %1851 = vmatpush1.bf16.msra.mxu1 %v2845_v12 }
 0x123   :  { %2023 = vmatpush1.bf16.msra.mxu0 %v2848_v13  ;;  %1852 = vmatprep.subr.bf16.mxu1 %v2853_v14 }
 0x124   :  { %2024 = vmatprep.subr.bf16.mxu0 %v2856_v15 }
 0x126   :  { %1853 = vmatpush1.bf16.msra.mxu1 %v2851_v16 }
 0x127   :  { %2025 = vmatpush1.bf16.msra.mxu0 %v2854_v17  ;;  %1854 = vmatprep.subr.bf16.mxu1 %v2859_v18 }
 0x128   :  { %2026 = vmatprep.subr.bf16.mxu0 %v2862_v19 }
 0x12a   :  { %1855 = vmatpush1.bf16.msra.mxu1 %v2857_v20 }
 0x12b   :  { %2027 = vmatpush1.bf16.msra.mxu0 %v2860_v21  ;;  %1856 = vmatprep.subr.bf16.mxu1 %v2865_v22 }
 0x12c   :  { %2028 = vmatprep.subr.bf16.mxu0 %v2868_v23 }
 0x12e   :  { %1857 = vmatpush1.bf16.msra.mxu1 %v2863_v27 }
 0x12f   :  { %2029 = vmatpush1.bf16.msra.mxu0 %v2866_v28  ;;  %1858 = vmatprep.subr.bf16.mxu1 %v2871_v24 }
 0x130   :  { %2030 = vmatprep.subr.bf16.mxu0 %v2874_v25 }
 0x132   :  { %1859 = vmatpush1.bf16.msra.mxu1 %v2869_v29 }
 0x133   :  { %2031 = vmatpush1.bf16.msra.mxu0 %v2872_v30 }
 0x135   :  { %1861 = vmatmul.mubr.bf16.vlgmr.msra.gmra.mrb[0].mxu1 %v2189_v34 }
 0x136   :  { %2033 = vmatmul.mubr.bf16.vlgmr.msra.gmra.mrb[0].mxu0 %v2197_v35 }
 0x208   :  { %v1862_v31 = vpop.f32.mrb[0].mxu1 }
 0x209   :  { %v2034_v32 = vpop.f32.mrb[0].mxu0  ;;  %v2455_v33 = vadd.f32 %v1862_v31, %v332_v41  ;;  %v1864_v42 = vpop.f32.mrb[1].mxu1 }
 0x20a   :  { %v2036_v43 = vpop.f32.mrb[1].mxu0  ;;  %v2457_v44 = vadd.f32 %v1864_v42, %v336_v26  ;;  %v1866_v45 = vpop.f32.mrb[2].mxu1 }
 0x20b   :  { %v2038_v46 = vpop.f32.mrb[2].mxu0  ;;  %v3893_v47 = vadd.f32 %v2455_v33, %v2034_v32  ;;  %v2459_v48 = vadd.f32 %v1866_v45, %v332_v41  ;;  %v1868_v49 = vpop.f32.mrb[3].mxu1 }
 0x20c   :  { %v2040_v50 = vpop.f32.mrb[3].mxu0  ;;  %v3895_v51 = vadd.f32 %v2457_v44, %v2036_v43  ;;  %v2461_v52 = vadd.f32 %v1868_v49, %v336_v26  ;;  %v2952_v26 = vmov 1966171168  }
 0x20d   :  { %v3897_v53 = vadd.f32 %v2459_v48, %v2038_v46  ;;  %v2059_v55 = vmul.f32 %v3893_v47, %v3893_v47  ;;  %v2094_v31 = vunpack.c.l.s4 %v2952_v26  ;;  %v2085_v46 = vld [vmem:[#allocation4] sm:$0x3] }
 0x20e   :  { %v3899_v54 = vadd.f32 %v2461_v52, %v2040_v50  ;;  %v2060_v58 = vmul.f32 %v3895_v51, %v3895_v51 }
 0x20f   :  { %v2043_v56 = vadd.f32 %v3897_v53, %v3893_v47  ;;  %v2061_v57 = vmul.f32 %v3897_v53, %v3897_v53  ;;  %v2095_v32 = vunpack.c.0.s8 %v2094_v31 }
 0x210   :  { %v2050_v59 = vadd.f32 %v3899_v54, %v3895_v51  ;;  %v2062_v60 = vmul.f32 %v3899_v54, %v3899_v54 }
 0x211   :  { %v2044_v61 = vrot.slane %v2043_v56, 4  ;;  %v2063_v62 = vadd.f32 %v2061_v57, %v2059_v55  ;;  %v2098_v42 = vsub.s32 %v2095_v32, %v3883_v37 }
 0x212   :  { %v2051_v63 = vrot.slane %v2050_v59, 4  ;;  %v2070_v0 = vadd.f32 %v2062_v60, %v2060_v58 }
 0x213   :  { %v2045_v1 = vadd.f32 %v2044_v61, %v2043_v56  ;;  %v2064_v2 = vrot.slane %v2063_v62, 4 }
 0x214   :  { %v2052_v3 = vadd.f32 %v2051_v63, %v2050_v59  ;;  %v2071_v4 = vrot.slane %v2070_v0, 4 }
 0x215   :  { %v2046_v5 = vrot.slane %v2045_v1, 2  ;;  %v2065_v6 = vadd.f32 %v2064_v2, %v2063_v62  ;;  %v2109_v62 = vld [vmem:[#allocation6] sm:$0x3] }
 0x216   :  { %v2053_v7 = vrot.slane %v2052_v3, 2  ;;  %v2072_v8 = vadd.f32 %v2071_v4, %v2070_v0 }
 0x217   :  { %v2047_v9 = vadd.f32 %v2046_v5, %v2045_v1  ;;  %v2066_v10 = vrot.slane %v2065_v6, 2 }
 0x218   :  { %v2054_v11 = vadd.f32 %v2053_v7, %v2052_v3  ;;  %v2073_v12 = vrot.slane %v2072_v8, 2 }
 0x219   :  { %v2048_v13 = vrot.slane %v2047_v9, 1  ;;  %v2067_v14 = vadd.f32 %v2066_v10, %v2065_v6 }
 0x21a   :  { %v2055_v15 = vrot.slane %v2054_v11, 1  ;;  %v2074_v16 = vadd.f32 %v2073_v12, %v2072_v8 }
 0x21b   :  { %v2049_v17 = vadd.f32 %v2048_v13, %v2047_v9  ;;  %v2068_v18 = vrot.slane %v2067_v14, 1 }
 0x21c   :  { %v2056_v19 = vadd.f32 %v2055_v15, %v2054_v11  ;;  %v2075_v20 = vrot.slane %v2074_v16, 1 }
 0x21d   :  { %v2057_v21 = vmul.f32 0.0625, %v2049_v17  ;;  %v2069_v22 = vadd.f32 %v2068_v18, %v2067_v14 }
 0x21e   :  { %v2058_v23 = vmul.f32 0.0625, %v2056_v19  ;;  %v2076_v27 = vadd.f32 %v2075_v20, %v2074_v16 }
 0x21f   :  { %v2077_v28 = vmul.f32 0.0625, %v2069_v22  ;;  %v2079_v24 = vmul.f32 %v2057_v21, %v2057_v21 }
 0x220   :  { %v2078_v25 = vmul.f32 0.0625, %v2076_v27  ;;  %v2080_v29 = vmul.f32 %v2058_v23, %v2058_v23 }
 0x221   :  { %v2081_v30 = vsub.f32 %v2077_v28, %v2079_v24 }
 0x222   :  { %v2082_v34 = vsub.f32 %v2078_v25, %v2080_v29 }
 0x223   :  { %v2083_v35 = vmax.f32 %v2081_v30, 0.0 }
 0x224   :  { %v2084_v36 = vmax.f32 %v2082_v34, 0.0 }
 0x225   :  { %v2086_v39 = vadd.f32 1e-05, %v2083_v35 }
 0x226   :  { %v2087_v41 = vadd.f32 1e-05, %v2084_v36 }
 0x227   :  { %2875 = vrsqrt.f32 %v2086_v39 }
 0x228   :  { %2877 = vrsqrt.f32 %v2087_v41 }
 0x231   :  { %v2876_v33 = vpop.eup %2875 }
 0x232   :  { %v2878_v43 = vpop.eup %2877 }
 0x233   :  { %v2092_v44 = vcombine.low %v2876_v33, %v2878_v43 }
 0x235   :  { %v2099_v45 = vrot.slane %v2092_v44, %v2098_v42 }
 0x237   :  { %v2106_v48 = vrot.slane %v2099_v45, %v2098_v42 }
 0x239   :  { %v2108_v49 = vmul.f32 %v2106_v48, %v2085_v46 }
 0x23b   :  { %v2114_v50 = vrot.slane %v2108_v49, %v3886_v38  ;;  %v2118_v52 = vrot.slane %v2108_v49, %v3889_v40 }
 0x23d   :  { %v2121_v55 = vmul.f32 %v2114_v50, %v2057_v21  ;;  %v2122_v56 = vmul.f32 %v2118_v52, %v2058_v23  ;;  %v2142_v57 = vmul.f32 %v3893_v47, %v2114_v50  ;;  %v2143_v58 = vmul.f32 %v3895_v51, %v2118_v52 }
 0x23e   :  { %v2144_v59 = vmul.f32 %v3897_v53, %v2114_v50  ;;  %v2145_v37 = vmul.f32 %v3899_v54, %v2118_v52 }
 0x23f   :  { %v2125_v60 = vcombine.low %v2121_v55, %v2122_v56 }
 0x241   :  { %v2132_v61 = vrot.slane %v2125_v60, %v2098_v42 }
 0x243   :  { %v2139_v63 = vrot.slane %v2132_v61, %v2098_v42 }
 0x245   :  { %v2141_v0 = vsub.f32 %v2109_v62, %v2139_v63 }
 0x247   :  { %v2150_v1 = vrot.slane %v2141_v0, %v3886_v38  ;;  %v2154_v2 = vrot.slane %v2141_v0, %v3889_v40 }
 0x249   :  { %v2157_v3 = vadd.f32 %v2150_v1, %v2142_v57  ;;  %v2158_v4 = vadd.f32 %v2154_v2, %v2143_v58  ;;  %v2159_v5 = vadd.f32 %v2150_v1, %v2144_v59  ;;  %v2160_v6 = vadd.f32 %v2154_v2, %v2145_v37 }
 0x24b   :  { %vm2161_vm0 = vcmp.ge.f32.partialorder %v2157_v3, 0.0  ;;  %vm2162_vm1 = vcmp.ge.f32.partialorder %v2158_v4, 0.0  ;;  %vm2163_vm2 = vcmp.ge.f32.partialorder %v2159_v5, 0.0  ;;  %vm2164_vm3 = vcmp.ge.f32.partialorder %v2160_v6, 0.0 }
 0x24c   :  { %v2165_v47 = vmul.f32 0.2, %v2157_v3  ;;  %v2166_v51 = vmul.f32 0.2, %v2158_v4  ;;  %v2167_v53 = vmul.f32 0.2, %v2159_v5 }
 0x24d   :  { %v2168_v54 = vmul.f32 0.2, %v2160_v6 }
 0x24e   :  { %v2169_v7 = vsel %vm2161_vm0, %v2157_v3, %v2165_v47  ;;  %v2170_v8 = vsel %vm2162_vm1, %v2158_v4, %v2166_v51  ;;  %v2171_v9 = vsel %vm2163_vm2, %v2159_v5, %v2167_v53 }
 0x24f   :  { %v2172_v10 = vsel %vm2164_vm3, %v2160_v6, %v2168_v54  ;;  %2173 = vst [vmem:[%s3939_s5] sm:$0xff] %v2169_v7  ;;  %2174 = vst [vmem:[%s3939_s5 + $0x8] sm:$0xff] %v2170_v8 }
 0x250   :  { %2175 = vst [vmem:[%s3939_s5 + $0x10] sm:$0xff] %v2171_v9  ;;  %2176 = vst [vmem:[%s3939_s5 + $0x18] sm:$0xff] %v2172_v10 }
 0x251   :  { %2181 = vsyncpa [#allocation3], 1 }
 0x252   :  { %2182 = vsyncpa [#allocation5], 1 }

// kernel: dvae_forward.8
= control target key start
LH: loop header
LB: loop body
LE: loop exit
PB: predicated region body
PF: predicated region fallthrough
CT: control target
= control target key end

     0   :  { %s5504_s12 = smov 0   ;;  %s6570_s0 = inlined_call_operand.vmem [shape: bf16[416,1024], index: 0, kind: input, shape index: {}]   ;;  %s6571_s1 = inlined_call_operand.vmem [shape: bf16[1024,512], index: 1, kind: input, shape index: {}]   ;;  %s6572_s2 = inlined_call_operand.vmem [shape: f32[1,512], index: 2, kind: input, shape index: {}]   ;;  %s6573_s3 = inlined_call_operand.vmem [shape: bf16[416,512], index: 3, kind: output, shape index: {}]  }
   0x1 LB: > { %s4191_s13 = sadd.s32 4294967295, %s5482_s12   ;;  %p4195_p0 = scmp.ge.s32.totalorder %s5482_s12, 1  ;;  %s5482_s12 = sphi %s5504_s12, %s13_s12  }
   0x2   : > { %p139_p1 = scmp.lt.s32.totalorder %s5482_s12, 3 }
   0x4   : > { %p140_p2 = pnand %p4195_p0, %p139_p1 }
   0x5   : > { %v5092_v0 = vld [vmem:[%s6571_s1 + $0x4] ss:$16 sps:$4 sm:$0xff] (!%p140_p2)   ;;  %v5094_v1 = vld [vmem:[%s6571_s1 + $0xc] ss:$16 sps:$4 sm:$0xff] (!%p140_p2)   ;;  %v5096_v2 = vld [vmem:[%s6571_s1] ss:$16 sps:$4 sm:$0xff] (!%p140_p2)  }
   0x6   : > { %143 = sbr.rel (%p140_p2) target bundleno = 700 (0x2bc), region = 32  ;;  %2361 = vmatprep.subr.bf16.mxu0 (!%p140_p2), %v5092_v0  ;;  %v5097_v3 = vld [vmem:[%s6571_s1 + $0x8] ss:$16 sps:$4 sm:$0xff] (!%p140_p2)   ;;  %3013 = vmatprep.subr.bf16.mxu1 (!%p140_p2), %v5094_v1  ;;  %v5098_v4 = vld [vmem:[%s6571_s1 + $0x24] ss:$16 sps:$4 sm:$0xff] (!%p140_p2)  }
   0x7   : > { %2362 = vmatpush1.bf16.msra.mxu0 (!%p140_p2), %v5096_v2  ;;  %3014 = vmatpush1.bf16.msra.mxu1 (!%p140_p2), %v5097_v3  ;;  %v5100_v5 = vld [vmem:[%s6571_s1 + $0x2c] ss:$16 sps:$4 sm:$0xff] (!%p140_p2)   ;;  %v5102_v6 = vld [vmem:[%s6571_s1 + $0x20] ss:$16 sps:$4 sm:$0xff] (!%p140_p2)   ;;  %v5103_v7 = vld [vmem:[%s6571_s1 + $0x28] ss:$16 sps:$4 sm:$0xff] (!%p140_p2)  }
   0x8   : > { %2363 = vmatprep.subr.bf16.mxu0 (!%p140_p2), %v5098_v4  ;;  %3015 = vmatprep.subr.bf16.mxu1 (!%p140_p2), %v5100_v5  ;;  %v5104_v8 = vld [vmem:[%s6571_s1 + $0x44] ss:$16 sps:$4 sm:$0xff] (!%p140_p2)   ;;  %v5106_v9 = vld [vmem:[%s6571_s1 + $0x4c] ss:$16 sps:$4 sm:$0xff] (!%p140_p2)   ;;  %v5108_v10 = vld [vmem:[%s6571_s1 + $0x40] ss:$16 sps:$4 sm:$0xff] (!%p140_p2)  }
   0x9   : > { %v5109_v11 = vld [vmem:[%s6571_s1 + $0x48] ss:$16 sps:$4 sm:$0xff] (!%p140_p2)   ;;  %v5110_v12 = vld [vmem:[%s6571_s1 + $0x64] ss:$16 sps:$4 sm:$0xff] (!%p140_p2)   ;;  %v5112_v13 = vld [vmem:[%s6571_s1 + $0x6c] ss:$16 sps:$4 sm:$0xff] (!%p140_p2)  }
   0xa   : > { %v5114_v14 = vld [vmem:[%s6571_s1 + $0x60] ss:$16 sps:$4 sm:$0xff] (!%p140_p2)   ;;  %v5115_v15 = vld [vmem:[%s6571_s1 + $0x68] ss:$16 sps:$4 sm:$0xff] (!%p140_p2)   ;;  %v5116_v16 = vld [vmem:[%s6571_s1 + $0x84] ss:$16 sps:$4 sm:$0xff] (!%p140_p2)  }
   0xb   : > { %2364 = vmatpush1.bf16.msra.mxu0 (!%p140_p2), %v5102_v6  ;;  %3016 = vmatpush1.bf16.msra.mxu1 (!%p140_p2), %v5103_v7  ;;  %v5118_v17 = vld [vmem:[%s6571_s1 + $0x8c] ss:$16 sps:$4 sm:$0xff] (!%p140_p2)   ;;  %v5120_v18 = vld [vmem:[%s6571_s1 + $0x80] ss:$16 sps:$4 sm:$0xff] (!%p140_p2)   ;;  %v5121_v19 = vld [vmem:[%s6571_s1 + $0x88] ss:$16 sps:$4 sm:$0xff] (!%p140_p2)  }
   0xc   : > { %2365 = vmatprep.subr.bf16.mxu0 (!%p140_p2), %v5104_v8  ;;  %3017 = vmatprep.subr.bf16.mxu1 (!%p140_p2), %v5106_v9  ;;  %v5122_v20 = vld [vmem:[%s6571_s1 + $0xa4] ss:$16 sps:$4 sm:$0xff] (!%p140_p2)   ;;  %v5124_v21 = vld [vmem:[%s6571_s1 + $0xac] ss:$16 sps:$4 sm:$0xff] (!%p140_p2)   ;;  %v5126_v22 = vld [vmem:[%s6571_s1 + $0xa0] ss:$16 sps:$4 sm:$0xff] (!%p140_p2)  }
   0xd   : > { %v5127_v23 = vld [vmem:[%s6571_s1 + $0xa8] ss:$16 sps:$4 sm:$0xff]   ;;  %v5128_v24 = vld [vmem:[%s6571_s1 + $0xc4] ss:$16 sps:$4 sm:$0xff]   ;;  %v5130_v25 = vld [vmem:[%s6571_s1 + $0xcc] ss:$16 sps:$4 sm:$0xff]  }
   0xe   : > { %v5132_v26 = vld [vmem:[%s6571_s1 + $0xc0] ss:$16 sps:$4 sm:$0xff]   ;;  %v5133_v27 = vld [vmem:[%s6571_s1 + $0xc8] ss:$16 sps:$4 sm:$0xff]   ;;  %v5134_v28 = vld [vmem:[%s6571_s1 + $0xe4] ss:$16 sps:$4 sm:$0xff]  }
   0xf   : > { %2366 = vmatpush1.bf16.msra.mxu0 %v5108_v10  ;;  %3018 = vmatpush1.bf16.msra.mxu1 %v5109_v11  ;;  %s165_s22 = smul.u32 26, %s4191_s13  ;;  %v5136_v29 = vld [vmem:[%s6571_s1 + $0xec] ss:$16 sps:$4 sm:$0xff]   ;;  %v5138_v30 = vld [vmem:[%s6571_s1 + $0xe0] ss:$16 sps:$4 sm:$0xff]  }
  0x10   : > { %2367 = vmatprep.subr.bf16.mxu0 %v5110_v12  ;;  %3019 = vmatprep.subr.bf16.mxu1 %v5112_v13  ;;  %v5139_v31 = vld [vmem:[%s6571_s1 + $0xe8] ss:$16 sps:$4 sm:$0xff]   ;;  %v5140_v32 = vld [vmem:[%s6571_s1 + $0x104] ss:$16 sps:$4 sm:$0xff]   ;;  %v5142_v33 = vld [vmem:[%s6571_s1 + $0x10c] ss:$16 sps:$4 sm:$0xff]  }
  0x11   : > { %p166_p3 = scmp.lt.s32.totalorder %s165_s22, 51  ;;  %v5144_v34 = vld [vmem:[%s6571_s1 + $0x100] ss:$16 sps:$4 sm:$0xff]   ;;  %v5145_v35 = vld [vmem:[%s6571_s1 + $0x108] ss:$16 sps:$4 sm:$0xff]  }
  0x12   : > { %v5146_v36 = vld [vmem:[%s6571_s1 + $0x124] ss:$16 sps:$4 sm:$0xff]   ;;  %v5148_v37 = vld [vmem:[%s6571_s1 + $0x12c] ss:$16 sps:$4 sm:$0xff]   ;;  %v5150_v38 = vld [vmem:[%s6571_s1 + $0x120] ss:$16 sps:$4 sm:$0xff]  }
  0x13   : > { %2368 = vmatpush1.bf16.msra.mxu0 %v5114_v14  ;;  %3020 = vmatpush1.bf16.msra.mxu1 %v5115_v15  ;;  %s6575_s22 = smov (!%p166_p3, %s165_s22), 51  ;;  %v5151_v39 = vld [vmem:[%s6571_s1 + $0x128] ss:$16 sps:$4 sm:$0xff]   ;;  %v5152_v40 = vld [vmem:[%s6571_s1 + $0x144] ss:$16 sps:$4 sm:$0xff]  }
  0x14   : > { %2369 = vmatprep.subr.bf16.mxu0 %v5116_v16  ;;  %3021 = vmatprep.subr.bf16.mxu1 %v5118_v17  ;;  %s4614_s21 = sshll.u32 %s6575_s22, 5  ;;  %v5154_v41 = vld [vmem:[%s6571_s1 + $0x14c] ss:$16 sps:$4 sm:$0xff]   ;;  %v5156_v42 = vld [vmem:[%s6571_s1 + $0x140] ss:$16 sps:$4 sm:$0xff]  }
  0x15   : > { %v5157_v43 = vld [vmem:[%s6571_s1 + $0x148] ss:$16 sps:$4 sm:$0xff]   ;;  %s5652_s13 = scalar_lea.vmem %s6570_s0, %s4614_s21  ;;  %v5158_v44 = vld [vmem:[%s6571_s1 + $0x164] ss:$16 sps:$4 sm:$0xff]   ;;  %v5160_v45 = vld [vmem:[%s6571_s1 + $0x16c] ss:$16 sps:$4 sm:$0xff]  }
  0x16   : > { %v179_v46 = vld [vmem:[%s5652_s13] sm:$0xff]  ;;  %v5163_v49 = vld [vmem:[%s6571_s1 + $0x168] ss:$16 sps:$4 sm:$0xff]   ;;  %v5166_v52 = vld [vmem:[%s6571_s1 + $0x18c] ss:$16 sps:$4 sm:$0xff]  }
  0x17   : > { %2370 = vmatpush1.bf16.msra.mxu0 %v5120_v18  ;;  %3022 = vmatpush1.bf16.msra.mxu1 %v5121_v19  ;;  %v183_v47 = vld [vmem:[%s5652_s13 + $0x20] sm:$0xff]  ;;  %v5169_v54 = vld [vmem:[%s6571_s1 + $0x188] ss:$16 sps:$4 sm:$0xff]   ;;  %v5172_v56 = vld [vmem:[%s6571_s1 + $0x1ac] ss:$16 sps:$4 sm:$0xff]  }
  0x18   : > { %2371 = vmatprep.subr.bf16.mxu0 %v5122_v20  ;;  %3023 = vmatprep.subr.bf16.mxu1 %v5124_v21  ;;  %v5162_v48 = vld [vmem:[%s6571_s1 + $0x160] ss:$16 sps:$4 sm:$0xff]   ;;  %v4201_v50 = vcombine.high %v179_v46, %v183_v47  ;;  %v5164_v51 = vld [vmem:[%s6571_s1 + $0x184] ss:$16 sps:$4 sm:$0xff]   ;;  %v5175_v58 = vld [vmem:[%s6571_s1 + $0x1a8] ss:$16 sps:$4 sm:$0xff]   ;;  %v4200_v7 = vcombine.low %v179_v46, %v183_v47 }
  0x19   : > { %v5168_v53 = vld [vmem:[%s6571_s1 + $0x180] ss:$16 sps:$4 sm:$0xff]   ;;  %v5170_v55 = vld [vmem:[%s6571_s1 + $0x1a4] ss:$16 sps:$4 sm:$0xff]   ;;  %v5178_v60 = vld [vmem:[%s6571_s1 + $0x1cc] ss:$16 sps:$4 sm:$0xff]  }
  0x1a   : > { %2393 = vmatprep.mubr.bf16.mxu0 %v4201_v50  ;;  %3045 = vmatprep.mubr.bf16.mxu1 %v4201_v50  ;;  %v5174_v57 = vld [vmem:[%s6571_s1 + $0x1a0] ss:$16 sps:$4 sm:$0xff]   ;;  %v5176_v59 = vld [vmem:[%s6571_s1 + $0x1c4] ss:$16 sps:$4 sm:$0xff]   ;;  %v5181_v62 = vld [vmem:[%s6571_s1 + $0x1c8] ss:$16 sps:$4 sm:$0xff]  }
  0x1b   : > { %2372 = vmatpush1.bf16.msra.mxu0 %v5126_v22  ;;  %3024 = vmatpush1.bf16.msra.mxu1 %v5127_v23  ;;  %v5180_v61 = vld [vmem:[%s6571_s1 + $0x1c0] ss:$16 sps:$4 sm:$0xff]   ;;  %v5182_v63 = vld [vmem:[%s6571_s1 + $0x1e4] ss:$16 sps:$4 sm:$0xff]   ;;  %v5184_v0 = vld [vmem:[%s6571_s1 + $0x1ec] ss:$16 sps:$4 sm:$0xff]  }
  0x1c   : > { %2373 = vmatprep.subr.bf16.mxu0 %v5128_v24  ;;  %3025 = vmatprep.subr.bf16.mxu1 %v5130_v25  ;;  %v5186_v1 = vld [vmem:[%s6571_s1 + $0x1e0] ss:$16 sps:$4 sm:$0xff]   ;;  %v5187_v2 = vld [vmem:[%s6571_s1 + $0x1e8] ss:$16 sps:$4 sm:$0xff]   ;;  %v5190_v3 = vld [vmem:[%s6571_s1 + $0x204] ss:$16 sps:$4 sm:$0xff]  }
  0x1d   : > { %v5193_v4 = vld [vmem:[%s6571_s1 + $0x20c] ss:$16 sps:$4 sm:$0xff]   ;;  %v187_v5 = vld [vmem:[%s5652_s13 + $0x40] sm:$0xff]  ;;  %v5191_v9 = vld [vmem:[%s6571_s1 + $0x208] ss:$16 sps:$4 sm:$0xff]  }
  0x1e   : > { %v191_v6 = vld [vmem:[%s5652_s13 + $0x60] sm:$0xff]  ;;  %v5199_v12 = vld [vmem:[%s6571_s1 + $0x22c] ss:$16 sps:$4 sm:$0xff]   ;;  %v5197_v14 = vld [vmem:[%s6571_s1 + $0x228] ss:$16 sps:$4 sm:$0xff]  }
  0x1f   : > { %2374 = vmatpush1.bf16.msra.mxu0 %v5132_v26  ;;  %3026 = vmatpush1.bf16.msra.mxu1 %v5133_v27  ;;  %v5188_v8 = vld [vmem:[%s6571_s1 + $0x200] ss:$16 sps:$4 sm:$0xff]   ;;  %v4209_v10 = vcombine.high %v187_v5, %v191_v6  ;;  %v5196_v11 = vld [vmem:[%s6571_s1 + $0x224] ss:$16 sps:$4 sm:$0xff]   ;;  %v5205_v16 = vld [vmem:[%s6571_s1 + $0x24c] ss:$16 sps:$4 sm:$0xff]   ;;  %v4208_v19 = vcombine.low %v187_v5, %v191_v6 }
  0x20   : > { %2375 = vmatprep.subr.bf16.mxu0 %v5134_v28  ;;  %3027 = vmatprep.subr.bf16.mxu1 %v5136_v29  ;;  %v5194_v13 = vld [vmem:[%s6571_s1 + $0x220] ss:$16 sps:$4 sm:$0xff]   ;;  %v5202_v15 = vld [vmem:[%s6571_s1 + $0x244] ss:$16 sps:$4 sm:$0xff]   ;;  %v5203_v21 = vld [vmem:[%s6571_s1 + $0x248] ss:$16 sps:$4 sm:$0xff]  }
  0x21   : > { %v195_v17 = vld [vmem:[%s5652_s13 + $0x80] sm:$0xff]  ;;  %v5211_v25 = vld [vmem:[%s6571_s1 + $0x26c] ss:$16 sps:$4 sm:$0xff]   ;;  %v5209_v26 = vld [vmem:[%s6571_s1 + $0x268] ss:$16 sps:$4 sm:$0xff]  }
  0x22   : > { %v199_v18 = vld [vmem:[%s5652_s13 + $0xa0] sm:$0xff]  ;;  %v5227_v46 = vld [vmem:[%s6571_s1 + $0x2c8] ss:$16 sps:$4 sm:$0xff]  }
  0x23   : > { %2376 = vmatpush1.bf16.msra.mxu0 %v5138_v30  ;;  %3028 = vmatpush1.bf16.msra.mxu1 %v5139_v31  ;;  %v5200_v20 = vld [vmem:[%s6571_s1 + $0x240] ss:$16 sps:$4 sm:$0xff]   ;;  %v4217_v22 = vcombine.high %v195_v17, %v199_v18  ;;  %v5208_v24 = vld [vmem:[%s6571_s1 + $0x264] ss:$16 sps:$4 sm:$0xff]   ;;  %v5217_v30 = vld [vmem:[%s6571_s1 + $0x28c] ss:$16 sps:$4 sm:$0xff]   ;;  %v4216_v31 = vcombine.low %v195_v17, %v199_v18 }
  0x24   : > { %2377 = vmatprep.subr.bf16.mxu0 %v5140_v32  ;;  %3029 = vmatprep.subr.bf16.mxu1 %v5142_v33  ;;  %v5206_v23 = vld [vmem:[%s6571_s1 + $0x260] ss:$16 sps:$4 sm:$0xff]   ;;  %v5214_v29 = vld [vmem:[%s6571_s1 + $0x284] ss:$16 sps:$4 sm:$0xff]   ;;  %v5251_v6 = vld [vmem:[%s6571_s1 + $0x348] ss:$16 sps:$4 sm:$0xff]  }
  0x25   : > { %v203_v27 = vld [vmem:[%s5652_s13 + $0xc0] sm:$0xff]  ;;  %v5263_v18 = vld [vmem:[%s6571_s1 + $0x388] ss:$16 sps:$4 sm:$0xff]  }
  0x26   : > { %v207_v28 = vld [vmem:[%s5652_s13 + $0xe0] sm:$0xff] }
  0x27   : > { %2378 = vmatpush1.bf16.msra.mxu0 %v5144_v34  ;;  %3030 = vmatpush1.bf16.msra.mxu1 %v5145_v35  ;;  %v4225_v32 = vcombine.high %v203_v27, %v207_v28  ;;  %v5212_v33 = vld [vmem:[%s6571_s1 + $0x280] ss:$16 sps:$4 sm:$0xff]   ;;  %v5215_v34 = vld [vmem:[%s6571_s1 + $0x288] ss:$16 sps:$4 sm:$0xff]   ;;  %v5220_v35 = vld [vmem:[%s6571_s1 + $0x2a4] ss:$16 sps:$4 sm:$0xff]  }
  0x28   : > { %2379 = vmatprep.subr.bf16.mxu0 %v5146_v36  ;;  %3031 = vmatprep.subr.bf16.mxu1 %v5148_v37  ;;  %v5223_v36 = vld [vmem:[%s6571_s1 + $0x2ac] ss:$16 sps:$4 sm:$0xff]   ;;  %v211_v37 = vld [vmem:[%s5652_s13 + $0x100] sm:$0xff] }
  0x29   : > { %v5232_v47 = vld [vmem:[%s6571_s1 + $0x2e4] ss:$16 sps:$4 sm:$0xff]   ;;  %v5248_v5 = vld [vmem:[%s6571_s1 + $0x340] ss:$16 sps:$4 sm:$0xff]  }
  0x2a   : > { %v223_v50 = vld [vmem:[%s5652_s13 + $0x160] sm:$0xff] }
  0x2b   : > { %2380 = vmatpush1.bf16.msra.mxu0 %v5150_v38  ;;  %3032 = vmatpush1.bf16.msra.mxu1 %v5151_v39  ;;  %v215_v38 = vld [vmem:[%s5652_s13 + $0x120] sm:$0xff] }
  0x2c   : > { %2381 = vmatprep.subr.bf16.mxu0 %v5152_v40  ;;  %3033 = vmatprep.subr.bf16.mxu1 %v5154_v41  ;;  %v5218_v39 = vld [vmem:[%s6571_s1 + $0x2a0] ss:$16 sps:$4 sm:$0xff]   ;;  %v5221_v40 = vld [vmem:[%s6571_s1 + $0x2a8] ss:$16 sps:$4 sm:$0xff]   ;;  %v5226_v41 = vld [vmem:[%s6571_s1 + $0x2c4] ss:$16 sps:$4 sm:$0xff]  }
  0x2d   : > { %v5260_v17 = vld [vmem:[%s6571_s1 + $0x380] ss:$16 sps:$4 sm:$0xff]  }
  0x2f   : > { %2382 = vmatpush1.bf16.msra.mxu0 %v5156_v42  ;;  %3034 = vmatpush1.bf16.msra.mxu1 %v5157_v43  ;;  %v5229_v42 = vld [vmem:[%s6571_s1 + $0x2cc] ss:$16 sps:$4 sm:$0xff]   ;;  %v4224_v43 = vcombine.low %v203_v27, %v207_v28 }
  0x30   : > { %2383 = vmatprep.subr.bf16.mxu0 %v5158_v44  ;;  %3035 = vmatprep.subr.bf16.mxu1 %v5160_v45  ;;  %v4233_v44 = vcombine.high %v211_v37, %v215_v38  ;;  %v5224_v45 = vld [vmem:[%s6571_s1 + $0x2c0] ss:$16 sps:$4 sm:$0xff]  }
  0x33   : > { %2384 = vmatpush1.bf16.msra.mxu0 %v5162_v48  ;;  %3036 = vmatpush1.bf16.msra.mxu1 %v5163_v49  ;;  %v5235_v48 = vld [vmem:[%s6571_s1 + $0x2ec] ss:$16 sps:$4 sm:$0xff]   ;;  %v219_v49 = vld [vmem:[%s5652_s13 + $0x140] sm:$0xff] }
  0x34   : > { %2385 = vmatprep.subr.bf16.mxu0 %v5164_v51  ;;  %3037 = vmatprep.subr.bf16.mxu1 %v5166_v52  ;;  %v5230_v51 = vld [vmem:[%s6571_s1 + $0x2e0] ss:$16 sps:$4 sm:$0xff]   ;;  %v5233_v52 = vld [vmem:[%s6571_s1 + $0x2e8] ss:$16 sps:$4 sm:$0xff]  }
  0x37   : > { %2386 = vmatpush1.bf16.msra.mxu0 %v5168_v53  ;;  %3038 = vmatpush1.bf16.msra.mxu1 %v5169_v54  ;;  %v5238_v53 = vld [vmem:[%s6571_s1 + $0x304] ss:$16 sps:$4 sm:$0xff]   ;;  %v5241_v54 = vld [vmem:[%s6571_s1 + $0x30c] ss:$16 sps:$4 sm:$0xff]  }
  0x38   : > { %2387 = vmatprep.subr.bf16.mxu0 %v5170_v55  ;;  %3039 = vmatprep.subr.bf16.mxu1 %v5172_v56  ;;  %v4232_v55 = vcombine.low %v211_v37, %v215_v38  ;;  %v4241_v56 = vcombine.high %v219_v49, %v223_v50  ;;  %v5286_v37 = vld [vmem:[%s6571_s1 + $0x404] ss:$16 sps:$4 sm:$0xff]   ;;  %v5289_v38 = vld [vmem:[%s6571_s1 + $0x40c] ss:$16 sps:$4 sm:$0xff]  }
  0x3b   : > { %2388 = vmatpush1.bf16.msra.mxu0 %v5174_v57  ;;  %3040 = vmatpush1.bf16.msra.mxu1 %v5175_v58  ;;  %v5236_v57 = vld [vmem:[%s6571_s1 + $0x300] ss:$16 sps:$4 sm:$0xff]   ;;  %v5239_v58 = vld [vmem:[%s6571_s1 + $0x308] ss:$16 sps:$4 sm:$0xff]  }
  0x3c   : > { %2389 = vmatprep.subr.bf16.mxu0 %v5176_v59  ;;  %3041 = vmatprep.subr.bf16.mxu1 %v5178_v60  ;;  %v5244_v59 = vld [vmem:[%s6571_s1 + $0x324] ss:$16 sps:$4 sm:$0xff]   ;;  %v5247_v60 = vld [vmem:[%s6571_s1 + $0x32c] ss:$16 sps:$4 sm:$0xff]  }
  0x3f   : > { %2390 = vmatpush1.bf16.msra.mxu0 %v5180_v61  ;;  %3042 = vmatpush1.bf16.msra.mxu1 %v5181_v62  ;;  %v227_v61 = vld [vmem:[%s5652_s13 + $0x180] sm:$0xff] }
  0x40   : > { %2391 = vmatprep.subr.bf16.mxu0 %v5182_v63  ;;  %3043 = vmatprep.subr.bf16.mxu1 %v5184_v0  ;;  %v231_v62 = vld [vmem:[%s5652_s13 + $0x1a0] sm:$0xff]  ;;  %v5245_v0 = vld [vmem:[%s6571_s1 + $0x328] ss:$16 sps:$4 sm:$0xff]  }
  0x41   : > { %v5242_v63 = vld [vmem:[%s6571_s1 + $0x320] ss:$16 sps:$4 sm:$0xff]  }
  0x43   : > { %2392 = vmatpush1.bf16.msra.mxu0 %v5186_v1  ;;  %3044 = vmatpush1.bf16.msra.mxu1 %v5187_v2  ;;  %v5250_v1 = vld [vmem:[%s6571_s1 + $0x344] ss:$16 sps:$4 sm:$0xff]   ;;  %v5253_v2 = vld [vmem:[%s6571_s1 + $0x34c] ss:$16 sps:$4 sm:$0xff]  }
  0x44   : > { %2524 = vmatprep.subr.bf16.mxu0 %v5190_v3  ;;  %3176 = vmatprep.subr.bf16.mxu1 %v5193_v4  ;;  %v4240_v3 = vcombine.low %v219_v49, %v223_v50  ;;  %v4249_v4 = vcombine.high %v227_v61, %v231_v62  ;;  %v275_v49 = vld [vmem:[%s5652_s13 + $0x300] sm:$0xff] }
  0x45   : > { %v279_v50 = vld [vmem:[%s5652_s13 + $0x320] sm:$0xff] }
  0x46   : > { %2394 = vmatmul.mubr.bf16.vlgmr.msra.gmra.mrb[0].mxu0 %v4200_v7  ;;  %3046 = vmatmul.mubr.bf16.vlgmr.msra.gmra.mrb[0].mxu1 %v4200_v7  ;;  %v5256_v7 = vld [vmem:[%s6571_s1 + $0x364] ss:$16 sps:$4 sm:$0xff]  }
  0x47   : > { %2525 = vmatpush1.bf16.msra.mxu0 %v5188_v8  ;;  %3177 = vmatpush1.bf16.msra.mxu1 %v5191_v9  ;;  %v5259_v8 = vld [vmem:[%s6571_s1 + $0x36c] ss:$16 sps:$4 sm:$0xff]   ;;  %v235_v9 = vld [vmem:[%s5652_s13 + $0x1c0] sm:$0xff] }
  0x48   : > { %2403 = vmatprep.mubr.bf16.mxu0 %v4209_v10  ;;  %2526 = vmatprep.subr.bf16.mxu0 %v5196_v11  ;;  %v5254_v11 = vld [vmem:[%s6571_s1 + $0x360] ss:$16 sps:$4 sm:$0xff]  }
  0x49   : > { %3055 = vmatprep.mubr.bf16.mxu1 %v4209_v10  ;;  %3178 = vmatprep.subr.bf16.mxu1 %v5199_v12  ;;  %v239_v10 = vld [vmem:[%s5652_s13 + $0x1e0] sm:$0xff]  ;;  %v5257_v12 = vld [vmem:[%s6571_s1 + $0x368] ss:$16 sps:$4 sm:$0xff]  }
  0x4a   : > { %v4256_v27 = vcombine.low %v235_v9, %v239_v10 }
  0x4b   : > { %2527 = vmatpush1.bf16.msra.mxu0 %v5194_v13  ;;  %3179 = vmatpush1.bf16.msra.mxu1 %v5197_v14  ;;  %v5262_v13 = vld [vmem:[%s6571_s1 + $0x384] ss:$16 sps:$4 sm:$0xff]   ;;  %v5265_v14 = vld [vmem:[%s6571_s1 + $0x38c] ss:$16 sps:$4 sm:$0xff]  }
  0x4c   : > { %2528 = vmatprep.subr.bf16.mxu0 %v5202_v15  ;;  %3180 = vmatprep.subr.bf16.mxu1 %v5205_v16  ;;  %v4248_v15 = vcombine.low %v227_v61, %v231_v62  ;;  %v4257_v16 = vcombine.high %v235_v9, %v239_v10  ;;  %v5292_v62 = vld [vmem:[%s6571_s1 + $0x424] ss:$16 sps:$4 sm:$0xff]   ;;  %v5299_v9 = vld [vmem:[%s6571_s1 + $0x448] ss:$16 sps:$4 sm:$0xff]  }
  0x4e   : > { %2404 = vmatmul.mubr.bf16.gmra.mrb[4].mxu0 %v4208_v19  ;;  %3056 = vmatmul.mubr.bf16.gmra.mrb[4].mxu1 %v4208_v19  ;;  %v5268_v19 = vld [vmem:[%s6571_s1 + $0x3a4] ss:$16 sps:$4 sm:$0xff]  }
  0x4f   : > { %2529 = vmatpush1.bf16.msra.mxu0 %v5200_v20  ;;  %3181 = vmatpush1.bf16.msra.mxu1 %v5203_v21  ;;  %v5271_v20 = vld [vmem:[%s6571_s1 + $0x3ac] ss:$16 sps:$4 sm:$0xff]   ;;  %v243_v21 = vld [vmem:[%s5652_s13 + $0x200] sm:$0xff] }
  0x50   : > { %2413 = vmatprep.mubr.bf16.mxu0 %v4217_v22  ;;  %3065 = vmatprep.mubr.bf16.mxu1 %v4217_v22  ;;  %v247_v22 = vld [vmem:[%s5652_s13 + $0x220] sm:$0xff] }
  0x51   : > { %2530 = vmatprep.subr.bf16.mxu0 %v5208_v24  ;;  %3182 = vmatprep.subr.bf16.mxu1 %v5211_v25  ;;  %v5269_v24 = vld [vmem:[%s6571_s1 + $0x3a8] ss:$16 sps:$4 sm:$0xff]   ;;  %v5274_v25 = vld [vmem:[%s6571_s1 + $0x3c4] ss:$16 sps:$4 sm:$0xff]   ;;  %v4265_v28 = vcombine.high %v243_v21, %v247_v22 }
  0x53   : > { %2531 = vmatpush1.bf16.msra.mxu0 %v5206_v23  ;;  %3183 = vmatpush1.bf16.msra.mxu1 %v5209_v26  ;;  %v5266_v23 = vld [vmem:[%s6571_s1 + $0x3a0] ss:$16 sps:$4 sm:$0xff]   ;;  %v5277_v26 = vld [vmem:[%s6571_s1 + $0x3cc] ss:$16 sps:$4 sm:$0xff]  }
  0x54   : > { %2532 = vmatprep.subr.bf16.mxu0 %v5214_v29  ;;  %3184 = vmatprep.subr.bf16.mxu1 %v5217_v30  ;;  %v5272_v29 = vld [vmem:[%s6571_s1 + $0x3c0] ss:$16 sps:$4 sm:$0xff]   ;;  %v5275_v30 = vld [vmem:[%s6571_s1 + $0x3c8] ss:$16 sps:$4 sm:$0xff]  }
  0x56   : > { %2414 = vmatmul.mubr.bf16.gmra.mrb[8].mxu0 %v4216_v31  ;;  %3066 = vmatmul.mubr.bf16.gmra.mrb[8].mxu1 %v4216_v31  ;;  %v5280_v31 = vld [vmem:[%s6571_s1 + $0x3e4] ss:$16 sps:$4 sm:$0xff]  }
  0x57   : > { %2423 = vmatprep.mubr.bf16.mxu0 %v4225_v32  ;;  %3075 = vmatprep.mubr.bf16.mxu1 %v4225_v32  ;;  %v5283_v32 = vld [vmem:[%s6571_s1 + $0x3ec] ss:$16 sps:$4 sm:$0xff]  }
  0x58   : > { %2533 = vmatpush1.bf16.msra.mxu0 %v5212_v33  ;;  %3185 = vmatpush1.bf16.msra.mxu1 %v5215_v34  ;;  %v251_v33 = vld [vmem:[%s5652_s13 + $0x240] sm:$0xff] }
  0x59   : > { %2534 = vmatprep.subr.bf16.mxu0 %v5220_v35  ;;  %3186 = vmatprep.subr.bf16.mxu1 %v5223_v36  ;;  %v255_v34 = vld [vmem:[%s5652_s13 + $0x260] sm:$0xff]  ;;  %v5281_v36 = vld [vmem:[%s6571_s1 + $0x3e8] ss:$16 sps:$4 sm:$0xff]  }
  0x5a   : > { %v5278_v35 = vld [vmem:[%s6571_s1 + $0x3e0] ss:$16 sps:$4 sm:$0xff]  }
  0x5c   : > { %2535 = vmatpush1.bf16.msra.mxu0 %v5218_v39  ;;  %3187 = vmatpush1.bf16.msra.mxu1 %v5221_v40  ;;  %v4264_v39 = vcombine.low %v243_v21, %v247_v22  ;;  %v4273_v40 = vcombine.high %v251_v33, %v255_v34  ;;  %v5308_v21 = vld [vmem:[%s6571_s1 + $0x480] ss:$16 sps:$4 sm:$0xff]   ;;  %v5311_v22 = vld [vmem:[%s6571_s1 + $0x488] ss:$16 sps:$4 sm:$0xff]  }
  0x5d   : > { %2536 = vmatprep.subr.bf16.mxu0 %v5226_v41  ;;  %3188 = vmatprep.subr.bf16.mxu1 %v5229_v42  ;;  %v259_v41 = vld [vmem:[%s5652_s13 + $0x280] sm:$0xff] }
  0x5e   : > { %2424 = vmatmul.mubr.bf16.gmra.mrb[12].mxu0 %v4224_v43  ;;  %3076 = vmatmul.mubr.bf16.gmra.mrb[12].mxu1 %v4224_v43  ;;  %v263_v42 = vld [vmem:[%s5652_s13 + $0x2a0] sm:$0xff]  ;;  %v4272_v43 = vcombine.low %v251_v33, %v255_v34  ;;  %v5323_v34 = vld [vmem:[%s6571_s1 + $0x4c8] ss:$16 sps:$4 sm:$0xff]  }
  0x5f   : > { %2433 = vmatprep.mubr.bf16.mxu0 %v4233_v44  ;;  %3085 = vmatprep.mubr.bf16.mxu1 %v4233_v44  ;;  %v4281_v44 = vcombine.high %v259_v41, %v263_v42  ;;  %v5320_v33 = vld [vmem:[%s6571_s1 + $0x4c0] ss:$16 sps:$4 sm:$0xff]  }
  0x60   : > { %2537 = vmatpush1.bf16.msra.mxu0 %v5224_v45  ;;  %3189 = vmatpush1.bf16.msra.mxu1 %v5227_v46  ;;  %v267_v45 = vld [vmem:[%s5652_s13 + $0x2c0] sm:$0xff] }
  0x61   : > { %2538 = vmatprep.subr.bf16.mxu0 %v5232_v47  ;;  %3190 = vmatprep.subr.bf16.mxu1 %v5235_v48  ;;  %v271_v46 = vld [vmem:[%s5652_s13 + $0x2e0] sm:$0xff]  ;;  %v4280_v47 = vcombine.low %v259_v41, %v263_v42  ;;  %v5337_v42 = vld [vmem:[%s6571_s1 + $0x50c] ss:$16 sps:$4 sm:$0xff]  }
  0x62   : > { %v4289_v48 = vcombine.high %v267_v45, %v271_v46  ;;  %v5334_v41 = vld [vmem:[%s6571_s1 + $0x504] ss:$16 sps:$4 sm:$0xff]  }
  0x64   : > { %2539 = vmatpush1.bf16.msra.mxu0 %v5230_v51  ;;  %3191 = vmatpush1.bf16.msra.mxu1 %v5233_v52  ;;  %v4288_v51 = vcombine.low %v267_v45, %v271_v46  ;;  %v4297_v52 = vcombine.high %v275_v49, %v279_v50  ;;  %v5332_v45 = vld [vmem:[%s6571_s1 + $0x500] ss:$16 sps:$4 sm:$0xff]   ;;  %v5335_v46 = vld [vmem:[%s6571_s1 + $0x508] ss:$16 sps:$4 sm:$0xff]  }
  0x65   : > { %2540 = vmatprep.subr.bf16.mxu0 %v5238_v53  ;;  %3192 = vmatprep.subr.bf16.mxu1 %v5241_v54  ;;  %v180_v53 = vld [vmem:[%s5652_s13 + $0x8] sm:$0xff] }
  0x66   : > { %2434 = vmatmul.mubr.bf16.gmra.mrb[16].mxu0 %v4232_v55  ;;  %3086 = vmatmul.mubr.bf16.gmra.mrb[16].mxu1 %v4232_v55  ;;  %v184_v54 = vld [vmem:[%s5652_s13 + $0x28] sm:$0xff]  ;;  %v4296_v55 = vcombine.low %v275_v49, %v279_v50 }
  0x67   : > { %2443 = vmatprep.mubr.bf16.mxu0 %v4241_v56  ;;  %3095 = vmatprep.mubr.bf16.mxu1 %v4241_v56  ;;  %v4203_v56 = vcombine.high %v180_v53, %v184_v54  ;;  %v4202_v61 = vcombine.low %v180_v53, %v184_v54  ;;  %v228_v49 = vld [vmem:[%s5652_s13 + $0x188] sm:$0xff]  ;;  %v5346_v53 = vld [vmem:[%s6571_s1 + $0x544] ss:$16 sps:$4 sm:$0xff]  }
  0x68   : > { %2541 = vmatpush1.bf16.msra.mxu0 %v5236_v57  ;;  %3193 = vmatpush1.bf16.msra.mxu1 %v5239_v58  ;;  %v188_v57 = vld [vmem:[%s5652_s13 + $0x48] sm:$0xff] }
  0x69   : > { %2542 = vmatprep.subr.bf16.mxu0 %v5244_v59  ;;  %3194 = vmatprep.subr.bf16.mxu1 %v5247_v60  ;;  %v192_v58 = vld [vmem:[%s5652_s13 + $0x68] sm:$0xff]  ;;  %v5284_v59 = vld [vmem:[%s6571_s1 + $0x400] ss:$16 sps:$4 sm:$0xff]  }
  0x6a   : > { %v5287_v60 = vld [vmem:[%s6571_s1 + $0x408] ss:$16 sps:$4 sm:$0xff]   ;;  %v5349_v54 = vld [vmem:[%s6571_s1 + $0x54c] ss:$16 sps:$4 sm:$0xff]  }
  0x6b   : > { %v232_v50 = vld [vmem:[%s5652_s13 + $0x1a8] sm:$0xff] }
  0x6c   : > { %2543 = vmatpush1.bf16.msra.mxu0 %v5242_v63  ;;  %3195 = vmatpush1.bf16.msra.mxu1 %v5245_v0  ;;  %v5295_v63 = vld [vmem:[%s6571_s1 + $0x42c] ss:$16 sps:$4 sm:$0xff]   ;;  %v4211_v0 = vcombine.high %v188_v57, %v192_v58 }
  0x6d   : > { %2544 = vmatprep.subr.bf16.mxu0 %v5250_v1  ;;  %3196 = vmatprep.subr.bf16.mxu1 %v5253_v2  ;;  %v5290_v1 = vld [vmem:[%s6571_s1 + $0x420] ss:$16 sps:$4 sm:$0xff]   ;;  %v5293_v2 = vld [vmem:[%s6571_s1 + $0x428] ss:$16 sps:$4 sm:$0xff]  }
  0x6e   : > { %2444 = vmatmul.mubr.bf16.gmra.mrb[20].mxu0 %v4240_v3  ;;  %3096 = vmatmul.mubr.bf16.gmra.mrb[20].mxu1 %v4240_v3  ;;  %v5298_v3 = vld [vmem:[%s6571_s1 + $0x444] ss:$16 sps:$4 sm:$0xff]  }
  0x6f   : > { %2453 = vmatprep.mubr.bf16.mxu0 %v4249_v4  ;;  %3105 = vmatprep.mubr.bf16.mxu1 %v4249_v4  ;;  %v5301_v4 = vld [vmem:[%s6571_s1 + $0x44c] ss:$16 sps:$4 sm:$0xff]  }
  0x70   : > { %2545 = vmatpush1.bf16.msra.mxu0 %v5248_v5  ;;  %3197 = vmatpush1.bf16.msra.mxu1 %v5251_v6  ;;  %v196_v5 = vld [vmem:[%s5652_s13 + $0x88] sm:$0xff] }
  0x71   : > { %2546 = vmatprep.subr.bf16.mxu0 %v5256_v7  ;;  %3198 = vmatprep.subr.bf16.mxu1 %v5259_v8  ;;  %v200_v6 = vld [vmem:[%s5652_s13 + $0xa8] sm:$0xff]  ;;  %v5296_v7 = vld [vmem:[%s6571_s1 + $0x440] ss:$16 sps:$4 sm:$0xff]   ;;  %v4210_v8 = vcombine.low %v188_v57, %v192_v58 }
  0x72   : > { %v4219_v10 = vcombine.high %v196_v5, %v200_v6  ;;  %v5344_v57 = vld [vmem:[%s6571_s1 + $0x540] ss:$16 sps:$4 sm:$0xff]   ;;  %v5347_v58 = vld [vmem:[%s6571_s1 + $0x548] ss:$16 sps:$4 sm:$0xff]  }
  0x74   : > { %2547 = vmatpush1.bf16.msra.mxu0 %v5254_v11  ;;  %3199 = vmatpush1.bf16.msra.mxu1 %v5257_v12  ;;  %v5304_v11 = vld [vmem:[%s6571_s1 + $0x464] ss:$16 sps:$4 sm:$0xff]   ;;  %v5307_v12 = vld [vmem:[%s6571_s1 + $0x46c] ss:$16 sps:$4 sm:$0xff]  }
  0x75   : > { %2548 = vmatprep.subr.bf16.mxu0 %v5262_v13  ;;  %3200 = vmatprep.subr.bf16.mxu1 %v5265_v14  ;;  %v5302_v13 = vld [vmem:[%s6571_s1 + $0x460] ss:$16 sps:$4 sm:$0xff]   ;;  %v5305_v14 = vld [vmem:[%s6571_s1 + $0x468] ss:$16 sps:$4 sm:$0xff]  }
  0x76   : > { %2454 = vmatmul.mubr.bf16.gmra.mrb[24].mxu0 %v4248_v15  ;;  %3106 = vmatmul.mubr.bf16.gmra.mrb[24].mxu1 %v4248_v15  ;;  %v204_v15 = vld [vmem:[%s5652_s13 + $0xc8] sm:$0xff] }
  0x77   : > { %2463 = vmatprep.mubr.bf16.mxu0 %v4257_v16  ;;  %3115 = vmatprep.mubr.bf16.mxu1 %v4257_v16  ;;  %v208_v16 = vld [vmem:[%s5652_s13 + $0xe8] sm:$0xff] }
  0x78   : > { %2549 = vmatpush1.bf16.msra.mxu0 %v5260_v17  ;;  %3201 = vmatpush1.bf16.msra.mxu1 %v5263_v18  ;;  %v5310_v17 = vld [vmem:[%s6571_s1 + $0x484] ss:$16 sps:$4 sm:$0xff]   ;;  %v5313_v18 = vld [vmem:[%s6571_s1 + $0x48c] ss:$16 sps:$4 sm:$0xff]  }
  0x79   : > { %2550 = vmatprep.subr.bf16.mxu0 %v5268_v19  ;;  %3202 = vmatprep.subr.bf16.mxu1 %v5271_v20  ;;  %v4218_v19 = vcombine.low %v196_v5, %v200_v6  ;;  %v4227_v20 = vcombine.high %v204_v15, %v208_v16  ;;  %v5356_v5 = vld [vmem:[%s6571_s1 + $0x580] ss:$16 sps:$4 sm:$0xff]   ;;  %v5359_v6 = vld [vmem:[%s6571_s1 + $0x588] ss:$16 sps:$4 sm:$0xff]  }
  0x7c   : > { %2551 = vmatpush1.bf16.msra.mxu0 %v5266_v23  ;;  %3203 = vmatpush1.bf16.msra.mxu1 %v5269_v24  ;;  %v5316_v23 = vld [vmem:[%s6571_s1 + $0x4a4] ss:$16 sps:$4 sm:$0xff]   ;;  %v5319_v24 = vld [vmem:[%s6571_s1 + $0x4ac] ss:$16 sps:$4 sm:$0xff]  }
  0x7d   : > { %2552 = vmatprep.subr.bf16.mxu0 %v5274_v25  ;;  %3204 = vmatprep.subr.bf16.mxu1 %v5277_v26  ;;  %v212_v25 = vld [vmem:[%s5652_s13 + $0x108] sm:$0xff] }
  0x7e   : > { %2464 = vmatmul.mubr.bf16.gmra.mrb[28].mxu0 %v4256_v27  ;;  %3116 = vmatmul.mubr.bf16.gmra.mrb[28].mxu1 %v4256_v27  ;;  %v216_v26 = vld [vmem:[%s5652_s13 + $0x128] sm:$0xff]  ;;  %v5314_v27 = vld [vmem:[%s6571_s1 + $0x4a0] ss:$16 sps:$4 sm:$0xff]  }
  0x7f   : > { %2473 = vmatprep.mubr.bf16.mxu0 %v4265_v28  ;;  %3125 = vmatprep.mubr.bf16.mxu1 %v4265_v28  ;;  %v5317_v28 = vld [vmem:[%s6571_s1 + $0x4a8] ss:$16 sps:$4 sm:$0xff]  }
  0x80   : > { %2553 = vmatpush1.bf16.msra.mxu0 %v5272_v29  ;;  %3205 = vmatpush1.bf16.msra.mxu1 %v5275_v30  ;;  %v5322_v29 = vld [vmem:[%s6571_s1 + $0x4c4] ss:$16 sps:$4 sm:$0xff]   ;;  %v5325_v30 = vld [vmem:[%s6571_s1 + $0x4cc] ss:$16 sps:$4 sm:$0xff]  }
  0x81   : > { %2554 = vmatprep.subr.bf16.mxu0 %v5280_v31  ;;  %3206 = vmatprep.subr.bf16.mxu1 %v5283_v32  ;;  %v4226_v31 = vcombine.low %v204_v15, %v208_v16  ;;  %v4235_v32 = vcombine.high %v212_v25, %v216_v26 }
  0x84   : > { %2555 = vmatpush1.bf16.msra.mxu0 %v5278_v35  ;;  %3207 = vmatpush1.bf16.msra.mxu1 %v5281_v36  ;;  %v5328_v35 = vld [vmem:[%s6571_s1 + $0x4e4] ss:$16 sps:$4 sm:$0xff]   ;;  %v5331_v36 = vld [vmem:[%s6571_s1 + $0x4ec] ss:$16 sps:$4 sm:$0xff]  }
  0x85   : > { %2687 = vmatprep.subr.bf16.mxu0 %v5286_v37  ;;  %3339 = vmatprep.subr.bf16.mxu1 %v5289_v38  ;;  %v220_v37 = vld [vmem:[%s5652_s13 + $0x148] sm:$0xff] }
  0x86   : > { %2474 = vmatmul.mubr.bf16.gmra.mrb[32].mxu0 %v4264_v39  ;;  %3126 = vmatmul.mubr.bf16.gmra.mrb[32].mxu1 %v4264_v39  ;;  %v224_v38 = vld [vmem:[%s5652_s13 + $0x168] sm:$0xff]  ;;  %v5326_v39 = vld [vmem:[%s6571_s1 + $0x4e0] ss:$16 sps:$4 sm:$0xff]  }
  0x87   : > { %2483 = vmatprep.mubr.bf16.mxu0 %v4273_v40  ;;  %3135 = vmatprep.mubr.bf16.mxu1 %v4273_v40  ;;  %v5329_v40 = vld [vmem:[%s6571_s1 + $0x4e8] ss:$16 sps:$4 sm:$0xff]  }
  0x8e   : > { %2484 = vmatmul.mubr.bf16.gmra.mrb[36].mxu0 %v4272_v43  ;;  %3136 = vmatmul.mubr.bf16.gmra.mrb[36].mxu1 %v4272_v43  ;;  %v4234_v43 = vcombine.low %v212_v25, %v216_v26  ;;  %v5382_v25 = vld [vmem:[%s6571_s1 + $0x604] ss:$16 sps:$4 sm:$0xff]   ;;  %v5385_v26 = vld [vmem:[%s6571_s1 + $0x60c] ss:$16 sps:$4 sm:$0xff]  }
  0x8f   : > { %2493 = vmatprep.mubr.bf16.mxu0 %v4281_v44  ;;  %3145 = vmatprep.mubr.bf16.mxu1 %v4281_v44  ;;  %v4243_v44 = vcombine.high %v220_v37, %v224_v38 }
  0x96   : > { %2494 = vmatmul.mubr.bf16.gmra.mrb[40].mxu0 %v4280_v47  ;;  %3146 = vmatmul.mubr.bf16.gmra.mrb[40].mxu1 %v4280_v47  ;;  %v5340_v47 = vld [vmem:[%s6571_s1 + $0x524] ss:$16 sps:$4 sm:$0xff]  }
  0x97   : > { %2503 = vmatprep.mubr.bf16.mxu0 %v4289_v48  ;;  %3155 = vmatprep.mubr.bf16.mxu1 %v4289_v48  ;;  %v5343_v48 = vld [vmem:[%s6571_s1 + $0x52c] ss:$16 sps:$4 sm:$0xff]  }
  0x9e   : > { %2504 = vmatmul.mubr.bf16.gmra.mrb[44].mxu0 %v4288_v51  ;;  %3156 = vmatmul.mubr.bf16.gmra.mrb[44].mxu1 %v4288_v51  ;;  %v5338_v51 = vld [vmem:[%s6571_s1 + $0x520] ss:$16 sps:$4 sm:$0xff]  }
  0x9f   : > { %2513 = vmatprep.mubr.bf16.mxu0 %v4297_v52  ;;  %3165 = vmatprep.mubr.bf16.mxu1 %v4297_v52  ;;  %v5341_v52 = vld [vmem:[%s6571_s1 + $0x528] ss:$16 sps:$4 sm:$0xff]  }
  0xa6   : > { %2514 = vmatmul.mubr.bf16.gmra.mrb[48].mxu0 %v4296_v55  ;;  %3166 = vmatmul.mubr.bf16.gmra.mrb[48].mxu1 %v4296_v55  ;;  %v4242_v55 = vcombine.low %v220_v37, %v224_v38  ;;  %v276_v37 = vld [vmem:[%s5652_s13 + $0x308] sm:$0xff] }
  0xa7   : > { %2556 = vmatprep.mubr.bf16.mxu0 %v4203_v56  ;;  %3208 = vmatprep.mubr.bf16.mxu1 %v4203_v56  ;;  %v4251_v56 = vcombine.high %v228_v49, %v232_v50  ;;  %v280_v38 = vld [vmem:[%s5652_s13 + $0x328] sm:$0xff] }
  0xae   : > { %2557 = vmatmul.mubr.bf16.vlgmr.msra.gmra.mrb[0].mxu0 %v4202_v61  ;;  %3209 = vmatmul.mubr.bf16.vlgmr.msra.gmra.mrb[0].mxu1 %v4202_v61  ;;  %v236_v61 = vld [vmem:[%s5652_s13 + $0x1c8] sm:$0xff] }
  0xaf   : > { %2688 = vmatpush1.bf16.msra.mxu0 %v5284_v59  ;;  %3340 = vmatpush1.bf16.msra.mxu1 %v5287_v60  ;;  %v5352_v59 = vld [vmem:[%s6571_s1 + $0x564] ss:$16 sps:$4 sm:$0xff]   ;;  %v5355_v60 = vld [vmem:[%s6571_s1 + $0x56c] ss:$16 sps:$4 sm:$0xff]  }
  0xb0   : > { %2566 = vmatprep.mubr.bf16.mxu0 %v4211_v0  ;;  %2689 = vmatprep.subr.bf16.mxu0 %v5292_v62  ;;  %v240_v62 = vld [vmem:[%s5652_s13 + $0x1e8] sm:$0xff] }
  0xb1   : > { %3218 = vmatprep.mubr.bf16.mxu1 %v4211_v0  ;;  %3341 = vmatprep.subr.bf16.mxu1 %v5295_v63  ;;  %v5350_v63 = vld [vmem:[%s6571_s1 + $0x560] ss:$16 sps:$4 sm:$0xff]   ;;  %v5353_v0 = vld [vmem:[%s6571_s1 + $0x568] ss:$16 sps:$4 sm:$0xff]   ;;  %v4258_v15 = vcombine.low %v236_v61, %v240_v62 }
  0xb3   : > { %2690 = vmatpush1.bf16.msra.mxu0 %v5290_v1  ;;  %3342 = vmatpush1.bf16.msra.mxu1 %v5293_v2  ;;  %v5358_v1 = vld [vmem:[%s6571_s1 + $0x584] ss:$16 sps:$4 sm:$0xff]   ;;  %v5361_v2 = vld [vmem:[%s6571_s1 + $0x58c] ss:$16 sps:$4 sm:$0xff]  }
  0xb4   : > { %2691 = vmatprep.subr.bf16.mxu0 %v5298_v3  ;;  %3343 = vmatprep.subr.bf16.mxu1 %v5301_v4  ;;  %v4250_v3 = vcombine.low %v228_v49, %v232_v50  ;;  %v4259_v4 = vcombine.high %v236_v61, %v240_v62  ;;  %v5383_v49 = vld [vmem:[%s6571_s1 + $0x608] ss:$16 sps:$4 sm:$0xff]  }
  0xb5   : > { %v5395_v61 = vld [vmem:[%s6571_s1 + $0x648] ss:$16 sps:$4 sm:$0xff]  }
  0xb6   : > { %2567 = vmatmul.mubr.bf16.gmra.mrb[4].mxu0 %v4210_v8  ;;  %3219 = vmatmul.mubr.bf16.gmra.mrb[4].mxu1 %v4210_v8  ;;  %v5367_v8 = vld [vmem:[%s6571_s1 + $0x5ac] ss:$16 sps:$4 sm:$0xff]  }
  0xb7   : > { %2692 = vmatpush1.bf16.msra.mxu0 %v5296_v7  ;;  %3344 = vmatpush1.bf16.msra.mxu1 %v5299_v9  ;;  %v5364_v7 = vld [vmem:[%s6571_s1 + $0x5a4] ss:$16 sps:$4 sm:$0xff]   ;;  %v244_v9 = vld [vmem:[%s5652_s13 + $0x208] sm:$0xff] }
  0xb8   : > { %2576 = vmatprep.mubr.bf16.mxu0 %v4219_v10  ;;  %3228 = vmatprep.mubr.bf16.mxu1 %v4219_v10  ;;  %v248_v10 = vld [vmem:[%s5652_s13 + $0x228] sm:$0xff] }
  0xb9   : > { %2693 = vmatprep.subr.bf16.mxu0 %v5304_v11  ;;  %3345 = vmatprep.subr.bf16.mxu1 %v5307_v12  ;;  %v5362_v11 = vld [vmem:[%s6571_s1 + $0x5a0] ss:$16 sps:$4 sm:$0xff]   ;;  %v5365_v12 = vld [vmem:[%s6571_s1 + $0x5a8] ss:$16 sps:$4 sm:$0xff]   ;;  %v4267_v16 = vcombine.high %v244_v9, %v248_v10 }
  0xbb   : > { %2694 = vmatpush1.bf16.msra.mxu0 %v5302_v13  ;;  %3346 = vmatpush1.bf16.msra.mxu1 %v5305_v14  ;;  %v5370_v13 = vld [vmem:[%s6571_s1 + $0x5c4] ss:$16 sps:$4 sm:$0xff]   ;;  %v5373_v14 = vld [vmem:[%s6571_s1 + $0x5cc] ss:$16 sps:$4 sm:$0xff]  }
  0xbc   : > { %2695 = vmatprep.subr.bf16.mxu0 %v5310_v17  ;;  %3347 = vmatprep.subr.bf16.mxu1 %v5313_v18  ;;  %v5368_v17 = vld [vmem:[%s6571_s1 + $0x5c0] ss:$16 sps:$4 sm:$0xff]   ;;  %v5371_v18 = vld [vmem:[%s6571_s1 + $0x5c8] ss:$16 sps:$4 sm:$0xff]  }
  0xbe   : > { %2577 = vmatmul.mubr.bf16.gmra.mrb[8].mxu0 %v4218_v19  ;;  %3229 = vmatmul.mubr.bf16.gmra.mrb[8].mxu1 %v4218_v19  ;;  %v5376_v19 = vld [vmem:[%s6571_s1 + $0x5e4] ss:$16 sps:$4 sm:$0xff]  }
  0xbf   : > { %2586 = vmatprep.mubr.bf16.mxu0 %v4227_v20  ;;  %3238 = vmatprep.mubr.bf16.mxu1 %v4227_v20  ;;  %v5379_v20 = vld [vmem:[%s6571_s1 + $0x5ec] ss:$16 sps:$4 sm:$0xff]  }
  0xc0   : > { %2696 = vmatpush1.bf16.msra.mxu0 %v5308_v21  ;;  %3348 = vmatpush1.bf16.msra.mxu1 %v5311_v22  ;;  %v252_v21 = vld [vmem:[%s5652_s13 + $0x248] sm:$0xff] }
  0xc1   : > { %2697 = vmatprep.subr.bf16.mxu0 %v5316_v23  ;;  %3349 = vmatprep.subr.bf16.mxu1 %v5319_v24  ;;  %v256_v22 = vld [vmem:[%s5652_s13 + $0x268] sm:$0xff]  ;;  %v5374_v23 = vld [vmem:[%s6571_s1 + $0x5e0] ss:$16 sps:$4 sm:$0xff]  }
  0xc2   : > { %v5377_v24 = vld [vmem:[%s6571_s1 + $0x5e8] ss:$16 sps:$4 sm:$0xff]  }
  0xc4   : > { %2698 = vmatpush1.bf16.msra.mxu0 %v5314_v27  ;;  %3350 = vmatpush1.bf16.msra.mxu1 %v5317_v28  ;;  %v4266_v27 = vcombine.low %v244_v9, %v248_v10  ;;  %v4275_v28 = vcombine.high %v252_v21, %v256_v22  ;;  %v5404_v9 = vld [vmem:[%s6571_s1 + $0x680] ss:$16 sps:$4 sm:$0xff]   ;;  %v5407_v10 = vld [vmem:[%s6571_s1 + $0x688] ss:$16 sps:$4 sm:$0xff]  }
  0xc5   : > { %2699 = vmatprep.subr.bf16.mxu0 %v5322_v29  ;;  %3351 = vmatprep.subr.bf16.mxu1 %v5325_v30  ;;  %v260_v29 = vld [vmem:[%s5652_s13 + $0x288] sm:$0xff] }
  0xc6   : > { %2587 = vmatmul.mubr.bf16.gmra.mrb[12].mxu0 %v4226_v31  ;;  %3239 = vmatmul.mubr.bf16.gmra.mrb[12].mxu1 %v4226_v31  ;;  %v264_v30 = vld [vmem:[%s5652_s13 + $0x2a8] sm:$0xff]  ;;  %v4274_v31 = vcombine.low %v252_v21, %v256_v22  ;;  %v5416_v21 = vld [vmem:[%s6571_s1 + $0x6c0] ss:$16 sps:$4 sm:$0xff]  }
  0xc7   : > { %2596 = vmatprep.mubr.bf16.mxu0 %v4235_v32  ;;  %3248 = vmatprep.mubr.bf16.mxu1 %v4235_v32  ;;  %v4283_v32 = vcombine.high %v260_v29, %v264_v30  ;;  %v5419_v22 = vld [vmem:[%s6571_s1 + $0x6c8] ss:$16 sps:$4 sm:$0xff]  }
  0xc8   : > { %2700 = vmatpush1.bf16.msra.mxu0 %v5320_v33  ;;  %3352 = vmatpush1.bf16.msra.mxu1 %v5323_v34  ;;  %v268_v33 = vld [vmem:[%s5652_s13 + $0x2c8] sm:$0xff] }
  0xc9   : > { %2701 = vmatprep.subr.bf16.mxu0 %v5328_v35  ;;  %3353 = vmatprep.subr.bf16.mxu1 %v5331_v36  ;;  %v272_v34 = vld [vmem:[%s5652_s13 + $0x2e8] sm:$0xff]  ;;  %v4282_v35 = vcombine.low %v260_v29, %v264_v30  ;;  %v5430_v29 = vld [vmem:[%s6571_s1 + $0x704] ss:$16 sps:$4 sm:$0xff]  }
  0xca   : > { %v4291_v36 = vcombine.high %v268_v33, %v272_v34  ;;  %v5433_v30 = vld [vmem:[%s6571_s1 + $0x70c] ss:$16 sps:$4 sm:$0xff]  }
  0xcc   : > { %2702 = vmatpush1.bf16.msra.mxu0 %v5326_v39  ;;  %3354 = vmatpush1.bf16.msra.mxu1 %v5329_v40  ;;  %v4290_v39 = vcombine.low %v268_v33, %v272_v34  ;;  %v4299_v40 = vcombine.high %v276_v37, %v280_v38  ;;  %v5428_v33 = vld [vmem:[%s6571_s1 + $0x700] ss:$16 sps:$4 sm:$0xff]   ;;  %v5431_v34 = vld [vmem:[%s6571_s1 + $0x708] ss:$16 sps:$4 sm:$0xff]  }
  0xcd   : > { %2703 = vmatprep.subr.bf16.mxu0 %v5334_v41  ;;  %3355 = vmatprep.subr.bf16.mxu1 %v5337_v42  ;;  %v181_v41 = vld [vmem:[%s5652_s13 + $0x10] sm:$0xff] }
  0xce   : > { %2597 = vmatmul.mubr.bf16.gmra.mrb[16].mxu0 %v4234_v43  ;;  %3249 = vmatmul.mubr.bf16.gmra.mrb[16].mxu1 %v4234_v43  ;;  %v185_v42 = vld [vmem:[%s5652_s13 + $0x30] sm:$0xff]  ;;  %v4298_v43 = vcombine.low %v276_v37, %v280_v38 }
  0xcf   : > { %2606 = vmatprep.mubr.bf16.mxu0 %v4243_v44  ;;  %3258 = vmatprep.mubr.bf16.mxu1 %v4243_v44  ;;  %v4205_v44 = vcombine.high %v181_v41, %v185_v42  ;;  %v229_v37 = vld [vmem:[%s5652_s13 + $0x190] sm:$0xff] }
  0xd0   : > { %2704 = vmatpush1.bf16.msra.mxu0 %v5332_v45  ;;  %3356 = vmatpush1.bf16.msra.mxu1 %v5335_v46  ;;  %v189_v45 = vld [vmem:[%s5652_s13 + $0x50] sm:$0xff] }
  0xd1   : > { %2705 = vmatprep.subr.bf16.mxu0 %v5340_v47  ;;  %3357 = vmatprep.subr.bf16.mxu1 %v5343_v48  ;;  %v193_v46 = vld [vmem:[%s5652_s13 + $0x70] sm:$0xff]  ;;  %v4204_v47 = vcombine.low %v181_v41, %v185_v42  ;;  %v5445_v42 = vld [vmem:[%s6571_s1 + $0x74c] ss:$16 sps:$4 sm:$0xff]  }
  0xd2   : > { %v5380_v48 = vld [vmem:[%s6571_s1 + $0x600] ss:$16 sps:$4 sm:$0xff]   ;;  %v4213_v50 = vcombine.high %v189_v45, %v193_v46  ;;  %v5442_v41 = vld [vmem:[%s6571_s1 + $0x744] ss:$16 sps:$4 sm:$0xff]  }
  0xd3   : > { %v233_v38 = vld [vmem:[%s5652_s13 + $0x1b0] sm:$0xff] }
  0xd4   : > { %2706 = vmatpush1.bf16.msra.mxu0 %v5338_v51  ;;  %3358 = vmatpush1.bf16.msra.mxu1 %v5341_v52  ;;  %v5388_v51 = vld [vmem:[%s6571_s1 + $0x624] ss:$16 sps:$4 sm:$0xff]   ;;  %v5391_v52 = vld [vmem:[%s6571_s1 + $0x62c] ss:$16 sps:$4 sm:$0xff]  }
  0xd5   : > { %2707 = vmatprep.subr.bf16.mxu0 %v5346_v53  ;;  %3359 = vmatprep.subr.bf16.mxu1 %v5349_v54  ;;  %v5386_v53 = vld [vmem:[%s6571_s1 + $0x620] ss:$16 sps:$4 sm:$0xff]   ;;  %v5389_v54 = vld [vmem:[%s6571_s1 + $0x628] ss:$16 sps:$4 sm:$0xff]  }
  0xd6   : > { %2607 = vmatmul.mubr.bf16.gmra.mrb[20].mxu0 %v4242_v55  ;;  %3259 = vmatmul.mubr.bf16.gmra.mrb[20].mxu1 %v4242_v55  ;;  %v5394_v55 = vld [vmem:[%s6571_s1 + $0x644] ss:$16 sps:$4 sm:$0xff]  }
  0xd7   : > { %2616 = vmatprep.mubr.bf16.mxu0 %v4251_v56  ;;  %3268 = vmatprep.mubr.bf16.mxu1 %v4251_v56  ;;  %v5397_v56 = vld [vmem:[%s6571_s1 + $0x64c] ss:$16 sps:$4 sm:$0xff]  }
  0xd8   : > { %2708 = vmatpush1.bf16.msra.mxu0 %v5344_v57  ;;  %3360 = vmatpush1.bf16.msra.mxu1 %v5347_v58  ;;  %v197_v57 = vld [vmem:[%s5652_s13 + $0x90] sm:$0xff] }
  0xd9   : > { %2709 = vmatprep.subr.bf16.mxu0 %v5352_v59  ;;  %3361 = vmatprep.subr.bf16.mxu1 %v5355_v60  ;;  %v201_v58 = vld [vmem:[%s5652_s13 + $0xb0] sm:$0xff]  ;;  %v4212_v59 = vcombine.low %v189_v45, %v193_v46  ;;  %v5443_v46 = vld [vmem:[%s6571_s1 + $0x748] ss:$16 sps:$4 sm:$0xff]  }
  0xda   : > { %v5392_v60 = vld [vmem:[%s6571_s1 + $0x640] ss:$16 sps:$4 sm:$0xff]   ;;  %v4221_v62 = vcombine.high %v197_v57, %v201_v58 }
  0xdb   : > { %v5440_v45 = vld [vmem:[%s6571_s1 + $0x740] ss:$16 sps:$4 sm:$0xff]  }
  0xdc   : > { %2710 = vmatpush1.bf16.msra.mxu0 %v5350_v63  ;;  %3362 = vmatpush1.bf16.msra.mxu1 %v5353_v0  ;;  %v5400_v63 = vld [vmem:[%s6571_s1 + $0x664] ss:$16 sps:$4 sm:$0xff]   ;;  %v5403_v0 = vld [vmem:[%s6571_s1 + $0x66c] ss:$16 sps:$4 sm:$0xff]  }
  0xdd   : > { %2711 = vmatprep.subr.bf16.mxu0 %v5358_v1  ;;  %3363 = vmatprep.subr.bf16.mxu1 %v5361_v2  ;;  %v5398_v1 = vld [vmem:[%s6571_s1 + $0x660] ss:$16 sps:$4 sm:$0xff]   ;;  %v5401_v2 = vld [vmem:[%s6571_s1 + $0x668] ss:$16 sps:$4 sm:$0xff]  }
  0xde   : > { %2617 = vmatmul.mubr.bf16.gmra.mrb[24].mxu0 %v4250_v3  ;;  %3269 = vmatmul.mubr.bf16.gmra.mrb[24].mxu1 %v4250_v3  ;;  %v205_v3 = vld [vmem:[%s5652_s13 + $0xd0] sm:$0xff] }
  0xdf   : > { %2626 = vmatprep.mubr.bf16.mxu0 %v4259_v4  ;;  %3278 = vmatprep.mubr.bf16.mxu1 %v4259_v4  ;;  %v209_v4 = vld [vmem:[%s5652_s13 + $0xf0] sm:$0xff] }
  0xe0   : > { %2712 = vmatpush1.bf16.msra.mxu0 %v5356_v5  ;;  %3364 = vmatpush1.bf16.msra.mxu1 %v5359_v6  ;;  %v5406_v5 = vld [vmem:[%s6571_s1 + $0x684] ss:$16 sps:$4 sm:$0xff]   ;;  %v5409_v6 = vld [vmem:[%s6571_s1 + $0x68c] ss:$16 sps:$4 sm:$0xff]  }
  0xe1   : > { %2713 = vmatprep.subr.bf16.mxu0 %v5364_v7  ;;  %3365 = vmatprep.subr.bf16.mxu1 %v5367_v8  ;;  %v4220_v7 = vcombine.low %v197_v57, %v201_v58  ;;  %v4229_v8 = vcombine.high %v205_v3, %v209_v4  ;;  %v5452_v57 = vld [vmem:[%s6571_s1 + $0x780] ss:$16 sps:$4 sm:$0xff]   ;;  %v5455_v58 = vld [vmem:[%s6571_s1 + $0x788] ss:$16 sps:$4 sm:$0xff]  }
  0xe4   : > { %2714 = vmatpush1.bf16.msra.mxu0 %v5362_v11  ;;  %3366 = vmatpush1.bf16.msra.mxu1 %v5365_v12  ;;  %v5412_v11 = vld [vmem:[%s6571_s1 + $0x6a4] ss:$16 sps:$4 sm:$0xff]   ;;  %v5415_v12 = vld [vmem:[%s6571_s1 + $0x6ac] ss:$16 sps:$4 sm:$0xff]  }
  0xe5   : > { %2715 = vmatprep.subr.bf16.mxu0 %v5370_v13  ;;  %3367 = vmatprep.subr.bf16.mxu1 %v5373_v14  ;;  %v213_v13 = vld [vmem:[%s5652_s13 + $0x110] sm:$0xff] }
  0xe6   : > { %2627 = vmatmul.mubr.bf16.gmra.mrb[28].mxu0 %v4258_v15  ;;  %3279 = vmatmul.mubr.bf16.gmra.mrb[28].mxu1 %v4258_v15  ;;  %v217_v14 = vld [vmem:[%s5652_s13 + $0x130] sm:$0xff] }
  0xe7   : > { %2636 = vmatprep.mubr.bf16.mxu0 %v4267_v16  ;;  %3288 = vmatprep.mubr.bf16.mxu1 %v4267_v16  ;;  %v5410_v15 = vld [vmem:[%s6571_s1 + $0x6a0] ss:$16 sps:$4 sm:$0xff]   ;;  %v5413_v16 = vld [vmem:[%s6571_s1 + $0x6a8] ss:$16 sps:$4 sm:$0xff]  }
  0xe8   : > { %2716 = vmatpush1.bf16.msra.mxu0 %v5368_v17  ;;  %3368 = vmatpush1.bf16.msra.mxu1 %v5371_v18  ;;  %v5418_v17 = vld [vmem:[%s6571_s1 + $0x6c4] ss:$16 sps:$4 sm:$0xff]   ;;  %v5421_v18 = vld [vmem:[%s6571_s1 + $0x6cc] ss:$16 sps:$4 sm:$0xff]  }
  0xe9   : > { %2717 = vmatprep.subr.bf16.mxu0 %v5376_v19  ;;  %3369 = vmatprep.subr.bf16.mxu1 %v5379_v20  ;;  %v4228_v19 = vcombine.low %v205_v3, %v209_v4  ;;  %v4237_v20 = vcombine.high %v213_v13, %v217_v14 }
  0xec   : > { %2718 = vmatpush1.bf16.msra.mxu0 %v5374_v23  ;;  %3370 = vmatpush1.bf16.msra.mxu1 %v5377_v24  ;;  %v5424_v23 = vld [vmem:[%s6571_s1 + $0x6e4] ss:$16 sps:$4 sm:$0xff]   ;;  %v5427_v24 = vld [vmem:[%s6571_s1 + $0x6ec] ss:$16 sps:$4 sm:$0xff]  }
  0xed   : > { %2850 = vmatprep.subr.bf16.mxu0 %v5382_v25  ;;  %3502 = vmatprep.subr.bf16.mxu1 %v5385_v26  ;;  %v221_v25 = vld [vmem:[%s5652_s13 + $0x150] sm:$0xff] }
  0xee   : > { %2637 = vmatmul.mubr.bf16.gmra.mrb[32].mxu0 %v4266_v27  ;;  %3289 = vmatmul.mubr.bf16.gmra.mrb[32].mxu1 %v4266_v27  ;;  %v225_v26 = vld [vmem:[%s5652_s13 + $0x170] sm:$0xff] }
  0xef   : > { %2646 = vmatprep.mubr.bf16.mxu0 %v4275_v28  ;;  %3298 = vmatprep.mubr.bf16.mxu1 %v4275_v28  ;;  %v5422_v27 = vld [vmem:[%s6571_s1 + $0x6e0] ss:$16 sps:$4 sm:$0xff]   ;;  %v5425_v28 = vld [vmem:[%s6571_s1 + $0x6e8] ss:$16 sps:$4 sm:$0xff]  }
  0xf6   : > { %2647 = vmatmul.mubr.bf16.gmra.mrb[36].mxu0 %v4274_v31  ;;  %3299 = vmatmul.mubr.bf16.gmra.mrb[36].mxu1 %v4274_v31  ;;  %v4236_v31 = vcombine.low %v213_v13, %v217_v14 }
  0xf7   : > { %2656 = vmatprep.mubr.bf16.mxu0 %v4283_v32  ;;  %3308 = vmatprep.mubr.bf16.mxu1 %v4283_v32  ;;  %v4245_v32 = vcombine.high %v221_v25, %v225_v26 }
  0xfe   : > { %2657 = vmatmul.mubr.bf16.gmra.mrb[40].mxu0 %v4282_v35  ;;  %3309 = vmatmul.mubr.bf16.gmra.mrb[40].mxu1 %v4282_v35  ;;  %v5436_v35 = vld [vmem:[%s6571_s1 + $0x724] ss:$16 sps:$4 sm:$0xff]  }
  0xff   : > { %2666 = vmatprep.mubr.bf16.mxu0 %v4291_v36  ;;  %3318 = vmatprep.mubr.bf16.mxu1 %v4291_v36  ;;  %v5439_v36 = vld [vmem:[%s6571_s1 + $0x72c] ss:$16 sps:$4 sm:$0xff]  }
 0x106   : > { %2667 = vmatmul.mubr.bf16.gmra.mrb[44].mxu0 %v4290_v39  ;;  %3319 = vmatmul.mubr.bf16.gmra.mrb[44].mxu1 %v4290_v39  ;;  %v5434_v39 = vld [vmem:[%s6571_s1 + $0x720] ss:$16 sps:$4 sm:$0xff]  }
 0x107   : > { %2676 = vmatprep.mubr.bf16.mxu0 %v4299_v40  ;;  %3328 = vmatprep.mubr.bf16.mxu1 %v4299_v40  ;;  %v5437_v40 = vld [vmem:[%s6571_s1 + $0x728] ss:$16 sps:$4 sm:$0xff]  }
 0x10e   : > { %2677 = vmatmul.mubr.bf16.gmra.mrb[48].mxu0 %v4298_v43  ;;  %3329 = vmatmul.mubr.bf16.gmra.mrb[48].mxu1 %v4298_v43  ;;  %v4244_v43 = vcombine.low %v221_v25, %v225_v26 }
 0x10f   : > { %2719 = vmatprep.mubr.bf16.mxu0 %v4205_v44  ;;  %3371 = vmatprep.mubr.bf16.mxu1 %v4205_v44  ;;  %v4253_v44 = vcombine.high %v229_v37, %v233_v38 }
 0x116   : > { %2720 = vmatmul.mubr.bf16.vlgmr.msra.gmra.mrb[0].mxu0 %v4204_v47  ;;  %3372 = vmatmul.mubr.bf16.vlgmr.msra.gmra.mrb[0].mxu1 %v4204_v47  ;;  %v5448_v47 = vld [vmem:[%s6571_s1 + $0x764] ss:$16 sps:$4 sm:$0xff]  }
 0x117   : > { %2851 = vmatpush1.bf16.msra.mxu0 %v5380_v48  ;;  %3503 = vmatpush1.bf16.msra.mxu1 %v5383_v49  ;;  %v5451_v48 = vld [vmem:[%s6571_s1 + $0x76c] ss:$16 sps:$4 sm:$0xff]   ;;  %v237_v49 = vld [vmem:[%s5652_s13 + $0x1d0] sm:$0xff] }
 0x118   : > { %2729 = vmatprep.mubr.bf16.mxu0 %v4213_v50  ;;  %2852 = vmatprep.subr.bf16.mxu0 %v5388_v51  ;;  %v5446_v51 = vld [vmem:[%s6571_s1 + $0x760] ss:$16 sps:$4 sm:$0xff]  }
 0x119   : > { %3381 = vmatprep.mubr.bf16.mxu1 %v4213_v50  ;;  %3504 = vmatprep.subr.bf16.mxu1 %v5391_v52  ;;  %v241_v50 = vld [vmem:[%s5652_s13 + $0x1f0] sm:$0xff]  ;;  %v5449_v52 = vld [vmem:[%s6571_s1 + $0x768] ss:$16 sps:$4 sm:$0xff]  }
 0x11a   : > { %v4260_v3 = vcombine.low %v237_v49, %v241_v50 }
 0x11b   : > { %2853 = vmatpush1.bf16.msra.mxu0 %v5386_v53  ;;  %3505 = vmatpush1.bf16.msra.mxu1 %v5389_v54  ;;  %v5454_v53 = vld [vmem:[%s6571_s1 + $0x784] ss:$16 sps:$4 sm:$0xff]   ;;  %v5457_v54 = vld [vmem:[%s6571_s1 + $0x78c] ss:$16 sps:$4 sm:$0xff]  }
 0x11c   : > { %2854 = vmatprep.subr.bf16.mxu0 %v5394_v55  ;;  %3506 = vmatprep.subr.bf16.mxu1 %v5397_v56  ;;  %v4252_v55 = vcombine.low %v229_v37, %v233_v38  ;;  %v4261_v56 = vcombine.high %v237_v49, %v241_v50 }
 0x11e   : > { %2730 = vmatmul.mubr.bf16.gmra.mrb[4].mxu0 %v4212_v59  ;;  %3382 = vmatmul.mubr.bf16.gmra.mrb[4].mxu1 %v4212_v59  ;;  %v5460_v59 = vld [vmem:[%s6571_s1 + $0x7a4] ss:$16 sps:$4 sm:$0xff]  }
 0x11f   : > { %2855 = vmatpush1.bf16.msra.mxu0 %v5392_v60  ;;  %3507 = vmatpush1.bf16.msra.mxu1 %v5395_v61  ;;  %v5463_v60 = vld [vmem:[%s6571_s1 + $0x7ac] ss:$16 sps:$4 sm:$0xff]   ;;  %v245_v61 = vld [vmem:[%s5652_s13 + $0x210] sm:$0xff] }
 0x120   : > { %2739 = vmatprep.mubr.bf16.mxu0 %v4221_v62  ;;  %3391 = vmatprep.mubr.bf16.mxu1 %v4221_v62  ;;  %v249_v62 = vld [vmem:[%s5652_s13 + $0x230] sm:$0xff] }
 0x121   : > { %2856 = vmatprep.subr.bf16.mxu0 %v5400_v63  ;;  %3508 = vmatprep.subr.bf16.mxu1 %v5403_v0  ;;  %v5458_v63 = vld [vmem:[%s6571_s1 + $0x7a0] ss:$16 sps:$4 sm:$0xff]   ;;  %v5461_v0 = vld [vmem:[%s6571_s1 + $0x7a8] ss:$16 sps:$4 sm:$0xff]   ;;  %v4269_v4 = vcombine.high %v245_v61, %v249_v62  ;;  %v4268_v13 = vcombine.low %v245_v61, %v249_v62 }
 0x123   : > { %2857 = vmatpush1.bf16.msra.mxu0 %v5398_v1  ;;  %3509 = vmatpush1.bf16.msra.mxu1 %v5401_v2  ;;  %v5466_v1 = vld [vmem:[%s6571_s1 + $0x7c4] ss:$16 sps:$4 sm:$0xff]   ;;  %v5469_v2 = vld [vmem:[%s6571_s1 + $0x7cc] ss:$16 sps:$4 sm:$0xff]  }
 0x124   : > { %2858 = vmatprep.subr.bf16.mxu0 %v5406_v5  ;;  %3510 = vmatprep.subr.bf16.mxu1 %v5409_v6  ;;  %v5464_v5 = vld [vmem:[%s6571_s1 + $0x7c0] ss:$16 sps:$4 sm:$0xff]   ;;  %v5467_v6 = vld [vmem:[%s6571_s1 + $0x7c8] ss:$16 sps:$4 sm:$0xff]  }
 0x126   : > { %2740 = vmatmul.mubr.bf16.gmra.mrb[8].mxu0 %v4220_v7  ;;  %3392 = vmatmul.mubr.bf16.gmra.mrb[8].mxu1 %v4220_v7  ;;  %v5472_v7 = vld [vmem:[%s6571_s1 + $0x7e4] ss:$16 sps:$4 sm:$0xff]  }
 0x127   : > { %2749 = vmatprep.mubr.bf16.mxu0 %v4229_v8  ;;  %3401 = vmatprep.mubr.bf16.mxu1 %v4229_v8  ;;  %v5475_v8 = vld [vmem:[%s6571_s1 + $0x7ec] ss:$16 sps:$4 sm:$0xff]  }
 0x128   : > { %2859 = vmatpush1.bf16.msra.mxu0 %v5404_v9  ;;  %3511 = vmatpush1.bf16.msra.mxu1 %v5407_v10  ;;  %v253_v9 = vld [vmem:[%s5652_s13 + $0x250] sm:$0xff] }
 0x129   : > { %2860 = vmatprep.subr.bf16.mxu0 %v5412_v11  ;;  %3512 = vmatprep.subr.bf16.mxu1 %v5415_v12  ;;  %v257_v10 = vld [vmem:[%s5652_s13 + $0x270] sm:$0xff]  ;;  %v5473_v12 = vld [vmem:[%s6571_s1 + $0x7e8] ss:$16 sps:$4 sm:$0xff]  }
 0x12a   : > { %v5470_v11 = vld [vmem:[%s6571_s1 + $0x7e0] ss:$16 sps:$4 sm:$0xff]   ;;  %v4277_v14 = vcombine.high %v253_v9, %v257_v10 }
 0x12c   : > { %2861 = vmatpush1.bf16.msra.mxu0 %v5410_v15  ;;  %3513 = vmatpush1.bf16.msra.mxu1 %v5413_v16  ;;  %v261_v15 = vld [vmem:[%s5652_s13 + $0x290] sm:$0xff] }
 0x12d   : > { %2862 = vmatprep.subr.bf16.mxu0 %v5418_v17  ;;  %3514 = vmatprep.subr.bf16.mxu1 %v5421_v18  ;;  %v265_v16 = vld [vmem:[%s5652_s13 + $0x2b0] sm:$0xff]  ;;  %v4276_v17 = vcombine.low %v253_v9, %v257_v10 }
 0x12e   : > { %2750 = vmatmul.mubr.bf16.gmra.mrb[12].mxu0 %v4228_v19  ;;  %3402 = vmatmul.mubr.bf16.gmra.mrb[12].mxu1 %v4228_v19  ;;  %v4285_v18 = vcombine.high %v261_v15, %v265_v16  ;;  %v269_v19 = vld [vmem:[%s5652_s13 + $0x2d0] sm:$0xff] }
 0x12f   : > { %2759 = vmatprep.mubr.bf16.mxu0 %v4237_v20  ;;  %3411 = vmatprep.mubr.bf16.mxu1 %v4237_v20  ;;  %v273_v20 = vld [vmem:[%s5652_s13 + $0x2f0] sm:$0xff] }
 0x130   : > { %2863 = vmatpush1.bf16.msra.mxu0 %v5416_v21  ;;  %3515 = vmatpush1.bf16.msra.mxu1 %v5419_v22  ;;  %v4284_v21 = vcombine.low %v261_v15, %v265_v16  ;;  %v4293_v22 = vcombine.high %v269_v19, %v273_v20  ;;  %v4292_v25 = vcombine.low %v269_v19, %v273_v20  ;;  %v541_v16 = vlaneseq  ;;  %v539_v20 = vld [vmem:[%s6572_s2] sm:$0xf] }
 0x131   : > { %2864 = vmatprep.subr.bf16.mxu0 %v5424_v23  ;;  %3516 = vmatprep.subr.bf16.mxu1 %v5427_v24  ;;  %v277_v23 = vld [vmem:[%s5652_s13 + $0x310] sm:$0xff] }
 0x132   : > { %v281_v24 = vld [vmem:[%s5652_s13 + $0x330] sm:$0xff] }
 0x133   : > { %v4301_v26 = vcombine.high %v277_v23, %v281_v24 }
 0x134   : > { %2865 = vmatpush1.bf16.msra.mxu0 %v5422_v27  ;;  %3517 = vmatpush1.bf16.msra.mxu1 %v5425_v28  ;;  %v182_v27 = vld [vmem:[%s5652_s13 + $0x18] sm:$0xff] }
 0x135   : > { %2866 = vmatprep.subr.bf16.mxu0 %v5430_v29  ;;  %3518 = vmatprep.subr.bf16.mxu1 %v5433_v30  ;;  %v186_v28 = vld [vmem:[%s5652_s13 + $0x38] sm:$0xff]  ;;  %v4300_v29 = vcombine.low %v277_v23, %v281_v24 }
 0x136   : > { %2760 = vmatmul.mubr.bf16.gmra.mrb[16].mxu0 %v4236_v31  ;;  %3412 = vmatmul.mubr.bf16.gmra.mrb[16].mxu1 %v4236_v31  ;;  %v4207_v30 = vcombine.high %v182_v27, %v186_v28  ;;  %v190_v31 = vld [vmem:[%s5652_s13 + $0x58] sm:$0xff] }
 0x137   : > { %2769 = vmatprep.mubr.bf16.mxu0 %v4245_v32  ;;  %3421 = vmatprep.mubr.bf16.mxu1 %v4245_v32  ;;  %v194_v32 = vld [vmem:[%s5652_s13 + $0x78] sm:$0xff] }
 0x138   : > { %2867 = vmatpush1.bf16.msra.mxu0 %v5428_v33  ;;  %3519 = vmatpush1.bf16.msra.mxu1 %v5431_v34  ;;  %v4206_v33 = vcombine.low %v182_v27, %v186_v28  ;;  %v4215_v34 = vcombine.high %v190_v31, %v194_v32  ;;  %v4214_v37 = vcombine.low %v190_v31, %v194_v32 }
 0x139   : > { %2868 = vmatprep.subr.bf16.mxu0 %v5436_v35  ;;  %3520 = vmatprep.subr.bf16.mxu1 %v5439_v36  ;;  %v198_v35 = vld [vmem:[%s5652_s13 + $0x98] sm:$0xff] }
 0x13a   : > { %v202_v36 = vld [vmem:[%s5652_s13 + $0xb8] sm:$0xff] }
 0x13b   : > { %v4223_v38 = vcombine.high %v198_v35, %v202_v36 }
 0x13c   : > { %2869 = vmatpush1.bf16.msra.mxu0 %v5434_v39  ;;  %3521 = vmatpush1.bf16.msra.mxu1 %v5437_v40  ;;  %v206_v39 = vld [vmem:[%s5652_s13 + $0xd8] sm:$0xff] }
 0x13d   : > { %2870 = vmatprep.subr.bf16.mxu0 %v5442_v41  ;;  %3522 = vmatprep.subr.bf16.mxu1 %v5445_v42  ;;  %v210_v40 = vld [vmem:[%s5652_s13 + $0xf8] sm:$0xff]  ;;  %v4222_v41 = vcombine.low %v198_v35, %v202_v36 }
 0x13e   : > { %2770 = vmatmul.mubr.bf16.gmra.mrb[20].mxu0 %v4244_v43  ;;  %3422 = vmatmul.mubr.bf16.gmra.mrb[20].mxu1 %v4244_v43  ;;  %v4231_v42 = vcombine.high %v206_v39, %v210_v40  ;;  %v214_v43 = vld [vmem:[%s5652_s13 + $0x118] sm:$0xff] }
 0x13f   : > { %2779 = vmatprep.mubr.bf16.mxu0 %v4253_v44  ;;  %3431 = vmatprep.mubr.bf16.mxu1 %v4253_v44  ;;  %v218_v44 = vld [vmem:[%s5652_s13 + $0x138] sm:$0xff] }
 0x140   : > { %2871 = vmatpush1.bf16.msra.mxu0 %v5440_v45  ;;  %3523 = vmatpush1.bf16.msra.mxu1 %v5443_v46  ;;  %v4230_v45 = vcombine.low %v206_v39, %v210_v40  ;;  %v4239_v46 = vcombine.high %v214_v43, %v218_v44  ;;  %v4238_v49 = vcombine.low %v214_v43, %v218_v44 }
 0x141   : > { %2872 = vmatprep.subr.bf16.mxu0 %v5448_v47  ;;  %3524 = vmatprep.subr.bf16.mxu1 %v5451_v48  ;;  %v222_v47 = vld [vmem:[%s5652_s13 + $0x158] sm:$0xff] }
 0x142   : > { %v226_v48 = vld [vmem:[%s5652_s13 + $0x178] sm:$0xff] }
 0x143   : > { %v4247_v50 = vcombine.high %v222_v47, %v226_v48 }
 0x144   : > { %2873 = vmatpush1.bf16.msra.mxu0 %v5446_v51  ;;  %3525 = vmatpush1.bf16.msra.mxu1 %v5449_v52  ;;  %v230_v51 = vld [vmem:[%s5652_s13 + $0x198] sm:$0xff] }
 0x145   : > { %2874 = vmatprep.subr.bf16.mxu0 %v5454_v53  ;;  %3526 = vmatprep.subr.bf16.mxu1 %v5457_v54  ;;  %v234_v52 = vld [vmem:[%s5652_s13 + $0x1b8] sm:$0xff]  ;;  %v4246_v53 = vcombine.low %v222_v47, %v226_v48 }
 0x146   : > { %2780 = vmatmul.mubr.bf16.gmra.mrb[24].mxu0 %v4252_v55  ;;  %3432 = vmatmul.mubr.bf16.gmra.mrb[24].mxu1 %v4252_v55  ;;  %v4255_v54 = vcombine.high %v230_v51, %v234_v52  ;;  %v238_v55 = vld [vmem:[%s5652_s13 + $0x1d8] sm:$0xff] }
 0x147   : > { %2789 = vmatprep.mubr.bf16.mxu0 %v4261_v56  ;;  %3441 = vmatprep.mubr.bf16.mxu1 %v4261_v56  ;;  %v242_v56 = vld [vmem:[%s5652_s13 + $0x1f8] sm:$0xff] }
 0x148   : > { %2875 = vmatpush1.bf16.msra.mxu0 %v5452_v57  ;;  %3527 = vmatpush1.bf16.msra.mxu1 %v5455_v58  ;;  %v4254_v57 = vcombine.low %v230_v51, %v234_v52  ;;  %v4263_v58 = vcombine.high %v238_v55, %v242_v56  ;;  %v4262_v61 = vcombine.low %v238_v55, %v242_v56 }
 0x149   : > { %2876 = vmatprep.subr.bf16.mxu0 %v5460_v59  ;;  %3528 = vmatprep.subr.bf16.mxu1 %v5463_v60  ;;  %v246_v59 = vld [vmem:[%s5652_s13 + $0x218] sm:$0xff] }
 0x14a   : > { %v250_v60 = vld [vmem:[%s5652_s13 + $0x238] sm:$0xff] }
 0x14b   : > { %v4271_v62 = vcombine.high %v246_v59, %v250_v60 }
 0x14c   : > { %2877 = vmatpush1.bf16.msra.mxu0 %v5458_v63  ;;  %3529 = vmatpush1.bf16.msra.mxu1 %v5461_v0  ;;  %v254_v63 = vld [vmem:[%s5652_s13 + $0x258] sm:$0xff] }
 0x14d   : > { %2878 = vmatprep.subr.bf16.mxu0 %v5466_v1  ;;  %3530 = vmatprep.subr.bf16.mxu1 %v5469_v2  ;;  %v258_v0 = vld [vmem:[%s5652_s13 + $0x278] sm:$0xff]  ;;  %v4270_v1 = vcombine.low %v246_v59, %v250_v60 }
 0x14e   : > { %2790 = vmatmul.mubr.bf16.gmra.mrb[28].mxu0 %v4260_v3  ;;  %3442 = vmatmul.mubr.bf16.gmra.mrb[28].mxu1 %v4260_v3  ;;  %v4279_v2 = vcombine.high %v254_v63, %v258_v0  ;;  %v262_v3 = vld [vmem:[%s5652_s13 + $0x298] sm:$0xff] }
 0x14f   : > { %2799 = vmatprep.mubr.bf16.mxu0 %v4269_v4  ;;  %3451 = vmatprep.mubr.bf16.mxu1 %v4269_v4  ;;  %v266_v4 = vld [vmem:[%s5652_s13 + $0x2b8] sm:$0xff] }
 0x150   : > { %2879 = vmatpush1.bf16.msra.mxu0 %v5464_v5  ;;  %3531 = vmatpush1.bf16.msra.mxu1 %v5467_v6  ;;  %v4278_v5 = vcombine.low %v254_v63, %v258_v0  ;;  %v4287_v6 = vcombine.high %v262_v3, %v266_v4  ;;  %v4286_v9 = vcombine.low %v262_v3, %v266_v4 }
 0x151   : > { %2880 = vmatprep.subr.bf16.mxu0 %v5472_v7  ;;  %3532 = vmatprep.subr.bf16.mxu1 %v5475_v8  ;;  %v270_v7 = vld [vmem:[%s5652_s13 + $0x2d8] sm:$0xff] }
 0x152   : > { %v274_v8 = vld [vmem:[%s5652_s13 + $0x2f8] sm:$0xff] }
 0x153   : > { %v4295_v10 = vcombine.high %v270_v7, %v274_v8 }
 0x154   : > { %2881 = vmatpush1.bf16.msra.mxu0 %v5470_v11  ;;  %3533 = vmatpush1.bf16.msra.mxu1 %v5473_v12  ;;  %v278_v11 = vld [vmem:[%s5652_s13 + $0x318] sm:$0xff] }
 0x155   : > { %v282_v12 = vld [vmem:[%s5652_s13 + $0x338] sm:$0xff]  ;;  %s4615_s13 = sshll.u32 %s6575_s22, 4 }
 0x156   : > { %2800 = vmatmul.mubr.bf16.gmra.mrb[32].mxu0 %v4268_v13  ;;  %3452 = vmatmul.mubr.bf16.gmra.mrb[32].mxu1 %v4268_v13  ;;  %v4294_v13 = vcombine.low %v270_v7, %v274_v8  ;;  %v4302_v15 = vcombine.low %v278_v11, %v282_v12  ;;  %s6417_s26 = scalar_lea.vmem %s6573_s3, %s4615_s13 }
 0x157   : > { %2809 = vmatprep.mubr.bf16.mxu0 %v4277_v14  ;;  %3461 = vmatprep.mubr.bf16.mxu1 %v4277_v14  ;;  %v4303_v14 = vcombine.high %v278_v11, %v282_v12 }
 0x15e   : > { %2810 = vmatmul.mubr.bf16.gmra.mrb[36].mxu0 %v4276_v17  ;;  %3462 = vmatmul.mubr.bf16.gmra.mrb[36].mxu1 %v4276_v17  ;;  %v542_v17 = vshrl.u32 %v541_v16, 7 }
 0x15f   : > { %2819 = vmatprep.mubr.bf16.mxu0 %v4285_v18  ;;  %3471 = vmatprep.mubr.bf16.mxu1 %v4285_v18 }
 0x160   : > { %v543_v18 = vsub.s32 0, %v542_v17  ;;  %v551_v19 = vsub.s32 2, %v542_v17 }
 0x162   : > { %v6397_v23 = vrot.slane %v539_v20, %v543_v18  ;;  %v6399_v24 = vrot.slane %v539_v20, %v551_v19 }
 0x166   : > { %2820 = vmatmul.mubr.bf16.gmra.mrb[40].mxu0 %v4284_v21  ;;  %3472 = vmatmul.mubr.bf16.gmra.mrb[40].mxu1 %v4284_v21  ;;  %v547_v21 = vsub.s32 1, %v542_v17 }
 0x167   : > { %2829 = vmatprep.mubr.bf16.mxu0 %v4293_v22  ;;  %3481 = vmatprep.mubr.bf16.mxu1 %v4293_v22  ;;  %v555_v22 = vsub.s32 3, %v542_v17 }
 0x16e   : > { %2830 = vmatmul.mubr.bf16.gmra.mrb[44].mxu0 %v4292_v25  ;;  %3482 = vmatmul.mubr.bf16.gmra.mrb[44].mxu1 %v4292_v25  ;;  %v6401_v25 = vrot.slane %v539_v20, %v547_v21 }
 0x16f   : > { %2839 = vmatprep.mubr.bf16.mxu0 %v4301_v26  ;;  %3491 = vmatprep.mubr.bf16.mxu1 %v4301_v26  ;;  %v6403_v26 = vrot.slane %v539_v20, %v555_v22 }
 0x176   : > { %2840 = vmatmul.mubr.bf16.gmra.mrb[48].mxu0 %v4300_v29  ;;  %3492 = vmatmul.mubr.bf16.gmra.mrb[48].mxu1 %v4300_v29 }
 0x177   : > { %2882 = vmatprep.mubr.bf16.mxu0 %v4207_v30  ;;  %3534 = vmatprep.mubr.bf16.mxu1 %v4207_v30 }
 0x17e   : > { %2883 = vmatmul.mubr.bf16.vlgmr.msra.gmra.mrb[0].mxu0 %v4206_v33  ;;  %3535 = vmatmul.mubr.bf16.vlgmr.msra.gmra.mrb[0].mxu1 %v4206_v33 }
 0x17f   : > { %2892 = vmatprep.mubr.bf16.mxu0 %v4215_v34  ;;  %3544 = vmatprep.mubr.bf16.mxu1 %v4215_v34 }
 0x186   : > { %2893 = vmatmul.mubr.bf16.gmra.mrb[4].mxu0 %v4214_v37  ;;  %3545 = vmatmul.mubr.bf16.gmra.mrb[4].mxu1 %v4214_v37 }
 0x187   : > { %2902 = vmatprep.mubr.bf16.mxu0 %v4223_v38  ;;  %3554 = vmatprep.mubr.bf16.mxu1 %v4223_v38 }
 0x18e   : > { %2903 = vmatmul.mubr.bf16.gmra.mrb[8].mxu0 %v4222_v41  ;;  %3555 = vmatmul.mubr.bf16.gmra.mrb[8].mxu1 %v4222_v41 }
 0x18f   : > { %2912 = vmatprep.mubr.bf16.mxu0 %v4231_v42  ;;  %3564 = vmatprep.mubr.bf16.mxu1 %v4231_v42 }
 0x196   : > { %2913 = vmatmul.mubr.bf16.gmra.mrb[12].mxu0 %v4230_v45  ;;  %3565 = vmatmul.mubr.bf16.gmra.mrb[12].mxu1 %v4230_v45 }
 0x197   : > { %2922 = vmatprep.mubr.bf16.mxu0 %v4239_v46  ;;  %3574 = vmatprep.mubr.bf16.mxu1 %v4239_v46 }
 0x19e   : > { %2923 = vmatmul.mubr.bf16.gmra.mrb[16].mxu0 %v4238_v49  ;;  %3575 = vmatmul.mubr.bf16.gmra.mrb[16].mxu1 %v4238_v49 }
 0x19f   : > { %2932 = vmatprep.mubr.bf16.mxu0 %v4247_v50  ;;  %3584 = vmatprep.mubr.bf16.mxu1 %v4247_v50 }
 0x1a6   : > { %2933 = vmatmul.mubr.bf16.gmra.mrb[20].mxu0 %v4246_v53  ;;  %3585 = vmatmul.mubr.bf16.gmra.mrb[20].mxu1 %v4246_v53 }
 0x1a7   : > { %2942 = vmatprep.mubr.bf16.mxu0 %v4255_v54  ;;  %3594 = vmatprep.mubr.bf16.mxu1 %v4255_v54 }
 0x1ae   : > { %2943 = vmatmul.mubr.bf16.gmra.mrb[24].mxu0 %v4254_v57  ;;  %3595 = vmatmul.mubr.bf16.gmra.mrb[24].mxu1 %v4254_v57 }
 0x1af   : > { %2952 = vmatprep.mubr.bf16.mxu0 %v4263_v58  ;;  %3604 = vmatprep.mubr.bf16.mxu1 %v4263_v58 }
 0x1b6   : > { %2953 = vmatmul.mubr.bf16.gmra.mrb[28].mxu0 %v4262_v61  ;;  %3605 = vmatmul.mubr.bf16.gmra.mrb[28].mxu1 %v4262_v61 }
 0x1b7   : > { %2962 = vmatprep.mubr.bf16.mxu0 %v4271_v62  ;;  %3614 = vmatprep.mubr.bf16.mxu1 %v4271_v62 }
 0x1be   : > { %2963 = vmatmul.mubr.bf16.gmra.mrb[32].mxu0 %v4270_v1  ;;  %3615 = vmatmul.mubr.bf16.gmra.mrb[32].mxu1 %v4270_v1 }
 0x1bf   : > { %2972 = vmatprep.mubr.bf16.mxu0 %v4279_v2  ;;  %3624 = vmatprep.mubr.bf16.mxu1 %v4279_v2 }
 0x1c6   : > { %2973 = vmatmul.mubr.bf16.gmra.mrb[36].mxu0 %v4278_v5  ;;  %3625 = vmatmul.mubr.bf16.gmra.mrb[36].mxu1 %v4278_v5 }
 0x1c7   : > { %2982 = vmatprep.mubr.bf16.mxu0 %v4287_v6  ;;  %3634 = vmatprep.mubr.bf16.mxu1 %v4287_v6 }
 0x1ce   : > { %2983 = vmatmul.mubr.bf16.gmra.mrb[40].mxu0 %v4286_v9  ;;  %3635 = vmatmul.mubr.bf16.gmra.mrb[40].mxu1 %v4286_v9 }
 0x1cf   : > { %2992 = vmatprep.mubr.bf16.mxu0 %v4295_v10  ;;  %3644 = vmatprep.mubr.bf16.mxu1 %v4295_v10 }
 0x1d6   : > { %2993 = vmatmul.mubr.bf16.gmra.mrb[44].mxu0 %v4294_v13  ;;  %3645 = vmatmul.mubr.bf16.gmra.mrb[44].mxu1 %v4294_v13 }
 0x1d7   : > { %3002 = vmatprep.mubr.bf16.mxu0 %v4303_v14  ;;  %3654 = vmatprep.mubr.bf16.mxu1 %v4303_v14 }
 0x1de   : > { %3003 = vmatmul.mubr.bf16.gmra.mrb[48].mxu0 %v4302_v15  ;;  %3655 = vmatmul.mubr.bf16.gmra.mrb[48].mxu1 %v4302_v15 }
 0x251   : > { %v2884_v27 = vpop.f32.mrb[0].mxu0  ;;  %v3536_v28 = vpop.f32.mrb[0].mxu1 }
 0x252   : > { %v4668_v29 = vadd.f32 %v2884_v27, %v6397_v23  ;;  %v4720_v30 = vadd.f32 %v3536_v28, %v6399_v24  ;;  %v2886_v31 = vpop.f32.mrb[1].mxu0  ;;  %v3538_v32 = vpop.f32.mrb[1].mxu1 }
 0x253   : > { %v4669_v33 = vadd.f32 %v2886_v31, %v6401_v25  ;;  %v4721_v34 = vadd.f32 %v3538_v32, %v6403_v26  ;;  %v2888_v35 = vpop.f32.mrb[2].mxu0  ;;  %v3540_v36 = vpop.f32.mrb[2].mxu1 }
 0x254   : > { %v3665_v37 = vmax.f32 %v4668_v29, 0.0  ;;  %v3667_v38 = vmax.f32 %v4720_v30, 0.0  ;;  %v4670_v39 = vadd.f32 %v2888_v35, %v6397_v23  ;;  %v4722_v40 = vadd.f32 %v3540_v36, %v6399_v24  ;;  %v2890_v41 = vpop.f32.mrb[3].mxu0  ;;  %v3542_v42 = vpop.f32.mrb[3].mxu1 }
 0x255   : > { %v3666_v43 = vmax.f32 %v4669_v33, 0.0  ;;  %v3668_v44 = vmax.f32 %v4721_v34, 0.0  ;;  %v4671_v45 = vadd.f32 %v2890_v41, %v6401_v25  ;;  %v4723_v46 = vadd.f32 %v3542_v42, %v6403_v26 }
 0x256   : > { %v3669_v47 = vmax.f32 %v4670_v39, 0.0  ;;  %v3671_v48 = vmax.f32 %v4722_v40, 0.0 }
 0x257   : > { %v4616_v49 = vpack.c.bf16 %v3666_v43, %v3665_v37  ;;  %v4617_v50 = vpack.c.bf16 %v3668_v44, %v3667_v38  ;;  %v3670_v51 = vmax.f32 %v4671_v45, 0.0  ;;  %v3672_v52 = vmax.f32 %v4723_v46, 0.0 }
 0x259   : > { %4081 = vst [vmem:[%s6417_s26] sm:$0xff] %v4616_v49  ;;  %4082 = vst [vmem:[%s6417_s26 + $0x8] sm:$0xff] %v4617_v50  ;;  %v4618_v53 = vpack.c.bf16 %v3670_v51, %v3669_v47  ;;  %v4619_v54 = vpack.c.bf16 %v3672_v52, %v3671_v48  ;;  %v2894_v55 = vpop.f32.mrb[4].mxu0  ;;  %v3546_v56 = vpop.f32.mrb[4].mxu1 }
 0x25a   : > { %v4672_v57 = vadd.f32 %v2894_v55, %v6397_v23  ;;  %v4724_v58 = vadd.f32 %v3546_v56, %v6399_v24  ;;  %v2896_v59 = vpop.f32.mrb[5].mxu0  ;;  %v3548_v60 = vpop.f32.mrb[5].mxu1 }
 0x25b   : > { %4083 = vst [vmem:[%s6417_s26 + $0x10] sm:$0xff] %v4618_v53  ;;  %4084 = vst [vmem:[%s6417_s26 + $0x18] sm:$0xff] %v4619_v54  ;;  %v4673_v61 = vadd.f32 %v2896_v59, %v6401_v25  ;;  %v4725_v62 = vadd.f32 %v3548_v60, %v6403_v26  ;;  %v2898_v63 = vpop.f32.mrb[6].mxu0  ;;  %v3550_v0 = vpop.f32.mrb[6].mxu1 }
 0x25c   : > { %v3673_v1 = vmax.f32 %v4672_v57, 0.0  ;;  %v3675_v2 = vmax.f32 %v4724_v58, 0.0  ;;  %v4674_v3 = vadd.f32 %v2898_v63, %v6397_v23  ;;  %v4726_v4 = vadd.f32 %v3550_v0, %v6399_v24  ;;  %v2900_v5 = vpop.f32.mrb[7].mxu0  ;;  %v3552_v6 = vpop.f32.mrb[7].mxu1 }
 0x25d   : > { %v3674_v7 = vmax.f32 %v4673_v61, 0.0  ;;  %v3676_v8 = vmax.f32 %v4725_v62, 0.0  ;;  %v4675_v9 = vadd.f32 %v2900_v5, %v6401_v25  ;;  %v4727_v10 = vadd.f32 %v3552_v6, %v6403_v26 }
 0x25e   : > { %v3677_v11 = vmax.f32 %v4674_v3, 0.0  ;;  %v3679_v12 = vmax.f32 %v4726_v4, 0.0 }
 0x25f   : > { %v4620_v13 = vpack.c.bf16 %v3674_v7, %v3673_v1  ;;  %v4621_v14 = vpack.c.bf16 %v3676_v8, %v3675_v2  ;;  %v3678_v15 = vmax.f32 %v4675_v9, 0.0  ;;  %v3680_v16 = vmax.f32 %v4727_v10, 0.0 }
 0x261   : > { %4085 = vst [vmem:[%s6417_s26 + $0x20] sm:$0xff] %v4620_v13  ;;  %4086 = vst [vmem:[%s6417_s26 + $0x28] sm:$0xff] %v4621_v14  ;;  %v4622_v17 = vpack.c.bf16 %v3678_v15, %v3677_v11  ;;  %v4623_v18 = vpack.c.bf16 %v3680_v16, %v3679_v12  ;;  %v2904_v19 = vpop.f32.mrb[8].mxu0  ;;  %v3556_v20 = vpop.f32.mrb[8].mxu1 }
 0x262   : > { %v4676_v21 = vadd.f32 %v2904_v19, %v6397_v23  ;;  %v4728_v22 = vadd.f32 %v3556_v20, %v6399_v24  ;;  %v2906_v27 = vpop.f32.mrb[9].mxu0  ;;  %v3558_v28 = vpop.f32.mrb[9].mxu1 }
 0x263   : > { %4087 = vst [vmem:[%s6417_s26 + $0x30] sm:$0xff] %v4622_v17  ;;  %4088 = vst [vmem:[%s6417_s26 + $0x38] sm:$0xff] %v4623_v18  ;;  %v4677_v29 = vadd.f32 %v2906_v27, %v6401_v25  ;;  %v4729_v30 = vadd.f32 %v3558_v28, %v6403_v26  ;;  %v2908_v31 = vpop.f32.mrb[10].mxu0  ;;  %v3560_v32 = vpop.f32.mrb[10].mxu1 }
 0x264   : > { %v3681_v33 = vmax.f32 %v4676_v21, 0.0  ;;  %v3683_v34 = vmax.f32 %v4728_v22, 0.0  ;;  %v4678_v35 = vadd.f32 %v2908_v31, %v6397_v23  ;;  %v4730_v36 = vadd.f32 %v3560_v32, %v6399_v24  ;;  %v2910_v37 = vpop.f32.mrb[11].mxu0  ;;  %v3562_v38 = vpop.f32.mrb[11].mxu1 }
 0x265   : > { %v3682_v39 = vmax.f32 %v4677_v29, 0.0  ;;  %v3684_v40 = vmax.f32 %v4729_v30, 0.0  ;;  %v4679_v41 = vadd.f32 %v2910_v37, %v6401_v25  ;;  %v4731_v42 = vadd.f32 %v3562_v38, %v6403_v26 }
 0x266   : > { %v3685_v43 = vmax.f32 %v4678_v35, 0.0  ;;  %v3687_v44 = vmax.f32 %v4730_v36, 0.0 }
 0x267   : > { %v4624_v45 = vpack.c.bf16 %v3682_v39, %v3681_v33  ;;  %v4625_v46 = vpack.c.bf16 %v3684_v40, %v3683_v34  ;;  %v3686_v47 = vmax.f32 %v4679_v41, 0.0  ;;  %v3688_v48 = vmax.f32 %v4731_v42, 0.0 }
 0x269   : > { %4089 = vst [vmem:[%s6417_s26 + $0x40] sm:$0xff] %v4624_v45  ;;  %4090 = vst [vmem:[%s6417_s26 + $0x48] sm:$0xff] %v4625_v46  ;;  %v4626_v49 = vpack.c.bf16 %v3686_v47, %v3685_v43  ;;  %v4627_v50 = vpack.c.bf16 %v3688_v48, %v3687_v44  ;;  %v2914_v51 = vpop.f32.mrb[12].mxu0  ;;  %v3566_v52 = vpop.f32.mrb[12].mxu1 }
 0x26a   : > { %v4680_v53 = vadd.f32 %v2914_v51, %v6397_v23  ;;  %v4732_v54 = vadd.f32 %v3566_v52, %v6399_v24  ;;  %v2916_v55 = vpop.f32.mrb[13].mxu0  ;;  %v3568_v56 = vpop.f32.mrb[13].mxu1 }
 0x26b   : > { %4091 = vst [vmem:[%s6417_s26 + $0x50] sm:$0xff] %v4626_v49  ;;  %4092 = vst [vmem:[%s6417_s26 + $0x58] sm:$0xff] %v4627_v50  ;;  %v4681_v57 = vadd.f32 %v2916_v55, %v6401_v25  ;;  %v4733_v58 = vadd.f32 %v3568_v56, %v6403_v26  ;;  %v2918_v59 = vpop.f32.mrb[14].mxu0  ;;  %v3570_v60 = vpop.f32.mrb[14].mxu1 }
 0x26c   : > { %v3689_v61 = vmax.f32 %v4680_v53, 0.0  ;;  %v3691_v62 = vmax.f32 %v4732_v54, 0.0  ;;  %v4682_v63 = vadd.f32 %v2918_v59, %v6397_v23  ;;  %v4734_v0 = vadd.f32 %v3570_v60, %v6399_v24  ;;  %v2920_v1 = vpop.f32.mrb[15].mxu0  ;;  %v3572_v2 = vpop.f32.mrb[15].mxu1 }
 0x26d   : > { %v3690_v3 = vmax.f32 %v4681_v57, 0.0  ;;  %v3692_v4 = vmax.f32 %v4733_v58, 0.0  ;;  %v4683_v5 = vadd.f32 %v2920_v1, %v6401_v25  ;;  %v4735_v6 = vadd.f32 %v3572_v2, %v6403_v26 }
 0x26e   : > { %v3693_v7 = vmax.f32 %v4682_v63, 0.0  ;;  %v3695_v8 = vmax.f32 %v4734_v0, 0.0 }
 0x26f   : > { %v4628_v9 = vpack.c.bf16 %v3690_v3, %v3689_v61  ;;  %v4629_v10 = vpack.c.bf16 %v3692_v4, %v3691_v62  ;;  %v3694_v11 = vmax.f32 %v4683_v5, 0.0  ;;  %v3696_v12 = vmax.f32 %v4735_v6, 0.0 }
 0x271   : > { %4093 = vst [vmem:[%s6417_s26 + $0x60] sm:$0xff] %v4628_v9  ;;  %4094 = vst [vmem:[%s6417_s26 + $0x68] sm:$0xff] %v4629_v10  ;;  %v4630_v13 = vpack.c.bf16 %v3694_v11, %v3693_v7  ;;  %v4631_v14 = vpack.c.bf16 %v3696_v12, %v3695_v8  ;;  %v2924_v15 = vpop.f32.mrb[16].mxu0  ;;  %v3576_v16 = vpop.f32.mrb[16].mxu1 }
 0x272   : > { %v4684_v17 = vadd.f32 %v2924_v15, %v6397_v23  ;;  %v4736_v18 = vadd.f32 %v3576_v16, %v6399_v24  ;;  %v2926_v19 = vpop.f32.mrb[17].mxu0  ;;  %v3578_v20 = vpop.f32.mrb[17].mxu1 }
 0x273   : > { %4095 = vst [vmem:[%s6417_s26 + $0x70] sm:$0xff] %v4630_v13  ;;  %4096 = vst [vmem:[%s6417_s26 + $0x78] sm:$0xff] %v4631_v14  ;;  %v4685_v21 = vadd.f32 %v2926_v19, %v6401_v25  ;;  %v4737_v22 = vadd.f32 %v3578_v20, %v6403_v26  ;;  %v2928_v27 = vpop.f32.mrb[18].mxu0  ;;  %v3580_v28 = vpop.f32.mrb[18].mxu1 }
 0x274   : > { %v3697_v29 = vmax.f32 %v4684_v17, 0.0  ;;  %v3699_v30 = vmax.f32 %v4736_v18, 0.0  ;;  %v4686_v31 = vadd.f32 %v2928_v27, %v6397_v23  ;;  %v4738_v32 = vadd.f32 %v3580_v28, %v6399_v24  ;;  %v2930_v33 = vpop.f32.mrb[19].mxu0  ;;  %v3582_v34 = vpop.f32.mrb[19].mxu1 }
 0x275   : > { %v3698_v35 = vmax.f32 %v4685_v21, 0.0  ;;  %v3700_v36 = vmax.f32 %v4737_v22, 0.0  ;;  %v4687_v37 = vadd.f32 %v2930_v33, %v6401_v25  ;;  %v4739_v38 = vadd.f32 %v3582_v34, %v6403_v26 }
 0x276   : > { %v3701_v39 = vmax.f32 %v4686_v31, 0.0  ;;  %v3703_v40 = vmax.f32 %v4738_v32, 0.0 }
 0x277   : > { %v4632_v41 = vpack.c.bf16 %v3698_v35, %v3697_v29  ;;  %v4633_v42 = vpack.c.bf16 %v3700_v36, %v3699_v30  ;;  %v3702_v43 = vmax.f32 %v4687_v37, 0.0  ;;  %v3704_v44 = vmax.f32 %v4739_v38, 0.0 }
 0x279   : > { %4097 = vst [vmem:[%s6417_s26 + $0x80] sm:$0xff] %v4632_v41  ;;  %4098 = vst [vmem:[%s6417_s26 + $0x88] sm:$0xff] %v4633_v42  ;;  %v4634_v45 = vpack.c.bf16 %v3702_v43, %v3701_v39  ;;  %v4635_v46 = vpack.c.bf16 %v3704_v44, %v3703_v40  ;;  %v2934_v47 = vpop.f32.mrb[20].mxu0  ;;  %v3586_v48 = vpop.f32.mrb[20].mxu1 }
 0x27a   : > { %v4688_v49 = vadd.f32 %v2934_v47, %v6397_v23  ;;  %v4740_v50 = vadd.f32 %v3586_v48, %v6399_v24  ;;  %v2936_v51 = vpop.f32.mrb[21].mxu0  ;;  %v3588_v52 = vpop.f32.mrb[21].mxu1 }
 0x27b   : > { %4099 = vst [vmem:[%s6417_s26 + $0x90] sm:$0xff] %v4634_v45  ;;  %4100 = vst [vmem:[%s6417_s26 + $0x98] sm:$0xff] %v4635_v46  ;;  %v4689_v53 = vadd.f32 %v2936_v51, %v6401_v25  ;;  %v4741_v54 = vadd.f32 %v3588_v52, %v6403_v26  ;;  %v2938_v55 = vpop.f32.mrb[22].mxu0  ;;  %v3590_v56 = vpop.f32.mrb[22].mxu1 }
 0x27c   : > { %v3705_v57 = vmax.f32 %v4688_v49, 0.0  ;;  %v3707_v58 = vmax.f32 %v4740_v50, 0.0  ;;  %v4690_v59 = vadd.f32 %v2938_v55, %v6397_v23  ;;  %v4742_v60 = vadd.f32 %v3590_v56, %v6399_v24  ;;  %v2940_v61 = vpop.f32.mrb[23].mxu0  ;;  %v3592_v62 = vpop.f32.mrb[23].mxu1 }
 0x27d   : > { %v3706_v63 = vmax.f32 %v4689_v53, 0.0  ;;  %v3708_v0 = vmax.f32 %v4741_v54, 0.0  ;;  %v4691_v1 = vadd.f32 %v2940_v61, %v6401_v25  ;;  %v4743_v2 = vadd.f32 %v3592_v62, %v6403_v26 }
 0x27e   : > { %v3709_v3 = vmax.f32 %v4690_v59, 0.0  ;;  %v3711_v4 = vmax.f32 %v4742_v60, 0.0 }
 0x27f   : > { %v4636_v5 = vpack.c.bf16 %v3706_v63, %v3705_v57  ;;  %v4637_v6 = vpack.c.bf16 %v3708_v0, %v3707_v58  ;;  %v3710_v7 = vmax.f32 %v4691_v1, 0.0  ;;  %v3712_v8 = vmax.f32 %v4743_v2, 0.0 }
 0x281   : > { %4101 = vst [vmem:[%s6417_s26 + $0xa0] sm:$0xff] %v4636_v5  ;;  %4102 = vst [vmem:[%s6417_s26 + $0xa8] sm:$0xff] %v4637_v6  ;;  %v4638_v9 = vpack.c.bf16 %v3710_v7, %v3709_v3  ;;  %v4639_v10 = vpack.c.bf16 %v3712_v8, %v3711_v4  ;;  %v2944_v11 = vpop.f32.mrb[24].mxu0  ;;  %v3596_v12 = vpop.f32.mrb[24].mxu1 }
 0x282   : > { %v4692_v13 = vadd.f32 %v2944_v11, %v6397_v23  ;;  %v4744_v14 = vadd.f32 %v3596_v12, %v6399_v24  ;;  %v2946_v15 = vpop.f32.mrb[25].mxu0  ;;  %v3598_v16 = vpop.f32.mrb[25].mxu1 }
 0x283   : > { %4103 = vst [vmem:[%s6417_s26 + $0xb0] sm:$0xff] %v4638_v9  ;;  %4104 = vst [vmem:[%s6417_s26 + $0xb8] sm:$0xff] %v4639_v10  ;;  %v4693_v17 = vadd.f32 %v2946_v15, %v6401_v25  ;;  %v4745_v18 = vadd.f32 %v3598_v16, %v6403_v26  ;;  %v2948_v19 = vpop.f32.mrb[26].mxu0  ;;  %v3600_v20 = vpop.f32.mrb[26].mxu1 }
 0x284   : > { %v3713_v21 = vmax.f32 %v4692_v13, 0.0  ;;  %v3715_v22 = vmax.f32 %v4744_v14, 0.0  ;;  %v4694_v27 = vadd.f32 %v2948_v19, %v6397_v23  ;;  %v4746_v28 = vadd.f32 %v3600_v20, %v6399_v24  ;;  %v2950_v29 = vpop.f32.mrb[27].mxu0  ;;  %v3602_v30 = vpop.f32.mrb[27].mxu1 }
 0x285   : > { %v3714_v31 = vmax.f32 %v4693_v17, 0.0  ;;  %v3716_v32 = vmax.f32 %v4745_v18, 0.0  ;;  %v4695_v33 = vadd.f32 %v2950_v29, %v6401_v25  ;;  %v4747_v34 = vadd.f32 %v3602_v30, %v6403_v26 }
 0x286   : > { %v3717_v35 = vmax.f32 %v4694_v27, 0.0  ;;  %v3719_v36 = vmax.f32 %v4746_v28, 0.0 }
 0x287   : > { %v4640_v37 = vpack.c.bf16 %v3714_v31, %v3713_v21  ;;  %v4641_v38 = vpack.c.bf16 %v3716_v32, %v3715_v22  ;;  %v3718_v39 = vmax.f32 %v4695_v33, 0.0  ;;  %v3720_v40 = vmax.f32 %v4747_v34, 0.0 }
 0x289   : > { %4105 = vst [vmem:[%s6417_s26 + $0xc0] sm:$0xff] %v4640_v37  ;;  %4106 = vst [vmem:[%s6417_s26 + $0xc8] sm:$0xff] %v4641_v38  ;;  %v4642_v41 = vpack.c.bf16 %v3718_v39, %v3717_v35  ;;  %v4643_v42 = vpack.c.bf16 %v3720_v40, %v3719_v36  ;;  %v2954_v43 = vpop.f32.mrb[28].mxu0  ;;  %v3606_v44 = vpop.f32.mrb[28].mxu1 }
 0x28a   : > { %v4696_v45 = vadd.f32 %v2954_v43, %v6397_v23  ;;  %v4748_v46 = vadd.f32 %v3606_v44, %v6399_v24  ;;  %v2956_v47 = vpop.f32.mrb[29].mxu0  ;;  %v3608_v48 = vpop.f32.mrb[29].mxu1 }
 0x28b   : > { %4107 = vst [vmem:[%s6417_s26 + $0xd0] sm:$0xff] %v4642_v41  ;;  %4108 = vst [vmem:[%s6417_s26 + $0xd8] sm:$0xff] %v4643_v42  ;;  %v4697_v49 = vadd.f32 %v2956_v47, %v6401_v25  ;;  %v4749_v50 = vadd.f32 %v3608_v48, %v6403_v26  ;;  %v2958_v51 = vpop.f32.mrb[30].mxu0  ;;  %v3610_v52 = vpop.f32.mrb[30].mxu1 }
 0x28c   : > { %v3721_v53 = vmax.f32 %v4696_v45, 0.0  ;;  %v3723_v54 = vmax.f32 %v4748_v46, 0.0  ;;  %v4698_v55 = vadd.f32 %v2958_v51, %v6397_v23  ;;  %v4750_v56 = vadd.f32 %v3610_v52, %v6399_v24  ;;  %v2960_v57 = vpop.f32.mrb[31].mxu0  ;;  %v3612_v58 = vpop.f32.mrb[31].mxu1 }
 0x28d   : > { %v3722_v59 = vmax.f32 %v4697_v49, 0.0  ;;  %v3724_v60 = vmax.f32 %v4749_v50, 0.0  ;;  %v4699_v61 = vadd.f32 %v2960_v57, %v6401_v25  ;;  %v4751_v62 = vadd.f32 %v3612_v58, %v6403_v26 }
 0x28e   : > { %v3725_v63 = vmax.f32 %v4698_v55, 0.0  ;;  %v3727_v0 = vmax.f32 %v4750_v56, 0.0 }
 0x28f   : > { %v4644_v1 = vpack.c.bf16 %v3722_v59, %v3721_v53  ;;  %v4645_v2 = vpack.c.bf16 %v3724_v60, %v3723_v54  ;;  %v3726_v3 = vmax.f32 %v4699_v61, 0.0  ;;  %v3728_v4 = vmax.f32 %v4751_v62, 0.0 }
 0x291   : > { %4109 = vst [vmem:[%s6417_s26 + $0xe0] sm:$0xff] %v4644_v1  ;;  %4110 = vst [vmem:[%s6417_s26 + $0xe8] sm:$0xff] %v4645_v2  ;;  %v4646_v5 = vpack.c.bf16 %v3726_v3, %v3725_v63  ;;  %v4647_v6 = vpack.c.bf16 %v3728_v4, %v3727_v0  ;;  %v2964_v7 = vpop.f32.mrb[32].mxu0  ;;  %v3616_v8 = vpop.f32.mrb[32].mxu1 }
 0x292   : > { %v4700_v9 = vadd.f32 %v2964_v7, %v6397_v23  ;;  %v4752_v10 = vadd.f32 %v3616_v8, %v6399_v24  ;;  %v2966_v11 = vpop.f32.mrb[33].mxu0  ;;  %v3618_v12 = vpop.f32.mrb[33].mxu1 }
 0x293   : > { %4111 = vst [vmem:[%s6417_s26 + $0xf0] sm:$0xff] %v4646_v5  ;;  %4112 = vst [vmem:[%s6417_s26 + $0xf8] sm:$0xff] %v4647_v6  ;;  %v4701_v13 = vadd.f32 %v2966_v11, %v6401_v25  ;;  %v4753_v14 = vadd.f32 %v3618_v12, %v6403_v26  ;;  %v2968_v15 = vpop.f32.mrb[34].mxu0  ;;  %v3620_v16 = vpop.f32.mrb[34].mxu1 }
 0x294   : > { %v3729_v17 = vmax.f32 %v4700_v9, 0.0  ;;  %v3731_v18 = vmax.f32 %v4752_v10, 0.0  ;;  %v4702_v19 = vadd.f32 %v2968_v15, %v6397_v23  ;;  %v4754_v20 = vadd.f32 %v3620_v16, %v6399_v24  ;;  %v2970_v21 = vpop.f32.mrb[35].mxu0  ;;  %v3622_v22 = vpop.f32.mrb[35].mxu1 }
 0x295   : > { %v3730_v27 = vmax.f32 %v4701_v13, 0.0  ;;  %v3732_v28 = vmax.f32 %v4753_v14, 0.0  ;;  %v4703_v29 = vadd.f32 %v2970_v21, %v6401_v25  ;;  %v4755_v30 = vadd.f32 %v3622_v22, %v6403_v26 }
 0x296   : > { %v3733_v31 = vmax.f32 %v4702_v19, 0.0  ;;  %v3735_v32 = vmax.f32 %v4754_v20, 0.0 }
 0x297   : > { %v4648_v33 = vpack.c.bf16 %v3730_v27, %v3729_v17  ;;  %v4649_v34 = vpack.c.bf16 %v3732_v28, %v3731_v18  ;;  %v3734_v35 = vmax.f32 %v4703_v29, 0.0  ;;  %v3736_v36 = vmax.f32 %v4755_v30, 0.0 }
 0x299   : > { %4113 = vst [vmem:[%s6417_s26 + $0x100] sm:$0xff] %v4648_v33  ;;  %4114 = vst [vmem:[%s6417_s26 + $0x108] sm:$0xff] %v4649_v34  ;;  %v4650_v37 = vpack.c.bf16 %v3734_v35, %v3733_v31  ;;  %v4651_v38 = vpack.c.bf16 %v3736_v36, %v3735_v32  ;;  %v2974_v39 = vpop.f32.mrb[36].mxu0  ;;  %v3626_v40 = vpop.f32.mrb[36].mxu1 }
 0x29a   : > { %v4704_v41 = vadd.f32 %v2974_v39, %v6397_v23  ;;  %v4756_v42 = vadd.f32 %v3626_v40, %v6399_v24  ;;  %v2976_v43 = vpop.f32.mrb[37].mxu0  ;;  %v3628_v44 = vpop.f32.mrb[37].mxu1 }
 0x29b   : > { %4115 = vst [vmem:[%s6417_s26 + $0x110] sm:$0xff] %v4650_v37  ;;  %4116 = vst [vmem:[%s6417_s26 + $0x118] sm:$0xff] %v4651_v38  ;;  %v4705_v45 = vadd.f32 %v2976_v43, %v6401_v25  ;;  %v4757_v46 = vadd.f32 %v3628_v44, %v6403_v26  ;;  %v2978_v47 = vpop.f32.mrb[38].mxu0  ;;  %v3630_v48 = vpop.f32.mrb[38].mxu1 }
 0x29c   : > { %v3737_v49 = vmax.f32 %v4704_v41, 0.0  ;;  %v3739_v50 = vmax.f32 %v4756_v42, 0.0  ;;  %v4706_v51 = vadd.f32 %v2978_v47, %v6397_v23  ;;  %v4758_v52 = vadd.f32 %v3630_v48, %v6399_v24  ;;  %v2980_v53 = vpop.f32.mrb[39].mxu0  ;;  %v3632_v54 = vpop.f32.mrb[39].mxu1 }
 0x29d   : > { %v3738_v55 = vmax.f32 %v4705_v45, 0.0  ;;  %v3740_v56 = vmax.f32 %v4757_v46, 0.0  ;;  %v4707_v57 = vadd.f32 %v2980_v53, %v6401_v25  ;;  %v4759_v58 = vadd.f32 %v3632_v54, %v6403_v26 }
 0x29e   : > { %v3741_v59 = vmax.f32 %v4706_v51, 0.0  ;;  %v3743_v60 = vmax.f32 %v4758_v52, 0.0 }
 0x29f   : > { %v4652_v61 = vpack.c.bf16 %v3738_v55, %v3737_v49  ;;  %v4653_v62 = vpack.c.bf16 %v3740_v56, %v3739_v50  ;;  %v3742_v63 = vmax.f32 %v4707_v57, 0.0  ;;  %v3744_v0 = vmax.f32 %v4759_v58, 0.0 }
 0x2a1   : > { %4117 = vst [vmem:[%s6417_s26 + $0x120] sm:$0xff] %v4652_v61  ;;  %4118 = vst [vmem:[%s6417_s26 + $0x128] sm:$0xff] %v4653_v62  ;;  %v4654_v1 = vpack.c.bf16 %v3742_v63, %v3741_v59  ;;  %v4655_v2 = vpack.c.bf16 %v3744_v0, %v3743_v60  ;;  %v2984_v3 = vpop.f32.mrb[40].mxu0  ;;  %v3636_v4 = vpop.f32.mrb[40].mxu1 }
 0x2a2   : > { %v4708_v5 = vadd.f32 %v2984_v3, %v6397_v23  ;;  %v4760_v6 = vadd.f32 %v3636_v4, %v6399_v24  ;;  %v2986_v7 = vpop.f32.mrb[41].mxu0  ;;  %v3638_v8 = vpop.f32.mrb[41].mxu1 }
 0x2a3   : > { %4119 = vst [vmem:[%s6417_s26 + $0x130] sm:$0xff] %v4654_v1  ;;  %4120 = vst [vmem:[%s6417_s26 + $0x138] sm:$0xff] %v4655_v2  ;;  %v4709_v9 = vadd.f32 %v2986_v7, %v6401_v25  ;;  %v4761_v10 = vadd.f32 %v3638_v8, %v6403_v26  ;;  %v2988_v11 = vpop.f32.mrb[42].mxu0  ;;  %v3640_v12 = vpop.f32.mrb[42].mxu1 }
 0x2a4   : > { %v3745_v13 = vmax.f32 %v4708_v5, 0.0  ;;  %v3747_v14 = vmax.f32 %v4760_v6, 0.0  ;;  %v4710_v15 = vadd.f32 %v2988_v11, %v6397_v23  ;;  %v4762_v16 = vadd.f32 %v3640_v12, %v6399_v24  ;;  %v2990_v17 = vpop.f32.mrb[43].mxu0  ;;  %v3642_v18 = vpop.f32.mrb[43].mxu1 }
 0x2a5   : > { %v3746_v19 = vmax.f32 %v4709_v9, 0.0  ;;  %v3748_v20 = vmax.f32 %v4761_v10, 0.0  ;;  %v4711_v21 = vadd.f32 %v2990_v17, %v6401_v25  ;;  %v4763_v22 = vadd.f32 %v3642_v18, %v6403_v26 }
 0x2a6   : > { %v3749_v27 = vmax.f32 %v4710_v15, 0.0  ;;  %v3751_v28 = vmax.f32 %v4762_v16, 0.0 }
 0x2a7   : > { %v4656_v29 = vpack.c.bf16 %v3746_v19, %v3745_v13  ;;  %v4657_v30 = vpack.c.bf16 %v3748_v20, %v3747_v14  ;;  %v3750_v31 = vmax.f32 %v4711_v21, 0.0  ;;  %v3752_v32 = vmax.f32 %v4763_v22, 0.0 }
 0x2a9   : > { %4121 = vst [vmem:[%s6417_s26 + $0x140] sm:$0xff] %v4656_v29  ;;  %4122 = vst [vmem:[%s6417_s26 + $0x148] sm:$0xff] %v4657_v30  ;;  %v4658_v33 = vpack.c.bf16 %v3750_v31, %v3749_v27  ;;  %v4659_v34 = vpack.c.bf16 %v3752_v32, %v3751_v28  ;;  %v2994_v35 = vpop.f32.mrb[44].mxu0  ;;  %v3646_v36 = vpop.f32.mrb[44].mxu1 }
 0x2aa   : > { %v4712_v37 = vadd.f32 %v2994_v35, %v6397_v23  ;;  %v4764_v38 = vadd.f32 %v3646_v36, %v6399_v24  ;;  %v2996_v39 = vpop.f32.mrb[45].mxu0  ;;  %v3648_v40 = vpop.f32.mrb[45].mxu1 }
 0x2ab   : > { %4123 = vst [vmem:[%s6417_s26 + $0x150] sm:$0xff] %v4658_v33  ;;  %4124 = vst [vmem:[%s6417_s26 + $0x158] sm:$0xff] %v4659_v34  ;;  %v4713_v41 = vadd.f32 %v2996_v39, %v6401_v25  ;;  %v4765_v42 = vadd.f32 %v3648_v40, %v6403_v26  ;;  %v2998_v43 = vpop.f32.mrb[46].mxu0  ;;  %v3650_v44 = vpop.f32.mrb[46].mxu1 }
 0x2ac   : > { %v3753_v45 = vmax.f32 %v4712_v37, 0.0  ;;  %v3755_v46 = vmax.f32 %v4764_v38, 0.0  ;;  %v4714_v47 = vadd.f32 %v2998_v43, %v6397_v23  ;;  %v4766_v48 = vadd.f32 %v3650_v44, %v6399_v24  ;;  %v3000_v49 = vpop.f32.mrb[47].mxu0  ;;  %v3652_v50 = vpop.f32.mrb[47].mxu1 }
 0x2ad   : > { %v3754_v51 = vmax.f32 %v4713_v41, 0.0  ;;  %v3756_v52 = vmax.f32 %v4765_v42, 0.0  ;;  %v4715_v53 = vadd.f32 %v3000_v49, %v6401_v25  ;;  %v4767_v54 = vadd.f32 %v3652_v50, %v6403_v26 }
 0x2ae   : > { %v3757_v55 = vmax.f32 %v4714_v47, 0.0  ;;  %v3759_v56 = vmax.f32 %v4766_v48, 0.0 }
 0x2af   : > { %v4660_v57 = vpack.c.bf16 %v3754_v51, %v3753_v45  ;;  %v4661_v58 = vpack.c.bf16 %v3756_v52, %v3755_v46  ;;  %v3758_v59 = vmax.f32 %v4715_v53, 0.0  ;;  %v3760_v60 = vmax.f32 %v4767_v54, 0.0 }
 0x2b1   : > { %4125 = vst [vmem:[%s6417_s26 + $0x160] sm:$0xff] %v4660_v57  ;;  %4126 = vst [vmem:[%s6417_s26 + $0x168] sm:$0xff] %v4661_v58  ;;  %v4662_v61 = vpack.c.bf16 %v3758_v59, %v3757_v55  ;;  %v4663_v62 = vpack.c.bf16 %v3760_v60, %v3759_v56  ;;  %v3004_v63 = vpop.f32.mrb[48].mxu0  ;;  %v3656_v0 = vpop.f32.mrb[48].mxu1 }
 0x2b2   : > { %v4716_v1 = vadd.f32 %v3004_v63, %v6397_v23  ;;  %v4768_v2 = vadd.f32 %v3656_v0, %v6399_v24  ;;  %v3006_v3 = vpop.f32.mrb[49].mxu0  ;;  %v3658_v4 = vpop.f32.mrb[49].mxu1 }
 0x2b3   : > { %4127 = vst [vmem:[%s6417_s26 + $0x170] sm:$0xff] %v4662_v61  ;;  %4128 = vst [vmem:[%s6417_s26 + $0x178] sm:$0xff] %v4663_v62  ;;  %v4717_v5 = vadd.f32 %v3006_v3, %v6401_v25  ;;  %v4769_v6 = vadd.f32 %v3658_v4, %v6403_v26  ;;  %v3008_v7 = vpop.f32.mrb[50].mxu0  ;;  %v3660_v8 = vpop.f32.mrb[50].mxu1 }
 0x2b4   : > { %v3761_v9 = vmax.f32 %v4716_v1, 0.0  ;;  %v3763_v10 = vmax.f32 %v4768_v2, 0.0  ;;  %v4718_v11 = vadd.f32 %v3008_v7, %v6397_v23  ;;  %v4770_v12 = vadd.f32 %v3660_v8, %v6399_v24  ;;  %v3010_v13 = vpop.f32.mrb[51].mxu0  ;;  %v3662_v14 = vpop.f32.mrb[51].mxu1 }
 0x2b5   : > { %v3762_v15 = vmax.f32 %v4717_v5, 0.0  ;;  %v3764_v16 = vmax.f32 %v4769_v6, 0.0  ;;  %v4719_v17 = vadd.f32 %v3010_v13, %v6401_v25  ;;  %v4771_v18 = vadd.f32 %v3662_v14, %v6403_v26 }
 0x2b6   : > { %v3765_v19 = vmax.f32 %v4718_v11, 0.0  ;;  %v3767_v20 = vmax.f32 %v4770_v12, 0.0 }
 0x2b7   : > { %v4664_v21 = vpack.c.bf16 %v3762_v15, %v3761_v9  ;;  %v4665_v22 = vpack.c.bf16 %v3764_v16, %v3763_v10  ;;  %v3766_v27 = vmax.f32 %v4719_v17, 0.0  ;;  %v3768_v28 = vmax.f32 %v4771_v18, 0.0 }
 0x2b9   : > { %4129 = vst [vmem:[%s6417_s26 + $0x180] sm:$0xff] %v4664_v21  ;;  %4130 = vst [vmem:[%s6417_s26 + $0x188] sm:$0xff] %v4665_v22  ;;  %v4666_v23 = vpack.c.bf16 %v3766_v27, %v3765_v19  ;;  %v4667_v24 = vpack.c.bf16 %v3768_v28, %v3767_v20 }
 0x2bb   : > { %4131 = vst [vmem:[%s6417_s26 + $0x190] sm:$0xff] %v4666_v23  ;;  %4132 = vst [vmem:[%s6417_s26 + $0x198] sm:$0xff] %v4667_v24 }
 0x2bc PF: > { %s13_s12 = sadd.s32 1, %s5482_s12  }
 0x2bd   : > { %p10_p4 = scmp.ge.s32.totalorder %s13_s12, 4  }
 0x2bf   :  { %12 = sbr.rel (!%p10_p4) target bundleno = 1 (0x1), region = 62 }

// kernel: dvae_forward.9
= control target key start
LH: loop header
LB: loop body
LE: loop exit
PB: predicated region body
PF: predicated region fallthrough
CT: control target
= control target key end

     0   :  { %vm2724_vm0 = vcmask 130048   ;;  %s4870_s1 = inlined_call_operand.vmem [shape: bf16[512,1296], index: 1, kind: input, shape index: {}]   ;;  %s4871_s0 = inlined_call_operand.vmem [shape: bf16[8,512], index: 0, kind: input, shape index: {}]   ;;  %s4872_s2 = inlined_call_operand.vmem [shape: f32[8,1], index: 2, kind: input, shape index: {}]   ;;  %s4873_s3 = inlined_call_operand.vmem [shape: f32[8,1296], index: 3, kind: output, shape index: {}]  }
   0x1   :  { %v3162_v0 = vld [vmem:[%s4870_s1 + $0x4] ss:$44 sps:$4 sm:$0xff]   ;;  %v3164_v1 = vld [vmem:[%s4870_s1 + $0xc] ss:$44 sps:$4 sm:$0xff]   ;;  %v3167_v3 = vld [vmem:[%s4870_s1 + $0x8] ss:$44 sps:$4 sm:$0xff]  }
   0x2   :  { %2213 = vmatprep.subr.bf16.mxu0 %v3162_v0  ;;  %v3166_v2 = vld [vmem:[%s4870_s1] ss:$44 sps:$4 sm:$0xff]   ;;  %2295 = vmatprep.subr.bf16.mxu1 %v3164_v1  ;;  %v3168_v4 = vld [vmem:[%s4870_s1 + $0x5c] ss:$44 sps:$4 sm:$0xff]   ;;  %v3170_v5 = vld [vmem:[%s4870_s1 + $0x64] ss:$44 sps:$4 sm:$0xff]  }
   0x3   :  { %2214 = vmatpush1.bf16.msra.mxu0 %v3166_v2  ;;  %2296 = vmatpush1.bf16.msra.mxu1 %v3167_v3  ;;  %v3172_v6 = vld [vmem:[%s4870_s1 + $0x58] ss:$44 sps:$4 sm:$0xff]   ;;  %v3173_v7 = vld [vmem:[%s4870_s1 + $0x60] ss:$44 sps:$4 sm:$0xff]   ;;  %v3176_v9 = vld [vmem:[%s4870_s1 + $0xbc] ss:$44 sps:$4 sm:$0xff]  }
   0x4   :  { %2215 = vmatprep.subr.bf16.mxu0 %v3168_v4  ;;  %2297 = vmatprep.subr.bf16.mxu1 %v3170_v5  ;;  %v3174_v8 = vld [vmem:[%s4870_s1 + $0xb4] ss:$44 sps:$4 sm:$0xff]   ;;  %v3178_v10 = vld [vmem:[%s4870_s1 + $0xb0] ss:$44 sps:$4 sm:$0xff]   ;;  %v3179_v11 = vld [vmem:[%s4870_s1 + $0xb8] ss:$44 sps:$4 sm:$0xff]  }
   0x5   :  { %v3180_v12 = vld [vmem:[%s4870_s1 + $0x10c] ss:$44 sps:$4 sm:$0xff]   ;;  %v3182_v13 = vld [vmem:[%s4870_s1 + $0x114] ss:$44 sps:$4 sm:$0xff]   ;;  %v3185_v15 = vld [vmem:[%s4870_s1 + $0x110] ss:$44 sps:$4 sm:$0xff]  }
   0x6   :  { %v3184_v14 = vld [vmem:[%s4870_s1 + $0x108] ss:$44 sps:$4 sm:$0xff]   ;;  %v3186_v16 = vld [vmem:[%s4870_s1 + $0x164] ss:$44 sps:$4 sm:$0xff]   ;;  %v3188_v17 = vld [vmem:[%s4870_s1 + $0x16c] ss:$44 sps:$4 sm:$0xff]  }
   0x7   :  { %2216 = vmatpush1.bf16.msra.mxu0 %v3172_v6  ;;  %2298 = vmatpush1.bf16.msra.mxu1 %v3173_v7  ;;  %v3190_v18 = vld [vmem:[%s4870_s1 + $0x160] ss:$44 sps:$4 sm:$0xff]   ;;  %v3191_v19 = vld [vmem:[%s4870_s1 + $0x168] ss:$44 sps:$4 sm:$0xff]   ;;  %v3194_v21 = vld [vmem:[%s4870_s1 + $0x1c4] ss:$44 sps:$4 sm:$0xff]  }
   0x8   :  { %2217 = vmatprep.subr.bf16.mxu0 %v3174_v8  ;;  %2299 = vmatprep.subr.bf16.mxu1 %v3176_v9  ;;  %v3192_v20 = vld [vmem:[%s4870_s1 + $0x1bc] ss:$44 sps:$4 sm:$0xff]   ;;  %v3196_v22 = vld [vmem:[%s4870_s1 + $0x1b8] ss:$44 sps:$4 sm:$0xff]   ;;  %v3197_v23 = vld [vmem:[%s4870_s1 + $0x1c0] ss:$44 sps:$4 sm:$0xff]  }
   0x9   :  { %v3198_v24 = vld [vmem:[%s4870_s1 + $0x214] ss:$44 sps:$4 sm:$0xff]   ;;  %v3200_v25 = vld [vmem:[%s4870_s1 + $0x21c] ss:$44 sps:$4 sm:$0xff]   ;;  %v3203_v27 = vld [vmem:[%s4870_s1 + $0x218] ss:$44 sps:$4 sm:$0xff]  }
   0xa   :  { %v3202_v26 = vld [vmem:[%s4870_s1 + $0x210] ss:$44 sps:$4 sm:$0xff]   ;;  %v3204_v28 = vld [vmem:[%s4870_s1 + $0x26c] ss:$44 sps:$4 sm:$0xff]   ;;  %v3206_v29 = vld [vmem:[%s4870_s1 + $0x274] ss:$44 sps:$4 sm:$0xff]  }
   0xb   :  { %2218 = vmatpush1.bf16.msra.mxu0 %v3178_v10  ;;  %2300 = vmatpush1.bf16.msra.mxu1 %v3179_v11  ;;  %v3208_v30 = vld [vmem:[%s4870_s1 + $0x268] ss:$44 sps:$4 sm:$0xff]   ;;  %v3209_v31 = vld [vmem:[%s4870_s1 + $0x270] ss:$44 sps:$4 sm:$0xff]   ;;  %v3212_v33 = vld [vmem:[%s4870_s1 + $0x2cc] ss:$44 sps:$4 sm:$0xff]  }
   0xc   :  { %2219 = vmatprep.subr.bf16.mxu0 %v3180_v12  ;;  %2301 = vmatprep.subr.bf16.mxu1 %v3182_v13  ;;  %v3210_v32 = vld [vmem:[%s4870_s1 + $0x2c4] ss:$44 sps:$4 sm:$0xff]   ;;  %v3214_v34 = vld [vmem:[%s4870_s1 + $0x2c0] ss:$44 sps:$4 sm:$0xff]   ;;  %v3215_v35 = vld [vmem:[%s4870_s1 + $0x2c8] ss:$44 sps:$4 sm:$0xff]  }
   0xd   :  { %v3216_v36 = vld [vmem:[%s4870_s1 + $0x31c] ss:$44 sps:$4 sm:$0xff]   ;;  %v3218_v37 = vld [vmem:[%s4870_s1 + $0x324] ss:$44 sps:$4 sm:$0xff]   ;;  %v3221_v39 = vld [vmem:[%s4870_s1 + $0x320] ss:$44 sps:$4 sm:$0xff]  }
   0xe   :  { %v3220_v38 = vld [vmem:[%s4870_s1 + $0x318] ss:$44 sps:$4 sm:$0xff]   ;;  %v3222_v40 = vld [vmem:[%s4870_s1 + $0x374] ss:$44 sps:$4 sm:$0xff]   ;;  %v3224_v41 = vld [vmem:[%s4870_s1 + $0x37c] ss:$44 sps:$4 sm:$0xff]  }
   0xf   :  { %2220 = vmatpush1.bf16.msra.mxu0 %v3184_v14  ;;  %2302 = vmatpush1.bf16.msra.mxu1 %v3185_v15  ;;  %v3226_v42 = vld [vmem:[%s4870_s1 + $0x370] ss:$44 sps:$4 sm:$0xff]   ;;  %v3227_v43 = vld [vmem:[%s4870_s1 + $0x378] ss:$44 sps:$4 sm:$0xff]   ;;  %v3230_v45 = vld [vmem:[%s4870_s1 + $0x3d4] ss:$44 sps:$4 sm:$0xff]  }
  0x10   :  { %2221 = vmatprep.subr.bf16.mxu0 %v3186_v16  ;;  %2303 = vmatprep.subr.bf16.mxu1 %v3188_v17  ;;  %v3228_v44 = vld [vmem:[%s4870_s1 + $0x3cc] ss:$44 sps:$4 sm:$0xff]   ;;  %v15_v46 = vld [vmem:[%s4871_s0] sm:$0xff]  ;;  %v3232_v47 = vld [vmem:[%s4870_s1 + $0x3c8] ss:$44 sps:$4 sm:$0xff]  }
  0x11   :  { %v3865_v48 = vcombine.high %v15_v46, %v15_v46  ;;  %v3233_v49 = vld [vmem:[%s4870_s1 + $0x3d0] ss:$44 sps:$4 sm:$0xff]   ;;  %v3236_v51 = vld [vmem:[%s4870_s1 + $0x42c] ss:$44 sps:$4 sm:$0xff]   ;;  %v3239_v53 = vld [vmem:[%s4870_s1 + $0x428] ss:$44 sps:$4 sm:$0xff]   ;;  %v3929_v5 = vcombine.low %v15_v46, %v15_v46 }
  0x12   :  { %v3234_v50 = vld [vmem:[%s4870_s1 + $0x424] ss:$44 sps:$4 sm:$0xff]   ;;  %v3238_v52 = vld [vmem:[%s4870_s1 + $0x420] ss:$44 sps:$4 sm:$0xff]   ;;  %v3240_v54 = vld [vmem:[%s4870_s1 + $0x47c] ss:$44 sps:$4 sm:$0xff]  }
  0x13   :  { %2222 = vmatpush1.bf16.msra.mxu0 %v3190_v18  ;;  %2304 = vmatpush1.bf16.msra.mxu1 %v3191_v19  ;;  %v3242_v55 = vld [vmem:[%s4870_s1 + $0x484] ss:$44 sps:$4 sm:$0xff]   ;;  %v3245_v57 = vld [vmem:[%s4870_s1 + $0x480] ss:$44 sps:$4 sm:$0xff]   ;;  %v3248_v59 = vld [vmem:[%s4870_s1 + $0x4dc] ss:$44 sps:$4 sm:$0xff]  }
  0x14   :  { %2223 = vmatprep.subr.bf16.mxu0 %v3192_v20  ;;  %2305 = vmatprep.subr.bf16.mxu1 %v3194_v21  ;;  %v3244_v56 = vld [vmem:[%s4870_s1 + $0x478] ss:$44 sps:$4 sm:$0xff]   ;;  %v3246_v58 = vld [vmem:[%s4870_s1 + $0x4d4] ss:$44 sps:$4 sm:$0xff]   ;;  %v3250_v60 = vld [vmem:[%s4870_s1 + $0x4d0] ss:$44 sps:$4 sm:$0xff]  }
  0x15   :  { %2245 = vmatprep.mubr.bf16.mxu0 %v3865_v48  ;;  %2327 = vmatprep.mubr.bf16.mxu1 %v3865_v48  ;;  %v3251_v61 = vld [vmem:[%s4870_s1 + $0x4d8] ss:$44 sps:$4 sm:$0xff]   ;;  %v3254_v63 = vld [vmem:[%s4870_s1 + $0x534] ss:$44 sps:$4 sm:$0xff]   ;;  %v3257_v1 = vld [vmem:[%s4870_s1 + $0x530] ss:$44 sps:$4 sm:$0xff]  }
  0x16   :  { %v3252_v62 = vld [vmem:[%s4870_s1 + $0x52c] ss:$44 sps:$4 sm:$0xff]   ;;  %v3256_v0 = vld [vmem:[%s4870_s1 + $0x528] ss:$44 sps:$4 sm:$0xff]   ;;  %v3261_v2 = vld [vmem:[%s4870_s1 + $0x584] ss:$44 sps:$4 sm:$0xff]  }
  0x17   :  { %2224 = vmatpush1.bf16.msra.mxu0 %v3196_v22  ;;  %2306 = vmatpush1.bf16.msra.mxu1 %v3197_v23  ;;  %v3264_v3 = vld [vmem:[%s4870_s1 + $0x58c] ss:$44 sps:$4 sm:$0xff]   ;;  %v3262_v6 = vld [vmem:[%s4870_s1 + $0x588] ss:$44 sps:$4 sm:$0xff]   ;;  %v3271_v8 = vld [vmem:[%s4870_s1 + $0x5e4] ss:$44 sps:$4 sm:$0xff]  }
  0x18   :  { %2225 = vmatprep.subr.bf16.mxu0 %v3198_v24  ;;  %2307 = vmatprep.subr.bf16.mxu1 %v3200_v25  ;;  %v3259_v4 = vld [vmem:[%s4870_s1 + $0x580] ss:$44 sps:$4 sm:$0xff]   ;;  %v3268_v7 = vld [vmem:[%s4870_s1 + $0x5dc] ss:$44 sps:$4 sm:$0xff]   ;;  %v3266_v9 = vld [vmem:[%s4870_s1 + $0x5d8] ss:$44 sps:$4 sm:$0xff]  }
  0x19   :  { %v3269_v10 = vld [vmem:[%s4870_s1 + $0x5e0] ss:$44 sps:$4 sm:$0xff]   ;;  %v3277_v12 = vld [vmem:[%s4870_s1 + $0x63c] ss:$44 sps:$4 sm:$0xff]   ;;  %v3275_v14 = vld [vmem:[%s4870_s1 + $0x638] ss:$44 sps:$4 sm:$0xff]  }
  0x1a   :  { %v3274_v11 = vld [vmem:[%s4870_s1 + $0x634] ss:$44 sps:$4 sm:$0xff]   ;;  %v3272_v13 = vld [vmem:[%s4870_s1 + $0x630] ss:$44 sps:$4 sm:$0xff]   ;;  %v3280_v15 = vld [vmem:[%s4870_s1 + $0x68c] ss:$44 sps:$4 sm:$0xff]  }
  0x1b   :  { %2226 = vmatpush1.bf16.msra.mxu0 %v3202_v26  ;;  %2308 = vmatpush1.bf16.msra.mxu1 %v3203_v27  ;;  %v3283_v16 = vld [vmem:[%s4870_s1 + $0x694] ss:$44 sps:$4 sm:$0xff]   ;;  %v3281_v18 = vld [vmem:[%s4870_s1 + $0x690] ss:$44 sps:$4 sm:$0xff]   ;;  %v3289_v20 = vld [vmem:[%s4870_s1 + $0x6ec] ss:$44 sps:$4 sm:$0xff]  }
  0x1c   :  { %2227 = vmatprep.subr.bf16.mxu0 %v3204_v28  ;;  %2309 = vmatprep.subr.bf16.mxu1 %v3206_v29  ;;  %v3278_v17 = vld [vmem:[%s4870_s1 + $0x688] ss:$44 sps:$4 sm:$0xff]   ;;  %v3286_v19 = vld [vmem:[%s4870_s1 + $0x6e4] ss:$44 sps:$4 sm:$0xff]   ;;  %v3284_v21 = vld [vmem:[%s4870_s1 + $0x6e0] ss:$44 sps:$4 sm:$0xff]  }
  0x1d   :  { %v3287_v22 = vld [vmem:[%s4870_s1 + $0x6e8] ss:$44 sps:$4 sm:$0xff]   ;;  %v3295_v24 = vld [vmem:[%s4870_s1 + $0x744] ss:$44 sps:$4 sm:$0xff]   ;;  %v3293_v26 = vld [vmem:[%s4870_s1 + $0x740] ss:$44 sps:$4 sm:$0xff]  }
  0x1e   :  { %v3292_v23 = vld [vmem:[%s4870_s1 + $0x73c] ss:$44 sps:$4 sm:$0xff]   ;;  %v3290_v25 = vld [vmem:[%s4870_s1 + $0x738] ss:$44 sps:$4 sm:$0xff]   ;;  %v3298_v27 = vld [vmem:[%s4870_s1 + $0x794] ss:$44 sps:$4 sm:$0xff]  }
  0x1f   :  { %2228 = vmatpush1.bf16.msra.mxu0 %v3208_v30  ;;  %2310 = vmatpush1.bf16.msra.mxu1 %v3209_v31  ;;  %v3301_v28 = vld [vmem:[%s4870_s1 + $0x79c] ss:$44 sps:$4 sm:$0xff]   ;;  %v3700_v31 = vmov 0   ;;  %v3322_v46 = vld [vmem:[%s4870_s1 + $0x8f4] ss:$44 sps:$4 sm:$0xff]  }
  0x20   :  { %2229 = vmatprep.subr.bf16.mxu0 %v3210_v32  ;;  %2311 = vmatprep.subr.bf16.mxu1 %v3212_v33  ;;  %v4005_v29 = vld [vmem:[%s4871_s0 + $0x8] sm:$0xff]  ;;  %v3296_v32 = vld [vmem:[%s4870_s1 + $0x790] ss:$44 sps:$4 sm:$0xff]   ;;  %v3299_v33 = vld [vmem:[%s4870_s1 + $0x798] ss:$44 sps:$4 sm:$0xff]  }
  0x21   :  { %v4009_v30 = vcombine.high %v4005_v29, %v4005_v29  ;;  %3161 = vset.pattern.permute.xlu0 %v3700_v31  ;;  %v3390_v31 = vld [vmem:[%s4870_s1 + $0x1cc] ss:$44 sps:$4 sm:$0xff]  }
  0x23   :  { %2230 = vmatpush1.bf16.msra.mxu0 %v3214_v34  ;;  %2312 = vmatpush1.bf16.msra.mxu1 %v3215_v35  ;;  %v3304_v34 = vld [vmem:[%s4870_s1 + $0x7ec] ss:$44 sps:$4 sm:$0xff]   ;;  %v3307_v35 = vld [vmem:[%s4870_s1 + $0x7f4] ss:$44 sps:$4 sm:$0xff]  }
  0x24   :  { %2231 = vmatprep.subr.bf16.mxu0 %v3216_v36  ;;  %2313 = vmatprep.subr.bf16.mxu1 %v3218_v37  ;;  %v3302_v36 = vld [vmem:[%s4870_s1 + $0x7e8] ss:$44 sps:$4 sm:$0xff]   ;;  %v3305_v37 = vld [vmem:[%s4870_s1 + $0x7f0] ss:$44 sps:$4 sm:$0xff]  }
  0x27   :  { %2232 = vmatpush1.bf16.msra.mxu0 %v3220_v38  ;;  %2314 = vmatpush1.bf16.msra.mxu1 %v3221_v39  ;;  %v3310_v38 = vld [vmem:[%s4870_s1 + $0x844] ss:$44 sps:$4 sm:$0xff]   ;;  %v3313_v39 = vld [vmem:[%s4870_s1 + $0x84c] ss:$44 sps:$4 sm:$0xff]  }
  0x28   :  { %2233 = vmatprep.subr.bf16.mxu0 %v3222_v40  ;;  %2315 = vmatprep.subr.bf16.mxu1 %v3224_v41  ;;  %v3308_v40 = vld [vmem:[%s4870_s1 + $0x840] ss:$44 sps:$4 sm:$0xff]   ;;  %v3311_v41 = vld [vmem:[%s4870_s1 + $0x848] ss:$44 sps:$4 sm:$0xff]  }
  0x2b   :  { %2234 = vmatpush1.bf16.msra.mxu0 %v3226_v42  ;;  %2316 = vmatpush1.bf16.msra.mxu1 %v3227_v43  ;;  %v3316_v42 = vld [vmem:[%s4870_s1 + $0x89c] ss:$44 sps:$4 sm:$0xff]   ;;  %v3319_v43 = vld [vmem:[%s4870_s1 + $0x8a4] ss:$44 sps:$4 sm:$0xff]  }
  0x2c   :  { %2235 = vmatprep.subr.bf16.mxu0 %v3228_v44  ;;  %2317 = vmatprep.subr.bf16.mxu1 %v3230_v45  ;;  %v3314_v44 = vld [vmem:[%s4870_s1 + $0x898] ss:$44 sps:$4 sm:$0xff]   ;;  %v3317_v45 = vld [vmem:[%s4870_s1 + $0x8a0] ss:$44 sps:$4 sm:$0xff]  }
  0x2f   :  { %2236 = vmatpush1.bf16.msra.mxu0 %v3232_v47  ;;  %2318 = vmatpush1.bf16.msra.mxu1 %v3233_v49  ;;  %v3325_v47 = vld [vmem:[%s4870_s1 + $0x8fc] ss:$44 sps:$4 sm:$0xff]  }
  0x30   :  { %2237 = vmatprep.subr.bf16.mxu0 %v3234_v50  ;;  %2319 = vmatprep.subr.bf16.mxu1 %v3236_v51  ;;  %v3320_v49 = vld [vmem:[%s4870_s1 + $0x8f0] ss:$44 sps:$4 sm:$0xff]   ;;  %v3323_v50 = vld [vmem:[%s4870_s1 + $0x8f8] ss:$44 sps:$4 sm:$0xff]  }
  0x31   :  { %v3328_v51 = vld [vmem:[%s4870_s1 + $0x94c] ss:$44 sps:$4 sm:$0xff]  }
  0x33   :  { %2238 = vmatpush1.bf16.msra.mxu0 %v3238_v52  ;;  %2320 = vmatpush1.bf16.msra.mxu1 %v3239_v53  ;;  %v3331_v52 = vld [vmem:[%s4870_s1 + $0x954] ss:$44 sps:$4 sm:$0xff]  }
  0x34   :  { %2239 = vmatprep.subr.bf16.mxu0 %v3240_v54  ;;  %2321 = vmatprep.subr.bf16.mxu1 %v3242_v55  ;;  %v3326_v53 = vld [vmem:[%s4870_s1 + $0x948] ss:$44 sps:$4 sm:$0xff]   ;;  %v3329_v54 = vld [vmem:[%s4870_s1 + $0x950] ss:$44 sps:$4 sm:$0xff]  }
  0x35   :  { %v3334_v55 = vld [vmem:[%s4870_s1 + $0x9a4] ss:$44 sps:$4 sm:$0xff]  }
  0x37   :  { %2240 = vmatpush1.bf16.msra.mxu0 %v3244_v56  ;;  %2322 = vmatpush1.bf16.msra.mxu1 %v3245_v57  ;;  %v3337_v56 = vld [vmem:[%s4870_s1 + $0x9ac] ss:$44 sps:$4 sm:$0xff]  }
  0x38   :  { %2241 = vmatprep.subr.bf16.mxu0 %v3246_v58  ;;  %2323 = vmatprep.subr.bf16.mxu1 %v3248_v59  ;;  %v3332_v57 = vld [vmem:[%s4870_s1 + $0x9a0] ss:$44 sps:$4 sm:$0xff]   ;;  %v3335_v58 = vld [vmem:[%s4870_s1 + $0x9a8] ss:$44 sps:$4 sm:$0xff]  }
  0x39   :  { %v3340_v59 = vld [vmem:[%s4870_s1 + $0x9fc] ss:$44 sps:$4 sm:$0xff]  }
  0x3b   :  { %2242 = vmatpush1.bf16.msra.mxu0 %v3250_v60  ;;  %2324 = vmatpush1.bf16.msra.mxu1 %v3251_v61  ;;  %v3343_v60 = vld [vmem:[%s4870_s1 + $0xa04] ss:$44 sps:$4 sm:$0xff]  }
  0x3c   :  { %2243 = vmatprep.subr.bf16.mxu0 %v3252_v62  ;;  %2325 = vmatprep.subr.bf16.mxu1 %v3254_v63  ;;  %v3338_v61 = vld [vmem:[%s4870_s1 + $0x9f8] ss:$44 sps:$4 sm:$0xff]   ;;  %v3341_v62 = vld [vmem:[%s4870_s1 + $0xa00] ss:$44 sps:$4 sm:$0xff]  }
  0x3d   :  { %v3346_v63 = vld [vmem:[%s4870_s1 + $0xa54] ss:$44 sps:$4 sm:$0xff]  }
  0x3f   :  { %2244 = vmatpush1.bf16.msra.mxu0 %v3256_v0  ;;  %2326 = vmatpush1.bf16.msra.mxu1 %v3257_v1  ;;  %v3349_v0 = vld [vmem:[%s4870_s1 + $0xa5c] ss:$44 sps:$4 sm:$0xff]  }
  0x40   :  { %2254 = vmatprep.subr.bf16.mxu0 %v3261_v2  ;;  %2336 = vmatprep.subr.bf16.mxu1 %v3264_v3  ;;  %v3344_v1 = vld [vmem:[%s4870_s1 + $0xa50] ss:$44 sps:$4 sm:$0xff]   ;;  %v3347_v2 = vld [vmem:[%s4870_s1 + $0xa58] ss:$44 sps:$4 sm:$0xff]  }
  0x41   :  { %v3352_v3 = vld [vmem:[%s4870_s1 + $0xaac] ss:$44 sps:$4 sm:$0xff]  }
  0x42   :  { %2246 = vmatmul.mubr.bf16.vlgmr.msra.gmra.mrb[0].mxu0 %v3929_v5  ;;  %2328 = vmatmul.mubr.bf16.vlgmr.msra.gmra.mrb[0].mxu1 %v3929_v5 }
  0x43   :  { %2255 = vmatpush1.bf16.msra.mxu0 %v3259_v4  ;;  %2337 = vmatpush1.bf16.msra.mxu1 %v3262_v6  ;;  %v3355_v4 = vld [vmem:[%s4870_s1 + $0xab4] ss:$44 sps:$4 sm:$0xff]  }
  0x44   :  { %2256 = vmatprep.subr.bf16.mxu0 %v3268_v7  ;;  %2338 = vmatprep.subr.bf16.mxu1 %v3271_v8  ;;  %v3350_v6 = vld [vmem:[%s4870_s1 + $0xaa8] ss:$44 sps:$4 sm:$0xff]   ;;  %v3353_v7 = vld [vmem:[%s4870_s1 + $0xab0] ss:$44 sps:$4 sm:$0xff]  }
  0x45   :  { %2286 = vmatprep.mubr.bf16.mxu0 %v4009_v30  ;;  %2368 = vmatprep.mubr.bf16.mxu1 %v4009_v30  ;;  %v3360_v8 = vld [vmem:[%s4870_s1 + $0x14] ss:$44 sps:$4 sm:$0xff]  }
  0x47   :  { %2257 = vmatpush1.bf16.msra.mxu0 %v3266_v9  ;;  %2339 = vmatpush1.bf16.msra.mxu1 %v3269_v10  ;;  %v3363_v9 = vld [vmem:[%s4870_s1 + $0x1c] ss:$44 sps:$4 sm:$0xff]   ;;  %v4135_v10 = vcombine.low %v4005_v29, %v4005_v29  ;;  %v3385_v29 = vld [vmem:[%s4870_s1 + $0x178] ss:$44 sps:$4 sm:$0xff]  }
  0x48   :  { %2258 = vmatprep.subr.bf16.mxu0 %v3274_v11  ;;  %2340 = vmatprep.subr.bf16.mxu1 %v3277_v12  ;;  %v3358_v11 = vld [vmem:[%s4870_s1 + $0x10] ss:$44 sps:$4 sm:$0xff]   ;;  %v3361_v12 = vld [vmem:[%s4870_s1 + $0x18] ss:$44 sps:$4 sm:$0xff]  }
  0x4b   :  { %2259 = vmatpush1.bf16.msra.mxu0 %v3272_v13  ;;  %2341 = vmatpush1.bf16.msra.mxu1 %v3275_v14  ;;  %v3366_v13 = vld [vmem:[%s4870_s1 + $0x6c] ss:$44 sps:$4 sm:$0xff]   ;;  %v3369_v14 = vld [vmem:[%s4870_s1 + $0x74] ss:$44 sps:$4 sm:$0xff]  }
  0x4c   :  { %2260 = vmatprep.subr.bf16.mxu0 %v3280_v15  ;;  %2342 = vmatprep.subr.bf16.mxu1 %v3283_v16  ;;  %v3364_v15 = vld [vmem:[%s4870_s1 + $0x68] ss:$44 sps:$4 sm:$0xff]   ;;  %v3367_v16 = vld [vmem:[%s4870_s1 + $0x70] ss:$44 sps:$4 sm:$0xff]  }
  0x4f   :  { %2261 = vmatpush1.bf16.msra.mxu0 %v3278_v17  ;;  %2343 = vmatpush1.bf16.msra.mxu1 %v3281_v18  ;;  %v3372_v17 = vld [vmem:[%s4870_s1 + $0xc4] ss:$44 sps:$4 sm:$0xff]   ;;  %v3375_v18 = vld [vmem:[%s4870_s1 + $0xcc] ss:$44 sps:$4 sm:$0xff]  }
  0x50   :  { %2262 = vmatprep.subr.bf16.mxu0 %v3286_v19  ;;  %2344 = vmatprep.subr.bf16.mxu1 %v3289_v20  ;;  %v3370_v19 = vld [vmem:[%s4870_s1 + $0xc0] ss:$44 sps:$4 sm:$0xff]   ;;  %v3373_v20 = vld [vmem:[%s4870_s1 + $0xc8] ss:$44 sps:$4 sm:$0xff]  }
  0x53   :  { %2263 = vmatpush1.bf16.msra.mxu0 %v3284_v21  ;;  %2345 = vmatpush1.bf16.msra.mxu1 %v3287_v22  ;;  %v3378_v21 = vld [vmem:[%s4870_s1 + $0x11c] ss:$44 sps:$4 sm:$0xff]   ;;  %v3381_v22 = vld [vmem:[%s4870_s1 + $0x124] ss:$44 sps:$4 sm:$0xff]  }
  0x54   :  { %2264 = vmatprep.subr.bf16.mxu0 %v3292_v23  ;;  %2346 = vmatprep.subr.bf16.mxu1 %v3295_v24  ;;  %v3376_v23 = vld [vmem:[%s4870_s1 + $0x118] ss:$44 sps:$4 sm:$0xff]   ;;  %v3379_v24 = vld [vmem:[%s4870_s1 + $0x120] ss:$44 sps:$4 sm:$0xff]  }
  0x57   :  { %2265 = vmatpush1.bf16.msra.mxu0 %v3290_v25  ;;  %2347 = vmatpush1.bf16.msra.mxu1 %v3293_v26  ;;  %v3384_v25 = vld [vmem:[%s4870_s1 + $0x174] ss:$44 sps:$4 sm:$0xff]   ;;  %v3387_v26 = vld [vmem:[%s4870_s1 + $0x17c] ss:$44 sps:$4 sm:$0xff]  }
  0x58   :  { %2266 = vmatprep.subr.bf16.mxu0 %v3298_v27  ;;  %2348 = vmatprep.subr.bf16.mxu1 %v3301_v28  ;;  %v401_v27 = vld [vmem:[%s4872_s2] sm:$0xff]  ;;  %v3382_v28 = vld [vmem:[%s4870_s1 + $0x170] ss:$44 sps:$4 sm:$0xff]  }
  0x59   :  { %404 = vperm.xlu0 %3161, %v401_v27   ;;  %v3477_v27 = vld [vmem:[%s4870_s1 + $0x6a4] ss:$44 sps:$4 sm:$0xff]  }
  0x5b   :  { %2267 = vmatpush1.bf16.msra.mxu0 %v3296_v32  ;;  %2349 = vmatpush1.bf16.msra.mxu1 %v3299_v33  ;;  %v3393_v32 = vld [vmem:[%s4870_s1 + $0x1d4] ss:$44 sps:$4 sm:$0xff]  }
  0x5c   :  { %2268 = vmatprep.subr.bf16.mxu0 %v3304_v34  ;;  %2350 = vmatprep.subr.bf16.mxu1 %v3307_v35  ;;  %v3388_v33 = vld [vmem:[%s4870_s1 + $0x1c8] ss:$44 sps:$4 sm:$0xff]   ;;  %v3391_v34 = vld [vmem:[%s4870_s1 + $0x1d0] ss:$44 sps:$4 sm:$0xff]  }
  0x5d   :  { %v3396_v35 = vld [vmem:[%s4870_s1 + $0x224] ss:$44 sps:$4 sm:$0xff]  }
  0x5f   :  { %2269 = vmatpush1.bf16.msra.mxu0 %v3302_v36  ;;  %2351 = vmatpush1.bf16.msra.mxu1 %v3305_v37  ;;  %v3399_v36 = vld [vmem:[%s4870_s1 + $0x22c] ss:$44 sps:$4 sm:$0xff]  }
  0x60   :  { %2270 = vmatprep.subr.bf16.mxu0 %v3310_v38  ;;  %2352 = vmatprep.subr.bf16.mxu1 %v3313_v39  ;;  %v3394_v37 = vld [vmem:[%s4870_s1 + $0x220] ss:$44 sps:$4 sm:$0xff]   ;;  %v3397_v38 = vld [vmem:[%s4870_s1 + $0x228] ss:$44 sps:$4 sm:$0xff]  }
  0x61   :  { %v3402_v39 = vld [vmem:[%s4870_s1 + $0x27c] ss:$44 sps:$4 sm:$0xff]  }
  0x63   :  { %2271 = vmatpush1.bf16.msra.mxu0 %v3308_v40  ;;  %2353 = vmatpush1.bf16.msra.mxu1 %v3311_v41  ;;  %v3405_v40 = vld [vmem:[%s4870_s1 + $0x284] ss:$44 sps:$4 sm:$0xff]  }
  0x64   :  { %2272 = vmatprep.subr.bf16.mxu0 %v3316_v42  ;;  %2354 = vmatprep.subr.bf16.mxu1 %v3319_v43  ;;  %v3400_v41 = vld [vmem:[%s4870_s1 + $0x278] ss:$44 sps:$4 sm:$0xff]   ;;  %v3403_v42 = vld [vmem:[%s4870_s1 + $0x280] ss:$44 sps:$4 sm:$0xff]  }
  0x65   :  { %v3408_v43 = vld [vmem:[%s4870_s1 + $0x2d4] ss:$44 sps:$4 sm:$0xff]  }
  0x67   :  { %2273 = vmatpush1.bf16.msra.mxu0 %v3314_v44  ;;  %2355 = vmatpush1.bf16.msra.mxu1 %v3317_v45  ;;  %v3411_v44 = vld [vmem:[%s4870_s1 + $0x2dc] ss:$44 sps:$4 sm:$0xff]  }
  0x68   :  { %2274 = vmatprep.subr.bf16.mxu0 %v3322_v46  ;;  %2356 = vmatprep.subr.bf16.mxu1 %v3325_v47  ;;  %v3406_v45 = vld [vmem:[%s4870_s1 + $0x2d0] ss:$44 sps:$4 sm:$0xff]   ;;  %v3409_v46 = vld [vmem:[%s4870_s1 + $0x2d8] ss:$44 sps:$4 sm:$0xff]  }
  0x69   :  { %v3414_v47 = vld [vmem:[%s4870_s1 + $0x32c] ss:$44 sps:$4 sm:$0xff]  }
  0x6b   :  { %2275 = vmatpush1.bf16.msra.mxu0 %v3320_v49  ;;  %2357 = vmatpush1.bf16.msra.mxu1 %v3323_v50  ;;  %v3417_v49 = vld [vmem:[%s4870_s1 + $0x334] ss:$44 sps:$4 sm:$0xff]  }
  0x6c   :  { %2276 = vmatprep.subr.bf16.mxu0 %v3328_v51  ;;  %2358 = vmatprep.subr.bf16.mxu1 %v3331_v52  ;;  %v3412_v50 = vld [vmem:[%s4870_s1 + $0x328] ss:$44 sps:$4 sm:$0xff]   ;;  %v3415_v51 = vld [vmem:[%s4870_s1 + $0x330] ss:$44 sps:$4 sm:$0xff]  }
  0x6d   :  { %v3420_v52 = vld [vmem:[%s4870_s1 + $0x384] ss:$44 sps:$4 sm:$0xff]  }
  0x6f   :  { %2277 = vmatpush1.bf16.msra.mxu0 %v3326_v53  ;;  %2359 = vmatpush1.bf16.msra.mxu1 %v3329_v54  ;;  %v3423_v53 = vld [vmem:[%s4870_s1 + $0x38c] ss:$44 sps:$4 sm:$0xff]  }
  0x70   :  { %2278 = vmatprep.subr.bf16.mxu0 %v3334_v55  ;;  %2360 = vmatprep.subr.bf16.mxu1 %v3337_v56  ;;  %v3418_v54 = vld [vmem:[%s4870_s1 + $0x380] ss:$44 sps:$4 sm:$0xff]   ;;  %v3421_v55 = vld [vmem:[%s4870_s1 + $0x388] ss:$44 sps:$4 sm:$0xff]  }
  0x71   :  { %v3426_v56 = vld [vmem:[%s4870_s1 + $0x3dc] ss:$44 sps:$4 sm:$0xff]  }
  0x73   :  { %2279 = vmatpush1.bf16.msra.mxu0 %v3332_v57  ;;  %2361 = vmatpush1.bf16.msra.mxu1 %v3335_v58  ;;  %v3429_v57 = vld [vmem:[%s4870_s1 + $0x3e4] ss:$44 sps:$4 sm:$0xff]  }
  0x74   :  { %2280 = vmatprep.subr.bf16.mxu0 %v3340_v59  ;;  %2362 = vmatprep.subr.bf16.mxu1 %v3343_v60  ;;  %v3424_v58 = vld [vmem:[%s4870_s1 + $0x3d8] ss:$44 sps:$4 sm:$0xff]   ;;  %v3427_v59 = vld [vmem:[%s4870_s1 + $0x3e0] ss:$44 sps:$4 sm:$0xff]  }
  0x75   :  { %v3432_v60 = vld [vmem:[%s4870_s1 + $0x434] ss:$44 sps:$4 sm:$0xff]  }
  0x77   :  { %2281 = vmatpush1.bf16.msra.mxu0 %v3338_v61  ;;  %2363 = vmatpush1.bf16.msra.mxu1 %v3341_v62  ;;  %v3435_v61 = vld [vmem:[%s4870_s1 + $0x43c] ss:$44 sps:$4 sm:$0xff]  }
  0x78   :  { %2282 = vmatprep.subr.bf16.mxu0 %v3346_v63  ;;  %2364 = vmatprep.subr.bf16.mxu1 %v3349_v0  ;;  %v3430_v62 = vld [vmem:[%s4870_s1 + $0x430] ss:$44 sps:$4 sm:$0xff]   ;;  %v3433_v63 = vld [vmem:[%s4870_s1 + $0x438] ss:$44 sps:$4 sm:$0xff]  }
  0x79   :  { %v3438_v0 = vld [vmem:[%s4870_s1 + $0x48c] ss:$44 sps:$4 sm:$0xff]  }
  0x7b   :  { %2283 = vmatpush1.bf16.msra.mxu0 %v3344_v1  ;;  %2365 = vmatpush1.bf16.msra.mxu1 %v3347_v2  ;;  %v3441_v1 = vld [vmem:[%s4870_s1 + $0x494] ss:$44 sps:$4 sm:$0xff]  }
  0x7c   :  { %2284 = vmatprep.subr.bf16.mxu0 %v3352_v3  ;;  %2366 = vmatprep.subr.bf16.mxu1 %v3355_v4  ;;  %v3436_v2 = vld [vmem:[%s4870_s1 + $0x488] ss:$44 sps:$4 sm:$0xff]   ;;  %v3439_v3 = vld [vmem:[%s4870_s1 + $0x490] ss:$44 sps:$4 sm:$0xff]  }
  0x7d   :  { %v3444_v4 = vld [vmem:[%s4870_s1 + $0x4e4] ss:$44 sps:$4 sm:$0xff]  }
  0x7f   :  { %2285 = vmatpush1.bf16.msra.mxu0 %v3350_v6  ;;  %2367 = vmatpush1.bf16.msra.mxu1 %v3353_v7  ;;  %v3447_v6 = vld [vmem:[%s4870_s1 + $0x4ec] ss:$44 sps:$4 sm:$0xff]  }
  0x80   :  { %2377 = vmatprep.subr.bf16.mxu0 %v3360_v8  ;;  %2459 = vmatprep.subr.bf16.mxu1 %v3363_v9  ;;  %v3442_v7 = vld [vmem:[%s4870_s1 + $0x4e0] ss:$44 sps:$4 sm:$0xff]   ;;  %v3445_v8 = vld [vmem:[%s4870_s1 + $0x4e8] ss:$44 sps:$4 sm:$0xff]  }
  0x81   :  { %v3450_v9 = vld [vmem:[%s4870_s1 + $0x53c] ss:$44 sps:$4 sm:$0xff]  }
  0x82   :  { %2287 = vmatmul.mubr.bf16.vlgmr.msra.gmra.mrb[0].mxu0 %v4135_v10  ;;  %2369 = vmatmul.mubr.bf16.vlgmr.msra.gmra.mrb[0].mxu1 %v4135_v10 }
  0x83   :  { %2378 = vmatpush1.bf16.msra.mxu0 %v3358_v11  ;;  %2460 = vmatpush1.bf16.msra.mxu1 %v3361_v12  ;;  %v3453_v11 = vld [vmem:[%s4870_s1 + $0x544] ss:$44 sps:$4 sm:$0xff]  }
  0x84   :  { %2379 = vmatprep.subr.bf16.mxu0 %v3366_v13  ;;  %2461 = vmatprep.subr.bf16.mxu1 %v3369_v14  ;;  %v3448_v12 = vld [vmem:[%s4870_s1 + $0x538] ss:$44 sps:$4 sm:$0xff]   ;;  %v3451_v13 = vld [vmem:[%s4870_s1 + $0x540] ss:$44 sps:$4 sm:$0xff]  }
  0x85   :  { %2409 = vmatprep.mubr.bf16.mxu0 %v3865_v48  ;;  %2491 = vmatprep.mubr.bf16.mxu1 %v3865_v48  ;;  %v3456_v14 = vld [vmem:[%s4870_s1 + $0x594] ss:$44 sps:$4 sm:$0xff]  }
  0x87   :  { %2380 = vmatpush1.bf16.msra.mxu0 %v3364_v15  ;;  %2462 = vmatpush1.bf16.msra.mxu1 %v3367_v16  ;;  %v3459_v15 = vld [vmem:[%s4870_s1 + $0x59c] ss:$44 sps:$4 sm:$0xff]  }
  0x88   :  { %2381 = vmatprep.subr.bf16.mxu0 %v3372_v17  ;;  %2463 = vmatprep.subr.bf16.mxu1 %v3375_v18  ;;  %v3454_v16 = vld [vmem:[%s4870_s1 + $0x590] ss:$44 sps:$4 sm:$0xff]   ;;  %v3457_v17 = vld [vmem:[%s4870_s1 + $0x598] ss:$44 sps:$4 sm:$0xff]  }
  0x89   :  { %v3462_v18 = vld [vmem:[%s4870_s1 + $0x5ec] ss:$44 sps:$4 sm:$0xff]  }
  0x8b   :  { %2382 = vmatpush1.bf16.msra.mxu0 %v3370_v19  ;;  %2464 = vmatpush1.bf16.msra.mxu1 %v3373_v20  ;;  %v3465_v19 = vld [vmem:[%s4870_s1 + $0x5f4] ss:$44 sps:$4 sm:$0xff]  }
  0x8c   :  { %2383 = vmatprep.subr.bf16.mxu0 %v3378_v21  ;;  %2465 = vmatprep.subr.bf16.mxu1 %v3381_v22  ;;  %v3460_v20 = vld [vmem:[%s4870_s1 + $0x5e8] ss:$44 sps:$4 sm:$0xff]   ;;  %v3463_v21 = vld [vmem:[%s4870_s1 + $0x5f0] ss:$44 sps:$4 sm:$0xff]  }
  0x8d   :  { %v3468_v22 = vld [vmem:[%s4870_s1 + $0x644] ss:$44 sps:$4 sm:$0xff]  }
  0x8f   :  { %2384 = vmatpush1.bf16.msra.mxu0 %v3376_v23  ;;  %2466 = vmatpush1.bf16.msra.mxu1 %v3379_v24  ;;  %v3471_v23 = vld [vmem:[%s4870_s1 + $0x64c] ss:$44 sps:$4 sm:$0xff]  }
  0x90   :  { %2385 = vmatprep.subr.bf16.mxu0 %v3384_v25  ;;  %2467 = vmatprep.subr.bf16.mxu1 %v3387_v26  ;;  %v3466_v24 = vld [vmem:[%s4870_s1 + $0x640] ss:$44 sps:$4 sm:$0xff]   ;;  %v3469_v25 = vld [vmem:[%s4870_s1 + $0x648] ss:$44 sps:$4 sm:$0xff]  }
  0x91   :  { %v3474_v26 = vld [vmem:[%s4870_s1 + $0x69c] ss:$44 sps:$4 sm:$0xff]  }
  0x93   :  { %2386 = vmatpush1.bf16.msra.mxu0 %v3382_v28  ;;  %2468 = vmatpush1.bf16.msra.mxu1 %v3385_v29  ;;  %v3472_v28 = vld [vmem:[%s4870_s1 + $0x698] ss:$44 sps:$4 sm:$0xff]   ;;  %v3475_v29 = vld [vmem:[%s4870_s1 + $0x6a0] ss:$44 sps:$4 sm:$0xff]  }
  0x94   :  { %2387 = vmatprep.subr.bf16.mxu0 %v3390_v31  ;;  %2469 = vmatprep.subr.bf16.mxu1 %v3393_v32  ;;  %v3480_v31 = vld [vmem:[%s4870_s1 + $0x6f4] ss:$44 sps:$4 sm:$0xff]   ;;  %v3483_v32 = vld [vmem:[%s4870_s1 + $0x6fc] ss:$44 sps:$4 sm:$0xff]  }
  0x97   :  { %2388 = vmatpush1.bf16.msra.mxu0 %v3388_v33  ;;  %2470 = vmatpush1.bf16.msra.mxu1 %v3391_v34  ;;  %v3478_v33 = vld [vmem:[%s4870_s1 + $0x6f0] ss:$44 sps:$4 sm:$0xff]   ;;  %v3481_v34 = vld [vmem:[%s4870_s1 + $0x6f8] ss:$44 sps:$4 sm:$0xff]  }
  0x98   :  { %2389 = vmatprep.subr.bf16.mxu0 %v3396_v35  ;;  %2471 = vmatprep.subr.bf16.mxu1 %v3399_v36  ;;  %v3486_v35 = vld [vmem:[%s4870_s1 + $0x74c] ss:$44 sps:$4 sm:$0xff]   ;;  %v3489_v36 = vld [vmem:[%s4870_s1 + $0x754] ss:$44 sps:$4 sm:$0xff]  }
  0x9b   :  { %2390 = vmatpush1.bf16.msra.mxu0 %v3394_v37  ;;  %2472 = vmatpush1.bf16.msra.mxu1 %v3397_v38  ;;  %v3484_v37 = vld [vmem:[%s4870_s1 + $0x748] ss:$44 sps:$4 sm:$0xff]   ;;  %v3487_v38 = vld [vmem:[%s4870_s1 + $0x750] ss:$44 sps:$4 sm:$0xff]  }
  0x9c   :  { %2391 = vmatprep.subr.bf16.mxu0 %v3402_v39  ;;  %2473 = vmatprep.subr.bf16.mxu1 %v3405_v40  ;;  %v3492_v39 = vld [vmem:[%s4870_s1 + $0x7a4] ss:$44 sps:$4 sm:$0xff]   ;;  %v3495_v40 = vld [vmem:[%s4870_s1 + $0x7ac] ss:$44 sps:$4 sm:$0xff]  }
  0x9f   :  { %2392 = vmatpush1.bf16.msra.mxu0 %v3400_v41  ;;  %2474 = vmatpush1.bf16.msra.mxu1 %v3403_v42  ;;  %v3490_v41 = vld [vmem:[%s4870_s1 + $0x7a0] ss:$44 sps:$4 sm:$0xff]   ;;  %v3493_v42 = vld [vmem:[%s4870_s1 + $0x7a8] ss:$44 sps:$4 sm:$0xff]  }
  0xa0   :  { %2393 = vmatprep.subr.bf16.mxu0 %v3408_v43  ;;  %2475 = vmatprep.subr.bf16.mxu1 %v3411_v44  ;;  %v3498_v43 = vld [vmem:[%s4870_s1 + $0x7fc] ss:$44 sps:$4 sm:$0xff]   ;;  %v3501_v44 = vld [vmem:[%s4870_s1 + $0x804] ss:$44 sps:$4 sm:$0xff]  }
  0xa3   :  { %2394 = vmatpush1.bf16.msra.mxu0 %v3406_v45  ;;  %2476 = vmatpush1.bf16.msra.mxu1 %v3409_v46  ;;  %v3496_v45 = vld [vmem:[%s4870_s1 + $0x7f8] ss:$44 sps:$4 sm:$0xff]   ;;  %v3499_v46 = vld [vmem:[%s4870_s1 + $0x800] ss:$44 sps:$4 sm:$0xff]  }
  0xa4   :  { %2395 = vmatprep.subr.bf16.mxu0 %v3414_v47  ;;  %2477 = vmatprep.subr.bf16.mxu1 %v3417_v49  ;;  %v3504_v47 = vld [vmem:[%s4870_s1 + $0x854] ss:$44 sps:$4 sm:$0xff]   ;;  %v3507_v49 = vld [vmem:[%s4870_s1 + $0x85c] ss:$44 sps:$4 sm:$0xff]  }
  0xa7   :  { %2396 = vmatpush1.bf16.msra.mxu0 %v3412_v50  ;;  %2478 = vmatpush1.bf16.msra.mxu1 %v3415_v51  ;;  %v3502_v50 = vld [vmem:[%s4870_s1 + $0x850] ss:$44 sps:$4 sm:$0xff]   ;;  %v3505_v51 = vld [vmem:[%s4870_s1 + $0x858] ss:$44 sps:$4 sm:$0xff]  }
  0xa8   :  { %2397 = vmatprep.subr.bf16.mxu0 %v3420_v52  ;;  %2479 = vmatprep.subr.bf16.mxu1 %v3423_v53  ;;  %v3510_v52 = vld [vmem:[%s4870_s1 + $0x8ac] ss:$44 sps:$4 sm:$0xff]   ;;  %v3513_v53 = vld [vmem:[%s4870_s1 + $0x8b4] ss:$44 sps:$4 sm:$0xff]  }
  0xab   :  { %2398 = vmatpush1.bf16.msra.mxu0 %v3418_v54  ;;  %2480 = vmatpush1.bf16.msra.mxu1 %v3421_v55  ;;  %v3508_v54 = vld [vmem:[%s4870_s1 + $0x8a8] ss:$44 sps:$4 sm:$0xff]   ;;  %v3511_v55 = vld [vmem:[%s4870_s1 + $0x8b0] ss:$44 sps:$4 sm:$0xff]  }
  0xac   :  { %2399 = vmatprep.subr.bf16.mxu0 %v3426_v56  ;;  %2481 = vmatprep.subr.bf16.mxu1 %v3429_v57  ;;  %v3516_v56 = vld [vmem:[%s4870_s1 + $0x904] ss:$44 sps:$4 sm:$0xff]   ;;  %v3519_v57 = vld [vmem:[%s4870_s1 + $0x90c] ss:$44 sps:$4 sm:$0xff]  }
  0xaf   :  { %2400 = vmatpush1.bf16.msra.mxu0 %v3424_v58  ;;  %2482 = vmatpush1.bf16.msra.mxu1 %v3427_v59  ;;  %v3514_v58 = vld [vmem:[%s4870_s1 + $0x900] ss:$44 sps:$4 sm:$0xff]   ;;  %v3517_v59 = vld [vmem:[%s4870_s1 + $0x908] ss:$44 sps:$4 sm:$0xff]  }
  0xb0   :  { %2401 = vmatprep.subr.bf16.mxu0 %v3432_v60  ;;  %2483 = vmatprep.subr.bf16.mxu1 %v3435_v61  ;;  %v3522_v60 = vld [vmem:[%s4870_s1 + $0x95c] ss:$44 sps:$4 sm:$0xff]   ;;  %v3525_v61 = vld [vmem:[%s4870_s1 + $0x964] ss:$44 sps:$4 sm:$0xff]  }
  0xb3   :  { %2402 = vmatpush1.bf16.msra.mxu0 %v3430_v62  ;;  %2484 = vmatpush1.bf16.msra.mxu1 %v3433_v63  ;;  %v3520_v62 = vld [vmem:[%s4870_s1 + $0x958] ss:$44 sps:$4 sm:$0xff]   ;;  %v3523_v63 = vld [vmem:[%s4870_s1 + $0x960] ss:$44 sps:$4 sm:$0xff]  }
  0xb4   :  { %2403 = vmatprep.subr.bf16.mxu0 %v3438_v0  ;;  %2485 = vmatprep.subr.bf16.mxu1 %v3441_v1  ;;  %v3528_v0 = vld [vmem:[%s4870_s1 + $0x9b4] ss:$44 sps:$4 sm:$0xff]   ;;  %v3531_v1 = vld [vmem:[%s4870_s1 + $0x9bc] ss:$44 sps:$4 sm:$0xff]  }
  0xb7   :  { %2404 = vmatpush1.bf16.msra.mxu0 %v3436_v2  ;;  %2486 = vmatpush1.bf16.msra.mxu1 %v3439_v3  ;;  %v3526_v2 = vld [vmem:[%s4870_s1 + $0x9b0] ss:$44 sps:$4 sm:$0xff]   ;;  %v3529_v3 = vld [vmem:[%s4870_s1 + $0x9b8] ss:$44 sps:$4 sm:$0xff]  }
  0xb8   :  { %2405 = vmatprep.subr.bf16.mxu0 %v3444_v4  ;;  %2487 = vmatprep.subr.bf16.mxu1 %v3447_v6  ;;  %v3534_v4 = vld [vmem:[%s4870_s1 + $0xa0c] ss:$44 sps:$4 sm:$0xff]   ;;  %v3537_v6 = vld [vmem:[%s4870_s1 + $0xa14] ss:$44 sps:$4 sm:$0xff]  }
  0xbb   :  { %2406 = vmatpush1.bf16.msra.mxu0 %v3442_v7  ;;  %2488 = vmatpush1.bf16.msra.mxu1 %v3445_v8  ;;  %v3532_v7 = vld [vmem:[%s4870_s1 + $0xa08] ss:$44 sps:$4 sm:$0xff]   ;;  %v3535_v8 = vld [vmem:[%s4870_s1 + $0xa10] ss:$44 sps:$4 sm:$0xff]  }
  0xbc   :  { %2407 = vmatprep.subr.bf16.mxu0 %v3450_v9  ;;  %2489 = vmatprep.subr.bf16.mxu1 %v3453_v11  ;;  %v3540_v9 = vld [vmem:[%s4870_s1 + $0xa64] ss:$44 sps:$4 sm:$0xff]   ;;  %v3543_v11 = vld [vmem:[%s4870_s1 + $0xa6c] ss:$44 sps:$4 sm:$0xff]  }
  0xbf   :  { %2408 = vmatpush1.bf16.msra.mxu0 %v3448_v12  ;;  %2490 = vmatpush1.bf16.msra.mxu1 %v3451_v13  ;;  %v3538_v12 = vld [vmem:[%s4870_s1 + $0xa60] ss:$44 sps:$4 sm:$0xff]   ;;  %v3541_v13 = vld [vmem:[%s4870_s1 + $0xa68] ss:$44 sps:$4 sm:$0xff]  }
  0xc0   :  { %2418 = vmatprep.subr.bf16.mxu0 %v3456_v14  ;;  %2500 = vmatprep.subr.bf16.mxu1 %v3459_v15  ;;  %v3546_v14 = vld [vmem:[%s4870_s1 + $0xabc] ss:$44 sps:$4 sm:$0xff]   ;;  %v3549_v15 = vld [vmem:[%s4870_s1 + $0xac4] ss:$44 sps:$4 sm:$0xff]  }
  0xc2   :  { %2410 = vmatmul.mubr.bf16.vlgmr.msra.gmra.mrb[4].mxu0 %v3929_v5  ;;  %2492 = vmatmul.mubr.bf16.vlgmr.msra.gmra.mrb[4].mxu1 %v3929_v5 }
  0xc3   :  { %2419 = vmatpush1.bf16.msra.mxu0 %v3454_v16  ;;  %2501 = vmatpush1.bf16.msra.mxu1 %v3457_v17  ;;  %v3544_v16 = vld [vmem:[%s4870_s1 + $0xab8] ss:$44 sps:$4 sm:$0xff]   ;;  %v3547_v17 = vld [vmem:[%s4870_s1 + $0xac0] ss:$44 sps:$4 sm:$0xff]  }
  0xc4   :  { %2420 = vmatprep.subr.bf16.mxu0 %v3462_v18  ;;  %2502 = vmatprep.subr.bf16.mxu1 %v3465_v19  ;;  %v3552_v18 = vld [vmem:[%s4870_s1 + $0x24] ss:$44 sps:$4 sm:$0xff]   ;;  %v3577_v19 = vld [vmem:[%s4870_s1 + $0x2e8] ss:$44 sps:$4 sm:$0xff]  }
  0xc5   :  { %2450 = vmatprep.mubr.bf16.mxu0 %v4009_v30  ;;  %2532 = vmatprep.mubr.bf16.mxu1 %v4009_v30 }
  0xc7   :  { %2421 = vmatpush1.bf16.msra.mxu0 %v3460_v20  ;;  %2503 = vmatpush1.bf16.msra.mxu1 %v3463_v21  ;;  %v3550_v20 = vld [vmem:[%s4870_s1 + $0x20] ss:$44 sps:$4 sm:$0xff]   ;;  %v3578_v21 = vld [vmem:[%s4870_s1 + $0x28] ss:$44 sps:$4 sm:$0xff]  }
  0xc8   :  { %2422 = vmatprep.subr.bf16.mxu0 %v3468_v22  ;;  %2504 = vmatprep.subr.bf16.mxu1 %v3471_v23  ;;  %v3555_v22 = vld [vmem:[%s4870_s1 + $0x7c] ss:$44 sps:$4 sm:$0xff]   ;;  %v3582_v23 = vld [vmem:[%s4870_s1 + $0x340] ss:$44 sps:$4 sm:$0xff]  }
  0xcb   :  { %2423 = vmatpush1.bf16.msra.mxu0 %v3466_v24  ;;  %2505 = vmatpush1.bf16.msra.mxu1 %v3469_v25  ;;  %v3553_v24 = vld [vmem:[%s4870_s1 + $0x78] ss:$44 sps:$4 sm:$0xff]   ;;  %v3583_v25 = vld [vmem:[%s4870_s1 + $0x80] ss:$44 sps:$4 sm:$0xff]  }
  0xcc   :  { %2424 = vmatprep.subr.bf16.mxu0 %v3474_v26  ;;  %2506 = vmatprep.subr.bf16.mxu1 %v3477_v27  ;;  %v3558_v26 = vld [vmem:[%s4870_s1 + $0xd4] ss:$44 sps:$4 sm:$0xff]   ;;  %v3587_v27 = vld [vmem:[%s4870_s1 + $0x398] ss:$44 sps:$4 sm:$0xff]  }
  0xcf   :  { %2425 = vmatpush1.bf16.msra.mxu0 %v3472_v28  ;;  %2507 = vmatpush1.bf16.msra.mxu1 %v3475_v29  ;;  %v3556_v28 = vld [vmem:[%s4870_s1 + $0xd0] ss:$44 sps:$4 sm:$0xff]   ;;  %v3588_v29 = vld [vmem:[%s4870_s1 + $0xd8] ss:$44 sps:$4 sm:$0xff]  }
  0xd0   :  { %2426 = vmatprep.subr.bf16.mxu0 %v3480_v31  ;;  %2508 = vmatprep.subr.bf16.mxu1 %v3483_v32  ;;  %v3561_v31 = vld [vmem:[%s4870_s1 + $0x12c] ss:$44 sps:$4 sm:$0xff]   ;;  %v3559_v32 = vld [vmem:[%s4870_s1 + $0x128] ss:$44 sps:$4 sm:$0xff]  }
  0xd3   :  { %2427 = vmatpush1.bf16.msra.mxu0 %v3478_v33  ;;  %2509 = vmatpush1.bf16.msra.mxu1 %v3481_v34  ;;  %v3593_v33 = vld [vmem:[%s4870_s1 + $0x130] ss:$44 sps:$4 sm:$0xff]  }
  0xd4   :  { %2428 = vmatprep.subr.bf16.mxu0 %v3486_v35  ;;  %2510 = vmatprep.subr.bf16.mxu1 %v3489_v36  ;;  %v3564_v34 = vld [vmem:[%s4870_s1 + $0x184] ss:$44 sps:$4 sm:$0xff]   ;;  %v3597_v35 = vld [vmem:[%s4870_s1 + $0x448] ss:$44 sps:$4 sm:$0xff]   ;;  %v3562_v36 = vld [vmem:[%s4870_s1 + $0x180] ss:$44 sps:$4 sm:$0xff]  }
  0xd7   :  { %2429 = vmatpush1.bf16.msra.mxu0 %v3484_v37  ;;  %2511 = vmatpush1.bf16.msra.mxu1 %v3487_v38  ;;  %v3598_v37 = vld [vmem:[%s4870_s1 + $0x188] ss:$44 sps:$4 sm:$0xff]  }
  0xd8   :  { %2430 = vmatprep.subr.bf16.mxu0 %v3492_v39  ;;  %2512 = vmatprep.subr.bf16.mxu1 %v3495_v40  ;;  %v3567_v38 = vld [vmem:[%s4870_s1 + $0x1dc] ss:$44 sps:$4 sm:$0xff]   ;;  %v3602_v39 = vld [vmem:[%s4870_s1 + $0x4a0] ss:$44 sps:$4 sm:$0xff]   ;;  %v3565_v40 = vld [vmem:[%s4870_s1 + $0x1d8] ss:$44 sps:$4 sm:$0xff]  }
  0xdb   :  { %2431 = vmatpush1.bf16.msra.mxu0 %v3490_v41  ;;  %2513 = vmatpush1.bf16.msra.mxu1 %v3493_v42  ;;  %v3603_v41 = vld [vmem:[%s4870_s1 + $0x1e0] ss:$44 sps:$4 sm:$0xff]  }
  0xdc   :  { %2432 = vmatprep.subr.bf16.mxu0 %v3498_v43  ;;  %2514 = vmatprep.subr.bf16.mxu1 %v3501_v44  ;;  %v3570_v42 = vld [vmem:[%s4870_s1 + $0x234] ss:$44 sps:$4 sm:$0xff]   ;;  %v3607_v43 = vld [vmem:[%s4870_s1 + $0x4f8] ss:$44 sps:$4 sm:$0xff]   ;;  %v3568_v44 = vld [vmem:[%s4870_s1 + $0x230] ss:$44 sps:$4 sm:$0xff]  }
  0xdf   :  { %2433 = vmatpush1.bf16.msra.mxu0 %v3496_v45  ;;  %2515 = vmatpush1.bf16.msra.mxu1 %v3499_v46  ;;  %v3608_v45 = vld [vmem:[%s4870_s1 + $0x238] ss:$44 sps:$4 sm:$0xff]  }
  0xe0   :  { %2434 = vmatprep.subr.bf16.mxu0 %v3504_v47  ;;  %2516 = vmatprep.subr.bf16.mxu1 %v3507_v49  ;;  %v3573_v46 = vld [vmem:[%s4870_s1 + $0x28c] ss:$44 sps:$4 sm:$0xff]   ;;  %v3612_v47 = vld [vmem:[%s4870_s1 + $0x550] ss:$44 sps:$4 sm:$0xff]   ;;  %v3571_v49 = vld [vmem:[%s4870_s1 + $0x288] ss:$44 sps:$4 sm:$0xff]  }
  0xe3   :  { %2435 = vmatpush1.bf16.msra.mxu0 %v3502_v50  ;;  %2517 = vmatpush1.bf16.msra.mxu1 %v3505_v51  ;;  %v3613_v50 = vld [vmem:[%s4870_s1 + $0x290] ss:$44 sps:$4 sm:$0xff]  }
  0xe4   :  { %2436 = vmatprep.subr.bf16.mxu0 %v3510_v52  ;;  %2518 = vmatprep.subr.bf16.mxu1 %v3513_v53  ;;  %v3576_v51 = vld [vmem:[%s4870_s1 + $0x2e4] ss:$44 sps:$4 sm:$0xff]   ;;  %v3617_v52 = vld [vmem:[%s4870_s1 + $0x868] ss:$44 sps:$4 sm:$0xff]   ;;  %v3574_v53 = vld [vmem:[%s4870_s1 + $0x2e0] ss:$44 sps:$4 sm:$0xff]  }
  0xe7   :  { %2437 = vmatpush1.bf16.msra.mxu0 %v3508_v54  ;;  %2519 = vmatpush1.bf16.msra.mxu1 %v3511_v55  ;;  %v3618_v54 = vld [vmem:[%s4870_s1 + $0x5a8] ss:$44 sps:$4 sm:$0xff]  }
  0xe8   :  { %2438 = vmatprep.subr.bf16.mxu0 %v3516_v56  ;;  %2520 = vmatprep.subr.bf16.mxu1 %v3519_v57  ;;  %v3581_v55 = vld [vmem:[%s4870_s1 + $0x33c] ss:$44 sps:$4 sm:$0xff]   ;;  %v3622_v56 = vld [vmem:[%s4870_s1 + $0x8c0] ss:$44 sps:$4 sm:$0xff]   ;;  %v3579_v57 = vld [vmem:[%s4870_s1 + $0x338] ss:$44 sps:$4 sm:$0xff]  }
  0xeb   :  { %2439 = vmatpush1.bf16.msra.mxu0 %v3514_v58  ;;  %2521 = vmatpush1.bf16.msra.mxu1 %v3517_v59  ;;  %v3623_v58 = vld [vmem:[%s4870_s1 + $0x600] ss:$44 sps:$4 sm:$0xff]  }
  0xec   :  { %2440 = vmatprep.subr.bf16.mxu0 %v3522_v60  ;;  %2522 = vmatprep.subr.bf16.mxu1 %v3525_v61  ;;  %v3586_v59 = vld [vmem:[%s4870_s1 + $0x394] ss:$44 sps:$4 sm:$0xff]   ;;  %v3627_v60 = vld [vmem:[%s4870_s1 + $0x918] ss:$44 sps:$4 sm:$0xff]   ;;  %v3584_v61 = vld [vmem:[%s4870_s1 + $0x390] ss:$44 sps:$4 sm:$0xff]  }
  0xef   :  { %2441 = vmatpush1.bf16.msra.mxu0 %v3520_v62  ;;  %2523 = vmatpush1.bf16.msra.mxu1 %v3523_v63  ;;  %v3628_v62 = vld [vmem:[%s4870_s1 + $0x658] ss:$44 sps:$4 sm:$0xff]  }
  0xf0   :  { %2442 = vmatprep.subr.bf16.mxu0 %v3528_v0  ;;  %2524 = vmatprep.subr.bf16.mxu1 %v3531_v1  ;;  %v3591_v63 = vld [vmem:[%s4870_s1 + $0x3ec] ss:$44 sps:$4 sm:$0xff]   ;;  %v3632_v0 = vld [vmem:[%s4870_s1 + $0x970] ss:$44 sps:$4 sm:$0xff]   ;;  %v3589_v1 = vld [vmem:[%s4870_s1 + $0x3e8] ss:$44 sps:$4 sm:$0xff]  }
  0xf3   :  { %2443 = vmatpush1.bf16.msra.mxu0 %v3526_v2  ;;  %2525 = vmatpush1.bf16.msra.mxu1 %v3529_v3  ;;  %v3633_v2 = vld [vmem:[%s4870_s1 + $0x6b0] ss:$44 sps:$4 sm:$0xff]  }
  0xf4   :  { %2444 = vmatprep.subr.bf16.mxu0 %v3534_v4  ;;  %2526 = vmatprep.subr.bf16.mxu1 %v3537_v6  ;;  %v3596_v3 = vld [vmem:[%s4870_s1 + $0x444] ss:$44 sps:$4 sm:$0xff]   ;;  %v3637_v4 = vld [vmem:[%s4870_s1 + $0x9c8] ss:$44 sps:$4 sm:$0xff]   ;;  %v3594_v6 = vld [vmem:[%s4870_s1 + $0x440] ss:$44 sps:$4 sm:$0xff]  }
  0xf7   :  { %2445 = vmatpush1.bf16.msra.mxu0 %v3532_v7  ;;  %2527 = vmatpush1.bf16.msra.mxu1 %v3535_v8  ;;  %v3638_v7 = vld [vmem:[%s4870_s1 + $0x708] ss:$44 sps:$4 sm:$0xff]  }
  0xf8   :  { %2446 = vmatprep.subr.bf16.mxu0 %v3540_v9  ;;  %2528 = vmatprep.subr.bf16.mxu1 %v3543_v11  ;;  %v3601_v8 = vld [vmem:[%s4870_s1 + $0x49c] ss:$44 sps:$4 sm:$0xff]   ;;  %v3642_v9 = vld [vmem:[%s4870_s1 + $0xa20] ss:$44 sps:$4 sm:$0xff]   ;;  %v3599_v11 = vld [vmem:[%s4870_s1 + $0x498] ss:$44 sps:$4 sm:$0xff]  }
  0xfb   :  { %2447 = vmatpush1.bf16.msra.mxu0 %v3538_v12  ;;  %2529 = vmatpush1.bf16.msra.mxu1 %v3541_v13  ;;  %v3643_v12 = vld [vmem:[%s4870_s1 + $0x760] ss:$44 sps:$4 sm:$0xff]  }
  0xfc   :  { %2448 = vmatprep.subr.bf16.mxu0 %v3546_v14  ;;  %2530 = vmatprep.subr.bf16.mxu1 %v3549_v15  ;;  %v3606_v13 = vld [vmem:[%s4870_s1 + $0x4f4] ss:$44 sps:$4 sm:$0xff]   ;;  %v3647_v14 = vld [vmem:[%s4870_s1 + $0xa78] ss:$44 sps:$4 sm:$0xff]   ;;  %v3604_v15 = vld [vmem:[%s4870_s1 + $0x4f0] ss:$44 sps:$4 sm:$0xff]  }
  0xff   :  { %2449 = vmatpush1.bf16.msra.mxu0 %v3544_v16  ;;  %2531 = vmatpush1.bf16.msra.mxu1 %v3547_v17  ;;  %v3648_v16 = vld [vmem:[%s4870_s1 + $0x7b8] ss:$44 sps:$4 sm:$0xff]  }
 0x100   :  { %2541 = vmatprep.subr.bf16.mxu0 %v3552_v18  ;;  %3086 = vmatprep.subr.bf16.mxu1 %v3577_v19  ;;  %v3611_v17 = vld [vmem:[%s4870_s1 + $0x54c] ss:$44 sps:$4 sm:$0xff]   ;;  %v3652_v18 = vld [vmem:[%s4870_s1 + $0xad0] ss:$44 sps:$4 sm:$0xff]   ;;  %v3609_v19 = vld [vmem:[%s4870_s1 + $0x548] ss:$44 sps:$4 sm:$0xff]  }
 0x102   :  { %2451 = vmatmul.mubr.bf16.vlgmr.msra.gmra.mrb[4].mxu0 %v4135_v10  ;;  %2533 = vmatmul.mubr.bf16.vlgmr.msra.gmra.mrb[4].mxu1 %v4135_v10 }
 0x103   :  { %2542 = vmatpush1.bf16.msra.mxu0 %v3550_v20  ;;  %3087 = vmatpush3.bf16.msra.mxu1 %v3578_v21  ;;  %v3653_v20 = vld [vmem:[%s4870_s1 + $0x810] ss:$44 sps:$4 sm:$0xff]  }
 0x104   :  { %2543 = vmatprep.subr.bf16.mxu0 %v3555_v22  ;;  %3088 = vmatprep.subr.bf16.mxu1 %v3582_v23  ;;  %v3616_v21 = vld [vmem:[%s4870_s1 + $0x5a4] ss:$44 sps:$4 sm:$0xff]   ;;  %v3614_v22 = vld [vmem:[%s4870_s1 + $0x5a0] ss:$44 sps:$4 sm:$0xff]   ;;  %v3621_v23 = vld [vmem:[%s4870_s1 + $0x5fc] ss:$44 sps:$4 sm:$0xff]  }
 0x105   :  { %2573 = vmatprep.mubr.bf16.mxu0 %v3865_v48  ;;  %2655 = vmatprep.mubr.bf16.mxu1 %v3865_v48  ;;  %v3592_v48 = vld [vmem:[%s4870_s1 + $0x3f0] ss:$44 sps:$4 sm:$0xff]  }
 0x107   :  { %2544 = vmatpush1.bf16.msra.mxu0 %v3553_v24  ;;  %3089 = vmatpush3.bf16.msra.mxu1 %v3583_v25  ;;  %v3619_v24 = vld [vmem:[%s4870_s1 + $0x5f8] ss:$44 sps:$4 sm:$0xff]   ;;  %v3626_v25 = vld [vmem:[%s4870_s1 + $0x654] ss:$44 sps:$4 sm:$0xff]  }
 0x108   :  { %2545 = vmatprep.subr.bf16.mxu0 %v3558_v26  ;;  %3090 = vmatprep.subr.bf16.mxu1 %v3587_v27  ;;  %v3624_v26 = vld [vmem:[%s4870_s1 + $0x650] ss:$44 sps:$4 sm:$0xff]  }
 0x109   :  { %v3636_v27 = vld [vmem:[%s4870_s1 + $0x704] ss:$44 sps:$4 sm:$0xff]  }
 0x10b   :  { %2546 = vmatpush1.bf16.msra.mxu0 %v3556_v28  ;;  %3091 = vmatpush3.bf16.msra.mxu1 %v3588_v29  ;;  %v3634_v28 = vld [vmem:[%s4870_s1 + $0x700] ss:$44 sps:$4 sm:$0xff]   ;;  %v3641_v29 = vld [vmem:[%s4870_s1 + $0x75c] ss:$44 sps:$4 sm:$0xff]  }
 0x10c   :  { %2547 = vmatprep.subr.bf16.mxu0 %v3561_v31  ;;  %3092 = vmatprep.subr.bf16.mxu1 %v3592_v48  ;;  %v4760_v31 = vpop.permute.xlu0 %404  ;;  %v3639_v48 = vld [vmem:[%s4870_s1 + $0x758] ss:$44 sps:$4 sm:$0xff]  }
 0x10f   :  { %2548 = vmatpush1.bf16.msra.mxu0 %v3559_v32  ;;  %3093 = vmatpush3.bf16.msra.mxu1 %v3593_v33  ;;  %v3646_v32 = vld [vmem:[%s4870_s1 + $0x7b4] ss:$44 sps:$4 sm:$0xff]  }
 0x110   :  { %2549 = vmatprep.subr.bf16.mxu0 %v3564_v34  ;;  %3094 = vmatprep.subr.bf16.mxu1 %v3597_v35 }
 0x113   :  { %2550 = vmatpush1.bf16.msra.mxu0 %v3562_v36  ;;  %3095 = vmatpush3.bf16.msra.mxu1 %v3598_v37 }
 0x114   :  { %2551 = vmatprep.subr.bf16.mxu0 %v3567_v38  ;;  %3096 = vmatprep.subr.bf16.mxu1 %v3602_v39 }
 0x117   :  { %2552 = vmatpush1.bf16.msra.mxu0 %v3565_v40  ;;  %3097 = vmatpush3.bf16.msra.mxu1 %v3603_v41 }
 0x118   :  { %2553 = vmatprep.subr.bf16.mxu0 %v3570_v42  ;;  %3098 = vmatprep.subr.bf16.mxu1 %v3607_v43  ;;  %v3644_v43 = vld [vmem:[%s4870_s1 + $0x7b0] ss:$44 sps:$4 sm:$0xff]  }
 0x11b   :  { %2554 = vmatpush1.bf16.msra.mxu0 %v3568_v44  ;;  %3099 = vmatpush3.bf16.msra.mxu1 %v3608_v45 }
 0x11c   :  { %2555 = vmatprep.subr.bf16.mxu0 %v3573_v46  ;;  %3100 = vmatprep.subr.bf16.mxu1 %v3612_v47  ;;  %v3651_v46 = vld [vmem:[%s4870_s1 + $0x80c] ss:$44 sps:$4 sm:$0xff]   ;;  %v3649_v47 = vld [vmem:[%s4870_s1 + $0x808] ss:$44 sps:$4 sm:$0xff]  }
 0x11f   :  { %2556 = vmatpush1.bf16.msra.mxu0 %v3571_v49  ;;  %3101 = vmatpush3.bf16.msra.mxu1 %v3613_v50  ;;  %v3656_v49 = vld [vmem:[%s4870_s1 + $0x864] ss:$44 sps:$4 sm:$0xff]   ;;  %v3654_v50 = vld [vmem:[%s4870_s1 + $0x860] ss:$44 sps:$4 sm:$0xff]  }
 0x120   :  { %2557 = vmatprep.subr.bf16.mxu0 %v3576_v51  ;;  %3108 = vmatprep.subr.bf16.mxu1 %v3617_v52  ;;  %v3659_v51 = vld [vmem:[%s4870_s1 + $0x8bc] ss:$44 sps:$4 sm:$0xff]  }
 0x122   :  { %2656 = vmatmul.mubr.bf16.vlgmr.msra.gmra.mrb[8].mxu1 %v3929_v5 }
 0x123   :  { %2558 = vmatpush1.bf16.msra.mxu0 %v3574_v53  ;;  %3109 = vmatpush3.bf16.msra.mxu1 %v3618_v54  ;;  %v3657_v54 = vld [vmem:[%s4870_s1 + $0x8b8] ss:$44 sps:$4 sm:$0xff]  }
 0x124   :  { %2559 = vmatprep.subr.bf16.mxu0 %v3581_v55  ;;  %3110 = vmatprep.subr.bf16.mxu1 %v3622_v56  ;;  %v3662_v56 = vld [vmem:[%s4870_s1 + $0x914] ss:$44 sps:$4 sm:$0xff]  }
 0x125   :  { %2695 = vmatprep.mubr.bf16.mxu1 %v4009_v30 }
 0x127   :  { %2560 = vmatpush1.bf16.msra.mxu0 %v3579_v57  ;;  %3111 = vmatpush3.bf16.msra.mxu1 %v3623_v58  ;;  %v3660_v58 = vld [vmem:[%s4870_s1 + $0x910] ss:$44 sps:$4 sm:$0xff]  }
 0x128   :  { %2561 = vmatprep.subr.bf16.mxu0 %v3586_v59  ;;  %3112 = vmatprep.subr.bf16.mxu1 %v3627_v60  ;;  %v3665_v59 = vld [vmem:[%s4870_s1 + $0x96c] ss:$44 sps:$4 sm:$0xff]   ;;  %v3663_v60 = vld [vmem:[%s4870_s1 + $0x968] ss:$44 sps:$4 sm:$0xff]  }
 0x12b   :  { %2562 = vmatpush1.bf16.msra.mxu0 %v3584_v61  ;;  %3113 = vmatpush3.bf16.msra.mxu1 %v3628_v62  ;;  %v3668_v61 = vld [vmem:[%s4870_s1 + $0x9c4] ss:$44 sps:$4 sm:$0xff]   ;;  %v3666_v62 = vld [vmem:[%s4870_s1 + $0x9c0] ss:$44 sps:$4 sm:$0xff]  }
 0x12c   :  { %2563 = vmatprep.subr.bf16.mxu0 %v3591_v63  ;;  %3114 = vmatprep.subr.bf16.mxu1 %v3632_v0  ;;  %v3671_v63 = vld [vmem:[%s4870_s1 + $0xa1c] ss:$44 sps:$4 sm:$0xff]   ;;  %v3669_v0 = vld [vmem:[%s4870_s1 + $0xa18] ss:$44 sps:$4 sm:$0xff]  }
 0x12f   :  { %2564 = vmatpush1.bf16.msra.mxu0 %v3589_v1  ;;  %3115 = vmatpush3.bf16.msra.mxu1 %v3633_v2  ;;  %v3674_v1 = vld [vmem:[%s4870_s1 + $0xa74] ss:$44 sps:$4 sm:$0xff]   ;;  %v3672_v2 = vld [vmem:[%s4870_s1 + $0xa70] ss:$44 sps:$4 sm:$0xff]  }
 0x130   :  { %2565 = vmatprep.subr.bf16.mxu0 %v3596_v3  ;;  %3116 = vmatprep.subr.bf16.mxu1 %v3637_v4  ;;  %v3677_v3 = vld [vmem:[%s4870_s1 + $0xacc] ss:$44 sps:$4 sm:$0xff]   ;;  %v3675_v4 = vld [vmem:[%s4870_s1 + $0xac8] ss:$44 sps:$4 sm:$0xff]  }
 0x133   :  { %2566 = vmatpush1.bf16.msra.mxu0 %v3594_v6  ;;  %3117 = vmatpush3.bf16.msra.mxu1 %v3638_v7 }
 0x134   :  { %2567 = vmatprep.subr.bf16.mxu0 %v3601_v8  ;;  %3118 = vmatprep.subr.bf16.mxu1 %v3642_v9 }
 0x137   :  { %2568 = vmatpush1.bf16.msra.mxu0 %v3599_v11  ;;  %3119 = vmatpush3.bf16.msra.mxu1 %v3643_v12 }
 0x138   :  { %2569 = vmatprep.subr.bf16.mxu0 %v3606_v13  ;;  %3120 = vmatprep.subr.bf16.mxu1 %v3647_v14 }
 0x13b   :  { %2570 = vmatpush1.bf16.msra.mxu0 %v3604_v15  ;;  %3121 = vmatpush3.bf16.msra.mxu1 %v3648_v16 }
 0x13c   :  { %2571 = vmatprep.subr.bf16.mxu0 %v3611_v17  ;;  %3122 = vmatprep.subr.bf16.mxu1 %v3652_v18 }
 0x13f   :  { %2572 = vmatpush1.bf16.msra.mxu0 %v3609_v19  ;;  %3123 = vmatpush3.bf16.msra.mxu1 %v3653_v20 }
 0x140   :  { %2582 = vmatprep.subr.bf16.mxu0 %v3616_v21 }
 0x142   :  { %2574 = vmatmul.mubr.bf16.vlgmr.msra.gmra.mrb[8].mxu0 %v3929_v5  ;;  %2696 = vmatmul.mubr.bf16.vlgmr.msra.gmra.mrb[12].mxu1 %v4135_v10  ;;  %v3631_v5 = vld [vmem:[%s4870_s1 + $0x6ac] ss:$44 sps:$4 sm:$0xff]  }
 0x143   :  { %2583 = vmatpush1.bf16.msra.mxu0 %v3614_v22  ;;  %2614 = vmatprep.mubr.bf16.mxu0 %v4009_v30  ;;  %v3629_v30 = vld [vmem:[%s4870_s1 + $0x6a8] ss:$44 sps:$4 sm:$0xff]  }
 0x144   :  { %2584 = vmatprep.subr.bf16.mxu0 %v3621_v23 }
 0x147   :  { %2585 = vmatpush1.bf16.msra.mxu0 %v3619_v24 }
 0x148   :  { %2586 = vmatprep.subr.bf16.mxu0 %v3626_v25 }
 0x14b   :  { %2587 = vmatpush1.bf16.msra.mxu0 %v3624_v26 }
 0x14c   :  { %2588 = vmatprep.subr.bf16.mxu0 %v3631_v5 }
 0x14f   :  { %2589 = vmatpush1.bf16.msra.mxu0 %v3629_v30 }
 0x150   :  { %2590 = vmatprep.subr.bf16.mxu0 %v3636_v27 }
 0x153   :  { %2591 = vmatpush1.bf16.msra.mxu0 %v3634_v28 }
 0x154   :  { %2592 = vmatprep.subr.bf16.mxu0 %v3641_v29 }
 0x155   :  { %v2288_v33 = vpop.f32.mrb[0].mxu0  ;;  %v2370_v34 = vpop.f32.mrb[0].mxu1 }
 0x156   :  { %v3130_v35 = vadd.f32 %v2288_v33, %v4760_v31  ;;  %v3132_v36 = vadd.f32 %v2370_v34, %v4760_v31  ;;  %v2290_v37 = vpop.f32.mrb[1].mxu0  ;;  %v2372_v38 = vpop.f32.mrb[1].mxu1 }
 0x157   :  { %v3131_v39 = vadd.f32 %v2290_v37, %v4760_v31  ;;  %v3133_v40 = vadd.f32 %v2372_v38, %v4760_v31  ;;  %v2292_v41 = vpop.f32.mrb[2].mxu0  ;;  %v2374_v42 = vpop.f32.mrb[2].mxu1  ;;  %2593 = vmatpush1.bf16.msra.mxu0 %v3639_v48 }
 0x158   :  { %3678 = vtanh.f32 %v3130_v35  ;;  %v2293_v44 = vpop.f32.mrb[3].mxu0  ;;  %v2375_v45 = vpop.f32.mrb[3].mxu1  ;;  %2594 = vmatprep.subr.bf16.mxu0 %v3646_v32 }
 0x159   :  { %3680 = vtanh.f32 %v3132_v36 }
 0x15a   :  { %3682 = vtanh.f32 %v3131_v39 }
 0x15b   :  { %3684 = vtanh.f32 %v3133_v40  ;;  %2595 = vmatpush1.bf16.msra.mxu0 %v3644_v43 }
 0x15c   :  { %2596 = vmatprep.subr.bf16.mxu0 %v3651_v46 }
 0x15f   :  { %2597 = vmatpush1.bf16.msra.mxu0 %v3649_v47 }
 0x160   :  { %2598 = vmatprep.subr.bf16.mxu0 %v3656_v49 }
 0x162   :  { %v3679_v52 = vpop.eup %3678 }
 0x163   :  { %v3681_v53 = vpop.eup %3680  ;;  %2714 = vst [vmem:[%s4873_s3] sm:$0xff] %v3679_v52  ;;  %2599 = vmatpush1.bf16.msra.mxu0 %v3654_v50 }
 0x164   :  { %v3683_v55 = vpop.eup %3682  ;;  %2716 = vst [vmem:[%s4873_s3 + $0x10] sm:$0xff] %v3681_v53  ;;  %2600 = vmatprep.subr.bf16.mxu0 %v3659_v51 }
 0x165   :  { %v3685_v57 = vpop.eup %3684  ;;  %2715 = vst [vmem:[%s4873_s3 + $0x8] sm:$0xff] %v3683_v55 }
 0x166   :  { %2717 = vst [vmem:[%s4873_s3 + $0x18] sm:$0xff] %v3685_v57 }
 0x167   :  { %2601 = vmatpush1.bf16.msra.mxu0 %v3657_v54 }
 0x168   :  { %2602 = vmatprep.subr.bf16.mxu0 %v3662_v56 }
 0x16b   :  { %2603 = vmatpush1.bf16.msra.mxu0 %v3660_v58 }
 0x16c   :  { %2604 = vmatprep.subr.bf16.mxu0 %v3665_v59 }
 0x16f   :  { %2605 = vmatpush1.bf16.msra.mxu0 %v3663_v60 }
 0x170   :  { %2606 = vmatprep.subr.bf16.mxu0 %v3668_v61 }
 0x173   :  { %2607 = vmatpush1.bf16.msra.mxu0 %v3666_v62 }
 0x174   :  { %2608 = vmatprep.subr.bf16.mxu0 %v3671_v63 }
 0x177   :  { %2609 = vmatpush1.bf16.msra.mxu0 %v3669_v0 }
 0x178   :  { %2610 = vmatprep.subr.bf16.mxu0 %v3674_v1 }
 0x17b   :  { %2611 = vmatpush1.bf16.msra.mxu0 %v3672_v2 }
 0x17c   :  { %2612 = vmatprep.subr.bf16.mxu0 %v3677_v3 }
 0x17f   :  { %2613 = vmatpush1.bf16.msra.mxu0 %v3675_v4 }
 0x182   :  { %2615 = vmatmul.mubr.bf16.vlgmr.msra.gmra.mrb[8].mxu0 %v4135_v10 }
 0x1d5   :  { %v2452_v6 = vpop.f32.mrb[4].mxu0  ;;  %v2534_v7 = vpop.f32.mrb[4].mxu1 }
 0x1d6   :  { %v3134_v8 = vadd.f32 %v2452_v6, %v4760_v31  ;;  %v3136_v9 = vadd.f32 %v2534_v7, %v4760_v31  ;;  %v2454_v11 = vpop.f32.mrb[5].mxu0  ;;  %v2536_v12 = vpop.f32.mrb[5].mxu1 }
 0x1d7   :  { %v3135_v13 = vadd.f32 %v2454_v11, %v4760_v31  ;;  %v3137_v14 = vadd.f32 %v2536_v12, %v4760_v31  ;;  %v2456_v15 = vpop.f32.mrb[6].mxu0  ;;  %v2538_v16 = vpop.f32.mrb[6].mxu1 }
 0x1d8   :  { %3686 = vtanh.f32 %v3134_v8  ;;  %v2457_v17 = vpop.f32.mrb[7].mxu0  ;;  %v2539_v18 = vpop.f32.mrb[7].mxu1 }
 0x1d9   :  { %3688 = vtanh.f32 %v3136_v9 }
 0x1da   :  { %3690 = vtanh.f32 %v3135_v13 }
 0x1db   :  { %3692 = vtanh.f32 %v3137_v14 }
 0x1e2   :  { %v3687_v10 = vpop.eup %3686 }
 0x1e3   :  { %v3689_v19 = vpop.eup %3688  ;;  %2718 = vst [vmem:[%s4873_s3 + $0x20] sm:$0xff] %v3687_v10 }
 0x1e4   :  { %v3691_v20 = vpop.eup %3690  ;;  %2720 = vst [vmem:[%s4873_s3 + $0x30] sm:$0xff] %v3689_v19 }
 0x1e5   :  { %v3693_v21 = vpop.eup %3692  ;;  %2719 = vst [vmem:[%s4873_s3 + $0x28] sm:$0xff] %v3691_v20 }
 0x1e6   :  { %2721 = vst [vmem:[%s4873_s3 + $0x38] sm:$0xff] %v3693_v21 }
 0x1f5   :  { %v3102_v22 = vpop.f32.mrb[8].mxu1 }
 0x1f6   :  { %v3103_v23 = vpop.f32.mrb[9].mxu1 }
 0x1f7   :  { %v3104_v24 = vadd.f32 %v3103_v23, %v3102_v22  ;;  %v3105_v25 = vpop.f32.mrb[10].mxu1 }
 0x1f8   :  { %v3106_v26 = vpop.f32.mrb[11].mxu1 }
 0x1f9   :  { %v2658_v5 = vadd.f32 %v3104_v24, %v4760_v31 }
 0x215   :  { %v3124_v30 = vpop.f32.mrb[12].mxu1 }
 0x216   :  { %v3125_v27 = vpop.f32.mrb[13].mxu1 }
 0x217   :  { %v3126_v28 = vadd.f32 %v3125_v27, %v3124_v30  ;;  %v3127_v29 = vpop.f32.mrb[14].mxu1 }
 0x218   :  { %v3128_v48 = vpop.f32.mrb[15].mxu1 }
 0x219   :  { %v2698_v32 = vadd.f32 %v3126_v28, %v2658_v5 }
 0x21b   :  { %3694 = vtanh.f32 %v2698_v32 }
 0x225   :  { %v3695_v33 = vpop.eup %3694 }
 0x226   :  { %2725 = vst.msk [vmem:[%s4873_s3 + $0x50] sm:$0xff] %vm2724_vm0, %v3695_v33 }
 0x255   :  { %v2616_v34 = vpop.f32.mrb[8].mxu0 }
 0x256   :  { %v3138_v35 = vadd.f32 %v2616_v34, %v4760_v31  ;;  %v2618_v36 = vpop.f32.mrb[9].mxu0 }
 0x257   :  { %v3139_v37 = vadd.f32 %v2618_v36, %v4760_v31  ;;  %v2620_v38 = vpop.f32.mrb[10].mxu0 }
 0x258   :  { %3696 = vtanh.f32 %v3138_v35  ;;  %v2621_v39 = vpop.f32.mrb[11].mxu0 }
 0x259   :  { %3698 = vtanh.f32 %v3139_v37 }
 0x262   :  { %v3697_v40 = vpop.eup %3696 }
 0x263   :  { %v3699_v41 = vpop.eup %3698  ;;  %2722 = vst [vmem:[%s4873_s3 + $0x40] sm:$0xff] %v3697_v40 }
 0x264   :  { %2723 = vst [vmem:[%s4873_s3 + $0x48] sm:$0xff] %v3699_v41 }

</bundles_post_ra>
